<compile_context>
chip_gen: v7x
topology: tpu7x:2x2x1
jax: 0.10.0
libtpu: 0.0.40
codegen_flags: <defaults>
</compile_context>

<pallas_src>
import functools

import jax
import jax.numpy as jnp
from jax.experimental import pallas as pl
from jax.experimental.pallas import tpu as pltpu


def _round_up(x, m):
    return ((x + m - 1) // m) * m


# ---------------------------------------------------------------------------
# Fused forward kernel (one grid step == `spb` batch samples)
# ---------------------------------------------------------------------------
def _fused_forward_kernel(x1p_ref, w1c_ref, b1c_ref, w2c_ref, b2c_ref,
                          w3c_ref, b3c_ref, w1fc_hbm, b1fc_ref, wofc_ref,
                          bofc_ref, o_ref, w1fc_vmem, dma_sem, *,
                          spb, n_taps, c1_out, oh2, ow2, kh3, kw3):
    # Start the big fc1-weight DMA immediately; wait only right before the fc1
    # matmul so the load is hidden behind the conv compute (perf rec #2).
    # It is (re)issued every grid step so it is correct regardless of how the
    # "parallel" batch axis is sharded across TensorCores.
    w1_copy = pltpu.make_async_copy(w1fc_hbm, w1fc_vmem, dma_sem)
    w1_copy.start()

    w1c = w1c_ref[...]          # (kh1*kw1*Cin, 32) bf16
    b1c = b1c_ref[...]          # (1, 32) f32
    w2c = w2c_ref[...]          # (16*32, 64) bf16
    b2c = b2c_ref[...]          # (1, 64) f32
    w3c = w3c_ref[...]          # (9*64, 64) bf16
    b3c = b3c_ref[...]          # (1, 64) f32

    oh3 = oh2 - kh3 + 1         # 7
    ow3 = ow2 - kw3 + 1         # 7
    n3 = oh3 * ow3              # 49

    flats = []
    for s in range(spb):
        # ---- conv1 + conv2: implicit GEMM over conv2's kh*kw taps ----------
        # x1p row-block (s*n_taps + t) holds, for conv2 tap t, the conv1 im2col
        # patches of exactly the conv1 output positions that tap needs.
        acc2 = None
        for t in range(n_taps):
            a1 = jnp.dot(x1p_ref[s * n_taps + t], w1c,
                         preferred_element_type=jnp.float32)        # (81, 32)
            a1 = jnp.maximum(a1 + b1c, 0.0).astype(jnp.bfloat16)    # ReLU conv1
            part = jnp.dot(a1, w2c[t * c1_out:(t + 1) * c1_out, :],
                           preferred_element_type=jnp.float32)      # (81, 64)
            acc2 = part if acc2 is None else acc2 + part
        a2 = jnp.maximum(acc2 + b2c, 0.0).astype(jnp.bfloat16)      # (81, 64)

        # ---- conv3 (3x3, stride 1): in-kernel im2col + one MXU dot ----------
        cols = []
        for i in range(kh3):
            for j in range(kw3):
                rows = [a2[(ph + i) * ow2 + j:(ph + i) * ow2 + j + ow3, :]
                        for ph in range(oh3)]
                cols.append(jnp.concatenate(rows, axis=0))           # (49, 64)
        p3 = jnp.concatenate(cols, axis=1)                           # (49, 576)
        a3 = jnp.dot(p3, w3c, preferred_element_type=jnp.float32)
        a3 = jnp.maximum(a3 + b3c, 0.0).astype(jnp.bfloat16)         # (49, 64)

        # ---- flatten NHWC (h, w, c) into one lane-dense row (1, 3136) -------
        flats.append(jnp.concatenate([a3[q:q + 1, :] for q in range(n3)],
                                     axis=1))

    x_fc = flats[0] if spb == 1 else jnp.concatenate(flats, axis=0)  # (spb,3136)

    # ---- MLP tail: fc1 + ReLU + fc2 (fc1 weight has been streaming) --------
    w1_copy.wait()
    h = jnp.dot(x_fc, w1fc_vmem[...], preferred_element_type=jnp.float32)
    h = jnp.maximum(h + b1fc_ref[...], 0.0).astype(jnp.bfloat16)     # (spb, 512)
    out = jnp.dot(h, wofc_ref[...], preferred_element_type=jnp.float32)
    o_ref[...] = (out + bofc_ref[...]).astype(o_ref.dtype)           # (spb, Ap)


def _fused_forward_call(x1p, params, *, batch, spb, oh2, ow2):
    """One pallas_call for the whole network. x1p: (B*16, oh2*ow2, kh1*kw1*C)."""
    n_rows, n2, k1 = x1p.shape
    n_taps = n_rows // batch
    c1_out = params["c1_w"].shape[1]          # 32
    k2, c2_out = params["c2_w"].shape         # (512, 64)
    k3, c3_out = params["c3_w"].shape         # (576, 64)
    kfc, hidden = params["fc1_w"].shape       # (3136, 512)
    ap = params["fc2_w"].shape[1]             # lane-padded action dim (>=128)
    assert batch % spb == 0
    grid_b = batch // spb

    kernel = functools.partial(
        _fused_forward_kernel, spb=spb, n_taps=n_taps, c1_out=c1_out,
        oh2=oh2, ow2=ow2, kh3=3, kw3=3)

    const = lambda g: (0, 0)   # resident (weights / biases) blocks
    out = pl.pallas_call(
        kernel,
        out_shape=jax.ShapeDtypeStruct((grid_b, spb, ap), jnp.float32),
        grid=(grid_b,),
        in_specs=[
            pl.BlockSpec((spb * n_taps, n2, k1), lambda g: (g, 0, 0)),
            pl.BlockSpec((k1, c1_out), const),
            pl.BlockSpec((1, c1_out), const),
            pl.BlockSpec((k2, c2_out), const),
            pl.BlockSpec((1, c2_out), const),
            pl.BlockSpec((k3, c3_out), const),
            pl.BlockSpec((1, c3_out), const),
            pl.BlockSpec(memory_space=pl.ANY),        # fc1 weight stays in HBM
            pl.BlockSpec((1, hidden), const),
            pl.BlockSpec((hidden, ap), const),
            pl.BlockSpec((1, ap), const),
        ],
        out_specs=pl.BlockSpec((None, spb, ap), lambda g: (g, 0, 0)),
        scratch_shapes=[
            pltpu.VMEM((kfc, hidden), jnp.bfloat16),   # fc1 weight landing pad
            pltpu.SemaphoreType.DMA(()),
        ],
        compiler_params=pltpu.CompilerParams(
            dimension_semantics=("parallel",)),
    )(x1p, params["c1_w"], params["c1_b"], params["c2_w"], params["c2_b"],
      params["c3_w"], params["c3_b"], params["fc1_w"], params["fc1_b"],
      params["fc2_w"], params["fc2_b"])
    return out.reshape(batch, ap)


# ---------------------------------------------------------------------------
# Wrapper-side patch building (conv1 im2col + per-conv2-tap gather)
# ---------------------------------------------------------------------------
def _conv12_patches(x_nhwc, *, kh1=8, kw1=8, s1=4, kh2=4, kw2=4, s2=2):
    B, H, W, C = x_nhwc.shape
    oh1 = (H - kh1) // s1 + 1
    ow1 = (W - kw1) // s1 + 1
    cols = []
    for i in range(kh1):
        for j in range(kw1):
            cols.append(x_nhwc[:, i:i + s1 * (oh1 - 1) + 1:s1,
                               j:j + s1 * (ow1 - 1) + 1:s1, :])
    p1 = jnp.concatenate(cols, axis=-1)               # (B, 20, 20, kh1*kw1*C)
    oh2 = (oh1 - kh2) // s2 + 1
    ow2 = (ow1 - kw2) // s2 + 1
    taps = []
    for i2 in range(kh2):
        for j2 in range(kw2):
            t = p1[:, i2:i2 + s2 * (oh2 - 1) + 1:s2,
                   j2:j2 + s2 * (ow2 - 1) + 1:s2, :]  # (B, 9, 9, kh1*kw1*C)
            taps.append(t.reshape(B, oh2 * ow2, p1.shape[-1]))
    x1p = jnp.stack(taps, axis=1)                     # (B, 16, 81, kh1*kw1*C)
    return x1p.reshape(B * kh2 * kw2, oh2 * ow2, p1.shape[-1]), oh2, ow2


# ---------------------------------------------------------------------------
# Parameters
# ---------------------------------------------------------------------------
def init_params(key, in_channels, action_size):
    """PyTorch-layout params (OIHW conv weights, (out,in) linear weights)."""
    ks = jax.random.split(key, 10)
    scale = 0.05
    return {
        "conv1_w": scale * jax.random.normal(ks[0], (32, in_channels, 8, 8), jnp.float32),
        "conv1_b": scale * jax.random.normal(ks[1], (32,), jnp.float32),
        "conv2_w": scale * jax.random.normal(ks[2], (64, 32, 4, 4), jnp.float32),
        "conv2_b": scale * jax.random.normal(ks[3], (64,), jnp.float32),
        "conv3_w": scale * jax.random.normal(ks[4], (64, 64, 3, 3), jnp.float32),
        "conv3_b": scale * jax.random.normal(ks[5], (64,), jnp.float32),
        "fc1_w": scale * jax.random.normal(ks[6], (512, 64 * 7 * 7), jnp.float32),
        "fc1_b": scale * jax.random.normal(ks[7], (512,), jnp.float32),
        "fc2_w": scale * jax.random.normal(ks[8], (action_size, 512), jnp.float32),
        "fc2_b": scale * jax.random.normal(ks[9], (action_size,), jnp.float32),
    }


def prepare_params(p):
    """One-time re-layout: flatten/permute/pad/cast everything for the kernel."""
    def conv_w(w):                 # (O,C,kh,kw) -> (kh*kw*C, O), NHWC patch order
        O, C, kh, kw = w.shape
        return w.transpose(2, 3, 1, 0).reshape(kh * kw * C, O).astype(jnp.bfloat16)

    def bias(b):
        return b.reshape(1, -1).astype(jnp.float32)

    # fc1: permute columns from NCHW flatten order (c,h,w) to NHWC (h,w,c).
    fc1_w = p["fc1_w"].reshape(512, 64, 7, 7).transpose(0, 2, 3, 1).reshape(512, -1)
    w1 = fc1_w.T.astype(jnp.bfloat16)                       # (3136, 512)

    # fc2: (A, 512) -> (512, A_pad), lane-padded to 128 (final store is dense).
    A = p["fc2_w"].shape[0]
    ap = max(128, _round_up(A, 128))
    w2 = jnp.zeros((512, ap), jnp.float32).at[:, :A].set(p["fc2_w"].T).astype(jnp.bfloat16)
    b2 = jnp.zeros((1, ap), jnp.float32).at[0, :A].set(p["fc2_b"])

    return {
        "c1_w": conv_w(p["conv1_w"]), "c1_b": bias(p["conv1_b"]),
        "c2_w": conv_w(p["conv2_w"]), "c2_b": bias(p["conv2_b"]),
        "c3_w": conv_w(p["conv3_w"]), "c3_b": bias(p["conv3_b"]),
        "fc1_w": w1, "fc1_b": bias(p["fc1_b"]),
        "fc2_w": w2, "fc2_b": b2,
    }


# ---------------------------------------------------------------------------
# Forward pass (matches CNN.forward: conv1/2/3 + ReLU, flatten, fc1+ReLU, fc2)
# ---------------------------------------------------------------------------
def cnn_forward(params, x_nchw, *, action_size, samples_per_step=1):
    B = x_nchw.shape[0]
    # Single interface conversion: NCHW f32 -> NHWC bf16.
    x = x_nchw.transpose(0, 2, 3, 1).astype(jnp.bfloat16)
    x1p, oh2, ow2 = _conv12_patches(x)                  # (B*16, 81, 256)
    # Sanity: conv geometry must match the 64*7*7 MLP input of the module.
    assert (oh2 - 2) * (ow2 - 2) * params["c3_w"].shape[1] == params["fc1_w"].shape[0]
    logits = _fused_forward_call(x1p, params, batch=B, spb=samples_per_step,
                                 oh2=oh2, ow2=ow2)      # (B, 128) f32
    return logits[:, :action_size]


if __name__ == "__main__":
    key = jax.random.PRNGKey(0)
    k_param, k_x = jax.random.split(key)

    batch, channels, height, width = 2, 4, 84, 84   # 84x84 implied by MLP(64*7*7)
    action_size = 6

    torch_layout_params = init_params(k_param, channels, action_size)
    params = prepare_params(torch_layout_params)     # one-time re-layout

    fwd = jax.jit(functools.partial(cnn_forward, action_size=action_size))
    x = jax.random.normal(k_x, (batch, channels, height, width), jnp.float32)

    out = fwd(params, x)
    out = jax.block_until_ready(out)
    assert out.shape == (batch, action_size), out.shape
    print("KERNEL_OK")
</pallas_src>

<mosaic_0001>
module attributes {stable_mosaic.version = 11 : i64} {
  func.func @_fused_forward_kernel(%arg0: i32, %arg1: memref<16x81x256xbf16, #tpu.memory_space<vmem>>, %arg2: memref<256x32xbf16, #tpu.memory_space<vmem>>, %arg3: memref<1x32xf32, #tpu.memory_space<vmem>>, %arg4: memref<512x64xbf16, #tpu.memory_space<vmem>>, %arg5: memref<1x64xf32, #tpu.memory_space<vmem>>, %arg6: memref<576x64xbf16, #tpu.memory_space<vmem>>, %arg7: memref<1x64xf32, #tpu.memory_space<vmem>>, %arg8: memref<3136x512xbf16, #tpu.memory_space<any>>, %arg9: memref<1x512xf32, #tpu.memory_space<vmem>>, %arg10: memref<512x128xbf16, #tpu.memory_space<vmem>>, %arg11: memref<1x128xf32, #tpu.memory_space<vmem>>, %arg12: memref<1x1x128xf32, #tpu.memory_space<vmem>>, %arg13: memref<3136x512xbf16, #tpu.memory_space<vmem>>, %arg14: memref<!tpu.dma_semaphore, #tpu.memory_space<semaphore_mem>>) attributes {dimension_semantics = [#tpu.dimension_semantics<parallel>], iteration_bounds = array<i64: 2>, scalar_prefetch = 0 : i64, scratch_operands = 2 : i64, tpu.core_type = #tpu.core_type<tc>, window_params = [{transform_indices = @transform_0, window_bounds = array<i64: 16, 81, 256>}, {pipeline_mode = #tpu.pipeline_mode<synchronous>, transform_indices = @transform_1, window_bounds = array<i64: 256, 32>}, {pipeline_mode = #tpu.pipeline_mode<synchronous>, transform_indices = @transform_2, window_bounds = array<i64: 1, 32>}, {pipeline_mode = #tpu.pipeline_mode<synchronous>, transform_indices = @transform_3, window_bounds = array<i64: 512, 64>}, {pipeline_mode = #tpu.pipeline_mode<synchronous>, transform_indices = @transform_4, window_bounds = array<i64: 1, 64>}, {pipeline_mode = #tpu.pipeline_mode<synchronous>, transform_indices = @transform_5, window_bounds = array<i64: 576, 64>}, {pipeline_mode = #tpu.pipeline_mode<synchronous>, transform_indices = @transform_6, window_bounds = array<i64: 1, 64>}, {}, {pipeline_mode = #tpu.pipeline_mode<synchronous>, transform_indices = @transform_8, window_bounds = array<i64: 1, 512>}, {pipeline_mode = #tpu.pipeline_mode<synchronous>, transform_indices = @transform_9, window_bounds = array<i64: 512, 128>}, {pipeline_mode = #tpu.pipeline_mode<synchronous>, transform_indices = @transform_10, window_bounds = array<i64: 1, 128>}, {transform_indices = @transform_11, window_bounds = array<i64: 1, 1, 128>}]} {
    tpu.enqueue_dma source(%arg8 : memref<3136x512xbf16, #tpu.memory_space<any>>) target(%arg13 : memref<3136x512xbf16, #tpu.memory_space<vmem>>) target_semaphore(%arg14 : memref<!tpu.dma_semaphore, #tpu.memory_space<semaphore_mem>>)
    %c0 = arith.constant 0 : index
    %c0_0 = arith.constant 0 : index
    %0 = vector.load %arg2[%c0, %c0_0] : memref<256x32xbf16, #tpu.memory_space<vmem>>, vector<256x32xbf16>
    %c0_1 = arith.constant 0 : index
    %c0_2 = arith.constant 0 : index
    %1 = vector.load %arg3[%c0_1, %c0_2] : memref<1x32xf32, #tpu.memory_space<vmem>>, vector<1x32xf32>
    %c0_3 = arith.constant 0 : index
    %c0_4 = arith.constant 0 : index
    %2 = vector.load %arg4[%c0_3, %c0_4] : memref<512x64xbf16, #tpu.memory_space<vmem>>, vector<512x64xbf16>
    %c0_5 = arith.constant 0 : index
    %c0_6 = arith.constant 0 : index
    %3 = vector.load %arg5[%c0_5, %c0_6] : memref<1x64xf32, #tpu.memory_space<vmem>>, vector<1x64xf32>
    %c0_7 = arith.constant 0 : index
    %c0_8 = arith.constant 0 : index
    %4 = vector.load %arg6[%c0_7, %c0_8] : memref<576x64xbf16, #tpu.memory_space<vmem>>, vector<576x64xbf16>
    %c0_9 = arith.constant 0 : index
    %c0_10 = arith.constant 0 : index
    %5 = vector.load %arg7[%c0_9, %c0_10] : memref<1x64xf32, #tpu.memory_space<vmem>>, vector<1x64xf32>
    %c0_11 = arith.constant 0 : index
    %c0_12 = arith.constant 0 : index
    %c0_13 = arith.constant 0 : index
    %6 = vector.load %arg1[%c0_11, %c0_12, %c0_13] : memref<16x81x256xbf16, #tpu.memory_space<vmem>>, vector<1x81x256xbf16>
    %7 = vector.shape_cast %6 : vector<1x81x256xbf16> to vector<81x256xbf16>
    %cst = arith.constant dense<0.000000e+00> : vector<81x32xf32>
    %8 = tpu.matmul %7, %0, %cst {dimension_numbers = #tpu.dot_dimension_numbers<[1], [0], [0], [1], [0, 0, 1, 1], [], []>} : vector<81x256xbf16>, vector<256x32xbf16>, vector<81x32xf32> -> vector<81x32xf32>
    %9 = vector.broadcast %1 : vector<1x32xf32> to vector<81x32xf32>
    %10 = arith.addf %8, %9 : vector<81x32xf32>
    %cst_14 = arith.constant 0.000000e+00 : f32
    %11 = vector.broadcast %cst_14 : f32 to vector<81x32xf32>
    %12 = arith.maximumf %10, %11 : vector<81x32xf32>
    %13 = arith.truncf %12 : vector<81x32xf32> to vector<81x32xbf16>
    %14 = vector.extract_strided_slice %2 {offsets = [0, 0], sizes = [32, 64], strides = [1, 1]} : vector<512x64xbf16> to vector<32x64xbf16>
    %cst_15 = arith.constant dense<0.000000e+00> : vector<81x64xf32>
    %15 = tpu.matmul %13, %14, %cst_15 {dimension_numbers = #tpu.dot_dimension_numbers<[1], [0], [0], [1], [0, 0, 1, 1], [], []>} : vector<81x32xbf16>, vector<32x64xbf16>, vector<81x64xf32> -> vector<81x64xf32>
    %c1 = arith.constant 1 : index
    %c0_16 = arith.constant 0 : index
    %c0_17 = arith.constant 0 : index
    %16 = vector.load %arg1[%c1, %c0_16, %c0_17] : memref<16x81x256xbf16, #tpu.memory_space<vmem>>, vector<1x81x256xbf16>
    %17 = vector.shape_cast %16 : vector<1x81x256xbf16> to vector<81x256xbf16>
    %cst_18 = arith.constant dense<0.000000e+00> : vector<81x32xf32>
    %18 = tpu.matmul %17, %0, %cst_18 {dimension_numbers = #tpu.dot_dimension_numbers<[1], [0], [0], [1], [0, 0, 1, 1], [], []>} : vector<81x256xbf16>, vector<256x32xbf16>, vector<81x32xf32> -> vector<81x32xf32>
    %19 = vector.broadcast %1 : vector<1x32xf32> to vector<81x32xf32>
    %20 = arith.addf %18, %19 : vector<81x32xf32>
    %cst_19 = arith.constant 0.000000e+00 : f32
    %21 = vector.broadcast %cst_19 : f32 to vector<81x32xf32>
    %22 = arith.maximumf %20, %21 : vector<81x32xf32>
    %23 = arith.truncf %22 : vector<81x32xf32> to vector<81x32xbf16>
    %24 = vector.extract_strided_slice %2 {offsets = [32, 0], sizes = [32, 64], strides = [1, 1]} : vector<512x64xbf16> to vector<32x64xbf16>
    %cst_20 = arith.constant dense<0.000000e+00> : vector<81x64xf32>
    %25 = tpu.matmul %23, %24, %cst_20 {dimension_numbers = #tpu.dot_dimension_numbers<[1], [0], [0], [1], [0, 0, 1, 1], [], []>} : vector<81x32xbf16>, vector<32x64xbf16>, vector<81x64xf32> -> vector<81x64xf32>
    %26 = arith.addf %15, %25 : vector<81x64xf32>
    %c2 = arith.constant 2 : index
    %c0_21 = arith.constant 0 : index
    %c0_22 = arith.constant 0 : index
    %27 = vector.load %arg1[%c2, %c0_21, %c0_22] : memref<16x81x256xbf16, #tpu.memory_space<vmem>>, vector<1x81x256xbf16>
    %28 = vector.shape_cast %27 : vector<1x81x256xbf16> to vector<81x256xbf16>
    %cst_23 = arith.constant dense<0.000000e+00> : vector<81x32xf32>
    %29 = tpu.matmul %28, %0, %cst_23 {dimension_numbers = #tpu.dot_dimension_numbers<[1], [0], [0], [1], [0, 0, 1, 1], [], []>} : vector<81x256xbf16>, vector<256x32xbf16>, vector<81x32xf32> -> vector<81x32xf32>
    %30 = vector.broadcast %1 : vector<1x32xf32> to vector<81x32xf32>
    %31 = arith.addf %29, %30 : vector<81x32xf32>
    %cst_24 = arith.constant 0.000000e+00 : f32
    %32 = vector.broadcast %cst_24 : f32 to vector<81x32xf32>
    %33 = arith.maximumf %31, %32 : vector<81x32xf32>
    %34 = arith.truncf %33 : vector<81x32xf32> to vector<81x32xbf16>
    %35 = vector.extract_strided_slice %2 {offsets = [64, 0], sizes = [32, 64], strides = [1, 1]} : vector<512x64xbf16> to vector<32x64xbf16>
    %cst_25 = arith.constant dense<0.000000e+00> : vector<81x64xf32>
    %36 = tpu.matmul %34, %35, %cst_25 {dimension_numbers = #tpu.dot_dimension_numbers<[1], [0], [0], [1], [0, 0, 1, 1], [], []>} : vector<81x32xbf16>, vector<32x64xbf16>, vector<81x64xf32> -> vector<81x64xf32>
    %37 = arith.addf %26, %36 : vector<81x64xf32>
    %c3 = arith.constant 3 : index
    %c0_26 = arith.constant 0 : index
    %c0_27 = arith.constant 0 : index
    %38 = vector.load %arg1[%c3, %c0_26, %c0_27] : memref<16x81x256xbf16, #tpu.memory_space<vmem>>, vector<1x81x256xbf16>
    %39 = vector.shape_cast %38 : vector<1x81x256xbf16> to vector<81x256xbf16>
    %cst_28 = arith.constant dense<0.000000e+00> : vector<81x32xf32>
    %40 = tpu.matmul %39, %0, %cst_28 {dimension_numbers = #tpu.dot_dimension_numbers<[1], [0], [0], [1], [0, 0, 1, 1], [], []>} : vector<81x256xbf16>, vector<256x32xbf16>, vector<81x32xf32> -> vector<81x32xf32>
    %41 = vector.broadcast %1 : vector<1x32xf32> to vector<81x32xf32>
    %42 = arith.addf %40, %41 : vector<81x32xf32>
    %cst_29 = arith.constant 0.000000e+00 : f32
    %43 = vector.broadcast %cst_29 : f32 to vector<81x32xf32>
    %44 = arith.maximumf %42, %43 : vector<81x32xf32>
    %45 = arith.truncf %44 : vector<81x32xf32> to vector<81x32xbf16>
    %46 = vector.extract_strided_slice %2 {offsets = [96, 0], sizes = [32, 64], strides = [1, 1]} : vector<512x64xbf16> to vector<32x64xbf16>
    %cst_30 = arith.constant dense<0.000000e+00> : vector<81x64xf32>
    %47 = tpu.matmul %45, %46, %cst_30 {dimension_numbers = #tpu.dot_dimension_numbers<[1], [0], [0], [1], [0, 0, 1, 1], [], []>} : vector<81x32xbf16>, vector<32x64xbf16>, vector<81x64xf32> -> vector<81x64xf32>
    %48 = arith.addf %37, %47 : vector<81x64xf32>
    %c4 = arith.constant 4 : index
    %c0_31 = arith.constant 0 : index
    %c0_32 = arith.constant 0 : index
    %49 = vector.load %arg1[%c4, %c0_31, %c0_32] : memref<16x81x256xbf16, #tpu.memory_space<vmem>>, vector<1x81x256xbf16>
    %50 = vector.shape_cast %49 : vector<1x81x256xbf16> to vector<81x256xbf16>
    %cst_33 = arith.constant dense<0.000000e+00> : vector<81x32xf32>
    %51 = tpu.matmul %50, %0, %cst_33 {dimension_numbers = #tpu.dot_dimension_numbers<[1], [0], [0], [1], [0, 0, 1, 1], [], []>} : vector<81x256xbf16>, vector<256x32xbf16>, vector<81x32xf32> -> vector<81x32xf32>
    %52 = vector.broadcast %1 : vector<1x32xf32> to vector<81x32xf32>
    %53 = arith.addf %51, %52 : vector<81x32xf32>
    %cst_34 = arith.constant 0.000000e+00 : f32
    %54 = vector.broadcast %cst_34 : f32 to vector<81x32xf32>
    %55 = arith.maximumf %53, %54 : vector<81x32xf32>
    %56 = arith.truncf %55 : vector<81x32xf32> to vector<81x32xbf16>
    %57 = vector.extract_strided_slice %2 {offsets = [128, 0], sizes = [32, 64], strides = [1, 1]} : vector<512x64xbf16> to vector<32x64xbf16>
    %cst_35 = arith.constant dense<0.000000e+00> : vector<81x64xf32>
    %58 = tpu.matmul %56, %57, %cst_35 {dimension_numbers = #tpu.dot_dimension_numbers<[1], [0], [0], [1], [0, 0, 1, 1], [], []>} : vector<81x32xbf16>, vector<32x64xbf16>, vector<81x64xf32> -> vector<81x64xf32>
    %59 = arith.addf %48, %58 : vector<81x64xf32>
    %c5 = arith.constant 5 : index
    %c0_36 = arith.constant 0 : index
    %c0_37 = arith.constant 0 : index
    %60 = vector.load %arg1[%c5, %c0_36, %c0_37] : memref<16x81x256xbf16, #tpu.memory_space<vmem>>, vector<1x81x256xbf16>
    %61 = vector.shape_cast %60 : vector<1x81x256xbf16> to vector<81x256xbf16>
    %cst_38 = arith.constant dense<0.000000e+00> : vector<81x32xf32>
    %62 = tpu.matmul %61, %0, %cst_38 {dimension_numbers = #tpu.dot_dimension_numbers<[1], [0], [0], [1], [0, 0, 1, 1], [], []>} : vector<81x256xbf16>, vector<256x32xbf16>, vector<81x32xf32> -> vector<81x32xf32>
    %63 = vector.broadcast %1 : vector<1x32xf32> to vector<81x32xf32>
    %64 = arith.addf %62, %63 : vector<81x32xf32>
    %cst_39 = arith.constant 0.000000e+00 : f32
    %65 = vector.broadcast %cst_39 : f32 to vector<81x32xf32>
    %66 = arith.maximumf %64, %65 : vector<81x32xf32>
    %67 = arith.truncf %66 : vector<81x32xf32> to vector<81x32xbf16>
    %68 = vector.extract_strided_slice %2 {offsets = [160, 0], sizes = [32, 64], strides = [1, 1]} : vector<512x64xbf16> to vector<32x64xbf16>
    %cst_40 = arith.constant dense<0.000000e+00> : vector<81x64xf32>
    %69 = tpu.matmul %67, %68, %cst_40 {dimension_numbers = #tpu.dot_dimension_numbers<[1], [0], [0], [1], [0, 0, 1, 1], [], []>} : vector<81x32xbf16>, vector<32x64xbf16>, vector<81x64xf32> -> vector<81x64xf32>
    %70 = arith.addf %59, %69 : vector<81x64xf32>
    %c6 = arith.constant 6 : index
    %c0_41 = arith.constant 0 : index
    %c0_42 = arith.constant 0 : index
    %71 = vector.load %arg1[%c6, %c0_41, %c0_42] : memref<16x81x256xbf16, #tpu.memory_space<vmem>>, vector<1x81x256xbf16>
    %72 = vector.shape_cast %71 : vector<1x81x256xbf16> to vector<81x256xbf16>
    %cst_43 = arith.constant dense<0.000000e+00> : vector<81x32xf32>
    %73 = tpu.matmul %72, %0, %cst_43 {dimension_numbers = #tpu.dot_dimension_numbers<[1], [0], [0], [1], [0, 0, 1, 1], [], []>} : vector<81x256xbf16>, vector<256x32xbf16>, vector<81x32xf32> -> vector<81x32xf32>
    %74 = vector.broadcast %1 : vector<1x32xf32> to vector<81x32xf32>
    %75 = arith.addf %73, %74 : vector<81x32xf32>
    %cst_44 = arith.constant 0.000000e+00 : f32
    %76 = vector.broadcast %cst_44 : f32 to vector<81x32xf32>
    %77 = arith.maximumf %75, %76 : vector<81x32xf32>
    %78 = arith.truncf %77 : vector<81x32xf32> to vector<81x32xbf16>
    %79 = vector.extract_strided_slice %2 {offsets = [192, 0], sizes = [32, 64], strides = [1, 1]} : vector<512x64xbf16> to vector<32x64xbf16>
    %cst_45 = arith.constant dense<0.000000e+00> : vector<81x64xf32>
    %80 = tpu.matmul %78, %79, %cst_45 {dimension_numbers = #tpu.dot_dimension_numbers<[1], [0], [0], [1], [0, 0, 1, 1], [], []>} : vector<81x32xbf16>, vector<32x64xbf16>, vector<81x64xf32> -> vector<81x64xf32>
    %81 = arith.addf %70, %80 : vector<81x64xf32>
    %c7 = arith.constant 7 : index
    %c0_46 = arith.constant 0 : index
    %c0_47 = arith.constant 0 : index
    %82 = vector.load %arg1[%c7, %c0_46, %c0_47] : memref<16x81x256xbf16, #tpu.memory_space<vmem>>, vector<1x81x256xbf16>
    %83 = vector.shape_cast %82 : vector<1x81x256xbf16> to vector<81x256xbf16>
    %cst_48 = arith.constant dense<0.000000e+00> : vector<81x32xf32>
    %84 = tpu.matmul %83, %0, %cst_48 {dimension_numbers = #tpu.dot_dimension_numbers<[1], [0], [0], [1], [0, 0, 1, 1], [], []>} : vector<81x256xbf16>, vector<256x32xbf16>, vector<81x32xf32> -> vector<81x32xf32>
    %85 = vector.broadcast %1 : vector<1x32xf32> to vector<81x32xf32>
    %86 = arith.addf %84, %85 : vector<81x32xf32>
    %cst_49 = arith.constant 0.000000e+00 : f32
    %87 = vector.broadcast %cst_49 : f32 to vector<81x32xf32>
    %88 = arith.maximumf %86, %87 : vector<81x32xf32>
    %89 = arith.truncf %88 : vector<81x32xf32> to vector<81x32xbf16>
    %90 = vector.extract_strided_slice %2 {offsets = [224, 0], sizes = [32, 64], strides = [1, 1]} : vector<512x64xbf16> to vector<32x64xbf16>
    %cst_50 = arith.constant dense<0.000000e+00> : vector<81x64xf32>
    %91 = tpu.matmul %89, %90, %cst_50 {dimension_numbers = #tpu.dot_dimension_numbers<[1], [0], [0], [1], [0, 0, 1, 1], [], []>} : vector<81x32xbf16>, vector<32x64xbf16>, vector<81x64xf32> -> vector<81x64xf32>
    %92 = arith.addf %81, %91 : vector<81x64xf32>
    %c8 = arith.constant 8 : index
    %c0_51 = arith.constant 0 : index
    %c0_52 = arith.constant 0 : index
    %93 = vector.load %arg1[%c8, %c0_51, %c0_52] : memref<16x81x256xbf16, #tpu.memory_space<vmem>>, vector<1x81x256xbf16>
    %94 = vector.shape_cast %93 : vector<1x81x256xbf16> to vector<81x256xbf16>
    %cst_53 = arith.constant dense<0.000000e+00> : vector<81x32xf32>
    %95 = tpu.matmul %94, %0, %cst_53 {dimension_numbers = #tpu.dot_dimension_numbers<[1], [0], [0], [1], [0, 0, 1, 1], [], []>} : vector<81x256xbf16>, vector<256x32xbf16>, vector<81x32xf32> -> vector<81x32xf32>
    %96 = vector.broadcast %1 : vector<1x32xf32> to vector<81x32xf32>
    %97 = arith.addf %95, %96 : vector<81x32xf32>
    %cst_54 = arith.constant 0.000000e+00 : f32
    %98 = vector.broadcast %cst_54 : f32 to vector<81x32xf32>
    %99 = arith.maximumf %97, %98 : vector<81x32xf32>
    %100 = arith.truncf %99 : vector<81x32xf32> to vector<81x32xbf16>
    %101 = vector.extract_strided_slice %2 {offsets = [256, 0], sizes = [32, 64], strides = [1, 1]} : vector<512x64xbf16> to vector<32x64xbf16>
    %cst_55 = arith.constant dense<0.000000e+00> : vector<81x64xf32>
    %102 = tpu.matmul %100, %101, %cst_55 {dimension_numbers = #tpu.dot_dimension_numbers<[1], [0], [0], [1], [0, 0, 1, 1], [], []>} : vector<81x32xbf16>, vector<32x64xbf16>, vector<81x64xf32> -> vector<81x64xf32>
    %103 = arith.addf %92, %102 : vector<81x64xf32>
    %c9 = arith.constant 9 : index
    %c0_56 = arith.constant 0 : index
    %c0_57 = arith.constant 0 : index
    %104 = vector.load %arg1[%c9, %c0_56, %c0_57] : memref<16x81x256xbf16, #tpu.memory_space<vmem>>, vector<1x81x256xbf16>
    %105 = vector.shape_cast %104 : vector<1x81x256xbf16> to vector<81x256xbf16>
    %cst_58 = arith.constant dense<0.000000e+00> : vector<81x32xf32>
    %106 = tpu.matmul %105, %0, %cst_58 {dimension_numbers = #tpu.dot_dimension_numbers<[1], [0], [0], [1], [0, 0, 1, 1], [], []>} : vector<81x256xbf16>, vector<256x32xbf16>, vector<81x32xf32> -> vector<81x32xf32>
    %107 = vector.broadcast %1 : vector<1x32xf32> to vector<81x32xf32>
    %108 = arith.addf %106, %107 : vector<81x32xf32>
    %cst_59 = arith.constant 0.000000e+00 : f32
    %109 = vector.broadcast %cst_59 : f32 to vector<81x32xf32>
    %110 = arith.maximumf %108, %109 : vector<81x32xf32>
    %111 = arith.truncf %110 : vector<81x32xf32> to vector<81x32xbf16>
    %112 = vector.extract_strided_slice %2 {offsets = [288, 0], sizes = [32, 64], strides = [1, 1]} : vector<512x64xbf16> to vector<32x64xbf16>
    %cst_60 = arith.constant dense<0.000000e+00> : vector<81x64xf32>
    %113 = tpu.matmul %111, %112, %cst_60 {dimension_numbers = #tpu.dot_dimension_numbers<[1], [0], [0], [1], [0, 0, 1, 1], [], []>} : vector<81x32xbf16>, vector<32x64xbf16>, vector<81x64xf32> -> vector<81x64xf32>
    %114 = arith.addf %103, %113 : vector<81x64xf32>
    %c10 = arith.constant 10 : index
    %c0_61 = arith.constant 0 : index
    %c0_62 = arith.constant 0 : index
    %115 = vector.load %arg1[%c10, %c0_61, %c0_62] : memref<16x81x256xbf16, #tpu.memory_space<vmem>>, vector<1x81x256xbf16>
    %116 = vector.shape_cast %115 : vector<1x81x256xbf16> to vector<81x256xbf16>
    %cst_63 = arith.constant dense<0.000000e+00> : vector<81x32xf32>
    %117 = tpu.matmul %116, %0, %cst_63 {dimension_numbers = #tpu.dot_dimension_numbers<[1], [0], [0], [1], [0, 0, 1, 1], [], []>} : vector<81x256xbf16>, vector<256x32xbf16>, vector<81x32xf32> -> vector<81x32xf32>
    %118 = vector.broadcast %1 : vector<1x32xf32> to vector<81x32xf32>
    %119 = arith.addf %117, %118 : vector<81x32xf32>
    %cst_64 = arith.constant 0.000000e+00 : f32
    %120 = vector.broadcast %cst_64 : f32 to vector<81x32xf32>
    %121 = arith.maximumf %119, %120 : vector<81x32xf32>
    %122 = arith.truncf %121 : vector<81x32xf32> to vector<81x32xbf16>
    %123 = vector.extract_strided_slice %2 {offsets = [320, 0], sizes = [32, 64], strides = [1, 1]} : vector<512x64xbf16> to vector<32x64xbf16>
    %cst_65 = arith.constant dense<0.000000e+00> : vector<81x64xf32>
    %124 = tpu.matmul %122, %123, %cst_65 {dimension_numbers = #tpu.dot_dimension_numbers<[1], [0], [0], [1], [0, 0, 1, 1], [], []>} : vector<81x32xbf16>, vector<32x64xbf16>, vector<81x64xf32> -> vector<81x64xf32>
    %125 = arith.addf %114, %124 : vector<81x64xf32>
    %c11 = arith.constant 11 : index
    %c0_66 = arith.constant 0 : index
    %c0_67 = arith.constant 0 : index
    %126 = vector.load %arg1[%c11, %c0_66, %c0_67] : memref<16x81x256xbf16, #tpu.memory_space<vmem>>, vector<1x81x256xbf16>
    %127 = vector.shape_cast %126 : vector<1x81x256xbf16> to vector<81x256xbf16>
    %cst_68 = arith.constant dense<0.000000e+00> : vector<81x32xf32>
    %128 = tpu.matmul %127, %0, %cst_68 {dimension_numbers = #tpu.dot_dimension_numbers<[1], [0], [0], [1], [0, 0, 1, 1], [], []>} : vector<81x256xbf16>, vector<256x32xbf16>, vector<81x32xf32> -> vector<81x32xf32>
    %129 = vector.broadcast %1 : vector<1x32xf32> to vector<81x32xf32>
    %130 = arith.addf %128, %129 : vector<81x32xf32>
    %cst_69 = arith.constant 0.000000e+00 : f32
    %131 = vector.broadcast %cst_69 : f32 to vector<81x32xf32>
    %132 = arith.maximumf %130, %131 : vector<81x32xf32>
    %133 = arith.truncf %132 : vector<81x32xf32> to vector<81x32xbf16>
    %134 = vector.extract_strided_slice %2 {offsets = [352, 0], sizes = [32, 64], strides = [1, 1]} : vector<512x64xbf16> to vector<32x64xbf16>
    %cst_70 = arith.constant dense<0.000000e+00> : vector<81x64xf32>
    %135 = tpu.matmul %133, %134, %cst_70 {dimension_numbers = #tpu.dot_dimension_numbers<[1], [0], [0], [1], [0, 0, 1, 1], [], []>} : vector<81x32xbf16>, vector<32x64xbf16>, vector<81x64xf32> -> vector<81x64xf32>
    %136 = arith.addf %125, %135 : vector<81x64xf32>
    %c12 = arith.constant 12 : index
    %c0_71 = arith.constant 0 : index
    %c0_72 = arith.constant 0 : index
    %137 = vector.load %arg1[%c12, %c0_71, %c0_72] : memref<16x81x256xbf16, #tpu.memory_space<vmem>>, vector<1x81x256xbf16>
    %138 = vector.shape_cast %137 : vector<1x81x256xbf16> to vector<81x256xbf16>
    %cst_73 = arith.constant dense<0.000000e+00> : vector<81x32xf32>
    %139 = tpu.matmul %138, %0, %cst_73 {dimension_numbers = #tpu.dot_dimension_numbers<[1], [0], [0], [1], [0, 0, 1, 1], [], []>} : vector<81x256xbf16>, vector<256x32xbf16>, vector<81x32xf32> -> vector<81x32xf32>
    %140 = vector.broadcast %1 : vector<1x32xf32> to vector<81x32xf32>
    %141 = arith.addf %139, %140 : vector<81x32xf32>
    %cst_74 = arith.constant 0.000000e+00 : f32
    %142 = vector.broadcast %cst_74 : f32 to vector<81x32xf32>
    %143 = arith.maximumf %141, %142 : vector<81x32xf32>
    %144 = arith.truncf %143 : vector<81x32xf32> to vector<81x32xbf16>
    %145 = vector.extract_strided_slice %2 {offsets = [384, 0], sizes = [32, 64], strides = [1, 1]} : vector<512x64xbf16> to vector<32x64xbf16>
    %cst_75 = arith.constant dense<0.000000e+00> : vector<81x64xf32>
    %146 = tpu.matmul %144, %145, %cst_75 {dimension_numbers = #tpu.dot_dimension_numbers<[1], [0], [0], [1], [0, 0, 1, 1], [], []>} : vector<81x32xbf16>, vector<32x64xbf16>, vector<81x64xf32> -> vector<81x64xf32>
    %147 = arith.addf %136, %146 : vector<81x64xf32>
    %c13 = arith.constant 13 : index
    %c0_76 = arith.constant 0 : index
    %c0_77 = arith.constant 0 : index
    %148 = vector.load %arg1[%c13, %c0_76, %c0_77] : memref<16x81x256xbf16, #tpu.memory_space<vmem>>, vector<1x81x256xbf16>
    %149 = vector.shape_cast %148 : vector<1x81x256xbf16> to vector<81x256xbf16>
    %cst_78 = arith.constant dense<0.000000e+00> : vector<81x32xf32>
    %150 = tpu.matmul %149, %0, %cst_78 {dimension_numbers = #tpu.dot_dimension_numbers<[1], [0], [0], [1], [0, 0, 1, 1], [], []>} : vector<81x256xbf16>, vector<256x32xbf16>, vector<81x32xf32> -> vector<81x32xf32>
    %151 = vector.broadcast %1 : vector<1x32xf32> to vector<81x32xf32>
    %152 = arith.addf %150, %151 : vector<81x32xf32>
    %cst_79 = arith.constant 0.000000e+00 : f32
    %153 = vector.broadcast %cst_79 : f32 to vector<81x32xf32>
    %154 = arith.maximumf %152, %153 : vector<81x32xf32>
    %155 = arith.truncf %154 : vector<81x32xf32> to vector<81x32xbf16>
    %156 = vector.extract_strided_slice %2 {offsets = [416, 0], sizes = [32, 64], strides = [1, 1]} : vector<512x64xbf16> to vector<32x64xbf16>
    %cst_80 = arith.constant dense<0.000000e+00> : vector<81x64xf32>
    %157 = tpu.matmul %155, %156, %cst_80 {dimension_numbers = #tpu.dot_dimension_numbers<[1], [0], [0], [1], [0, 0, 1, 1], [], []>} : vector<81x32xbf16>, vector<32x64xbf16>, vector<81x64xf32> -> vector<81x64xf32>
    %158 = arith.addf %147, %157 : vector<81x64xf32>
    %c14 = arith.constant 14 : index
    %c0_81 = arith.constant 0 : index
    %c0_82 = arith.constant 0 : index
    %159 = vector.load %arg1[%c14, %c0_81, %c0_82] : memref<16x81x256xbf16, #tpu.memory_space<vmem>>, vector<1x81x256xbf16>
    %160 = vector.shape_cast %159 : vector<1x81x256xbf16> to vector<81x256xbf16>
    %cst_83 = arith.constant dense<0.000000e+00> : vector<81x32xf32>
    %161 = tpu.matmul %160, %0, %cst_83 {dimension_numbers = #tpu.dot_dimension_numbers<[1], [0], [0], [1], [0, 0, 1, 1], [], []>} : vector<81x256xbf16>, vector<256x32xbf16>, vector<81x32xf32> -> vector<81x32xf32>
    %162 = vector.broadcast %1 : vector<1x32xf32> to vector<81x32xf32>
    %163 = arith.addf %161, %162 : vector<81x32xf32>
    %cst_84 = arith.constant 0.000000e+00 : f32
    %164 = vector.broadcast %cst_84 : f32 to vector<81x32xf32>
    %165 = arith.maximumf %163, %164 : vector<81x32xf32>
    %166 = arith.truncf %165 : vector<81x32xf32> to vector<81x32xbf16>
    %167 = vector.extract_strided_slice %2 {offsets = [448, 0], sizes = [32, 64], strides = [1, 1]} : vector<512x64xbf16> to vector<32x64xbf16>
    %cst_85 = arith.constant dense<0.000000e+00> : vector<81x64xf32>
    %168 = tpu.matmul %166, %167, %cst_85 {dimension_numbers = #tpu.dot_dimension_numbers<[1], [0], [0], [1], [0, 0, 1, 1], [], []>} : vector<81x32xbf16>, vector<32x64xbf16>, vector<81x64xf32> -> vector<81x64xf32>
    %169 = arith.addf %158, %168 : vector<81x64xf32>
    %c15 = arith.constant 15 : index
    %c0_86 = arith.constant 0 : index
    %c0_87 = arith.constant 0 : index
    %170 = vector.load %arg1[%c15, %c0_86, %c0_87] : memref<16x81x256xbf16, #tpu.memory_space<vmem>>, vector<1x81x256xbf16>
    %171 = vector.shape_cast %170 : vector<1x81x256xbf16> to vector<81x256xbf16>
    %cst_88 = arith.constant dense<0.000000e+00> : vector<81x32xf32>
    %172 = tpu.matmul %171, %0, %cst_88 {dimension_numbers = #tpu.dot_dimension_numbers<[1], [0], [0], [1], [0, 0, 1, 1], [], []>} : vector<81x256xbf16>, vector<256x32xbf16>, vector<81x32xf32> -> vector<81x32xf32>
    %173 = vector.broadcast %1 : vector<1x32xf32> to vector<81x32xf32>
    %174 = arith.addf %172, %173 : vector<81x32xf32>
    %cst_89 = arith.constant 0.000000e+00 : f32
    %175 = vector.broadcast %cst_89 : f32 to vector<81x32xf32>
    %176 = arith.maximumf %174, %175 : vector<81x32xf32>
    %177 = arith.truncf %176 : vector<81x32xf32> to vector<81x32xbf16>
    %178 = vector.extract_strided_slice %2 {offsets = [480, 0], sizes = [32, 64], strides = [1, 1]} : vector<512x64xbf16> to vector<32x64xbf16>
    %cst_90 = arith.constant dense<0.000000e+00> : vector<81x64xf32>
    %179 = tpu.matmul %177, %178, %cst_90 {dimension_numbers = #tpu.dot_dimension_numbers<[1], [0], [0], [1], [0, 0, 1, 1], [], []>} : vector<81x32xbf16>, vector<32x64xbf16>, vector<81x64xf32> -> vector<81x64xf32>
    %180 = arith.addf %169, %179 : vector<81x64xf32>
    %181 = vector.broadcast %3 : vector<1x64xf32> to vector<81x64xf32>
    %182 = arith.addf %180, %181 : vector<81x64xf32>
    %cst_91 = arith.constant 0.000000e+00 : f32
    %183 = vector.broadcast %cst_91 : f32 to vector<81x64xf32>
    %184 = arith.maximumf %182, %183 : vector<81x64xf32>
    %185 = arith.truncf %184 : vector<81x64xf32> to vector<81x64xbf16>
    %186 = vector.extract_strided_slice %185 {offsets = [0, 0], sizes = [7, 64], strides = [1, 1]} : vector<81x64xbf16> to vector<7x64xbf16>
    %187 = vector.extract_strided_slice %185 {offsets = [9, 0], sizes = [7, 64], strides = [1, 1]} : vector<81x64xbf16> to vector<7x64xbf16>
    %188 = vector.extract_strided_slice %185 {offsets = [18, 0], sizes = [7, 64], strides = [1, 1]} : vector<81x64xbf16> to vector<7x64xbf16>
    %189 = vector.extract_strided_slice %185 {offsets = [27, 0], sizes = [7, 64], strides = [1, 1]} : vector<81x64xbf16> to vector<7x64xbf16>
    %190 = vector.extract_strided_slice %185 {offsets = [36, 0], sizes = [7, 64], strides = [1, 1]} : vector<81x64xbf16> to vector<7x64xbf16>
    %191 = vector.extract_strided_slice %185 {offsets = [45, 0], sizes = [7, 64], strides = [1, 1]} : vector<81x64xbf16> to vector<7x64xbf16>
    %192 = vector.extract_strided_slice %185 {offsets = [54, 0], sizes = [7, 64], strides = [1, 1]} : vector<81x64xbf16> to vector<7x64xbf16>
    %193 = tpu.concatenate %186, %187, %188, %189, %190, %191, %192 in 0 : vector<7x64xbf16>, vector<7x64xbf16>, vector<7x64xbf16>, vector<7x64xbf16>, vector<7x64xbf16>, vector<7x64xbf16>, vector<7x64xbf16> -> vector<49x64xbf16>
    %194 = vector.extract_strided_slice %185 {offsets = [1, 0], sizes = [7, 64], strides = [1, 1]} : vector<81x64xbf16> to vector<7x64xbf16>
    %195 = vector.extract_strided_slice %185 {offsets = [10, 0], sizes = [7, 64], strides = [1, 1]} : vector<81x64xbf16> to vector<7x64xbf16>
    %196 = vector.extract_strided_slice %185 {offsets = [19, 0], sizes = [7, 64], strides = [1, 1]} : vector<81x64xbf16> to vector<7x64xbf16>
    %197 = vector.extract_strided_slice %185 {offsets = [28, 0], sizes = [7, 64], strides = [1, 1]} : vector<81x64xbf16> to vector<7x64xbf16>
    %198 = vector.extract_strided_slice %185 {offsets = [37, 0], sizes = [7, 64], strides = [1, 1]} : vector<81x64xbf16> to vector<7x64xbf16>
    %199 = vector.extract_strided_slice %185 {offsets = [46, 0], sizes = [7, 64], strides = [1, 1]} : vector<81x64xbf16> to vector<7x64xbf16>
    %200 = vector.extract_strided_slice %185 {offsets = [55, 0], sizes = [7, 64], strides = [1, 1]} : vector<81x64xbf16> to vector<7x64xbf16>
    %201 = tpu.concatenate %194, %195, %196, %197, %198, %199, %200 in 0 : vector<7x64xbf16>, vector<7x64xbf16>, vector<7x64xbf16>, vector<7x64xbf16>, vector<7x64xbf16>, vector<7x64xbf16>, vector<7x64xbf16> -> vector<49x64xbf16>
    %202 = vector.extract_strided_slice %185 {offsets = [2, 0], sizes = [7, 64], strides = [1, 1]} : vector<81x64xbf16> to vector<7x64xbf16>
    %203 = vector.extract_strided_slice %185 {offsets = [11, 0], sizes = [7, 64], strides = [1, 1]} : vector<81x64xbf16> to vector<7x64xbf16>
    %204 = vector.extract_strided_slice %185 {offsets = [20, 0], sizes = [7, 64], strides = [1, 1]} : vector<81x64xbf16> to vector<7x64xbf16>
    %205 = vector.extract_strided_slice %185 {offsets = [29, 0], sizes = [7, 64], strides = [1, 1]} : vector<81x64xbf16> to vector<7x64xbf16>
    %206 = vector.extract_strided_slice %185 {offsets = [38, 0], sizes = [7, 64], strides = [1, 1]} : vector<81x64xbf16> to vector<7x64xbf16>
    %207 = vector.extract_strided_slice %185 {offsets = [47, 0], sizes = [7, 64], strides = [1, 1]} : vector<81x64xbf16> to vector<7x64xbf16>
    %208 = vector.extract_strided_slice %185 {offsets = [56, 0], sizes = [7, 64], strides = [1, 1]} : vector<81x64xbf16> to vector<7x64xbf16>
    %209 = tpu.concatenate %202, %203, %204, %205, %206, %207, %208 in 0 : vector<7x64xbf16>, vector<7x64xbf16>, vector<7x64xbf16>, vector<7x64xbf16>, vector<7x64xbf16>, vector<7x64xbf16>, vector<7x64xbf16> -> vector<49x64xbf16>
    %210 = vector.extract_strided_slice %185 {offsets = [9, 0], sizes = [7, 64], strides = [1, 1]} : vector<81x64xbf16> to vector<7x64xbf16>
    %211 = vector.extract_strided_slice %185 {offsets = [18, 0], sizes = [7, 64], strides = [1, 1]} : vector<81x64xbf16> to vector<7x64xbf16>
    %212 = vector.extract_strided_slice %185 {offsets = [27, 0], sizes = [7, 64], strides = [1, 1]} : vector<81x64xbf16> to vector<7x64xbf16>
    %213 = vector.extract_strided_slice %185 {offsets = [36, 0], sizes = [7, 64], strides = [1, 1]} : vector<81x64xbf16> to vector<7x64xbf16>
    %214 = vector.extract_strided_slice %185 {offsets = [45, 0], sizes = [7, 64], strides = [1, 1]} : vector<81x64xbf16> to vector<7x64xbf16>
    %215 = vector.extract_strided_slice %185 {offsets = [54, 0], sizes = [7, 64], strides = [1, 1]} : vector<81x64xbf16> to vector<7x64xbf16>
    %216 = vector.extract_strided_slice %185 {offsets = [63, 0], sizes = [7, 64], strides = [1, 1]} : vector<81x64xbf16> to vector<7x64xbf16>
    %217 = tpu.concatenate %210, %211, %212, %213, %214, %215, %216 in 0 : vector<7x64xbf16>, vector<7x64xbf16>, vector<7x64xbf16>, vector<7x64xbf16>, vector<7x64xbf16>, vector<7x64xbf16>, vector<7x64xbf16> -> vector<49x64xbf16>
    %218 = vector.extract_strided_slice %185 {offsets = [10, 0], sizes = [7, 64], strides = [1, 1]} : vector<81x64xbf16> to vector<7x64xbf16>
    %219 = vector.extract_strided_slice %185 {offsets = [19, 0], sizes = [7, 64], strides = [1, 1]} : vector<81x64xbf16> to vector<7x64xbf16>
    %220 = vector.extract_strided_slice %185 {offsets = [28, 0], sizes = [7, 64], strides = [1, 1]} : vector<81x64xbf16> to vector<7x64xbf16>
    %221 = vector.extract_strided_slice %185 {offsets = [37, 0], sizes = [7, 64], strides = [1, 1]} : vector<81x64xbf16> to vector<7x64xbf16>
    %222 = vector.extract_strided_slice %185 {offsets = [46, 0], sizes = [7, 64], strides = [1, 1]} : vector<81x64xbf16> to vector<7x64xbf16>
    %223 = vector.extract_strided_slice %185 {offsets = [55, 0], sizes = [7, 64], strides = [1, 1]} : vector<81x64xbf16> to vector<7x64xbf16>
    %224 = vector.extract_strided_slice %185 {offsets = [64, 0], sizes = [7, 64], strides = [1, 1]} : vector<81x64xbf16> to vector<7x64xbf16>
    %225 = tpu.concatenate %218, %219, %220, %221, %222, %223, %224 in 0 : vector<7x64xbf16>, vector<7x64xbf16>, vector<7x64xbf16>, vector<7x64xbf16>, vector<7x64xbf16>, vector<7x64xbf16>, vector<7x64xbf16> -> vector<49x64xbf16>
    %226 = vector.extract_strided_slice %185 {offsets = [11, 0], sizes = [7, 64], strides = [1, 1]} : vector<81x64xbf16> to vector<7x64xbf16>
    %227 = vector.extract_strided_slice %185 {offsets = [20, 0], sizes = [7, 64], strides = [1, 1]} : vector<81x64xbf16> to vector<7x64xbf16>
    %228 = vector.extract_strided_slice %185 {offsets = [29, 0], sizes = [7, 64], strides = [1, 1]} : vector<81x64xbf16> to vector<7x64xbf16>
    %229 = vector.extract_strided_slice %185 {offsets = [38, 0], sizes = [7, 64], strides = [1, 1]} : vector<81x64xbf16> to vector<7x64xbf16>
    %230 = vector.extract_strided_slice %185 {offsets = [47, 0], sizes = [7, 64], strides = [1, 1]} : vector<81x64xbf16> to vector<7x64xbf16>
    %231 = vector.extract_strided_slice %185 {offsets = [56, 0], sizes = [7, 64], strides = [1, 1]} : vector<81x64xbf16> to vector<7x64xbf16>
    %232 = vector.extract_strided_slice %185 {offsets = [65, 0], sizes = [7, 64], strides = [1, 1]} : vector<81x64xbf16> to vector<7x64xbf16>
    %233 = tpu.concatenate %226, %227, %228, %229, %230, %231, %232 in 0 : vector<7x64xbf16>, vector<7x64xbf16>, vector<7x64xbf16>, vector<7x64xbf16>, vector<7x64xbf16>, vector<7x64xbf16>, vector<7x64xbf16> -> vector<49x64xbf16>
    %234 = vector.extract_strided_slice %185 {offsets = [18, 0], sizes = [7, 64], strides = [1, 1]} : vector<81x64xbf16> to vector<7x64xbf16>
    %235 = vector.extract_strided_slice %185 {offsets = [27, 0], sizes = [7, 64], strides = [1, 1]} : vector<81x64xbf16> to vector<7x64xbf16>
    %236 = vector.extract_strided_slice %185 {offsets = [36, 0], sizes = [7, 64], strides = [1, 1]} : vector<81x64xbf16> to vector<7x64xbf16>
    %237 = vector.extract_strided_slice %185 {offsets = [45, 0], sizes = [7, 64], strides = [1, 1]} : vector<81x64xbf16> to vector<7x64xbf16>
    %238 = vector.extract_strided_slice %185 {offsets = [54, 0], sizes = [7, 64], strides = [1, 1]} : vector<81x64xbf16> to vector<7x64xbf16>
    %239 = vector.extract_strided_slice %185 {offsets = [63, 0], sizes = [7, 64], strides = [1, 1]} : vector<81x64xbf16> to vector<7x64xbf16>
    %240 = vector.extract_strided_slice %185 {offsets = [72, 0], sizes = [7, 64], strides = [1, 1]} : vector<81x64xbf16> to vector<7x64xbf16>
    %241 = tpu.concatenate %234, %235, %236, %237, %238, %239, %240 in 0 : vector<7x64xbf16>, vector<7x64xbf16>, vector<7x64xbf16>, vector<7x64xbf16>, vector<7x64xbf16>, vector<7x64xbf16>, vector<7x64xbf16> -> vector<49x64xbf16>
    %242 = vector.extract_strided_slice %185 {offsets = [19, 0], sizes = [7, 64], strides = [1, 1]} : vector<81x64xbf16> to vector<7x64xbf16>
    %243 = vector.extract_strided_slice %185 {offsets = [28, 0], sizes = [7, 64], strides = [1, 1]} : vector<81x64xbf16> to vector<7x64xbf16>
    %244 = vector.extract_strided_slice %185 {offsets = [37, 0], sizes = [7, 64], strides = [1, 1]} : vector<81x64xbf16> to vector<7x64xbf16>
    %245 = vector.extract_strided_slice %185 {offsets = [46, 0], sizes = [7, 64], strides = [1, 1]} : vector<81x64xbf16> to vector<7x64xbf16>
    %246 = vector.extract_strided_slice %185 {offsets = [55, 0], sizes = [7, 64], strides = [1, 1]} : vector<81x64xbf16> to vector<7x64xbf16>
    %247 = vector.extract_strided_slice %185 {offsets = [64, 0], sizes = [7, 64], strides = [1, 1]} : vector<81x64xbf16> to vector<7x64xbf16>
    %248 = vector.extract_strided_slice %185 {offsets = [73, 0], sizes = [7, 64], strides = [1, 1]} : vector<81x64xbf16> to vector<7x64xbf16>
    %249 = tpu.concatenate %242, %243, %244, %245, %246, %247, %248 in 0 : vector<7x64xbf16>, vector<7x64xbf16>, vector<7x64xbf16>, vector<7x64xbf16>, vector<7x64xbf16>, vector<7x64xbf16>, vector<7x64xbf16> -> vector<49x64xbf16>
    %250 = vector.extract_strided_slice %185 {offsets = [20, 0], sizes = [7, 64], strides = [1, 1]} : vector<81x64xbf16> to vector<7x64xbf16>
    %251 = vector.extract_strided_slice %185 {offsets = [29, 0], sizes = [7, 64], strides = [1, 1]} : vector<81x64xbf16> to vector<7x64xbf16>
    %252 = vector.extract_strided_slice %185 {offsets = [38, 0], sizes = [7, 64], strides = [1, 1]} : vector<81x64xbf16> to vector<7x64xbf16>
    %253 = vector.extract_strided_slice %185 {offsets = [47, 0], sizes = [7, 64], strides = [1, 1]} : vector<81x64xbf16> to vector<7x64xbf16>
    %254 = vector.extract_strided_slice %185 {offsets = [56, 0], sizes = [7, 64], strides = [1, 1]} : vector<81x64xbf16> to vector<7x64xbf16>
    %255 = vector.extract_strided_slice %185 {offsets = [65, 0], sizes = [7, 64], strides = [1, 1]} : vector<81x64xbf16> to vector<7x64xbf16>
    %256 = vector.extract_strided_slice %185 {offsets = [74, 0], sizes = [7, 64], strides = [1, 1]} : vector<81x64xbf16> to vector<7x64xbf16>
    %257 = tpu.concatenate %250, %251, %252, %253, %254, %255, %256 in 0 : vector<7x64xbf16>, vector<7x64xbf16>, vector<7x64xbf16>, vector<7x64xbf16>, vector<7x64xbf16>, vector<7x64xbf16>, vector<7x64xbf16> -> vector<49x64xbf16>
    %258 = tpu.concatenate %193, %201, %209, %217, %225, %233, %241, %249, %257 in 1 : vector<49x64xbf16>, vector<49x64xbf16>, vector<49x64xbf16>, vector<49x64xbf16>, vector<49x64xbf16>, vector<49x64xbf16>, vector<49x64xbf16>, vector<49x64xbf16>, vector<49x64xbf16> -> vector<49x576xbf16>
    %cst_92 = arith.constant dense<0.000000e+00> : vector<49x64xf32>
    %259 = tpu.matmul %258, %4, %cst_92 {dimension_numbers = #tpu.dot_dimension_numbers<[1], [0], [0], [1], [0, 0, 1, 1], [], []>} : vector<49x576xbf16>, vector<576x64xbf16>, vector<49x64xf32> -> vector<49x64xf32>
    %260 = vector.broadcast %5 : vector<1x64xf32> to vector<49x64xf32>
    %261 = arith.addf %259, %260 : vector<49x64xf32>
    %cst_93 = arith.constant 0.000000e+00 : f32
    %262 = vector.broadcast %cst_93 : f32 to vector<49x64xf32>
    %263 = arith.maximumf %261, %262 : vector<49x64xf32>
    %264 = arith.truncf %263 : vector<49x64xf32> to vector<49x64xbf16>
    %265 = vector.extract_strided_slice %264 {offsets = [0, 0], sizes = [1, 64], strides = [1, 1]} : vector<49x64xbf16> to vector<1x64xbf16>
    %266 = vector.extract_strided_slice %264 {offsets = [1, 0], sizes = [1, 64], strides = [1, 1]} : vector<49x64xbf16> to vector<1x64xbf16>
    %267 = vector.extract_strided_slice %264 {offsets = [2, 0], sizes = [1, 64], strides = [1, 1]} : vector<49x64xbf16> to vector<1x64xbf16>
    %268 = vector.extract_strided_slice %264 {offsets = [3, 0], sizes = [1, 64], strides = [1, 1]} : vector<49x64xbf16> to vector<1x64xbf16>
    %269 = vector.extract_strided_slice %264 {offsets = [4, 0], sizes = [1, 64], strides = [1, 1]} : vector<49x64xbf16> to vector<1x64xbf16>
    %270 = vector.extract_strided_slice %264 {offsets = [5, 0], sizes = [1, 64], strides = [1, 1]} : vector<49x64xbf16> to vector<1x64xbf16>
    %271 = vector.extract_strided_slice %264 {offsets = [6, 0], sizes = [1, 64], strides = [1, 1]} : vector<49x64xbf16> to vector<1x64xbf16>
    %272 = vector.extract_strided_slice %264 {offsets = [7, 0], sizes = [1, 64], strides = [1, 1]} : vector<49x64xbf16> to vector<1x64xbf16>
    %273 = vector.extract_strided_slice %264 {offsets = [8, 0], sizes = [1, 64], strides = [1, 1]} : vector<49x64xbf16> to vector<1x64xbf16>
    %274 = vector.extract_strided_slice %264 {offsets = [9, 0], sizes = [1, 64], strides = [1, 1]} : vector<49x64xbf16> to vector<1x64xbf16>
    %275 = vector.extract_strided_slice %264 {offsets = [10, 0], sizes = [1, 64], strides = [1, 1]} : vector<49x64xbf16> to vector<1x64xbf16>
    %276 = vector.extract_strided_slice %264 {offsets = [11, 0], sizes = [1, 64], strides = [1, 1]} : vector<49x64xbf16> to vector<1x64xbf16>
    %277 = vector.extract_strided_slice %264 {offsets = [12, 0], sizes = [1, 64], strides = [1, 1]} : vector<49x64xbf16> to vector<1x64xbf16>
    %278 = vector.extract_strided_slice %264 {offsets = [13, 0], sizes = [1, 64], strides = [1, 1]} : vector<49x64xbf16> to vector<1x64xbf16>
    %279 = vector.extract_strided_slice %264 {offsets = [14, 0], sizes = [1, 64], strides = [1, 1]} : vector<49x64xbf16> to vector<1x64xbf16>
    %280 = vector.extract_strided_slice %264 {offsets = [15, 0], sizes = [1, 64], strides = [1, 1]} : vector<49x64xbf16> to vector<1x64xbf16>
    %281 = vector.extract_strided_slice %264 {offsets = [16, 0], sizes = [1, 64], strides = [1, 1]} : vector<49x64xbf16> to vector<1x64xbf16>
    %282 = vector.extract_strided_slice %264 {offsets = [17, 0], sizes = [1, 64], strides = [1, 1]} : vector<49x64xbf16> to vector<1x64xbf16>
    %283 = vector.extract_strided_slice %264 {offsets = [18, 0], sizes = [1, 64], strides = [1, 1]} : vector<49x64xbf16> to vector<1x64xbf16>
    %284 = vector.extract_strided_slice %264 {offsets = [19, 0], sizes = [1, 64], strides = [1, 1]} : vector<49x64xbf16> to vector<1x64xbf16>
    %285 = vector.extract_strided_slice %264 {offsets = [20, 0], sizes = [1, 64], strides = [1, 1]} : vector<49x64xbf16> to vector<1x64xbf16>
    %286 = vector.extract_strided_slice %264 {offsets = [21, 0], sizes = [1, 64], strides = [1, 1]} : vector<49x64xbf16> to vector<1x64xbf16>
    %287 = vector.extract_strided_slice %264 {offsets = [22, 0], sizes = [1, 64], strides = [1, 1]} : vector<49x64xbf16> to vector<1x64xbf16>
    %288 = vector.extract_strided_slice %264 {offsets = [23, 0], sizes = [1, 64], strides = [1, 1]} : vector<49x64xbf16> to vector<1x64xbf16>
    %289 = vector.extract_strided_slice %264 {offsets = [24, 0], sizes = [1, 64], strides = [1, 1]} : vector<49x64xbf16> to vector<1x64xbf16>
    %290 = vector.extract_strided_slice %264 {offsets = [25, 0], sizes = [1, 64], strides = [1, 1]} : vector<49x64xbf16> to vector<1x64xbf16>
    %291 = vector.extract_strided_slice %264 {offsets = [26, 0], sizes = [1, 64], strides = [1, 1]} : vector<49x64xbf16> to vector<1x64xbf16>
    %292 = vector.extract_strided_slice %264 {offsets = [27, 0], sizes = [1, 64], strides = [1, 1]} : vector<49x64xbf16> to vector<1x64xbf16>
    %293 = vector.extract_strided_slice %264 {offsets = [28, 0], sizes = [1, 64], strides = [1, 1]} : vector<49x64xbf16> to vector<1x64xbf16>
    %294 = vector.extract_strided_slice %264 {offsets = [29, 0], sizes = [1, 64], strides = [1, 1]} : vector<49x64xbf16> to vector<1x64xbf16>
    %295 = vector.extract_strided_slice %264 {offsets = [30, 0], sizes = [1, 64], strides = [1, 1]} : vector<49x64xbf16> to vector<1x64xbf16>
    %296 = vector.extract_strided_slice %264 {offsets = [31, 0], sizes = [1, 64], strides = [1, 1]} : vector<49x64xbf16> to vector<1x64xbf16>
    %297 = vector.extract_strided_slice %264 {offsets = [32, 0], sizes = [1, 64], strides = [1, 1]} : vector<49x64xbf16> to vector<1x64xbf16>
    %298 = vector.extract_strided_slice %264 {offsets = [33, 0], sizes = [1, 64], strides = [1, 1]} : vector<49x64xbf16> to vector<1x64xbf16>
    %299 = vector.extract_strided_slice %264 {offsets = [34, 0], sizes = [1, 64], strides = [1, 1]} : vector<49x64xbf16> to vector<1x64xbf16>
    %300 = vector.extract_strided_slice %264 {offsets = [35, 0], sizes = [1, 64], strides = [1, 1]} : vector<49x64xbf16> to vector<1x64xbf16>
    %301 = vector.extract_strided_slice %264 {offsets = [36, 0], sizes = [1, 64], strides = [1, 1]} : vector<49x64xbf16> to vector<1x64xbf16>
    %302 = vector.extract_strided_slice %264 {offsets = [37, 0], sizes = [1, 64], strides = [1, 1]} : vector<49x64xbf16> to vector<1x64xbf16>
    %303 = vector.extract_strided_slice %264 {offsets = [38, 0], sizes = [1, 64], strides = [1, 1]} : vector<49x64xbf16> to vector<1x64xbf16>
    %304 = vector.extract_strided_slice %264 {offsets = [39, 0], sizes = [1, 64], strides = [1, 1]} : vector<49x64xbf16> to vector<1x64xbf16>
    %305 = vector.extract_strided_slice %264 {offsets = [40, 0], sizes = [1, 64], strides = [1, 1]} : vector<49x64xbf16> to vector<1x64xbf16>
    %306 = vector.extract_strided_slice %264 {offsets = [41, 0], sizes = [1, 64], strides = [1, 1]} : vector<49x64xbf16> to vector<1x64xbf16>
    %307 = vector.extract_strided_slice %264 {offsets = [42, 0], sizes = [1, 64], strides = [1, 1]} : vector<49x64xbf16> to vector<1x64xbf16>
    %308 = vector.extract_strided_slice %264 {offsets = [43, 0], sizes = [1, 64], strides = [1, 1]} : vector<49x64xbf16> to vector<1x64xbf16>
    %309 = vector.extract_strided_slice %264 {offsets = [44, 0], sizes = [1, 64], strides = [1, 1]} : vector<49x64xbf16> to vector<1x64xbf16>
    %310 = vector.extract_strided_slice %264 {offsets = [45, 0], sizes = [1, 64], strides = [1, 1]} : vector<49x64xbf16> to vector<1x64xbf16>
    %311 = vector.extract_strided_slice %264 {offsets = [46, 0], sizes = [1, 64], strides = [1, 1]} : vector<49x64xbf16> to vector<1x64xbf16>
    %312 = vector.extract_strided_slice %264 {offsets = [47, 0], sizes = [1, 64], strides = [1, 1]} : vector<49x64xbf16> to vector<1x64xbf16>
    %313 = vector.extract_strided_slice %264 {offsets = [48, 0], sizes = [1, 64], strides = [1, 1]} : vector<49x64xbf16> to vector<1x64xbf16>
    %314 = tpu.concatenate %265, %266, %267, %268, %269, %270, %271, %272, %273, %274, %275, %276, %277, %278, %279, %280 in 1 : vector<1x64xbf16>, vector<1x64xbf16>, vector<1x64xbf16>, vector<1x64xbf16>, vector<1x64xbf16>, vector<1x64xbf16>, vector<1x64xbf16>, vector<1x64xbf16>, vector<1x64xbf16>, vector<1x64xbf16>, vector<1x64xbf16>, vector<1x64xbf16>, vector<1x64xbf16>, vector<1x64xbf16>, vector<1x64xbf16>, vector<1x64xbf16> -> vector<1x1024xbf16>
    %315 = tpu.concatenate %281, %282, %283, %284, %285, %286, %287, %288, %289, %290, %291, %292, %293, %294, %295, %296 in 1 : vector<1x64xbf16>, vector<1x64xbf16>, vector<1x64xbf16>, vector<1x64xbf16>, vector<1x64xbf16>, vector<1x64xbf16>, vector<1x64xbf16>, vector<1x64xbf16>, vector<1x64xbf16>, vector<1x64xbf16>, vector<1x64xbf16>, vector<1x64xbf16>, vector<1x64xbf16>, vector<1x64xbf16>, vector<1x64xbf16>, vector<1x64xbf16> -> vector<1x1024xbf16>
    %316 = tpu.concatenate %297, %298, %299, %300, %301, %302, %303, %304, %305, %306, %307, %308, %309, %310, %311, %312 in 1 : vector<1x64xbf16>, vector<1x64xbf16>, vector<1x64xbf16>, vector<1x64xbf16>, vector<1x64xbf16>, vector<1x64xbf16>, vector<1x64xbf16>, vector<1x64xbf16>, vector<1x64xbf16>, vector<1x64xbf16>, vector<1x64xbf16>, vector<1x64xbf16>, vector<1x64xbf16>, vector<1x64xbf16>, vector<1x64xbf16>, vector<1x64xbf16> -> vector<1x1024xbf16>
    %317 = tpu.concatenate %314, %315, %316, %313 in 1 : vector<1x1024xbf16>, vector<1x1024xbf16>, vector<1x1024xbf16>, vector<1x64xbf16> -> vector<1x3136xbf16>
    tpu.wait_dma2 semaphore(%arg14 : memref<!tpu.dma_semaphore, #tpu.memory_space<semaphore_mem>>) src(%arg8 : memref<3136x512xbf16, #tpu.memory_space<any>>) dst(%arg13 : memref<3136x512xbf16, #tpu.memory_space<vmem>>)
    %c0_94 = arith.constant 0 : index
    %c0_95 = arith.constant 0 : index
    %318 = vector.load %arg13[%c0_94, %c0_95] : memref<3136x512xbf16, #tpu.memory_space<vmem>>, vector<3136x512xbf16>
    %cst_96 = arith.constant dense<0.000000e+00> : vector<1x512xf32>
    %319 = tpu.matmul %317, %318, %cst_96 {dimension_numbers = #tpu.dot_dimension_numbers<[1], [0], [0], [1], [0, 0, 1, 1], [], []>} : vector<1x3136xbf16>, vector<3136x512xbf16>, vector<1x512xf32> -> vector<1x512xf32>
    %c0_97 = arith.constant 0 : index
    %c0_98 = arith.constant 0 : index
    %320 = vector.load %arg9[%c0_97, %c0_98] : memref<1x512xf32, #tpu.memory_space<vmem>>, vector<1x512xf32>
    %321 = arith.addf %319, %320 : vector<1x512xf32>
    %cst_99 = arith.constant 0.000000e+00 : f32
    %322 = vector.broadcast %cst_99 : f32 to vector<1x512xf32>
    %323 = arith.maximumf %321, %322 : vector<1x512xf32>
    %324 = arith.truncf %323 : vector<1x512xf32> to vector<1x512xbf16>
    %c0_100 = arith.constant 0 : index
    %c0_101 = arith.constant 0 : index
    %325 = vector.load %arg10[%c0_100, %c0_101] : memref<512x128xbf16, #tpu.memory_space<vmem>>, vector<512x128xbf16>
    %cst_102 = arith.constant dense<0.000000e+00> : vector<1x128xf32>
    %326 = tpu.matmul %324, %325, %cst_102 {dimension_numbers = #tpu.dot_dimension_numbers<[1], [0], [0], [1], [0, 0, 1, 1], [], []>} : vector<1x512xbf16>, vector<512x128xbf16>, vector<1x128xf32> -> vector<1x128xf32>
    %c0_103 = arith.constant 0 : index
    %c0_104 = arith.constant 0 : index
    %327 = vector.load %arg11[%c0_103, %c0_104] : memref<1x128xf32, #tpu.memory_space<vmem>>, vector<1x128xf32>
    %328 = arith.addf %326, %327 : vector<1x128xf32>
    %c0_105 = arith.constant 0 : index
    %c0_106 = arith.constant 0 : index
    %c0_107 = arith.constant 0 : index
    %329 = vector.load %arg12[%c0_105, %c0_106, %c0_107] : memref<1x1x128xf32, #tpu.memory_space<vmem>>, vector<1x1x128xf32>
    %330 = vector.shape_cast %329 : vector<1x1x128xf32> to vector<1x128xf32>
    %331 = vector.shape_cast %328 : vector<1x128xf32> to vector<1x1x128xf32>
    tpu.vector_store %arg12[%c0_105, %c0_106, %c0_107], %331 {strides = array<i32>} : memref<1x1x128xf32, #tpu.memory_space<vmem>>, vector<1x1x128xf32>,
    return
  }
  func.func @transform_0(%arg0: i32) -> (i32, i32, i32) {
    %c0_i32 = arith.constant 0 : i32
    %c0_i32_0 = arith.constant 0 : i32
    %c0_i32_1 = arith.constant 0 : i32
    return %arg0, %c0_i32, %c0_i32_0 : i32, i32, i32
  }
  func.func @transform_1(%arg0: i32) -> (i32, i32) {
    %c0_i32 = arith.constant 0 : i32
    %c0_i32_0 = arith.constant 0 : i32
    %c0_i32_1 = arith.constant 0 : i32
    return %c0_i32, %c0_i32_0 : i32, i32
  }
  func.func @transform_2(%arg0: i32) -> (i32, i32) {
    %c0_i32 = arith.constant 0 : i32
    %c0_i32_0 = arith.constant 0 : i32
    %c0_i32_1 = arith.constant 0 : i32
    return %c0_i32, %c0_i32_0 : i32, i32
  }
  func.func @transform_3(%arg0: i32) -> (i32, i32) {
    %c0_i32 = arith.constant 0 : i32
    %c0_i32_0 = arith.constant 0 : i32
    %c0_i32_1 = arith.constant 0 : i32
    return %c0_i32, %c0_i32_0 : i32, i32
  }
  func.func @transform_4(%arg0: i32) -> (i32, i32) {
    %c0_i32 = arith.constant 0 : i32
    %c0_i32_0 = arith.constant 0 : i32
    %c0_i32_1 = arith.constant 0 : i32
    return %c0_i32, %c0_i32_0 : i32, i32
  }
  func.func @transform_5(%arg0: i32) -> (i32, i32) {
    %c0_i32 = arith.constant 0 : i32
    %c0_i32_0 = arith.constant 0 : i32
    %c0_i32_1 = arith.constant 0 : i32
    return %c0_i32, %c0_i32_0 : i32, i32
  }
  func.func @transform_6(%arg0: i32) -> (i32, i32) {
    %c0_i32 = arith.constant 0 : i32
    %c0_i32_0 = arith.constant 0 : i32
    %c0_i32_1 = arith.constant 0 : i32
    return %c0_i32, %c0_i32_0 : i32, i32
  }
  func.func @transform_8(%arg0: i32) -> (i32, i32) {
    %c0_i32 = arith.constant 0 : i32
    %c0_i32_0 = arith.constant 0 : i32
    %c0_i32_1 = arith.constant 0 : i32
    return %c0_i32, %c0_i32_0 : i32, i32
  }
  func.func @transform_9(%arg0: i32) -> (i32, i32) {
    %c0_i32 = arith.constant 0 : i32
    %c0_i32_0 = arith.constant 0 : i32
    %c0_i32_1 = arith.constant 0 : i32
    return %c0_i32, %c0_i32_0 : i32, i32
  }
  func.func @transform_10(%arg0: i32) -> (i32, i32) {
    %c0_i32 = arith.constant 0 : i32
    %c0_i32_0 = arith.constant 0 : i32
    %c0_i32_1 = arith.constant 0 : i32
    return %c0_i32, %c0_i32_0 : i32, i32
  }
  func.func @transform_11(%arg0: i32) -> (i32, i32, i32) {
    %c0_i32 = arith.constant 0 : i32
    %c0_i32_0 = arith.constant 0 : i32
    %c0_i32_1 = arith.constant 0 : i32
    return %arg0, %c0_i32, %c0_i32_0 : i32, i32, i32
  }
}

</mosaic_0001>

<bundles_post_ra>
// kernel: cnn_forward.1
= control target key start
LH: loop header
LB: loop body
LE: loop exit
PB: predicated region body
PF: predicated region fallthrough
CT: control target
= control target key end

     0   :  { %16 = vsyncpa [#allocation5], 0  ;;  %s21830_s0 = inlined_call_operand.vmem [shape: bf16[32,81,256], index: 0, kind: input, shape index: {}]   ;;  %s21831_s1 = inlined_call_operand.vmem [shape: bf16[256,32], index: 1, kind: input, shape index: {}]   ;;  %s21832_s2 = inlined_call_operand.vmem [shape: f32[1,32], index: 2, kind: input, shape index: {}]   ;;  %s21833_s3 = inlined_call_operand.vmem [shape: bf16[512,64], index: 3, kind: input, shape index: {}]   ;;  %s21834_s4 = inlined_call_operand.vmem [shape: f32[1,64], index: 4, kind: input, shape index: {}]   ;;  %s21835_s5 = inlined_call_operand.vmem [shape: bf16[576,64], index: 5, kind: input, shape index: {}]   ;;  %s21836_s6 = inlined_call_operand.vmem [shape: f32[1,64], index: 6, kind: input, shape index: {}]   ;;  %s21837_s7 = inlined_call_operand.vmem [shape: bf16[3136,512], index: 7, kind: input, shape index: {}]   ;;  %s21838_s8 = inlined_call_operand.vmem [shape: f32[1,512], index: 8, kind: input, shape index: {}]   ;;  %s21839_s9 = inlined_call_operand.vmem [shape: bf16[512,128], index: 9, kind: input, shape index: {}]   ;;  %s21840_s10 = inlined_call_operand.vmem [shape: f32[1,128], index: 10, kind: input, shape index: {}]   ;;  %s21841_s11 = inlined_call_operand.hbm [shape: f32[2,1,128], index: 11, kind: output, shape index: {}]  }
   0x1   :  { %18 = vsyncpa [#allocation5 + $0x1], 0  ;;  %s17931_s17 = smov 0   ;;  %s17933_s18 = smov 0  }
   0x2   :  { %s17935_s19 = smov 0   ;;  %s17937_s20 = smov 0  }
   0x3 LB: > { %21846 = sst [smem:[#allocation9_spill]] %s17846_s19  ;;  %s15072_s21 = sadd.s32 4294967295, %s17850_s20   ;;  %s17850_s20 = sphi %s17937_s20, %s21860_s20   ;;  %s17846_s19 = sphi %s17935_s19, %s21862_s19   ;;  %s17842_s18 = sphi %s17933_s18, %s21864_s18   ;;  %s17838_s17 = sphi %s17931_s17, %s21863_s17  }
   0x4   : > { %s15073_s22 = sadd.s32 4294967294, %s17850_s20   ;;  %s17954_s23 = sadd.s32 1, %s17850_s20  }
   0x5   : > { %21847 = sst [smem:[#allocation10_spill]] %s17954_s23  ;;  %s246_s24 = sadd.s32 1, %s17846_s19 }
   0x6   : > { %s243_s25 = ssub.s32 %s17850_s20, %s17954_s23  ;;  %p256_p0 = scmp.ne.s32.totalorder %s17846_s19, %s17842_s18 }
   0x7   : > { %p244_p1 = scmp.eq.s32.totalorder %s243_s25, 0  ;;  %p257_p2 = scmp.eq.s32.totalorder %s15072_s21, 1 }
   0x8   : > { %p262_p3 = scmp.ne.s32.totalorder %s17842_s18, %s17838_s17  ;;  %p263_p4 = scmp.eq.s32.totalorder %s15073_s22, 1 }
   0x9   : > { %s17964_s26 = scalar_select %p244_p1, %s17846_s19, %s246_s24  }
   0xa   : > { %p17966_p5 = por %p257_p2, %p256_p0  ;;  %p17970_p6 = por %p263_p4, %p262_p3 }
   0xb   : > { %21848 = sst [smem:[#allocation11_spill]] %s17964_s26  ;;  %p15076_p7 = scmp.ge.s32.totalorder %s17850_s20, 1 }
   0xc   : > { %p318_p8 = scmp.lt.s32.totalorder %s17850_s20, 3 }
   0xe   : > { %p319_p9 = pnand %p15076_p7, %p318_p8 }
   0xf   : > { %s21845_s29 = sand.u32 (!%p319_p9), 1, %s17842_s18   ;;  %s17977_s30 = sshll.u32 (!%p319_p9), %s15072_s21, 4 }
  0x10   : > { %322 = sbr.rel (%p319_p9) target bundleno = 3996 (0xf9c), region = 60  ;;  %p357_p10 = scmp.lt.s32.totalorder (!%p319_p9), %s17977_s30, 31 }
  0x11   : > { %s17988_s22 = scalar_lea.vmem (!%p319_p9), [#allocation4], %s21845_s29  ;;  %s17990_s24 = smov (!%p319_p9), [#allocation2]  }
  0x12   : > { %s21851_s21 = smov (!%p319_p9), %s21837_s7  ;;  %s17997_s19 = smov (!%p319_p9), 0  }
  0x13   : > { %s17999_s23 = smov (!%p319_p9), 0  }
  0x17   : > { %s358_s12 = scalar_select %p357_p10, %s17977_s30, 31 }
  0x19   : > { %s17257_s13 = smul.u32 88, %s358_s12 }
  0x1b   : > { %s17984_s16 = scalar_lea.vmem %s21830_s0, %s17257_s13 }
  0x1c LB: >> { %v384_v0 = vld [vmem:[%s17858_s21] sm:$0xf]  ;;  %v386_v1 = vld [vmem:[%s17858_s21 + $0x4] sm:$0xf]  ;;  %v388_v2 = vld [vmem:[%s17858_s21 + $0x8] sm:$0xf]  ;;  %s17866_s23 = sphi %s17999_s23, %s380_s23   ;;  %s17862_s19 = sphi %s17997_s19, %s21852_s19   ;;  %s17858_s21 = sphi %s21851_s21, %s1957_s21   ;;  %s17854_s24 = sphi %s17990_s24, %s1958_s24  }
  0x1d   : >> { %385 = vst [vmem:[%s17854_s24] sm:$0xf] %v384_v0  ;;  %387 = vst [vmem:[%s17854_s24 + $0x8] sm:$0xf] %v386_v1  ;;  %v390_v3 = vld [vmem:[%s17858_s21 + $0xc] sm:$0xf]  ;;  %s1952_s26 = sadd.s32 1, %s17862_s19 }
  0x1e   : >> { %389 = vst [vmem:[%s17854_s24 + $0x10] sm:$0xf] %v388_v2  ;;  %v392_v4 = vld [vmem:[%s17858_s21 + $0x20] sm:$0xf]  ;;  %v394_v5 = vld [vmem:[%s17858_s21 + $0x24] sm:$0xf] }
  0x1f   : >> { %391 = vst [vmem:[%s17854_s24 + $0x18] sm:$0xf] %v390_v3  ;;  %393 = vst [vmem:[%s17854_s24 + $0x20] sm:$0xf] %v392_v4  ;;  %v396_v6 = vld [vmem:[%s17858_s21 + $0x28] sm:$0xf] }
  0x20   : >> { %395 = vst [vmem:[%s17854_s24 + $0x28] sm:$0xf] %v394_v5  ;;  %v398_v7 = vld [vmem:[%s17858_s21 + $0x2c] sm:$0xf]  ;;  %v400_v8 = vld [vmem:[%s17858_s21 + $0x40] sm:$0xf] }
  0x21   : >> { %397 = vst [vmem:[%s17854_s24 + $0x30] sm:$0xf] %v396_v6  ;;  %399 = vst [vmem:[%s17854_s24 + $0x38] sm:$0xf] %v398_v7  ;;  %v402_v9 = vld [vmem:[%s17858_s21 + $0x44] sm:$0xf] }
  0x22   : >> { %401 = vst [vmem:[%s17854_s24 + $0x40] sm:$0xf] %v400_v8  ;;  %v404_v10 = vld [vmem:[%s17858_s21 + $0x48] sm:$0xf]  ;;  %v406_v11 = vld [vmem:[%s17858_s21 + $0x4c] sm:$0xf] }
  0x23   : >> { %403 = vst [vmem:[%s17854_s24 + $0x48] sm:$0xf] %v402_v9  ;;  %405 = vst [vmem:[%s17854_s24 + $0x50] sm:$0xf] %v404_v10  ;;  %v408_v12 = vld [vmem:[%s17858_s21 + $0x60] sm:$0xf] }
  0x24   : >> { %407 = vst [vmem:[%s17854_s24 + $0x58] sm:$0xf] %v406_v11  ;;  %v410_v13 = vld [vmem:[%s17858_s21 + $0x64] sm:$0xf]  ;;  %v412_v14 = vld [vmem:[%s17858_s21 + $0x68] sm:$0xf] }
  0x25   : >> { %409 = vst [vmem:[%s17854_s24 + $0x60] sm:$0xf] %v408_v12  ;;  %411 = vst [vmem:[%s17854_s24 + $0x68] sm:$0xf] %v410_v13  ;;  %v414_v15 = vld [vmem:[%s17858_s21 + $0x6c] sm:$0xf] }
  0x26   : >> { %413 = vst [vmem:[%s17854_s24 + $0x70] sm:$0xf] %v412_v14  ;;  %v416_v16 = vld [vmem:[%s17858_s21 + $0x80] sm:$0xf]  ;;  %v418_v17 = vld [vmem:[%s17858_s21 + $0x84] sm:$0xf] }
  0x27   : >> { %415 = vst [vmem:[%s17854_s24 + $0x78] sm:$0xf] %v414_v15  ;;  %417 = vst [vmem:[%s17854_s24 + $0x80] sm:$0xf] %v416_v16  ;;  %v420_v18 = vld [vmem:[%s17858_s21 + $0x88] sm:$0xf] }
  0x28   : >> { %419 = vst [vmem:[%s17854_s24 + $0x88] sm:$0xf] %v418_v17  ;;  %v422_v19 = vld [vmem:[%s17858_s21 + $0x8c] sm:$0xf]  ;;  %v424_v20 = vld [vmem:[%s17858_s21 + $0xa0] sm:$0xf] }
  0x29   : >> { %421 = vst [vmem:[%s17854_s24 + $0x90] sm:$0xf] %v420_v18  ;;  %423 = vst [vmem:[%s17854_s24 + $0x98] sm:$0xf] %v422_v19  ;;  %v426_v21 = vld [vmem:[%s17858_s21 + $0xa4] sm:$0xf] }
  0x2a   : >> { %425 = vst [vmem:[%s17854_s24 + $0xa0] sm:$0xf] %v424_v20  ;;  %v428_v22 = vld [vmem:[%s17858_s21 + $0xa8] sm:$0xf]  ;;  %v430_v23 = vld [vmem:[%s17858_s21 + $0xac] sm:$0xf] }
  0x2b   : >> { %427 = vst [vmem:[%s17854_s24 + $0xa8] sm:$0xf] %v426_v21  ;;  %429 = vst [vmem:[%s17854_s24 + $0xb0] sm:$0xf] %v428_v22  ;;  %v432_v24 = vld [vmem:[%s17858_s21 + $0xc0] sm:$0xf] }
  0x2c   : >> { %431 = vst [vmem:[%s17854_s24 + $0xb8] sm:$0xf] %v430_v23  ;;  %v434_v25 = vld [vmem:[%s17858_s21 + $0xc4] sm:$0xf]  ;;  %v436_v26 = vld [vmem:[%s17858_s21 + $0xc8] sm:$0xf] }
  0x2d   : >> { %433 = vst [vmem:[%s17854_s24 + $0xc0] sm:$0xf] %v432_v24  ;;  %435 = vst [vmem:[%s17854_s24 + $0xc8] sm:$0xf] %v434_v25  ;;  %v438_v27 = vld [vmem:[%s17858_s21 + $0xcc] sm:$0xf] }
  0x2e   : >> { %437 = vst [vmem:[%s17854_s24 + $0xd0] sm:$0xf] %v436_v26  ;;  %v440_v28 = vld [vmem:[%s17858_s21 + $0xe0] sm:$0xf]  ;;  %v442_v29 = vld [vmem:[%s17858_s21 + $0xe4] sm:$0xf] }
  0x2f   : >> { %439 = vst [vmem:[%s17854_s24 + $0xd8] sm:$0xf] %v438_v27  ;;  %441 = vst [vmem:[%s17854_s24 + $0xe0] sm:$0xf] %v440_v28  ;;  %v444_v30 = vld [vmem:[%s17858_s21 + $0xe8] sm:$0xf] }
  0x30   : >> { %443 = vst [vmem:[%s17854_s24 + $0xe8] sm:$0xf] %v442_v29  ;;  %v446_v31 = vld [vmem:[%s17858_s21 + $0xec] sm:$0xf]  ;;  %v448_v32 = vld [vmem:[%s17858_s21 + $0x100] sm:$0xf] }
  0x31   : >> { %445 = vst [vmem:[%s17854_s24 + $0xf0] sm:$0xf] %v444_v30  ;;  %447 = vst [vmem:[%s17854_s24 + $0xf8] sm:$0xf] %v446_v31  ;;  %v450_v33 = vld [vmem:[%s17858_s21 + $0x104] sm:$0xf] }
  0x32   : >> { %449 = vst [vmem:[%s17854_s24 + $0x100] sm:$0xf] %v448_v32  ;;  %v452_v34 = vld [vmem:[%s17858_s21 + $0x108] sm:$0xf]  ;;  %v454_v35 = vld [vmem:[%s17858_s21 + $0x10c] sm:$0xf] }
  0x33   : >> { %451 = vst [vmem:[%s17854_s24 + $0x108] sm:$0xf] %v450_v33  ;;  %453 = vst [vmem:[%s17854_s24 + $0x110] sm:$0xf] %v452_v34  ;;  %v456_v36 = vld [vmem:[%s17858_s21 + $0x120] sm:$0xf] }
  0x34   : >> { %455 = vst [vmem:[%s17854_s24 + $0x118] sm:$0xf] %v454_v35  ;;  %v458_v37 = vld [vmem:[%s17858_s21 + $0x124] sm:$0xf]  ;;  %v460_v38 = vld [vmem:[%s17858_s21 + $0x128] sm:$0xf] }
  0x35   : >> { %457 = vst [vmem:[%s17854_s24 + $0x120] sm:$0xf] %v456_v36  ;;  %459 = vst [vmem:[%s17854_s24 + $0x128] sm:$0xf] %v458_v37  ;;  %v462_v39 = vld [vmem:[%s17858_s21 + $0x12c] sm:$0xf] }
  0x36   : >> { %461 = vst [vmem:[%s17854_s24 + $0x130] sm:$0xf] %v460_v38  ;;  %v464_v40 = vld [vmem:[%s17858_s21 + $0x140] sm:$0xf]  ;;  %v466_v41 = vld [vmem:[%s17858_s21 + $0x144] sm:$0xf] }
  0x37   : >> { %463 = vst [vmem:[%s17854_s24 + $0x138] sm:$0xf] %v462_v39  ;;  %465 = vst [vmem:[%s17854_s24 + $0x140] sm:$0xf] %v464_v40  ;;  %v468_v42 = vld [vmem:[%s17858_s21 + $0x148] sm:$0xf] }
  0x38   : >> { %467 = vst [vmem:[%s17854_s24 + $0x148] sm:$0xf] %v466_v41  ;;  %v470_v43 = vld [vmem:[%s17858_s21 + $0x14c] sm:$0xf]  ;;  %v472_v44 = vld [vmem:[%s17858_s21 + $0x160] sm:$0xf] }
  0x39   : >> { %469 = vst [vmem:[%s17854_s24 + $0x150] sm:$0xf] %v468_v42  ;;  %471 = vst [vmem:[%s17854_s24 + $0x158] sm:$0xf] %v470_v43  ;;  %v474_v45 = vld [vmem:[%s17858_s21 + $0x164] sm:$0xf] }
  0x3a   : >> { %473 = vst [vmem:[%s17854_s24 + $0x160] sm:$0xf] %v472_v44  ;;  %v476_v46 = vld [vmem:[%s17858_s21 + $0x168] sm:$0xf]  ;;  %v478_v47 = vld [vmem:[%s17858_s21 + $0x16c] sm:$0xf] }
  0x3b   : >> { %475 = vst [vmem:[%s17854_s24 + $0x168] sm:$0xf] %v474_v45  ;;  %477 = vst [vmem:[%s17854_s24 + $0x170] sm:$0xf] %v476_v46  ;;  %v480_v48 = vld [vmem:[%s17858_s21 + $0x180] sm:$0xf] }
  0x3c   : >> { %479 = vst [vmem:[%s17854_s24 + $0x178] sm:$0xf] %v478_v47  ;;  %v482_v49 = vld [vmem:[%s17858_s21 + $0x184] sm:$0xf]  ;;  %v484_v50 = vld [vmem:[%s17858_s21 + $0x188] sm:$0xf] }
  0x3d   : >> { %481 = vst [vmem:[%s17854_s24 + $0x180] sm:$0xf] %v480_v48  ;;  %483 = vst [vmem:[%s17854_s24 + $0x188] sm:$0xf] %v482_v49  ;;  %v486_v51 = vld [vmem:[%s17858_s21 + $0x18c] sm:$0xf] }
  0x3e   : >> { %485 = vst [vmem:[%s17854_s24 + $0x190] sm:$0xf] %v484_v50  ;;  %v488_v52 = vld [vmem:[%s17858_s21 + $0x1a0] sm:$0xf]  ;;  %v490_v53 = vld [vmem:[%s17858_s21 + $0x1a4] sm:$0xf] }
  0x3f   : >> { %487 = vst [vmem:[%s17854_s24 + $0x198] sm:$0xf] %v486_v51  ;;  %489 = vst [vmem:[%s17854_s24 + $0x1a0] sm:$0xf] %v488_v52  ;;  %v492_v54 = vld [vmem:[%s17858_s21 + $0x1a8] sm:$0xf] }
  0x40   : >> { %491 = vst [vmem:[%s17854_s24 + $0x1a8] sm:$0xf] %v490_v53  ;;  %v494_v55 = vld [vmem:[%s17858_s21 + $0x1ac] sm:$0xf]  ;;  %v496_v56 = vld [vmem:[%s17858_s21 + $0x1c0] sm:$0xf] }
  0x41   : >> { %493 = vst [vmem:[%s17854_s24 + $0x1b0] sm:$0xf] %v492_v54  ;;  %495 = vst [vmem:[%s17854_s24 + $0x1b8] sm:$0xf] %v494_v55  ;;  %v498_v57 = vld [vmem:[%s17858_s21 + $0x1c4] sm:$0xf] }
  0x42   : >> { %497 = vst [vmem:[%s17854_s24 + $0x1c0] sm:$0xf] %v496_v56  ;;  %v500_v58 = vld [vmem:[%s17858_s21 + $0x1c8] sm:$0xf]  ;;  %v502_v59 = vld [vmem:[%s17858_s21 + $0x1cc] sm:$0xf] }
  0x43   : >> { %499 = vst [vmem:[%s17854_s24 + $0x1c8] sm:$0xf] %v498_v57  ;;  %501 = vst [vmem:[%s17854_s24 + $0x1d0] sm:$0xf] %v500_v58  ;;  %v504_v60 = vld [vmem:[%s17858_s21 + $0x1e0] sm:$0xf] }
  0x44   : >> { %503 = vst [vmem:[%s17854_s24 + $0x1d8] sm:$0xf] %v502_v59  ;;  %v506_v61 = vld [vmem:[%s17858_s21 + $0x1e4] sm:$0xf]  ;;  %v508_v62 = vld [vmem:[%s17858_s21 + $0x1e8] sm:$0xf] }
  0x45   : >> { %505 = vst [vmem:[%s17854_s24 + $0x1e0] sm:$0xf] %v504_v60  ;;  %507 = vst [vmem:[%s17854_s24 + $0x1e8] sm:$0xf] %v506_v61  ;;  %v510_v63 = vld [vmem:[%s17858_s21 + $0x1ec] sm:$0xf] }
  0x46   : >> { %509 = vst [vmem:[%s17854_s24 + $0x1f0] sm:$0xf] %v508_v62  ;;  %v512_v0 = vld [vmem:[%s17858_s21 + $0x200] sm:$0xf]  ;;  %v514_v1 = vld [vmem:[%s17858_s21 + $0x204] sm:$0xf] }
  0x47   : >> { %511 = vst [vmem:[%s17854_s24 + $0x1f8] sm:$0xf] %v510_v63  ;;  %513 = vst [vmem:[%s17854_s24 + $0x200] sm:$0xf] %v512_v0  ;;  %v516_v2 = vld [vmem:[%s17858_s21 + $0x208] sm:$0xf] }
  0x48   : >> { %515 = vst [vmem:[%s17854_s24 + $0x208] sm:$0xf] %v514_v1  ;;  %v518_v3 = vld [vmem:[%s17858_s21 + $0x20c] sm:$0xf]  ;;  %v520_v4 = vld [vmem:[%s17858_s21 + $0x220] sm:$0xf] }
  0x49   : >> { %517 = vst [vmem:[%s17854_s24 + $0x210] sm:$0xf] %v516_v2  ;;  %519 = vst [vmem:[%s17854_s24 + $0x218] sm:$0xf] %v518_v3  ;;  %v522_v5 = vld [vmem:[%s17858_s21 + $0x224] sm:$0xf] }
  0x4a   : >> { %521 = vst [vmem:[%s17854_s24 + $0x220] sm:$0xf] %v520_v4  ;;  %v524_v6 = vld [vmem:[%s17858_s21 + $0x228] sm:$0xf]  ;;  %v526_v7 = vld [vmem:[%s17858_s21 + $0x22c] sm:$0xf] }
  0x4b   : >> { %523 = vst [vmem:[%s17854_s24 + $0x228] sm:$0xf] %v522_v5  ;;  %525 = vst [vmem:[%s17854_s24 + $0x230] sm:$0xf] %v524_v6  ;;  %v528_v8 = vld [vmem:[%s17858_s21 + $0x240] sm:$0xf] }
  0x4c   : >> { %527 = vst [vmem:[%s17854_s24 + $0x238] sm:$0xf] %v526_v7  ;;  %v530_v9 = vld [vmem:[%s17858_s21 + $0x244] sm:$0xf]  ;;  %v532_v10 = vld [vmem:[%s17858_s21 + $0x248] sm:$0xf] }
  0x4d   : >> { %529 = vst [vmem:[%s17854_s24 + $0x240] sm:$0xf] %v528_v8  ;;  %531 = vst [vmem:[%s17854_s24 + $0x248] sm:$0xf] %v530_v9  ;;  %v534_v11 = vld [vmem:[%s17858_s21 + $0x24c] sm:$0xf] }
  0x4e   : >> { %533 = vst [vmem:[%s17854_s24 + $0x250] sm:$0xf] %v532_v10  ;;  %v536_v12 = vld [vmem:[%s17858_s21 + $0x260] sm:$0xf]  ;;  %v538_v13 = vld [vmem:[%s17858_s21 + $0x264] sm:$0xf] }
  0x4f   : >> { %535 = vst [vmem:[%s17854_s24 + $0x258] sm:$0xf] %v534_v11  ;;  %537 = vst [vmem:[%s17854_s24 + $0x260] sm:$0xf] %v536_v12  ;;  %v540_v14 = vld [vmem:[%s17858_s21 + $0x268] sm:$0xf] }
  0x50   : >> { %539 = vst [vmem:[%s17854_s24 + $0x268] sm:$0xf] %v538_v13  ;;  %v542_v15 = vld [vmem:[%s17858_s21 + $0x26c] sm:$0xf]  ;;  %v544_v16 = vld [vmem:[%s17858_s21 + $0x280] sm:$0xf] }
  0x51   : >> { %541 = vst [vmem:[%s17854_s24 + $0x270] sm:$0xf] %v540_v14  ;;  %543 = vst [vmem:[%s17854_s24 + $0x278] sm:$0xf] %v542_v15  ;;  %v546_v17 = vld [vmem:[%s17858_s21 + $0x284] sm:$0xf] }
  0x52   : >> { %545 = vst [vmem:[%s17854_s24 + $0x280] sm:$0xf] %v544_v16  ;;  %v548_v18 = vld [vmem:[%s17858_s21 + $0x288] sm:$0xf]  ;;  %v550_v19 = vld [vmem:[%s17858_s21 + $0x28c] sm:$0xf] }
  0x53   : >> { %547 = vst [vmem:[%s17854_s24 + $0x288] sm:$0xf] %v546_v17  ;;  %549 = vst [vmem:[%s17854_s24 + $0x290] sm:$0xf] %v548_v18  ;;  %v552_v20 = vld [vmem:[%s17858_s21 + $0x2a0] sm:$0xf] }
  0x54   : >> { %551 = vst [vmem:[%s17854_s24 + $0x298] sm:$0xf] %v550_v19  ;;  %v554_v21 = vld [vmem:[%s17858_s21 + $0x2a4] sm:$0xf]  ;;  %v556_v22 = vld [vmem:[%s17858_s21 + $0x2a8] sm:$0xf] }
  0x55   : >> { %553 = vst [vmem:[%s17854_s24 + $0x2a0] sm:$0xf] %v552_v20  ;;  %555 = vst [vmem:[%s17854_s24 + $0x2a8] sm:$0xf] %v554_v21  ;;  %v558_v23 = vld [vmem:[%s17858_s21 + $0x2ac] sm:$0xf] }
  0x56   : >> { %557 = vst [vmem:[%s17854_s24 + $0x2b0] sm:$0xf] %v556_v22  ;;  %v560_v24 = vld [vmem:[%s17858_s21 + $0x2c0] sm:$0xf]  ;;  %v562_v25 = vld [vmem:[%s17858_s21 + $0x2c4] sm:$0xf] }
  0x57   : >> { %559 = vst [vmem:[%s17854_s24 + $0x2b8] sm:$0xf] %v558_v23  ;;  %561 = vst [vmem:[%s17854_s24 + $0x2c0] sm:$0xf] %v560_v24  ;;  %v564_v26 = vld [vmem:[%s17858_s21 + $0x2c8] sm:$0xf] }
  0x58   : >> { %563 = vst [vmem:[%s17854_s24 + $0x2c8] sm:$0xf] %v562_v25  ;;  %v566_v27 = vld [vmem:[%s17858_s21 + $0x2cc] sm:$0xf]  ;;  %v568_v28 = vld [vmem:[%s17858_s21 + $0x2e0] sm:$0xf] }
  0x59   : >> { %565 = vst [vmem:[%s17854_s24 + $0x2d0] sm:$0xf] %v564_v26  ;;  %567 = vst [vmem:[%s17854_s24 + $0x2d8] sm:$0xf] %v566_v27  ;;  %v570_v29 = vld [vmem:[%s17858_s21 + $0x2e4] sm:$0xf] }
  0x5a   : >> { %569 = vst [vmem:[%s17854_s24 + $0x2e0] sm:$0xf] %v568_v28  ;;  %v572_v30 = vld [vmem:[%s17858_s21 + $0x2e8] sm:$0xf]  ;;  %v574_v31 = vld [vmem:[%s17858_s21 + $0x2ec] sm:$0xf] }
  0x5b   : >> { %571 = vst [vmem:[%s17854_s24 + $0x2e8] sm:$0xf] %v570_v29  ;;  %573 = vst [vmem:[%s17854_s24 + $0x2f0] sm:$0xf] %v572_v30  ;;  %v576_v32 = vld [vmem:[%s17858_s21 + $0x300] sm:$0xf] }
  0x5c   : >> { %575 = vst [vmem:[%s17854_s24 + $0x2f8] sm:$0xf] %v574_v31  ;;  %v578_v33 = vld [vmem:[%s17858_s21 + $0x304] sm:$0xf]  ;;  %v580_v34 = vld [vmem:[%s17858_s21 + $0x308] sm:$0xf] }
  0x5d   : >> { %577 = vst [vmem:[%s17854_s24 + $0x300] sm:$0xf] %v576_v32  ;;  %579 = vst [vmem:[%s17854_s24 + $0x308] sm:$0xf] %v578_v33  ;;  %v582_v35 = vld [vmem:[%s17858_s21 + $0x30c] sm:$0xf] }
  0x5e   : >> { %581 = vst [vmem:[%s17854_s24 + $0x310] sm:$0xf] %v580_v34  ;;  %v584_v36 = vld [vmem:[%s17858_s21 + $0x320] sm:$0xf]  ;;  %v586_v37 = vld [vmem:[%s17858_s21 + $0x324] sm:$0xf] }
  0x5f   : >> { %583 = vst [vmem:[%s17854_s24 + $0x318] sm:$0xf] %v582_v35  ;;  %585 = vst [vmem:[%s17854_s24 + $0x320] sm:$0xf] %v584_v36  ;;  %v588_v38 = vld [vmem:[%s17858_s21 + $0x328] sm:$0xf] }
  0x60   : >> { %587 = vst [vmem:[%s17854_s24 + $0x328] sm:$0xf] %v586_v37  ;;  %v590_v39 = vld [vmem:[%s17858_s21 + $0x32c] sm:$0xf]  ;;  %v592_v40 = vld [vmem:[%s17858_s21 + $0x340] sm:$0xf] }
  0x61   : >> { %589 = vst [vmem:[%s17854_s24 + $0x330] sm:$0xf] %v588_v38  ;;  %591 = vst [vmem:[%s17854_s24 + $0x338] sm:$0xf] %v590_v39  ;;  %v594_v41 = vld [vmem:[%s17858_s21 + $0x344] sm:$0xf] }
  0x62   : >> { %593 = vst [vmem:[%s17854_s24 + $0x340] sm:$0xf] %v592_v40  ;;  %v596_v42 = vld [vmem:[%s17858_s21 + $0x348] sm:$0xf]  ;;  %v598_v43 = vld [vmem:[%s17858_s21 + $0x34c] sm:$0xf] }
  0x63   : >> { %595 = vst [vmem:[%s17854_s24 + $0x348] sm:$0xf] %v594_v41  ;;  %597 = vst [vmem:[%s17854_s24 + $0x350] sm:$0xf] %v596_v42  ;;  %v600_v44 = vld [vmem:[%s17858_s21 + $0x360] sm:$0xf] }
  0x64   : >> { %599 = vst [vmem:[%s17854_s24 + $0x358] sm:$0xf] %v598_v43  ;;  %v602_v45 = vld [vmem:[%s17858_s21 + $0x364] sm:$0xf]  ;;  %v604_v46 = vld [vmem:[%s17858_s21 + $0x368] sm:$0xf] }
  0x65   : >> { %601 = vst [vmem:[%s17854_s24 + $0x360] sm:$0xf] %v600_v44  ;;  %603 = vst [vmem:[%s17854_s24 + $0x368] sm:$0xf] %v602_v45  ;;  %v606_v47 = vld [vmem:[%s17858_s21 + $0x36c] sm:$0xf] }
  0x66   : >> { %605 = vst [vmem:[%s17854_s24 + $0x370] sm:$0xf] %v604_v46  ;;  %v608_v48 = vld [vmem:[%s17858_s21 + $0x380] sm:$0xf]  ;;  %v610_v49 = vld [vmem:[%s17858_s21 + $0x384] sm:$0xf] }
  0x67   : >> { %607 = vst [vmem:[%s17854_s24 + $0x378] sm:$0xf] %v606_v47  ;;  %609 = vst [vmem:[%s17854_s24 + $0x380] sm:$0xf] %v608_v48  ;;  %v612_v50 = vld [vmem:[%s17858_s21 + $0x388] sm:$0xf] }
  0x68   : >> { %611 = vst [vmem:[%s17854_s24 + $0x388] sm:$0xf] %v610_v49  ;;  %v614_v51 = vld [vmem:[%s17858_s21 + $0x38c] sm:$0xf]  ;;  %v616_v52 = vld [vmem:[%s17858_s21 + $0x3a0] sm:$0xf] }
  0x69   : >> { %613 = vst [vmem:[%s17854_s24 + $0x390] sm:$0xf] %v612_v50  ;;  %615 = vst [vmem:[%s17854_s24 + $0x398] sm:$0xf] %v614_v51  ;;  %v618_v53 = vld [vmem:[%s17858_s21 + $0x3a4] sm:$0xf] }
  0x6a   : >> { %617 = vst [vmem:[%s17854_s24 + $0x3a0] sm:$0xf] %v616_v52  ;;  %v620_v54 = vld [vmem:[%s17858_s21 + $0x3a8] sm:$0xf]  ;;  %v622_v55 = vld [vmem:[%s17858_s21 + $0x3ac] sm:$0xf] }
  0x6b   : >> { %619 = vst [vmem:[%s17854_s24 + $0x3a8] sm:$0xf] %v618_v53  ;;  %621 = vst [vmem:[%s17854_s24 + $0x3b0] sm:$0xf] %v620_v54  ;;  %v624_v56 = vld [vmem:[%s17858_s21 + $0x3c0] sm:$0xf] }
  0x6c   : >> { %623 = vst [vmem:[%s17854_s24 + $0x3b8] sm:$0xf] %v622_v55  ;;  %v626_v57 = vld [vmem:[%s17858_s21 + $0x3c4] sm:$0xf]  ;;  %v628_v58 = vld [vmem:[%s17858_s21 + $0x3c8] sm:$0xf] }
  0x6d   : >> { %625 = vst [vmem:[%s17854_s24 + $0x3c0] sm:$0xf] %v624_v56  ;;  %627 = vst [vmem:[%s17854_s24 + $0x3c8] sm:$0xf] %v626_v57  ;;  %v630_v59 = vld [vmem:[%s17858_s21 + $0x3cc] sm:$0xf] }
  0x6e   : >> { %629 = vst [vmem:[%s17854_s24 + $0x3d0] sm:$0xf] %v628_v58  ;;  %v632_v60 = vld [vmem:[%s17858_s21 + $0x3e0] sm:$0xf]  ;;  %v634_v61 = vld [vmem:[%s17858_s21 + $0x3e4] sm:$0xf] }
  0x6f   : >> { %631 = vst [vmem:[%s17854_s24 + $0x3d8] sm:$0xf] %v630_v59  ;;  %633 = vst [vmem:[%s17854_s24 + $0x3e0] sm:$0xf] %v632_v60  ;;  %v636_v62 = vld [vmem:[%s17858_s21 + $0x3e8] sm:$0xf] }
  0x70   : >> { %635 = vst [vmem:[%s17854_s24 + $0x3e8] sm:$0xf] %v634_v61  ;;  %v638_v63 = vld [vmem:[%s17858_s21 + $0x3ec] sm:$0xf]  ;;  %v640_v0 = vld [vmem:[%s17858_s21 + $0x400] sm:$0xf] }
  0x71   : >> { %637 = vst [vmem:[%s17854_s24 + $0x3f0] sm:$0xf] %v636_v62  ;;  %639 = vst [vmem:[%s17854_s24 + $0x3f8] sm:$0xf] %v638_v63  ;;  %v642_v1 = vld [vmem:[%s17858_s21 + $0x404] sm:$0xf] }
  0x72   : >> { %641 = vst [vmem:[%s17854_s24 + $0x400] sm:$0xf] %v640_v0  ;;  %v644_v2 = vld [vmem:[%s17858_s21 + $0x408] sm:$0xf]  ;;  %v646_v3 = vld [vmem:[%s17858_s21 + $0x40c] sm:$0xf] }
  0x73   : >> { %643 = vst [vmem:[%s17854_s24 + $0x408] sm:$0xf] %v642_v1  ;;  %645 = vst [vmem:[%s17854_s24 + $0x410] sm:$0xf] %v644_v2  ;;  %v648_v4 = vld [vmem:[%s17858_s21 + $0x420] sm:$0xf] }
  0x74   : >> { %647 = vst [vmem:[%s17854_s24 + $0x418] sm:$0xf] %v646_v3  ;;  %v650_v5 = vld [vmem:[%s17858_s21 + $0x424] sm:$0xf]  ;;  %v652_v6 = vld [vmem:[%s17858_s21 + $0x428] sm:$0xf] }
  0x75   : >> { %649 = vst [vmem:[%s17854_s24 + $0x420] sm:$0xf] %v648_v4  ;;  %651 = vst [vmem:[%s17854_s24 + $0x428] sm:$0xf] %v650_v5  ;;  %v654_v7 = vld [vmem:[%s17858_s21 + $0x42c] sm:$0xf] }
  0x76   : >> { %653 = vst [vmem:[%s17854_s24 + $0x430] sm:$0xf] %v652_v6  ;;  %v656_v8 = vld [vmem:[%s17858_s21 + $0x440] sm:$0xf]  ;;  %v658_v9 = vld [vmem:[%s17858_s21 + $0x444] sm:$0xf] }
  0x77   : >> { %655 = vst [vmem:[%s17854_s24 + $0x438] sm:$0xf] %v654_v7  ;;  %657 = vst [vmem:[%s17854_s24 + $0x440] sm:$0xf] %v656_v8  ;;  %v660_v10 = vld [vmem:[%s17858_s21 + $0x448] sm:$0xf] }
  0x78   : >> { %659 = vst [vmem:[%s17854_s24 + $0x448] sm:$0xf] %v658_v9  ;;  %v662_v11 = vld [vmem:[%s17858_s21 + $0x44c] sm:$0xf]  ;;  %v664_v12 = vld [vmem:[%s17858_s21 + $0x460] sm:$0xf] }
  0x79   : >> { %661 = vst [vmem:[%s17854_s24 + $0x450] sm:$0xf] %v660_v10  ;;  %663 = vst [vmem:[%s17854_s24 + $0x458] sm:$0xf] %v662_v11  ;;  %v666_v13 = vld [vmem:[%s17858_s21 + $0x464] sm:$0xf] }
  0x7a   : >> { %665 = vst [vmem:[%s17854_s24 + $0x460] sm:$0xf] %v664_v12  ;;  %v668_v14 = vld [vmem:[%s17858_s21 + $0x468] sm:$0xf]  ;;  %v670_v15 = vld [vmem:[%s17858_s21 + $0x46c] sm:$0xf] }
  0x7b   : >> { %667 = vst [vmem:[%s17854_s24 + $0x468] sm:$0xf] %v666_v13  ;;  %669 = vst [vmem:[%s17854_s24 + $0x470] sm:$0xf] %v668_v14  ;;  %v672_v16 = vld [vmem:[%s17858_s21 + $0x480] sm:$0xf] }
  0x7c   : >> { %671 = vst [vmem:[%s17854_s24 + $0x478] sm:$0xf] %v670_v15  ;;  %v674_v17 = vld [vmem:[%s17858_s21 + $0x484] sm:$0xf]  ;;  %v676_v18 = vld [vmem:[%s17858_s21 + $0x488] sm:$0xf] }
  0x7d   : >> { %673 = vst [vmem:[%s17854_s24 + $0x480] sm:$0xf] %v672_v16  ;;  %675 = vst [vmem:[%s17854_s24 + $0x488] sm:$0xf] %v674_v17  ;;  %v678_v19 = vld [vmem:[%s17858_s21 + $0x48c] sm:$0xf] }
  0x7e   : >> { %677 = vst [vmem:[%s17854_s24 + $0x490] sm:$0xf] %v676_v18  ;;  %v680_v20 = vld [vmem:[%s17858_s21 + $0x4a0] sm:$0xf]  ;;  %v682_v21 = vld [vmem:[%s17858_s21 + $0x4a4] sm:$0xf] }
  0x7f   : >> { %679 = vst [vmem:[%s17854_s24 + $0x498] sm:$0xf] %v678_v19  ;;  %681 = vst [vmem:[%s17854_s24 + $0x4a0] sm:$0xf] %v680_v20  ;;  %v684_v22 = vld [vmem:[%s17858_s21 + $0x4a8] sm:$0xf] }
  0x80   : >> { %683 = vst [vmem:[%s17854_s24 + $0x4a8] sm:$0xf] %v682_v21  ;;  %v686_v23 = vld [vmem:[%s17858_s21 + $0x4ac] sm:$0xf]  ;;  %v688_v24 = vld [vmem:[%s17858_s21 + $0x4c0] sm:$0xf] }
  0x81   : >> { %685 = vst [vmem:[%s17854_s24 + $0x4b0] sm:$0xf] %v684_v22  ;;  %687 = vst [vmem:[%s17854_s24 + $0x4b8] sm:$0xf] %v686_v23  ;;  %v690_v25 = vld [vmem:[%s17858_s21 + $0x4c4] sm:$0xf] }
  0x82   : >> { %689 = vst [vmem:[%s17854_s24 + $0x4c0] sm:$0xf] %v688_v24  ;;  %v692_v26 = vld [vmem:[%s17858_s21 + $0x4c8] sm:$0xf]  ;;  %v694_v27 = vld [vmem:[%s17858_s21 + $0x4cc] sm:$0xf] }
  0x83   : >> { %691 = vst [vmem:[%s17854_s24 + $0x4c8] sm:$0xf] %v690_v25  ;;  %693 = vst [vmem:[%s17854_s24 + $0x4d0] sm:$0xf] %v692_v26  ;;  %v696_v28 = vld [vmem:[%s17858_s21 + $0x4e0] sm:$0xf] }
  0x84   : >> { %695 = vst [vmem:[%s17854_s24 + $0x4d8] sm:$0xf] %v694_v27  ;;  %v698_v29 = vld [vmem:[%s17858_s21 + $0x4e4] sm:$0xf]  ;;  %v700_v30 = vld [vmem:[%s17858_s21 + $0x4e8] sm:$0xf] }
  0x85   : >> { %697 = vst [vmem:[%s17854_s24 + $0x4e0] sm:$0xf] %v696_v28  ;;  %699 = vst [vmem:[%s17854_s24 + $0x4e8] sm:$0xf] %v698_v29  ;;  %v702_v31 = vld [vmem:[%s17858_s21 + $0x4ec] sm:$0xf] }
  0x86   : >> { %701 = vst [vmem:[%s17854_s24 + $0x4f0] sm:$0xf] %v700_v30  ;;  %v704_v32 = vld [vmem:[%s17858_s21 + $0x500] sm:$0xf]  ;;  %v706_v33 = vld [vmem:[%s17858_s21 + $0x504] sm:$0xf] }
  0x87   : >> { %703 = vst [vmem:[%s17854_s24 + $0x4f8] sm:$0xf] %v702_v31  ;;  %705 = vst [vmem:[%s17854_s24 + $0x500] sm:$0xf] %v704_v32  ;;  %v708_v34 = vld [vmem:[%s17858_s21 + $0x508] sm:$0xf] }
  0x88   : >> { %707 = vst [vmem:[%s17854_s24 + $0x508] sm:$0xf] %v706_v33  ;;  %v710_v35 = vld [vmem:[%s17858_s21 + $0x50c] sm:$0xf]  ;;  %v712_v36 = vld [vmem:[%s17858_s21 + $0x520] sm:$0xf] }
  0x89   : >> { %709 = vst [vmem:[%s17854_s24 + $0x510] sm:$0xf] %v708_v34  ;;  %711 = vst [vmem:[%s17854_s24 + $0x518] sm:$0xf] %v710_v35  ;;  %v714_v37 = vld [vmem:[%s17858_s21 + $0x524] sm:$0xf] }
  0x8a   : >> { %713 = vst [vmem:[%s17854_s24 + $0x520] sm:$0xf] %v712_v36  ;;  %v716_v38 = vld [vmem:[%s17858_s21 + $0x528] sm:$0xf]  ;;  %v718_v39 = vld [vmem:[%s17858_s21 + $0x52c] sm:$0xf] }
  0x8b   : >> { %715 = vst [vmem:[%s17854_s24 + $0x528] sm:$0xf] %v714_v37  ;;  %717 = vst [vmem:[%s17854_s24 + $0x530] sm:$0xf] %v716_v38  ;;  %v720_v40 = vld [vmem:[%s17858_s21 + $0x540] sm:$0xf] }
  0x8c   : >> { %719 = vst [vmem:[%s17854_s24 + $0x538] sm:$0xf] %v718_v39  ;;  %v722_v41 = vld [vmem:[%s17858_s21 + $0x544] sm:$0xf]  ;;  %v724_v42 = vld [vmem:[%s17858_s21 + $0x548] sm:$0xf] }
  0x8d   : >> { %721 = vst [vmem:[%s17854_s24 + $0x540] sm:$0xf] %v720_v40  ;;  %723 = vst [vmem:[%s17854_s24 + $0x548] sm:$0xf] %v722_v41  ;;  %v726_v43 = vld [vmem:[%s17858_s21 + $0x54c] sm:$0xf] }
  0x8e   : >> { %725 = vst [vmem:[%s17854_s24 + $0x550] sm:$0xf] %v724_v42  ;;  %v728_v44 = vld [vmem:[%s17858_s21 + $0x560] sm:$0xf]  ;;  %v730_v45 = vld [vmem:[%s17858_s21 + $0x564] sm:$0xf] }
  0x8f   : >> { %727 = vst [vmem:[%s17854_s24 + $0x558] sm:$0xf] %v726_v43  ;;  %729 = vst [vmem:[%s17854_s24 + $0x560] sm:$0xf] %v728_v44  ;;  %v732_v46 = vld [vmem:[%s17858_s21 + $0x568] sm:$0xf] }
  0x90   : >> { %731 = vst [vmem:[%s17854_s24 + $0x568] sm:$0xf] %v730_v45  ;;  %v734_v47 = vld [vmem:[%s17858_s21 + $0x56c] sm:$0xf]  ;;  %v736_v48 = vld [vmem:[%s17858_s21 + $0x580] sm:$0xf] }
  0x91   : >> { %733 = vst [vmem:[%s17854_s24 + $0x570] sm:$0xf] %v732_v46  ;;  %735 = vst [vmem:[%s17854_s24 + $0x578] sm:$0xf] %v734_v47  ;;  %v738_v49 = vld [vmem:[%s17858_s21 + $0x584] sm:$0xf] }
  0x92   : >> { %737 = vst [vmem:[%s17854_s24 + $0x580] sm:$0xf] %v736_v48  ;;  %v740_v50 = vld [vmem:[%s17858_s21 + $0x588] sm:$0xf]  ;;  %v742_v51 = vld [vmem:[%s17858_s21 + $0x58c] sm:$0xf] }
  0x93   : >> { %739 = vst [vmem:[%s17854_s24 + $0x588] sm:$0xf] %v738_v49  ;;  %741 = vst [vmem:[%s17854_s24 + $0x590] sm:$0xf] %v740_v50  ;;  %v744_v52 = vld [vmem:[%s17858_s21 + $0x5a0] sm:$0xf] }
  0x94   : >> { %743 = vst [vmem:[%s17854_s24 + $0x598] sm:$0xf] %v742_v51  ;;  %v746_v53 = vld [vmem:[%s17858_s21 + $0x5a4] sm:$0xf]  ;;  %v748_v54 = vld [vmem:[%s17858_s21 + $0x5a8] sm:$0xf] }
  0x95   : >> { %745 = vst [vmem:[%s17854_s24 + $0x5a0] sm:$0xf] %v744_v52  ;;  %747 = vst [vmem:[%s17854_s24 + $0x5a8] sm:$0xf] %v746_v53  ;;  %v750_v55 = vld [vmem:[%s17858_s21 + $0x5ac] sm:$0xf] }
  0x96   : >> { %749 = vst [vmem:[%s17854_s24 + $0x5b0] sm:$0xf] %v748_v54  ;;  %v752_v56 = vld [vmem:[%s17858_s21 + $0x5c0] sm:$0xf]  ;;  %v754_v57 = vld [vmem:[%s17858_s21 + $0x5c4] sm:$0xf] }
  0x97   : >> { %751 = vst [vmem:[%s17854_s24 + $0x5b8] sm:$0xf] %v750_v55  ;;  %753 = vst [vmem:[%s17854_s24 + $0x5c0] sm:$0xf] %v752_v56  ;;  %v756_v58 = vld [vmem:[%s17858_s21 + $0x5c8] sm:$0xf] }
  0x98   : >> { %755 = vst [vmem:[%s17854_s24 + $0x5c8] sm:$0xf] %v754_v57  ;;  %v758_v59 = vld [vmem:[%s17858_s21 + $0x5cc] sm:$0xf]  ;;  %v760_v60 = vld [vmem:[%s17858_s21 + $0x5e0] sm:$0xf] }
  0x99   : >> { %757 = vst [vmem:[%s17854_s24 + $0x5d0] sm:$0xf] %v756_v58  ;;  %759 = vst [vmem:[%s17854_s24 + $0x5d8] sm:$0xf] %v758_v59  ;;  %v762_v61 = vld [vmem:[%s17858_s21 + $0x5e4] sm:$0xf] }
  0x9a   : >> { %761 = vst [vmem:[%s17854_s24 + $0x5e0] sm:$0xf] %v760_v60  ;;  %v764_v62 = vld [vmem:[%s17858_s21 + $0x5e8] sm:$0xf]  ;;  %v766_v63 = vld [vmem:[%s17858_s21 + $0x5ec] sm:$0xf] }
  0x9b   : >> { %763 = vst [vmem:[%s17854_s24 + $0x5e8] sm:$0xf] %v762_v61  ;;  %765 = vst [vmem:[%s17854_s24 + $0x5f0] sm:$0xf] %v764_v62  ;;  %v768_v0 = vld [vmem:[%s17858_s21 + $0x600] sm:$0xf] }
  0x9c   : >> { %767 = vst [vmem:[%s17854_s24 + $0x5f8] sm:$0xf] %v766_v63  ;;  %v770_v1 = vld [vmem:[%s17858_s21 + $0x604] sm:$0xf]  ;;  %v772_v2 = vld [vmem:[%s17858_s21 + $0x608] sm:$0xf] }
  0x9d   : >> { %769 = vst [vmem:[%s17854_s24 + $0x600] sm:$0xf] %v768_v0  ;;  %771 = vst [vmem:[%s17854_s24 + $0x608] sm:$0xf] %v770_v1  ;;  %v774_v3 = vld [vmem:[%s17858_s21 + $0x60c] sm:$0xf] }
  0x9e   : >> { %773 = vst [vmem:[%s17854_s24 + $0x610] sm:$0xf] %v772_v2  ;;  %v776_v4 = vld [vmem:[%s17858_s21 + $0x620] sm:$0xf]  ;;  %v778_v5 = vld [vmem:[%s17858_s21 + $0x624] sm:$0xf] }
  0x9f   : >> { %775 = vst [vmem:[%s17854_s24 + $0x618] sm:$0xf] %v774_v3  ;;  %777 = vst [vmem:[%s17854_s24 + $0x620] sm:$0xf] %v776_v4  ;;  %v780_v6 = vld [vmem:[%s17858_s21 + $0x628] sm:$0xf] }
  0xa0   : >> { %779 = vst [vmem:[%s17854_s24 + $0x628] sm:$0xf] %v778_v5  ;;  %v782_v7 = vld [vmem:[%s17858_s21 + $0x62c] sm:$0xf]  ;;  %v784_v8 = vld [vmem:[%s17858_s21 + $0x640] sm:$0xf] }
  0xa1   : >> { %781 = vst [vmem:[%s17854_s24 + $0x630] sm:$0xf] %v780_v6  ;;  %783 = vst [vmem:[%s17854_s24 + $0x638] sm:$0xf] %v782_v7  ;;  %v786_v9 = vld [vmem:[%s17858_s21 + $0x644] sm:$0xf] }
  0xa2   : >> { %785 = vst [vmem:[%s17854_s24 + $0x640] sm:$0xf] %v784_v8  ;;  %v788_v10 = vld [vmem:[%s17858_s21 + $0x648] sm:$0xf]  ;;  %v790_v11 = vld [vmem:[%s17858_s21 + $0x64c] sm:$0xf] }
  0xa3   : >> { %787 = vst [vmem:[%s17854_s24 + $0x648] sm:$0xf] %v786_v9  ;;  %789 = vst [vmem:[%s17854_s24 + $0x650] sm:$0xf] %v788_v10  ;;  %v792_v12 = vld [vmem:[%s17858_s21 + $0x660] sm:$0xf] }
  0xa4   : >> { %791 = vst [vmem:[%s17854_s24 + $0x658] sm:$0xf] %v790_v11  ;;  %v794_v13 = vld [vmem:[%s17858_s21 + $0x664] sm:$0xf]  ;;  %v796_v14 = vld [vmem:[%s17858_s21 + $0x668] sm:$0xf] }
  0xa5   : >> { %793 = vst [vmem:[%s17854_s24 + $0x660] sm:$0xf] %v792_v12  ;;  %795 = vst [vmem:[%s17854_s24 + $0x668] sm:$0xf] %v794_v13  ;;  %v798_v15 = vld [vmem:[%s17858_s21 + $0x66c] sm:$0xf] }
  0xa6   : >> { %797 = vst [vmem:[%s17854_s24 + $0x670] sm:$0xf] %v796_v14  ;;  %v800_v16 = vld [vmem:[%s17858_s21 + $0x680] sm:$0xf]  ;;  %v802_v17 = vld [vmem:[%s17858_s21 + $0x684] sm:$0xf] }
  0xa7   : >> { %799 = vst [vmem:[%s17854_s24 + $0x678] sm:$0xf] %v798_v15  ;;  %801 = vst [vmem:[%s17854_s24 + $0x680] sm:$0xf] %v800_v16  ;;  %v804_v18 = vld [vmem:[%s17858_s21 + $0x688] sm:$0xf] }
  0xa8   : >> { %803 = vst [vmem:[%s17854_s24 + $0x688] sm:$0xf] %v802_v17  ;;  %v806_v19 = vld [vmem:[%s17858_s21 + $0x68c] sm:$0xf]  ;;  %v808_v20 = vld [vmem:[%s17858_s21 + $0x6a0] sm:$0xf] }
  0xa9   : >> { %805 = vst [vmem:[%s17854_s24 + $0x690] sm:$0xf] %v804_v18  ;;  %807 = vst [vmem:[%s17854_s24 + $0x698] sm:$0xf] %v806_v19  ;;  %v810_v21 = vld [vmem:[%s17858_s21 + $0x6a4] sm:$0xf] }
  0xaa   : >> { %809 = vst [vmem:[%s17854_s24 + $0x6a0] sm:$0xf] %v808_v20  ;;  %v812_v22 = vld [vmem:[%s17858_s21 + $0x6a8] sm:$0xf]  ;;  %v814_v23 = vld [vmem:[%s17858_s21 + $0x6ac] sm:$0xf] }
  0xab   : >> { %811 = vst [vmem:[%s17854_s24 + $0x6a8] sm:$0xf] %v810_v21  ;;  %813 = vst [vmem:[%s17854_s24 + $0x6b0] sm:$0xf] %v812_v22  ;;  %v816_v24 = vld [vmem:[%s17858_s21 + $0x6c0] sm:$0xf] }
  0xac   : >> { %815 = vst [vmem:[%s17854_s24 + $0x6b8] sm:$0xf] %v814_v23  ;;  %v818_v25 = vld [vmem:[%s17858_s21 + $0x6c4] sm:$0xf]  ;;  %v820_v26 = vld [vmem:[%s17858_s21 + $0x6c8] sm:$0xf] }
  0xad   : >> { %817 = vst [vmem:[%s17854_s24 + $0x6c0] sm:$0xf] %v816_v24  ;;  %819 = vst [vmem:[%s17854_s24 + $0x6c8] sm:$0xf] %v818_v25  ;;  %v822_v27 = vld [vmem:[%s17858_s21 + $0x6cc] sm:$0xf] }
  0xae   : >> { %821 = vst [vmem:[%s17854_s24 + $0x6d0] sm:$0xf] %v820_v26  ;;  %v824_v28 = vld [vmem:[%s17858_s21 + $0x6e0] sm:$0xf]  ;;  %v826_v29 = vld [vmem:[%s17858_s21 + $0x6e4] sm:$0xf] }
  0xaf   : >> { %823 = vst [vmem:[%s17854_s24 + $0x6d8] sm:$0xf] %v822_v27  ;;  %825 = vst [vmem:[%s17854_s24 + $0x6e0] sm:$0xf] %v824_v28  ;;  %v828_v30 = vld [vmem:[%s17858_s21 + $0x6e8] sm:$0xf] }
  0xb0   : >> { %827 = vst [vmem:[%s17854_s24 + $0x6e8] sm:$0xf] %v826_v29  ;;  %v830_v31 = vld [vmem:[%s17858_s21 + $0x6ec] sm:$0xf]  ;;  %v832_v32 = vld [vmem:[%s17858_s21 + $0x700] sm:$0xf] }
  0xb1   : >> { %829 = vst [vmem:[%s17854_s24 + $0x6f0] sm:$0xf] %v828_v30  ;;  %831 = vst [vmem:[%s17854_s24 + $0x6f8] sm:$0xf] %v830_v31  ;;  %v834_v33 = vld [vmem:[%s17858_s21 + $0x704] sm:$0xf] }
  0xb2   : >> { %833 = vst [vmem:[%s17854_s24 + $0x700] sm:$0xf] %v832_v32  ;;  %v836_v34 = vld [vmem:[%s17858_s21 + $0x708] sm:$0xf]  ;;  %v838_v35 = vld [vmem:[%s17858_s21 + $0x70c] sm:$0xf] }
  0xb3   : >> { %835 = vst [vmem:[%s17854_s24 + $0x708] sm:$0xf] %v834_v33  ;;  %837 = vst [vmem:[%s17854_s24 + $0x710] sm:$0xf] %v836_v34  ;;  %v840_v36 = vld [vmem:[%s17858_s21 + $0x720] sm:$0xf] }
  0xb4   : >> { %839 = vst [vmem:[%s17854_s24 + $0x718] sm:$0xf] %v838_v35  ;;  %v842_v37 = vld [vmem:[%s17858_s21 + $0x724] sm:$0xf]  ;;  %v844_v38 = vld [vmem:[%s17858_s21 + $0x728] sm:$0xf] }
  0xb5   : >> { %841 = vst [vmem:[%s17854_s24 + $0x720] sm:$0xf] %v840_v36  ;;  %843 = vst [vmem:[%s17854_s24 + $0x728] sm:$0xf] %v842_v37  ;;  %v846_v39 = vld [vmem:[%s17858_s21 + $0x72c] sm:$0xf] }
  0xb6   : >> { %845 = vst [vmem:[%s17854_s24 + $0x730] sm:$0xf] %v844_v38  ;;  %v848_v40 = vld [vmem:[%s17858_s21 + $0x740] sm:$0xf]  ;;  %v850_v41 = vld [vmem:[%s17858_s21 + $0x744] sm:$0xf] }
  0xb7   : >> { %847 = vst [vmem:[%s17854_s24 + $0x738] sm:$0xf] %v846_v39  ;;  %849 = vst [vmem:[%s17854_s24 + $0x740] sm:$0xf] %v848_v40  ;;  %v852_v42 = vld [vmem:[%s17858_s21 + $0x748] sm:$0xf] }
  0xb8   : >> { %851 = vst [vmem:[%s17854_s24 + $0x748] sm:$0xf] %v850_v41  ;;  %v854_v43 = vld [vmem:[%s17858_s21 + $0x74c] sm:$0xf]  ;;  %v856_v44 = vld [vmem:[%s17858_s21 + $0x760] sm:$0xf] }
  0xb9   : >> { %853 = vst [vmem:[%s17854_s24 + $0x750] sm:$0xf] %v852_v42  ;;  %855 = vst [vmem:[%s17854_s24 + $0x758] sm:$0xf] %v854_v43  ;;  %v858_v45 = vld [vmem:[%s17858_s21 + $0x764] sm:$0xf] }
  0xba   : >> { %857 = vst [vmem:[%s17854_s24 + $0x760] sm:$0xf] %v856_v44  ;;  %v860_v46 = vld [vmem:[%s17858_s21 + $0x768] sm:$0xf]  ;;  %v862_v47 = vld [vmem:[%s17858_s21 + $0x76c] sm:$0xf] }
  0xbb   : >> { %859 = vst [vmem:[%s17854_s24 + $0x768] sm:$0xf] %v858_v45  ;;  %861 = vst [vmem:[%s17854_s24 + $0x770] sm:$0xf] %v860_v46  ;;  %v864_v48 = vld [vmem:[%s17858_s21 + $0x780] sm:$0xf] }
  0xbc   : >> { %863 = vst [vmem:[%s17854_s24 + $0x778] sm:$0xf] %v862_v47  ;;  %v866_v49 = vld [vmem:[%s17858_s21 + $0x784] sm:$0xf]  ;;  %v868_v50 = vld [vmem:[%s17858_s21 + $0x788] sm:$0xf] }
  0xbd   : >> { %865 = vst [vmem:[%s17854_s24 + $0x780] sm:$0xf] %v864_v48  ;;  %867 = vst [vmem:[%s17854_s24 + $0x788] sm:$0xf] %v866_v49  ;;  %v870_v51 = vld [vmem:[%s17858_s21 + $0x78c] sm:$0xf] }
  0xbe   : >> { %869 = vst [vmem:[%s17854_s24 + $0x790] sm:$0xf] %v868_v50  ;;  %v872_v52 = vld [vmem:[%s17858_s21 + $0x7a0] sm:$0xf]  ;;  %v874_v53 = vld [vmem:[%s17858_s21 + $0x7a4] sm:$0xf] }
  0xbf   : >> { %871 = vst [vmem:[%s17854_s24 + $0x798] sm:$0xf] %v870_v51  ;;  %873 = vst [vmem:[%s17854_s24 + $0x7a0] sm:$0xf] %v872_v52  ;;  %v876_v54 = vld [vmem:[%s17858_s21 + $0x7a8] sm:$0xf] }
  0xc0   : >> { %875 = vst [vmem:[%s17854_s24 + $0x7a8] sm:$0xf] %v874_v53  ;;  %v878_v55 = vld [vmem:[%s17858_s21 + $0x7ac] sm:$0xf]  ;;  %v880_v56 = vld [vmem:[%s17858_s21 + $0x7c0] sm:$0xf] }
  0xc1   : >> { %877 = vst [vmem:[%s17854_s24 + $0x7b0] sm:$0xf] %v876_v54  ;;  %879 = vst [vmem:[%s17854_s24 + $0x7b8] sm:$0xf] %v878_v55  ;;  %v882_v57 = vld [vmem:[%s17858_s21 + $0x7c4] sm:$0xf] }
  0xc2   : >> { %881 = vst [vmem:[%s17854_s24 + $0x7c0] sm:$0xf] %v880_v56  ;;  %v884_v58 = vld [vmem:[%s17858_s21 + $0x7c8] sm:$0xf]  ;;  %v886_v59 = vld [vmem:[%s17858_s21 + $0x7cc] sm:$0xf] }
  0xc3   : >> { %883 = vst [vmem:[%s17854_s24 + $0x7c8] sm:$0xf] %v882_v57  ;;  %885 = vst [vmem:[%s17854_s24 + $0x7d0] sm:$0xf] %v884_v58  ;;  %v888_v60 = vld [vmem:[%s17858_s21 + $0x7e0] sm:$0xf] }
  0xc4   : >> { %887 = vst [vmem:[%s17854_s24 + $0x7d8] sm:$0xf] %v886_v59  ;;  %v890_v61 = vld [vmem:[%s17858_s21 + $0x7e4] sm:$0xf]  ;;  %v892_v62 = vld [vmem:[%s17858_s21 + $0x7e8] sm:$0xf] }
  0xc5   : >> { %889 = vst [vmem:[%s17854_s24 + $0x7e0] sm:$0xf] %v888_v60  ;;  %891 = vst [vmem:[%s17854_s24 + $0x7e8] sm:$0xf] %v890_v61  ;;  %v894_v63 = vld [vmem:[%s17858_s21 + $0x7ec] sm:$0xf] }
  0xc6   : >> { %893 = vst [vmem:[%s17854_s24 + $0x7f0] sm:$0xf] %v892_v62  ;;  %v896_v0 = vld [vmem:[%s17858_s21 + $0x800] sm:$0xf]  ;;  %v898_v1 = vld [vmem:[%s17858_s21 + $0x804] sm:$0xf] }
  0xc7   : >> { %895 = vst [vmem:[%s17854_s24 + $0x7f8] sm:$0xf] %v894_v63  ;;  %897 = vst [vmem:[%s17854_s24 + $0x800] sm:$0xf] %v896_v0  ;;  %v900_v2 = vld [vmem:[%s17858_s21 + $0x808] sm:$0xf] }
  0xc8   : >> { %899 = vst [vmem:[%s17854_s24 + $0x808] sm:$0xf] %v898_v1  ;;  %v902_v3 = vld [vmem:[%s17858_s21 + $0x80c] sm:$0xf]  ;;  %v904_v4 = vld [vmem:[%s17858_s21 + $0x820] sm:$0xf] }
  0xc9   : >> { %901 = vst [vmem:[%s17854_s24 + $0x810] sm:$0xf] %v900_v2  ;;  %903 = vst [vmem:[%s17854_s24 + $0x818] sm:$0xf] %v902_v3  ;;  %v906_v5 = vld [vmem:[%s17858_s21 + $0x824] sm:$0xf] }
  0xca   : >> { %905 = vst [vmem:[%s17854_s24 + $0x820] sm:$0xf] %v904_v4  ;;  %v908_v6 = vld [vmem:[%s17858_s21 + $0x828] sm:$0xf]  ;;  %v910_v7 = vld [vmem:[%s17858_s21 + $0x82c] sm:$0xf] }
  0xcb   : >> { %907 = vst [vmem:[%s17854_s24 + $0x828] sm:$0xf] %v906_v5  ;;  %909 = vst [vmem:[%s17854_s24 + $0x830] sm:$0xf] %v908_v6  ;;  %v912_v8 = vld [vmem:[%s17858_s21 + $0x840] sm:$0xf] }
  0xcc   : >> { %911 = vst [vmem:[%s17854_s24 + $0x838] sm:$0xf] %v910_v7  ;;  %v914_v9 = vld [vmem:[%s17858_s21 + $0x844] sm:$0xf]  ;;  %v916_v10 = vld [vmem:[%s17858_s21 + $0x848] sm:$0xf] }
  0xcd   : >> { %913 = vst [vmem:[%s17854_s24 + $0x840] sm:$0xf] %v912_v8  ;;  %915 = vst [vmem:[%s17854_s24 + $0x848] sm:$0xf] %v914_v9  ;;  %v918_v11 = vld [vmem:[%s17858_s21 + $0x84c] sm:$0xf] }
  0xce   : >> { %917 = vst [vmem:[%s17854_s24 + $0x850] sm:$0xf] %v916_v10  ;;  %v920_v12 = vld [vmem:[%s17858_s21 + $0x860] sm:$0xf]  ;;  %v922_v13 = vld [vmem:[%s17858_s21 + $0x864] sm:$0xf] }
  0xcf   : >> { %919 = vst [vmem:[%s17854_s24 + $0x858] sm:$0xf] %v918_v11  ;;  %921 = vst [vmem:[%s17854_s24 + $0x860] sm:$0xf] %v920_v12  ;;  %v924_v14 = vld [vmem:[%s17858_s21 + $0x868] sm:$0xf] }
  0xd0   : >> { %923 = vst [vmem:[%s17854_s24 + $0x868] sm:$0xf] %v922_v13  ;;  %v926_v15 = vld [vmem:[%s17858_s21 + $0x86c] sm:$0xf]  ;;  %v928_v16 = vld [vmem:[%s17858_s21 + $0x880] sm:$0xf] }
  0xd1   : >> { %925 = vst [vmem:[%s17854_s24 + $0x870] sm:$0xf] %v924_v14  ;;  %927 = vst [vmem:[%s17854_s24 + $0x878] sm:$0xf] %v926_v15  ;;  %v930_v17 = vld [vmem:[%s17858_s21 + $0x884] sm:$0xf] }
  0xd2   : >> { %929 = vst [vmem:[%s17854_s24 + $0x880] sm:$0xf] %v928_v16  ;;  %v932_v18 = vld [vmem:[%s17858_s21 + $0x888] sm:$0xf]  ;;  %v934_v19 = vld [vmem:[%s17858_s21 + $0x88c] sm:$0xf] }
  0xd3   : >> { %931 = vst [vmem:[%s17854_s24 + $0x888] sm:$0xf] %v930_v17  ;;  %933 = vst [vmem:[%s17854_s24 + $0x890] sm:$0xf] %v932_v18  ;;  %v936_v20 = vld [vmem:[%s17858_s21 + $0x8a0] sm:$0xf] }
  0xd4   : >> { %935 = vst [vmem:[%s17854_s24 + $0x898] sm:$0xf] %v934_v19  ;;  %v938_v21 = vld [vmem:[%s17858_s21 + $0x8a4] sm:$0xf]  ;;  %v940_v22 = vld [vmem:[%s17858_s21 + $0x8a8] sm:$0xf] }
  0xd5   : >> { %937 = vst [vmem:[%s17854_s24 + $0x8a0] sm:$0xf] %v936_v20  ;;  %939 = vst [vmem:[%s17854_s24 + $0x8a8] sm:$0xf] %v938_v21  ;;  %v942_v23 = vld [vmem:[%s17858_s21 + $0x8ac] sm:$0xf] }
  0xd6   : >> { %941 = vst [vmem:[%s17854_s24 + $0x8b0] sm:$0xf] %v940_v22  ;;  %v944_v24 = vld [vmem:[%s17858_s21 + $0x8c0] sm:$0xf]  ;;  %v946_v25 = vld [vmem:[%s17858_s21 + $0x8c4] sm:$0xf] }
  0xd7   : >> { %943 = vst [vmem:[%s17854_s24 + $0x8b8] sm:$0xf] %v942_v23  ;;  %945 = vst [vmem:[%s17854_s24 + $0x8c0] sm:$0xf] %v944_v24  ;;  %v948_v26 = vld [vmem:[%s17858_s21 + $0x8c8] sm:$0xf] }
  0xd8   : >> { %947 = vst [vmem:[%s17854_s24 + $0x8c8] sm:$0xf] %v946_v25  ;;  %v950_v27 = vld [vmem:[%s17858_s21 + $0x8cc] sm:$0xf]  ;;  %v952_v28 = vld [vmem:[%s17858_s21 + $0x8e0] sm:$0xf] }
  0xd9   : >> { %949 = vst [vmem:[%s17854_s24 + $0x8d0] sm:$0xf] %v948_v26  ;;  %951 = vst [vmem:[%s17854_s24 + $0x8d8] sm:$0xf] %v950_v27  ;;  %v954_v29 = vld [vmem:[%s17858_s21 + $0x8e4] sm:$0xf] }
  0xda   : >> { %953 = vst [vmem:[%s17854_s24 + $0x8e0] sm:$0xf] %v952_v28  ;;  %v956_v30 = vld [vmem:[%s17858_s21 + $0x8e8] sm:$0xf]  ;;  %v958_v31 = vld [vmem:[%s17858_s21 + $0x8ec] sm:$0xf] }
  0xdb   : >> { %955 = vst [vmem:[%s17854_s24 + $0x8e8] sm:$0xf] %v954_v29  ;;  %957 = vst [vmem:[%s17854_s24 + $0x8f0] sm:$0xf] %v956_v30  ;;  %v960_v32 = vld [vmem:[%s17858_s21 + $0x900] sm:$0xf] }
  0xdc   : >> { %959 = vst [vmem:[%s17854_s24 + $0x8f8] sm:$0xf] %v958_v31  ;;  %v962_v33 = vld [vmem:[%s17858_s21 + $0x904] sm:$0xf]  ;;  %v964_v34 = vld [vmem:[%s17858_s21 + $0x908] sm:$0xf] }
  0xdd   : >> { %961 = vst [vmem:[%s17854_s24 + $0x900] sm:$0xf] %v960_v32  ;;  %963 = vst [vmem:[%s17854_s24 + $0x908] sm:$0xf] %v962_v33  ;;  %v966_v35 = vld [vmem:[%s17858_s21 + $0x90c] sm:$0xf] }
  0xde   : >> { %965 = vst [vmem:[%s17854_s24 + $0x910] sm:$0xf] %v964_v34  ;;  %v968_v36 = vld [vmem:[%s17858_s21 + $0x920] sm:$0xf]  ;;  %v970_v37 = vld [vmem:[%s17858_s21 + $0x924] sm:$0xf] }
  0xdf   : >> { %967 = vst [vmem:[%s17854_s24 + $0x918] sm:$0xf] %v966_v35  ;;  %969 = vst [vmem:[%s17854_s24 + $0x920] sm:$0xf] %v968_v36  ;;  %v972_v38 = vld [vmem:[%s17858_s21 + $0x928] sm:$0xf] }
  0xe0   : >> { %971 = vst [vmem:[%s17854_s24 + $0x928] sm:$0xf] %v970_v37  ;;  %v974_v39 = vld [vmem:[%s17858_s21 + $0x92c] sm:$0xf]  ;;  %v976_v40 = vld [vmem:[%s17858_s21 + $0x940] sm:$0xf] }
  0xe1   : >> { %973 = vst [vmem:[%s17854_s24 + $0x930] sm:$0xf] %v972_v38  ;;  %975 = vst [vmem:[%s17854_s24 + $0x938] sm:$0xf] %v974_v39  ;;  %v978_v41 = vld [vmem:[%s17858_s21 + $0x944] sm:$0xf] }
  0xe2   : >> { %977 = vst [vmem:[%s17854_s24 + $0x940] sm:$0xf] %v976_v40  ;;  %v980_v42 = vld [vmem:[%s17858_s21 + $0x948] sm:$0xf]  ;;  %v982_v43 = vld [vmem:[%s17858_s21 + $0x94c] sm:$0xf] }
  0xe3   : >> { %979 = vst [vmem:[%s17854_s24 + $0x948] sm:$0xf] %v978_v41  ;;  %981 = vst [vmem:[%s17854_s24 + $0x950] sm:$0xf] %v980_v42  ;;  %v984_v44 = vld [vmem:[%s17858_s21 + $0x960] sm:$0xf] }
  0xe4   : >> { %983 = vst [vmem:[%s17854_s24 + $0x958] sm:$0xf] %v982_v43  ;;  %v986_v45 = vld [vmem:[%s17858_s21 + $0x964] sm:$0xf]  ;;  %v988_v46 = vld [vmem:[%s17858_s21 + $0x968] sm:$0xf] }
  0xe5   : >> { %985 = vst [vmem:[%s17854_s24 + $0x960] sm:$0xf] %v984_v44  ;;  %987 = vst [vmem:[%s17854_s24 + $0x968] sm:$0xf] %v986_v45  ;;  %v990_v47 = vld [vmem:[%s17858_s21 + $0x96c] sm:$0xf] }
  0xe6   : >> { %989 = vst [vmem:[%s17854_s24 + $0x970] sm:$0xf] %v988_v46  ;;  %v992_v48 = vld [vmem:[%s17858_s21 + $0x980] sm:$0xf]  ;;  %v994_v49 = vld [vmem:[%s17858_s21 + $0x984] sm:$0xf] }
  0xe7   : >> { %991 = vst [vmem:[%s17854_s24 + $0x978] sm:$0xf] %v990_v47  ;;  %993 = vst [vmem:[%s17854_s24 + $0x980] sm:$0xf] %v992_v48  ;;  %v996_v50 = vld [vmem:[%s17858_s21 + $0x988] sm:$0xf] }
  0xe8   : >> { %995 = vst [vmem:[%s17854_s24 + $0x988] sm:$0xf] %v994_v49  ;;  %v998_v51 = vld [vmem:[%s17858_s21 + $0x98c] sm:$0xf]  ;;  %v1000_v52 = vld [vmem:[%s17858_s21 + $0x9a0] sm:$0xf] }
  0xe9   : >> { %997 = vst [vmem:[%s17854_s24 + $0x990] sm:$0xf] %v996_v50  ;;  %999 = vst [vmem:[%s17854_s24 + $0x998] sm:$0xf] %v998_v51  ;;  %v1002_v53 = vld [vmem:[%s17858_s21 + $0x9a4] sm:$0xf] }
  0xea   : >> { %1001 = vst [vmem:[%s17854_s24 + $0x9a0] sm:$0xf] %v1000_v52  ;;  %v1004_v54 = vld [vmem:[%s17858_s21 + $0x9a8] sm:$0xf]  ;;  %v1006_v55 = vld [vmem:[%s17858_s21 + $0x9ac] sm:$0xf] }
  0xeb   : >> { %1003 = vst [vmem:[%s17854_s24 + $0x9a8] sm:$0xf] %v1002_v53  ;;  %1005 = vst [vmem:[%s17854_s24 + $0x9b0] sm:$0xf] %v1004_v54  ;;  %v1008_v56 = vld [vmem:[%s17858_s21 + $0x9c0] sm:$0xf] }
  0xec   : >> { %1007 = vst [vmem:[%s17854_s24 + $0x9b8] sm:$0xf] %v1006_v55  ;;  %v1010_v57 = vld [vmem:[%s17858_s21 + $0x9c4] sm:$0xf]  ;;  %v1012_v58 = vld [vmem:[%s17858_s21 + $0x9c8] sm:$0xf] }
  0xed   : >> { %1009 = vst [vmem:[%s17854_s24 + $0x9c0] sm:$0xf] %v1008_v56  ;;  %1011 = vst [vmem:[%s17854_s24 + $0x9c8] sm:$0xf] %v1010_v57  ;;  %v1014_v59 = vld [vmem:[%s17858_s21 + $0x9cc] sm:$0xf] }
  0xee   : >> { %1013 = vst [vmem:[%s17854_s24 + $0x9d0] sm:$0xf] %v1012_v58  ;;  %v1016_v60 = vld [vmem:[%s17858_s21 + $0x9e0] sm:$0xf]  ;;  %v1018_v61 = vld [vmem:[%s17858_s21 + $0x9e4] sm:$0xf] }
  0xef   : >> { %1015 = vst [vmem:[%s17854_s24 + $0x9d8] sm:$0xf] %v1014_v59  ;;  %1017 = vst [vmem:[%s17854_s24 + $0x9e0] sm:$0xf] %v1016_v60  ;;  %v1020_v62 = vld [vmem:[%s17858_s21 + $0x9e8] sm:$0xf] }
  0xf0   : >> { %1019 = vst [vmem:[%s17854_s24 + $0x9e8] sm:$0xf] %v1018_v61  ;;  %v1022_v63 = vld [vmem:[%s17858_s21 + $0x9ec] sm:$0xf]  ;;  %v1024_v0 = vld [vmem:[%s17858_s21 + $0xa00] sm:$0xf] }
  0xf1   : >> { %1021 = vst [vmem:[%s17854_s24 + $0x9f0] sm:$0xf] %v1020_v62  ;;  %1023 = vst [vmem:[%s17854_s24 + $0x9f8] sm:$0xf] %v1022_v63  ;;  %v1026_v1 = vld [vmem:[%s17858_s21 + $0xa04] sm:$0xf] }
  0xf2   : >> { %1025 = vst [vmem:[%s17854_s24 + $0xa00] sm:$0xf] %v1024_v0  ;;  %v1028_v2 = vld [vmem:[%s17858_s21 + $0xa08] sm:$0xf]  ;;  %v1030_v3 = vld [vmem:[%s17858_s21 + $0xa0c] sm:$0xf] }
  0xf3   : >> { %1027 = vst [vmem:[%s17854_s24 + $0xa08] sm:$0xf] %v1026_v1  ;;  %1029 = vst [vmem:[%s17854_s24 + $0xa10] sm:$0xf] %v1028_v2  ;;  %v1032_v4 = vld [vmem:[%s17858_s21 + $0xa20] sm:$0xf] }
  0xf4   : >> { %1031 = vst [vmem:[%s17854_s24 + $0xa18] sm:$0xf] %v1030_v3  ;;  %v1034_v5 = vld [vmem:[%s17858_s21 + $0xa24] sm:$0xf]  ;;  %v1036_v6 = vld [vmem:[%s17858_s21 + $0xa28] sm:$0xf] }
  0xf5   : >> { %1033 = vst [vmem:[%s17854_s24 + $0xa20] sm:$0xf] %v1032_v4  ;;  %1035 = vst [vmem:[%s17854_s24 + $0xa28] sm:$0xf] %v1034_v5  ;;  %v1038_v7 = vld [vmem:[%s17858_s21 + $0xa2c] sm:$0xf] }
  0xf6   : >> { %1037 = vst [vmem:[%s17854_s24 + $0xa30] sm:$0xf] %v1036_v6  ;;  %v1040_v8 = vld [vmem:[%s17858_s21 + $0xa40] sm:$0xf]  ;;  %v1042_v9 = vld [vmem:[%s17858_s21 + $0xa44] sm:$0xf] }
  0xf7   : >> { %1039 = vst [vmem:[%s17854_s24 + $0xa38] sm:$0xf] %v1038_v7  ;;  %1041 = vst [vmem:[%s17854_s24 + $0xa40] sm:$0xf] %v1040_v8  ;;  %v1044_v10 = vld [vmem:[%s17858_s21 + $0xa48] sm:$0xf] }
  0xf8   : >> { %1043 = vst [vmem:[%s17854_s24 + $0xa48] sm:$0xf] %v1042_v9  ;;  %v1046_v11 = vld [vmem:[%s17858_s21 + $0xa4c] sm:$0xf]  ;;  %v1048_v12 = vld [vmem:[%s17858_s21 + $0xa60] sm:$0xf] }
  0xf9   : >> { %1045 = vst [vmem:[%s17854_s24 + $0xa50] sm:$0xf] %v1044_v10  ;;  %1047 = vst [vmem:[%s17854_s24 + $0xa58] sm:$0xf] %v1046_v11  ;;  %v1050_v13 = vld [vmem:[%s17858_s21 + $0xa64] sm:$0xf] }
  0xfa   : >> { %1049 = vst [vmem:[%s17854_s24 + $0xa60] sm:$0xf] %v1048_v12  ;;  %v1052_v14 = vld [vmem:[%s17858_s21 + $0xa68] sm:$0xf]  ;;  %v1054_v15 = vld [vmem:[%s17858_s21 + $0xa6c] sm:$0xf] }
  0xfb   : >> { %1051 = vst [vmem:[%s17854_s24 + $0xa68] sm:$0xf] %v1050_v13  ;;  %1053 = vst [vmem:[%s17854_s24 + $0xa70] sm:$0xf] %v1052_v14  ;;  %v1056_v16 = vld [vmem:[%s17858_s21 + $0xa80] sm:$0xf] }
  0xfc   : >> { %1055 = vst [vmem:[%s17854_s24 + $0xa78] sm:$0xf] %v1054_v15  ;;  %v1058_v17 = vld [vmem:[%s17858_s21 + $0xa84] sm:$0xf]  ;;  %v1060_v18 = vld [vmem:[%s17858_s21 + $0xa88] sm:$0xf] }
  0xfd   : >> { %1057 = vst [vmem:[%s17854_s24 + $0xa80] sm:$0xf] %v1056_v16  ;;  %1059 = vst [vmem:[%s17854_s24 + $0xa88] sm:$0xf] %v1058_v17  ;;  %v1062_v19 = vld [vmem:[%s17858_s21 + $0xa8c] sm:$0xf] }
  0xfe   : >> { %1061 = vst [vmem:[%s17854_s24 + $0xa90] sm:$0xf] %v1060_v18  ;;  %v1064_v20 = vld [vmem:[%s17858_s21 + $0xaa0] sm:$0xf]  ;;  %v1066_v21 = vld [vmem:[%s17858_s21 + $0xaa4] sm:$0xf] }
  0xff   : >> { %1063 = vst [vmem:[%s17854_s24 + $0xa98] sm:$0xf] %v1062_v19  ;;  %1065 = vst [vmem:[%s17854_s24 + $0xaa0] sm:$0xf] %v1064_v20  ;;  %v1068_v22 = vld [vmem:[%s17858_s21 + $0xaa8] sm:$0xf] }
 0x100   : >> { %1067 = vst [vmem:[%s17854_s24 + $0xaa8] sm:$0xf] %v1066_v21  ;;  %v1070_v23 = vld [vmem:[%s17858_s21 + $0xaac] sm:$0xf]  ;;  %v1072_v24 = vld [vmem:[%s17858_s21 + $0xac0] sm:$0xf] }
 0x101   : >> { %1069 = vst [vmem:[%s17854_s24 + $0xab0] sm:$0xf] %v1068_v22  ;;  %1071 = vst [vmem:[%s17854_s24 + $0xab8] sm:$0xf] %v1070_v23  ;;  %v1074_v25 = vld [vmem:[%s17858_s21 + $0xac4] sm:$0xf] }
 0x102   : >> { %1073 = vst [vmem:[%s17854_s24 + $0xac0] sm:$0xf] %v1072_v24  ;;  %v1076_v26 = vld [vmem:[%s17858_s21 + $0xac8] sm:$0xf]  ;;  %v1078_v27 = vld [vmem:[%s17858_s21 + $0xacc] sm:$0xf] }
 0x103   : >> { %1075 = vst [vmem:[%s17854_s24 + $0xac8] sm:$0xf] %v1074_v25  ;;  %1077 = vst [vmem:[%s17854_s24 + $0xad0] sm:$0xf] %v1076_v26  ;;  %v1080_v28 = vld [vmem:[%s17858_s21 + $0xae0] sm:$0xf] }
 0x104   : >> { %1079 = vst [vmem:[%s17854_s24 + $0xad8] sm:$0xf] %v1078_v27  ;;  %v1082_v29 = vld [vmem:[%s17858_s21 + $0xae4] sm:$0xf]  ;;  %v1084_v30 = vld [vmem:[%s17858_s21 + $0xae8] sm:$0xf] }
 0x105   : >> { %1081 = vst [vmem:[%s17854_s24 + $0xae0] sm:$0xf] %v1080_v28  ;;  %1083 = vst [vmem:[%s17854_s24 + $0xae8] sm:$0xf] %v1082_v29  ;;  %v1086_v31 = vld [vmem:[%s17858_s21 + $0xaec] sm:$0xf] }
 0x106   : >> { %1085 = vst [vmem:[%s17854_s24 + $0xaf0] sm:$0xf] %v1084_v30  ;;  %v1088_v32 = vld [vmem:[%s17858_s21 + $0xb00] sm:$0xf]  ;;  %v1090_v33 = vld [vmem:[%s17858_s21 + $0xb04] sm:$0xf] }
 0x107   : >> { %1087 = vst [vmem:[%s17854_s24 + $0xaf8] sm:$0xf] %v1086_v31  ;;  %1089 = vst [vmem:[%s17854_s24 + $0xb00] sm:$0xf] %v1088_v32  ;;  %v1092_v34 = vld [vmem:[%s17858_s21 + $0xb08] sm:$0xf] }
 0x108   : >> { %1091 = vst [vmem:[%s17854_s24 + $0xb08] sm:$0xf] %v1090_v33  ;;  %v1094_v35 = vld [vmem:[%s17858_s21 + $0xb0c] sm:$0xf]  ;;  %v1096_v36 = vld [vmem:[%s17858_s21 + $0xb20] sm:$0xf] }
 0x109   : >> { %1093 = vst [vmem:[%s17854_s24 + $0xb10] sm:$0xf] %v1092_v34  ;;  %1095 = vst [vmem:[%s17854_s24 + $0xb18] sm:$0xf] %v1094_v35  ;;  %v1098_v37 = vld [vmem:[%s17858_s21 + $0xb24] sm:$0xf] }
 0x10a   : >> { %1097 = vst [vmem:[%s17854_s24 + $0xb20] sm:$0xf] %v1096_v36  ;;  %v1100_v38 = vld [vmem:[%s17858_s21 + $0xb28] sm:$0xf]  ;;  %v1102_v39 = vld [vmem:[%s17858_s21 + $0xb2c] sm:$0xf] }
 0x10b   : >> { %1099 = vst [vmem:[%s17854_s24 + $0xb28] sm:$0xf] %v1098_v37  ;;  %1101 = vst [vmem:[%s17854_s24 + $0xb30] sm:$0xf] %v1100_v38  ;;  %v1104_v40 = vld [vmem:[%s17858_s21 + $0xb40] sm:$0xf] }
 0x10c   : >> { %1103 = vst [vmem:[%s17854_s24 + $0xb38] sm:$0xf] %v1102_v39  ;;  %v1106_v41 = vld [vmem:[%s17858_s21 + $0xb44] sm:$0xf]  ;;  %v1108_v42 = vld [vmem:[%s17858_s21 + $0xb48] sm:$0xf] }
 0x10d   : >> { %1105 = vst [vmem:[%s17854_s24 + $0xb40] sm:$0xf] %v1104_v40  ;;  %1107 = vst [vmem:[%s17854_s24 + $0xb48] sm:$0xf] %v1106_v41  ;;  %v1110_v43 = vld [vmem:[%s17858_s21 + $0xb4c] sm:$0xf] }
 0x10e   : >> { %1109 = vst [vmem:[%s17854_s24 + $0xb50] sm:$0xf] %v1108_v42  ;;  %v1112_v44 = vld [vmem:[%s17858_s21 + $0xb60] sm:$0xf]  ;;  %v1114_v45 = vld [vmem:[%s17858_s21 + $0xb64] sm:$0xf] }
 0x10f   : >> { %1111 = vst [vmem:[%s17854_s24 + $0xb58] sm:$0xf] %v1110_v43  ;;  %1113 = vst [vmem:[%s17854_s24 + $0xb60] sm:$0xf] %v1112_v44  ;;  %v1116_v46 = vld [vmem:[%s17858_s21 + $0xb68] sm:$0xf] }
 0x110   : >> { %1115 = vst [vmem:[%s17854_s24 + $0xb68] sm:$0xf] %v1114_v45  ;;  %v1118_v47 = vld [vmem:[%s17858_s21 + $0xb6c] sm:$0xf]  ;;  %v1120_v48 = vld [vmem:[%s17858_s21 + $0xb80] sm:$0xf] }
 0x111   : >> { %1117 = vst [vmem:[%s17854_s24 + $0xb70] sm:$0xf] %v1116_v46  ;;  %1119 = vst [vmem:[%s17854_s24 + $0xb78] sm:$0xf] %v1118_v47  ;;  %v1122_v49 = vld [vmem:[%s17858_s21 + $0xb84] sm:$0xf] }
 0x112   : >> { %1121 = vst [vmem:[%s17854_s24 + $0xb80] sm:$0xf] %v1120_v48  ;;  %v1124_v50 = vld [vmem:[%s17858_s21 + $0xb88] sm:$0xf]  ;;  %v1126_v51 = vld [vmem:[%s17858_s21 + $0xb8c] sm:$0xf] }
 0x113   : >> { %1123 = vst [vmem:[%s17854_s24 + $0xb88] sm:$0xf] %v1122_v49  ;;  %1125 = vst [vmem:[%s17854_s24 + $0xb90] sm:$0xf] %v1124_v50  ;;  %v1128_v52 = vld [vmem:[%s17858_s21 + $0xba0] sm:$0xf] }
 0x114   : >> { %1127 = vst [vmem:[%s17854_s24 + $0xb98] sm:$0xf] %v1126_v51  ;;  %v1130_v53 = vld [vmem:[%s17858_s21 + $0xba4] sm:$0xf]  ;;  %v1132_v54 = vld [vmem:[%s17858_s21 + $0xba8] sm:$0xf] }
 0x115   : >> { %1129 = vst [vmem:[%s17854_s24 + $0xba0] sm:$0xf] %v1128_v52  ;;  %1131 = vst [vmem:[%s17854_s24 + $0xba8] sm:$0xf] %v1130_v53  ;;  %v1134_v55 = vld [vmem:[%s17858_s21 + $0xbac] sm:$0xf] }
 0x116   : >> { %1133 = vst [vmem:[%s17854_s24 + $0xbb0] sm:$0xf] %v1132_v54  ;;  %v1136_v56 = vld [vmem:[%s17858_s21 + $0xbc0] sm:$0xf]  ;;  %v1138_v57 = vld [vmem:[%s17858_s21 + $0xbc4] sm:$0xf] }
 0x117   : >> { %1135 = vst [vmem:[%s17854_s24 + $0xbb8] sm:$0xf] %v1134_v55  ;;  %1137 = vst [vmem:[%s17854_s24 + $0xbc0] sm:$0xf] %v1136_v56  ;;  %v1140_v58 = vld [vmem:[%s17858_s21 + $0xbc8] sm:$0xf] }
 0x118   : >> { %1139 = vst [vmem:[%s17854_s24 + $0xbc8] sm:$0xf] %v1138_v57  ;;  %v1142_v59 = vld [vmem:[%s17858_s21 + $0xbcc] sm:$0xf]  ;;  %v1144_v60 = vld [vmem:[%s17858_s21 + $0xbe0] sm:$0xf] }
 0x119   : >> { %1141 = vst [vmem:[%s17854_s24 + $0xbd0] sm:$0xf] %v1140_v58  ;;  %1143 = vst [vmem:[%s17854_s24 + $0xbd8] sm:$0xf] %v1142_v59  ;;  %v1146_v61 = vld [vmem:[%s17858_s21 + $0xbe4] sm:$0xf] }
 0x11a   : >> { %1145 = vst [vmem:[%s17854_s24 + $0xbe0] sm:$0xf] %v1144_v60  ;;  %v1148_v62 = vld [vmem:[%s17858_s21 + $0xbe8] sm:$0xf]  ;;  %v1150_v63 = vld [vmem:[%s17858_s21 + $0xbec] sm:$0xf] }
 0x11b   : >> { %1147 = vst [vmem:[%s17854_s24 + $0xbe8] sm:$0xf] %v1146_v61  ;;  %1149 = vst [vmem:[%s17854_s24 + $0xbf0] sm:$0xf] %v1148_v62  ;;  %v1152_v0 = vld [vmem:[%s17858_s21 + $0xc00] sm:$0xf] }
 0x11c   : >> { %1151 = vst [vmem:[%s17854_s24 + $0xbf8] sm:$0xf] %v1150_v63  ;;  %v1154_v1 = vld [vmem:[%s17858_s21 + $0xc04] sm:$0xf]  ;;  %v1156_v2 = vld [vmem:[%s17858_s21 + $0xc08] sm:$0xf] }
 0x11d   : >> { %1153 = vst [vmem:[%s17854_s24 + $0xc00] sm:$0xf] %v1152_v0  ;;  %1155 = vst [vmem:[%s17854_s24 + $0xc08] sm:$0xf] %v1154_v1  ;;  %v1158_v3 = vld [vmem:[%s17858_s21 + $0xc0c] sm:$0xf] }
 0x11e   : >> { %1157 = vst [vmem:[%s17854_s24 + $0xc10] sm:$0xf] %v1156_v2  ;;  %v1160_v4 = vld [vmem:[%s17858_s21 + $0xc20] sm:$0xf]  ;;  %v1162_v5 = vld [vmem:[%s17858_s21 + $0xc24] sm:$0xf] }
 0x11f   : >> { %1159 = vst [vmem:[%s17854_s24 + $0xc18] sm:$0xf] %v1158_v3  ;;  %1161 = vst [vmem:[%s17854_s24 + $0xc20] sm:$0xf] %v1160_v4  ;;  %v1164_v6 = vld [vmem:[%s17858_s21 + $0xc28] sm:$0xf] }
 0x120   : >> { %1163 = vst [vmem:[%s17854_s24 + $0xc28] sm:$0xf] %v1162_v5  ;;  %v1166_v7 = vld [vmem:[%s17858_s21 + $0xc2c] sm:$0xf]  ;;  %v1168_v8 = vld [vmem:[%s17858_s21 + $0xc40] sm:$0xf] }
 0x121   : >> { %1165 = vst [vmem:[%s17854_s24 + $0xc30] sm:$0xf] %v1164_v6  ;;  %1167 = vst [vmem:[%s17854_s24 + $0xc38] sm:$0xf] %v1166_v7  ;;  %v1170_v9 = vld [vmem:[%s17858_s21 + $0xc44] sm:$0xf] }
 0x122   : >> { %1169 = vst [vmem:[%s17854_s24 + $0xc40] sm:$0xf] %v1168_v8  ;;  %v1172_v10 = vld [vmem:[%s17858_s21 + $0xc48] sm:$0xf]  ;;  %v1174_v11 = vld [vmem:[%s17858_s21 + $0xc4c] sm:$0xf] }
 0x123   : >> { %1171 = vst [vmem:[%s17854_s24 + $0xc48] sm:$0xf] %v1170_v9  ;;  %1173 = vst [vmem:[%s17854_s24 + $0xc50] sm:$0xf] %v1172_v10  ;;  %v1176_v12 = vld [vmem:[%s17858_s21 + $0xc60] sm:$0xf] }
 0x124   : >> { %1175 = vst [vmem:[%s17854_s24 + $0xc58] sm:$0xf] %v1174_v11  ;;  %v1178_v13 = vld [vmem:[%s17858_s21 + $0xc64] sm:$0xf]  ;;  %v1180_v14 = vld [vmem:[%s17858_s21 + $0xc68] sm:$0xf] }
 0x125   : >> { %1177 = vst [vmem:[%s17854_s24 + $0xc60] sm:$0xf] %v1176_v12  ;;  %1179 = vst [vmem:[%s17854_s24 + $0xc68] sm:$0xf] %v1178_v13  ;;  %v1182_v15 = vld [vmem:[%s17858_s21 + $0xc6c] sm:$0xf] }
 0x126   : >> { %1181 = vst [vmem:[%s17854_s24 + $0xc70] sm:$0xf] %v1180_v14  ;;  %v1184_v16 = vld [vmem:[%s17858_s21 + $0xc80] sm:$0xf]  ;;  %v1186_v17 = vld [vmem:[%s17858_s21 + $0xc84] sm:$0xf] }
 0x127   : >> { %1183 = vst [vmem:[%s17854_s24 + $0xc78] sm:$0xf] %v1182_v15  ;;  %1185 = vst [vmem:[%s17854_s24 + $0xc80] sm:$0xf] %v1184_v16  ;;  %v1188_v18 = vld [vmem:[%s17858_s21 + $0xc88] sm:$0xf] }
 0x128   : >> { %1187 = vst [vmem:[%s17854_s24 + $0xc88] sm:$0xf] %v1186_v17  ;;  %v1190_v19 = vld [vmem:[%s17858_s21 + $0xc8c] sm:$0xf]  ;;  %v1192_v20 = vld [vmem:[%s17858_s21 + $0xca0] sm:$0xf] }
 0x129   : >> { %1189 = vst [vmem:[%s17854_s24 + $0xc90] sm:$0xf] %v1188_v18  ;;  %1191 = vst [vmem:[%s17854_s24 + $0xc98] sm:$0xf] %v1190_v19  ;;  %v1194_v21 = vld [vmem:[%s17858_s21 + $0xca4] sm:$0xf] }
 0x12a   : >> { %1193 = vst [vmem:[%s17854_s24 + $0xca0] sm:$0xf] %v1192_v20  ;;  %v1196_v22 = vld [vmem:[%s17858_s21 + $0xca8] sm:$0xf]  ;;  %v1198_v23 = vld [vmem:[%s17858_s21 + $0xcac] sm:$0xf] }
 0x12b   : >> { %1195 = vst [vmem:[%s17854_s24 + $0xca8] sm:$0xf] %v1194_v21  ;;  %1197 = vst [vmem:[%s17854_s24 + $0xcb0] sm:$0xf] %v1196_v22  ;;  %v1200_v24 = vld [vmem:[%s17858_s21 + $0xcc0] sm:$0xf] }
 0x12c   : >> { %1199 = vst [vmem:[%s17854_s24 + $0xcb8] sm:$0xf] %v1198_v23  ;;  %v1202_v25 = vld [vmem:[%s17858_s21 + $0xcc4] sm:$0xf]  ;;  %v1204_v26 = vld [vmem:[%s17858_s21 + $0xcc8] sm:$0xf] }
 0x12d   : >> { %1201 = vst [vmem:[%s17854_s24 + $0xcc0] sm:$0xf] %v1200_v24  ;;  %1203 = vst [vmem:[%s17854_s24 + $0xcc8] sm:$0xf] %v1202_v25  ;;  %v1206_v27 = vld [vmem:[%s17858_s21 + $0xccc] sm:$0xf] }
 0x12e   : >> { %1205 = vst [vmem:[%s17854_s24 + $0xcd0] sm:$0xf] %v1204_v26  ;;  %v1208_v28 = vld [vmem:[%s17858_s21 + $0xce0] sm:$0xf]  ;;  %v1210_v29 = vld [vmem:[%s17858_s21 + $0xce4] sm:$0xf] }
 0x12f   : >> { %1207 = vst [vmem:[%s17854_s24 + $0xcd8] sm:$0xf] %v1206_v27  ;;  %1209 = vst [vmem:[%s17854_s24 + $0xce0] sm:$0xf] %v1208_v28  ;;  %v1212_v30 = vld [vmem:[%s17858_s21 + $0xce8] sm:$0xf] }
 0x130   : >> { %1211 = vst [vmem:[%s17854_s24 + $0xce8] sm:$0xf] %v1210_v29  ;;  %v1214_v31 = vld [vmem:[%s17858_s21 + $0xcec] sm:$0xf]  ;;  %v1216_v32 = vld [vmem:[%s17858_s21 + $0xd00] sm:$0xf] }
 0x131   : >> { %1213 = vst [vmem:[%s17854_s24 + $0xcf0] sm:$0xf] %v1212_v30  ;;  %1215 = vst [vmem:[%s17854_s24 + $0xcf8] sm:$0xf] %v1214_v31  ;;  %v1218_v33 = vld [vmem:[%s17858_s21 + $0xd04] sm:$0xf] }
 0x132   : >> { %1217 = vst [vmem:[%s17854_s24 + $0xd00] sm:$0xf] %v1216_v32  ;;  %v1220_v34 = vld [vmem:[%s17858_s21 + $0xd08] sm:$0xf]  ;;  %v1222_v35 = vld [vmem:[%s17858_s21 + $0xd0c] sm:$0xf] }
 0x133   : >> { %1219 = vst [vmem:[%s17854_s24 + $0xd08] sm:$0xf] %v1218_v33  ;;  %1221 = vst [vmem:[%s17854_s24 + $0xd10] sm:$0xf] %v1220_v34  ;;  %v1224_v36 = vld [vmem:[%s17858_s21 + $0xd20] sm:$0xf] }
 0x134   : >> { %1223 = vst [vmem:[%s17854_s24 + $0xd18] sm:$0xf] %v1222_v35  ;;  %v1226_v37 = vld [vmem:[%s17858_s21 + $0xd24] sm:$0xf]  ;;  %v1228_v38 = vld [vmem:[%s17858_s21 + $0xd28] sm:$0xf] }
 0x135   : >> { %1225 = vst [vmem:[%s17854_s24 + $0xd20] sm:$0xf] %v1224_v36  ;;  %1227 = vst [vmem:[%s17854_s24 + $0xd28] sm:$0xf] %v1226_v37  ;;  %v1230_v39 = vld [vmem:[%s17858_s21 + $0xd2c] sm:$0xf] }
 0x136   : >> { %1229 = vst [vmem:[%s17854_s24 + $0xd30] sm:$0xf] %v1228_v38  ;;  %v1232_v40 = vld [vmem:[%s17858_s21 + $0xd40] sm:$0xf]  ;;  %v1234_v41 = vld [vmem:[%s17858_s21 + $0xd44] sm:$0xf] }
 0x137   : >> { %1231 = vst [vmem:[%s17854_s24 + $0xd38] sm:$0xf] %v1230_v39  ;;  %1233 = vst [vmem:[%s17854_s24 + $0xd40] sm:$0xf] %v1232_v40  ;;  %v1236_v42 = vld [vmem:[%s17858_s21 + $0xd48] sm:$0xf] }
 0x138   : >> { %1235 = vst [vmem:[%s17854_s24 + $0xd48] sm:$0xf] %v1234_v41  ;;  %v1238_v43 = vld [vmem:[%s17858_s21 + $0xd4c] sm:$0xf]  ;;  %v1240_v44 = vld [vmem:[%s17858_s21 + $0xd60] sm:$0xf] }
 0x139   : >> { %1237 = vst [vmem:[%s17854_s24 + $0xd50] sm:$0xf] %v1236_v42  ;;  %1239 = vst [vmem:[%s17854_s24 + $0xd58] sm:$0xf] %v1238_v43  ;;  %v1242_v45 = vld [vmem:[%s17858_s21 + $0xd64] sm:$0xf] }
 0x13a   : >> { %1241 = vst [vmem:[%s17854_s24 + $0xd60] sm:$0xf] %v1240_v44  ;;  %v1244_v46 = vld [vmem:[%s17858_s21 + $0xd68] sm:$0xf]  ;;  %v1246_v47 = vld [vmem:[%s17858_s21 + $0xd6c] sm:$0xf] }
 0x13b   : >> { %1243 = vst [vmem:[%s17854_s24 + $0xd68] sm:$0xf] %v1242_v45  ;;  %1245 = vst [vmem:[%s17854_s24 + $0xd70] sm:$0xf] %v1244_v46  ;;  %v1248_v48 = vld [vmem:[%s17858_s21 + $0xd80] sm:$0xf] }
 0x13c   : >> { %1247 = vst [vmem:[%s17854_s24 + $0xd78] sm:$0xf] %v1246_v47  ;;  %v1250_v49 = vld [vmem:[%s17858_s21 + $0xd84] sm:$0xf]  ;;  %v1252_v50 = vld [vmem:[%s17858_s21 + $0xd88] sm:$0xf] }
 0x13d   : >> { %1249 = vst [vmem:[%s17854_s24 + $0xd80] sm:$0xf] %v1248_v48  ;;  %1251 = vst [vmem:[%s17854_s24 + $0xd88] sm:$0xf] %v1250_v49  ;;  %v1254_v51 = vld [vmem:[%s17858_s21 + $0xd8c] sm:$0xf] }
 0x13e   : >> { %1253 = vst [vmem:[%s17854_s24 + $0xd90] sm:$0xf] %v1252_v50  ;;  %v1256_v52 = vld [vmem:[%s17858_s21 + $0xda0] sm:$0xf]  ;;  %v1258_v53 = vld [vmem:[%s17858_s21 + $0xda4] sm:$0xf] }
 0x13f   : >> { %1255 = vst [vmem:[%s17854_s24 + $0xd98] sm:$0xf] %v1254_v51  ;;  %1257 = vst [vmem:[%s17854_s24 + $0xda0] sm:$0xf] %v1256_v52  ;;  %v1260_v54 = vld [vmem:[%s17858_s21 + $0xda8] sm:$0xf] }
 0x140   : >> { %1259 = vst [vmem:[%s17854_s24 + $0xda8] sm:$0xf] %v1258_v53  ;;  %v1262_v55 = vld [vmem:[%s17858_s21 + $0xdac] sm:$0xf]  ;;  %v1264_v56 = vld [vmem:[%s17858_s21 + $0xdc0] sm:$0xf] }
 0x141   : >> { %1261 = vst [vmem:[%s17854_s24 + $0xdb0] sm:$0xf] %v1260_v54  ;;  %1263 = vst [vmem:[%s17854_s24 + $0xdb8] sm:$0xf] %v1262_v55  ;;  %v1266_v57 = vld [vmem:[%s17858_s21 + $0xdc4] sm:$0xf] }
 0x142   : >> { %1265 = vst [vmem:[%s17854_s24 + $0xdc0] sm:$0xf] %v1264_v56  ;;  %v1268_v58 = vld [vmem:[%s17858_s21 + $0xdc8] sm:$0xf]  ;;  %v1270_v59 = vld [vmem:[%s17858_s21 + $0xdcc] sm:$0xf] }
 0x143   : >> { %1267 = vst [vmem:[%s17854_s24 + $0xdc8] sm:$0xf] %v1266_v57  ;;  %1269 = vst [vmem:[%s17854_s24 + $0xdd0] sm:$0xf] %v1268_v58  ;;  %v1272_v60 = vld [vmem:[%s17858_s21 + $0xde0] sm:$0xf] }
 0x144   : >> { %1271 = vst [vmem:[%s17854_s24 + $0xdd8] sm:$0xf] %v1270_v59  ;;  %v1274_v61 = vld [vmem:[%s17858_s21 + $0xde4] sm:$0xf]  ;;  %v1276_v62 = vld [vmem:[%s17858_s21 + $0xde8] sm:$0xf] }
 0x145   : >> { %1273 = vst [vmem:[%s17854_s24 + $0xde0] sm:$0xf] %v1272_v60  ;;  %1275 = vst [vmem:[%s17854_s24 + $0xde8] sm:$0xf] %v1274_v61  ;;  %v1278_v63 = vld [vmem:[%s17858_s21 + $0xdec] sm:$0xf] }
 0x146   : >> { %1277 = vst [vmem:[%s17854_s24 + $0xdf0] sm:$0xf] %v1276_v62  ;;  %v1280_v0 = vld [vmem:[%s17858_s21 + $0xe00] sm:$0xf]  ;;  %v1282_v1 = vld [vmem:[%s17858_s21 + $0xe04] sm:$0xf] }
 0x147   : >> { %1279 = vst [vmem:[%s17854_s24 + $0xdf8] sm:$0xf] %v1278_v63  ;;  %1281 = vst [vmem:[%s17854_s24 + $0xe00] sm:$0xf] %v1280_v0  ;;  %v1284_v2 = vld [vmem:[%s17858_s21 + $0xe08] sm:$0xf] }
 0x148   : >> { %1283 = vst [vmem:[%s17854_s24 + $0xe08] sm:$0xf] %v1282_v1  ;;  %v1286_v3 = vld [vmem:[%s17858_s21 + $0xe0c] sm:$0xf]  ;;  %v1288_v4 = vld [vmem:[%s17858_s21 + $0xe20] sm:$0xf] }
 0x149   : >> { %1285 = vst [vmem:[%s17854_s24 + $0xe10] sm:$0xf] %v1284_v2  ;;  %1287 = vst [vmem:[%s17854_s24 + $0xe18] sm:$0xf] %v1286_v3  ;;  %v1290_v5 = vld [vmem:[%s17858_s21 + $0xe24] sm:$0xf] }
 0x14a   : >> { %1289 = vst [vmem:[%s17854_s24 + $0xe20] sm:$0xf] %v1288_v4  ;;  %v1292_v6 = vld [vmem:[%s17858_s21 + $0xe28] sm:$0xf]  ;;  %v1294_v7 = vld [vmem:[%s17858_s21 + $0xe2c] sm:$0xf] }
 0x14b   : >> { %1291 = vst [vmem:[%s17854_s24 + $0xe28] sm:$0xf] %v1290_v5  ;;  %1293 = vst [vmem:[%s17854_s24 + $0xe30] sm:$0xf] %v1292_v6  ;;  %v1296_v8 = vld [vmem:[%s17858_s21 + $0xe40] sm:$0xf] }
 0x14c   : >> { %1295 = vst [vmem:[%s17854_s24 + $0xe38] sm:$0xf] %v1294_v7  ;;  %v1298_v9 = vld [vmem:[%s17858_s21 + $0xe44] sm:$0xf]  ;;  %v1300_v10 = vld [vmem:[%s17858_s21 + $0xe48] sm:$0xf] }
 0x14d   : >> { %1297 = vst [vmem:[%s17854_s24 + $0xe40] sm:$0xf] %v1296_v8  ;;  %1299 = vst [vmem:[%s17854_s24 + $0xe48] sm:$0xf] %v1298_v9  ;;  %v1302_v11 = vld [vmem:[%s17858_s21 + $0xe4c] sm:$0xf] }
 0x14e   : >> { %1301 = vst [vmem:[%s17854_s24 + $0xe50] sm:$0xf] %v1300_v10  ;;  %v1304_v12 = vld [vmem:[%s17858_s21 + $0xe60] sm:$0xf]  ;;  %v1306_v13 = vld [vmem:[%s17858_s21 + $0xe64] sm:$0xf] }
 0x14f   : >> { %1303 = vst [vmem:[%s17854_s24 + $0xe58] sm:$0xf] %v1302_v11  ;;  %1305 = vst [vmem:[%s17854_s24 + $0xe60] sm:$0xf] %v1304_v12  ;;  %v1308_v14 = vld [vmem:[%s17858_s21 + $0xe68] sm:$0xf] }
 0x150   : >> { %1307 = vst [vmem:[%s17854_s24 + $0xe68] sm:$0xf] %v1306_v13  ;;  %v1310_v15 = vld [vmem:[%s17858_s21 + $0xe6c] sm:$0xf]  ;;  %v1312_v16 = vld [vmem:[%s17858_s21 + $0xe80] sm:$0xf] }
 0x151   : >> { %1309 = vst [vmem:[%s17854_s24 + $0xe70] sm:$0xf] %v1308_v14  ;;  %1311 = vst [vmem:[%s17854_s24 + $0xe78] sm:$0xf] %v1310_v15  ;;  %v1314_v17 = vld [vmem:[%s17858_s21 + $0xe84] sm:$0xf] }
 0x152   : >> { %1313 = vst [vmem:[%s17854_s24 + $0xe80] sm:$0xf] %v1312_v16  ;;  %v1316_v18 = vld [vmem:[%s17858_s21 + $0xe88] sm:$0xf]  ;;  %v1318_v19 = vld [vmem:[%s17858_s21 + $0xe8c] sm:$0xf] }
 0x153   : >> { %1315 = vst [vmem:[%s17854_s24 + $0xe88] sm:$0xf] %v1314_v17  ;;  %1317 = vst [vmem:[%s17854_s24 + $0xe90] sm:$0xf] %v1316_v18  ;;  %v1320_v20 = vld [vmem:[%s17858_s21 + $0xea0] sm:$0xf] }
 0x154   : >> { %1319 = vst [vmem:[%s17854_s24 + $0xe98] sm:$0xf] %v1318_v19  ;;  %v1322_v21 = vld [vmem:[%s17858_s21 + $0xea4] sm:$0xf]  ;;  %v1324_v22 = vld [vmem:[%s17858_s21 + $0xea8] sm:$0xf] }
 0x155   : >> { %1321 = vst [vmem:[%s17854_s24 + $0xea0] sm:$0xf] %v1320_v20  ;;  %1323 = vst [vmem:[%s17854_s24 + $0xea8] sm:$0xf] %v1322_v21  ;;  %v1326_v23 = vld [vmem:[%s17858_s21 + $0xeac] sm:$0xf] }
 0x156   : >> { %1325 = vst [vmem:[%s17854_s24 + $0xeb0] sm:$0xf] %v1324_v22  ;;  %v1328_v24 = vld [vmem:[%s17858_s21 + $0xec0] sm:$0xf]  ;;  %v1330_v25 = vld [vmem:[%s17858_s21 + $0xec4] sm:$0xf] }
 0x157   : >> { %1327 = vst [vmem:[%s17854_s24 + $0xeb8] sm:$0xf] %v1326_v23  ;;  %1329 = vst [vmem:[%s17854_s24 + $0xec0] sm:$0xf] %v1328_v24  ;;  %v1332_v26 = vld [vmem:[%s17858_s21 + $0xec8] sm:$0xf] }
 0x158   : >> { %1331 = vst [vmem:[%s17854_s24 + $0xec8] sm:$0xf] %v1330_v25  ;;  %v1334_v27 = vld [vmem:[%s17858_s21 + $0xecc] sm:$0xf]  ;;  %v1336_v28 = vld [vmem:[%s17858_s21 + $0xee0] sm:$0xf] }
 0x159   : >> { %1333 = vst [vmem:[%s17854_s24 + $0xed0] sm:$0xf] %v1332_v26  ;;  %1335 = vst [vmem:[%s17854_s24 + $0xed8] sm:$0xf] %v1334_v27  ;;  %v1338_v29 = vld [vmem:[%s17858_s21 + $0xee4] sm:$0xf] }
 0x15a   : >> { %1337 = vst [vmem:[%s17854_s24 + $0xee0] sm:$0xf] %v1336_v28  ;;  %v1340_v30 = vld [vmem:[%s17858_s21 + $0xee8] sm:$0xf]  ;;  %v1342_v31 = vld [vmem:[%s17858_s21 + $0xeec] sm:$0xf] }
 0x15b   : >> { %1339 = vst [vmem:[%s17854_s24 + $0xee8] sm:$0xf] %v1338_v29  ;;  %1341 = vst [vmem:[%s17854_s24 + $0xef0] sm:$0xf] %v1340_v30  ;;  %v1344_v32 = vld [vmem:[%s17858_s21 + $0xf00] sm:$0xf] }
 0x15c   : >> { %1343 = vst [vmem:[%s17854_s24 + $0xef8] sm:$0xf] %v1342_v31  ;;  %v1346_v33 = vld [vmem:[%s17858_s21 + $0xf04] sm:$0xf]  ;;  %v1348_v34 = vld [vmem:[%s17858_s21 + $0xf08] sm:$0xf] }
 0x15d   : >> { %1345 = vst [vmem:[%s17854_s24 + $0xf00] sm:$0xf] %v1344_v32  ;;  %1347 = vst [vmem:[%s17854_s24 + $0xf08] sm:$0xf] %v1346_v33  ;;  %v1350_v35 = vld [vmem:[%s17858_s21 + $0xf0c] sm:$0xf] }
 0x15e   : >> { %1349 = vst [vmem:[%s17854_s24 + $0xf10] sm:$0xf] %v1348_v34  ;;  %v1352_v36 = vld [vmem:[%s17858_s21 + $0xf20] sm:$0xf]  ;;  %v1354_v37 = vld [vmem:[%s17858_s21 + $0xf24] sm:$0xf] }
 0x15f   : >> { %1351 = vst [vmem:[%s17854_s24 + $0xf18] sm:$0xf] %v1350_v35  ;;  %1353 = vst [vmem:[%s17854_s24 + $0xf20] sm:$0xf] %v1352_v36  ;;  %v1356_v38 = vld [vmem:[%s17858_s21 + $0xf28] sm:$0xf] }
 0x160   : >> { %1355 = vst [vmem:[%s17854_s24 + $0xf28] sm:$0xf] %v1354_v37  ;;  %v1358_v39 = vld [vmem:[%s17858_s21 + $0xf2c] sm:$0xf]  ;;  %v1360_v40 = vld [vmem:[%s17858_s21 + $0xf40] sm:$0xf] }
 0x161   : >> { %1357 = vst [vmem:[%s17854_s24 + $0xf30] sm:$0xf] %v1356_v38  ;;  %1359 = vst [vmem:[%s17854_s24 + $0xf38] sm:$0xf] %v1358_v39  ;;  %v1362_v41 = vld [vmem:[%s17858_s21 + $0xf44] sm:$0xf] }
 0x162   : >> { %1361 = vst [vmem:[%s17854_s24 + $0xf40] sm:$0xf] %v1360_v40  ;;  %v1364_v42 = vld [vmem:[%s17858_s21 + $0xf48] sm:$0xf]  ;;  %v1366_v43 = vld [vmem:[%s17858_s21 + $0xf4c] sm:$0xf] }
 0x163   : >> { %1363 = vst [vmem:[%s17854_s24 + $0xf48] sm:$0xf] %v1362_v41  ;;  %1365 = vst [vmem:[%s17854_s24 + $0xf50] sm:$0xf] %v1364_v42  ;;  %v1368_v44 = vld [vmem:[%s17858_s21 + $0xf60] sm:$0xf] }
 0x164   : >> { %1367 = vst [vmem:[%s17854_s24 + $0xf58] sm:$0xf] %v1366_v43  ;;  %v1370_v45 = vld [vmem:[%s17858_s21 + $0xf64] sm:$0xf]  ;;  %v1372_v46 = vld [vmem:[%s17858_s21 + $0xf68] sm:$0xf] }
 0x165   : >> { %1369 = vst [vmem:[%s17854_s24 + $0xf60] sm:$0xf] %v1368_v44  ;;  %1371 = vst [vmem:[%s17854_s24 + $0xf68] sm:$0xf] %v1370_v45  ;;  %v1374_v47 = vld [vmem:[%s17858_s21 + $0xf6c] sm:$0xf] }
 0x166   : >> { %1373 = vst [vmem:[%s17854_s24 + $0xf70] sm:$0xf] %v1372_v46  ;;  %v1376_v48 = vld [vmem:[%s17858_s21 + $0xf80] sm:$0xf]  ;;  %v1378_v49 = vld [vmem:[%s17858_s21 + $0xf84] sm:$0xf] }
 0x167   : >> { %1375 = vst [vmem:[%s17854_s24 + $0xf78] sm:$0xf] %v1374_v47  ;;  %1377 = vst [vmem:[%s17854_s24 + $0xf80] sm:$0xf] %v1376_v48  ;;  %v1380_v50 = vld [vmem:[%s17858_s21 + $0xf88] sm:$0xf] }
 0x168   : >> { %1379 = vst [vmem:[%s17854_s24 + $0xf88] sm:$0xf] %v1378_v49  ;;  %v1382_v51 = vld [vmem:[%s17858_s21 + $0xf8c] sm:$0xf]  ;;  %v1384_v52 = vld [vmem:[%s17858_s21 + $0xfa0] sm:$0xf] }
 0x169   : >> { %1381 = vst [vmem:[%s17854_s24 + $0xf90] sm:$0xf] %v1380_v50  ;;  %1383 = vst [vmem:[%s17854_s24 + $0xf98] sm:$0xf] %v1382_v51  ;;  %v1386_v53 = vld [vmem:[%s17858_s21 + $0xfa4] sm:$0xf] }
 0x16a   : >> { %1385 = vst [vmem:[%s17854_s24 + $0xfa0] sm:$0xf] %v1384_v52  ;;  %v1388_v54 = vld [vmem:[%s17858_s21 + $0xfa8] sm:$0xf]  ;;  %v1390_v55 = vld [vmem:[%s17858_s21 + $0xfac] sm:$0xf] }
 0x16b   : >> { %1387 = vst [vmem:[%s17854_s24 + $0xfa8] sm:$0xf] %v1386_v53  ;;  %1389 = vst [vmem:[%s17854_s24 + $0xfb0] sm:$0xf] %v1388_v54  ;;  %v1392_v56 = vld [vmem:[%s17858_s21 + $0xfc0] sm:$0xf] }
 0x16c   : >> { %1391 = vst [vmem:[%s17854_s24 + $0xfb8] sm:$0xf] %v1390_v55  ;;  %v1394_v57 = vld [vmem:[%s17858_s21 + $0xfc4] sm:$0xf]  ;;  %v1396_v58 = vld [vmem:[%s17858_s21 + $0xfc8] sm:$0xf] }
 0x16d   : >> { %1393 = vst [vmem:[%s17854_s24 + $0xfc0] sm:$0xf] %v1392_v56  ;;  %1395 = vst [vmem:[%s17854_s24 + $0xfc8] sm:$0xf] %v1394_v57  ;;  %v1398_v59 = vld [vmem:[%s17858_s21 + $0xfcc] sm:$0xf] }
 0x16e   : >> { %1397 = vst [vmem:[%s17854_s24 + $0xfd0] sm:$0xf] %v1396_v58  ;;  %v1400_v60 = vld [vmem:[%s17858_s21 + $0xfe0] sm:$0xf]  ;;  %v1402_v61 = vld [vmem:[%s17858_s21 + $0xfe4] sm:$0xf] }
 0x16f   : >> { %1399 = vst [vmem:[%s17854_s24 + $0xfd8] sm:$0xf] %v1398_v59  ;;  %1401 = vst [vmem:[%s17854_s24 + $0xfe0] sm:$0xf] %v1400_v60  ;;  %v1404_v62 = vld [vmem:[%s17858_s21 + $0xfe8] sm:$0xf] }
 0x170   : >> { %1403 = vst [vmem:[%s17854_s24 + $0xfe8] sm:$0xf] %v1402_v61  ;;  %v1406_v63 = vld [vmem:[%s17858_s21 + $0xfec] sm:$0xf]  ;;  %v1408_v0 = vld [vmem:[%s17858_s21 + $0x1000] sm:$0xf] }
 0x171   : >> { %1405 = vst [vmem:[%s17854_s24 + $0xff0] sm:$0xf] %v1404_v62  ;;  %1407 = vst [vmem:[%s17854_s24 + $0xff8] sm:$0xf] %v1406_v63  ;;  %v1410_v1 = vld [vmem:[%s17858_s21 + $0x1004] sm:$0xf] }
 0x172   : >> { %1409 = vst [vmem:[%s17854_s24 + $0x1000] sm:$0xf] %v1408_v0  ;;  %v1412_v2 = vld [vmem:[%s17858_s21 + $0x1008] sm:$0xf]  ;;  %v1414_v3 = vld [vmem:[%s17858_s21 + $0x100c] sm:$0xf] }
 0x173   : >> { %1411 = vst [vmem:[%s17854_s24 + $0x1008] sm:$0xf] %v1410_v1  ;;  %1413 = vst [vmem:[%s17854_s24 + $0x1010] sm:$0xf] %v1412_v2  ;;  %v1416_v4 = vld [vmem:[%s17858_s21 + $0x1020] sm:$0xf] }
 0x174   : >> { %1415 = vst [vmem:[%s17854_s24 + $0x1018] sm:$0xf] %v1414_v3  ;;  %v1418_v5 = vld [vmem:[%s17858_s21 + $0x1024] sm:$0xf]  ;;  %v1420_v6 = vld [vmem:[%s17858_s21 + $0x1028] sm:$0xf] }
 0x175   : >> { %1417 = vst [vmem:[%s17854_s24 + $0x1020] sm:$0xf] %v1416_v4  ;;  %1419 = vst [vmem:[%s17854_s24 + $0x1028] sm:$0xf] %v1418_v5  ;;  %v1422_v7 = vld [vmem:[%s17858_s21 + $0x102c] sm:$0xf] }
 0x176   : >> { %1421 = vst [vmem:[%s17854_s24 + $0x1030] sm:$0xf] %v1420_v6  ;;  %v1424_v8 = vld [vmem:[%s17858_s21 + $0x1040] sm:$0xf]  ;;  %v1426_v9 = vld [vmem:[%s17858_s21 + $0x1044] sm:$0xf] }
 0x177   : >> { %1423 = vst [vmem:[%s17854_s24 + $0x1038] sm:$0xf] %v1422_v7  ;;  %1425 = vst [vmem:[%s17854_s24 + $0x1040] sm:$0xf] %v1424_v8  ;;  %v1428_v10 = vld [vmem:[%s17858_s21 + $0x1048] sm:$0xf] }
 0x178   : >> { %1427 = vst [vmem:[%s17854_s24 + $0x1048] sm:$0xf] %v1426_v9  ;;  %v1430_v11 = vld [vmem:[%s17858_s21 + $0x104c] sm:$0xf]  ;;  %v1432_v12 = vld [vmem:[%s17858_s21 + $0x1060] sm:$0xf] }
 0x179   : >> { %1429 = vst [vmem:[%s17854_s24 + $0x1050] sm:$0xf] %v1428_v10  ;;  %1431 = vst [vmem:[%s17854_s24 + $0x1058] sm:$0xf] %v1430_v11  ;;  %v1434_v13 = vld [vmem:[%s17858_s21 + $0x1064] sm:$0xf] }
 0x17a   : >> { %1433 = vst [vmem:[%s17854_s24 + $0x1060] sm:$0xf] %v1432_v12  ;;  %v1436_v14 = vld [vmem:[%s17858_s21 + $0x1068] sm:$0xf]  ;;  %v1438_v15 = vld [vmem:[%s17858_s21 + $0x106c] sm:$0xf] }
 0x17b   : >> { %1435 = vst [vmem:[%s17854_s24 + $0x1068] sm:$0xf] %v1434_v13  ;;  %1437 = vst [vmem:[%s17854_s24 + $0x1070] sm:$0xf] %v1436_v14  ;;  %v1440_v16 = vld [vmem:[%s17858_s21 + $0x1080] sm:$0xf] }
 0x17c   : >> { %1439 = vst [vmem:[%s17854_s24 + $0x1078] sm:$0xf] %v1438_v15  ;;  %v1442_v17 = vld [vmem:[%s17858_s21 + $0x1084] sm:$0xf]  ;;  %v1444_v18 = vld [vmem:[%s17858_s21 + $0x1088] sm:$0xf] }
 0x17d   : >> { %1441 = vst [vmem:[%s17854_s24 + $0x1080] sm:$0xf] %v1440_v16  ;;  %1443 = vst [vmem:[%s17854_s24 + $0x1088] sm:$0xf] %v1442_v17  ;;  %v1446_v19 = vld [vmem:[%s17858_s21 + $0x108c] sm:$0xf] }
 0x17e   : >> { %1445 = vst [vmem:[%s17854_s24 + $0x1090] sm:$0xf] %v1444_v18  ;;  %v1448_v20 = vld [vmem:[%s17858_s21 + $0x10a0] sm:$0xf]  ;;  %v1450_v21 = vld [vmem:[%s17858_s21 + $0x10a4] sm:$0xf] }
 0x17f   : >> { %1447 = vst [vmem:[%s17854_s24 + $0x1098] sm:$0xf] %v1446_v19  ;;  %1449 = vst [vmem:[%s17854_s24 + $0x10a0] sm:$0xf] %v1448_v20  ;;  %v1452_v22 = vld [vmem:[%s17858_s21 + $0x10a8] sm:$0xf] }
 0x180   : >> { %1451 = vst [vmem:[%s17854_s24 + $0x10a8] sm:$0xf] %v1450_v21  ;;  %v1454_v23 = vld [vmem:[%s17858_s21 + $0x10ac] sm:$0xf]  ;;  %v1456_v24 = vld [vmem:[%s17858_s21 + $0x10c0] sm:$0xf] }
 0x181   : >> { %1453 = vst [vmem:[%s17854_s24 + $0x10b0] sm:$0xf] %v1452_v22  ;;  %1455 = vst [vmem:[%s17854_s24 + $0x10b8] sm:$0xf] %v1454_v23  ;;  %v1458_v25 = vld [vmem:[%s17858_s21 + $0x10c4] sm:$0xf] }
 0x182   : >> { %1457 = vst [vmem:[%s17854_s24 + $0x10c0] sm:$0xf] %v1456_v24  ;;  %v1460_v26 = vld [vmem:[%s17858_s21 + $0x10c8] sm:$0xf]  ;;  %v1462_v27 = vld [vmem:[%s17858_s21 + $0x10cc] sm:$0xf] }
 0x183   : >> { %1459 = vst [vmem:[%s17854_s24 + $0x10c8] sm:$0xf] %v1458_v25  ;;  %1461 = vst [vmem:[%s17854_s24 + $0x10d0] sm:$0xf] %v1460_v26  ;;  %v1464_v28 = vld [vmem:[%s17858_s21 + $0x10e0] sm:$0xf] }
 0x184   : >> { %1463 = vst [vmem:[%s17854_s24 + $0x10d8] sm:$0xf] %v1462_v27  ;;  %v1466_v29 = vld [vmem:[%s17858_s21 + $0x10e4] sm:$0xf]  ;;  %v1468_v30 = vld [vmem:[%s17858_s21 + $0x10e8] sm:$0xf] }
 0x185   : >> { %1465 = vst [vmem:[%s17854_s24 + $0x10e0] sm:$0xf] %v1464_v28  ;;  %1467 = vst [vmem:[%s17854_s24 + $0x10e8] sm:$0xf] %v1466_v29  ;;  %v1470_v31 = vld [vmem:[%s17858_s21 + $0x10ec] sm:$0xf] }
 0x186   : >> { %1469 = vst [vmem:[%s17854_s24 + $0x10f0] sm:$0xf] %v1468_v30  ;;  %v1472_v32 = vld [vmem:[%s17858_s21 + $0x1100] sm:$0xf]  ;;  %v1474_v33 = vld [vmem:[%s17858_s21 + $0x1104] sm:$0xf] }
 0x187   : >> { %1471 = vst [vmem:[%s17854_s24 + $0x10f8] sm:$0xf] %v1470_v31  ;;  %1473 = vst [vmem:[%s17854_s24 + $0x1100] sm:$0xf] %v1472_v32  ;;  %v1476_v34 = vld [vmem:[%s17858_s21 + $0x1108] sm:$0xf] }
 0x188   : >> { %1475 = vst [vmem:[%s17854_s24 + $0x1108] sm:$0xf] %v1474_v33  ;;  %v1478_v35 = vld [vmem:[%s17858_s21 + $0x110c] sm:$0xf]  ;;  %v1480_v36 = vld [vmem:[%s17858_s21 + $0x1120] sm:$0xf] }
 0x189   : >> { %1477 = vst [vmem:[%s17854_s24 + $0x1110] sm:$0xf] %v1476_v34  ;;  %1479 = vst [vmem:[%s17854_s24 + $0x1118] sm:$0xf] %v1478_v35  ;;  %v1482_v37 = vld [vmem:[%s17858_s21 + $0x1124] sm:$0xf] }
 0x18a   : >> { %1481 = vst [vmem:[%s17854_s24 + $0x1120] sm:$0xf] %v1480_v36  ;;  %v1484_v38 = vld [vmem:[%s17858_s21 + $0x1128] sm:$0xf]  ;;  %v1486_v39 = vld [vmem:[%s17858_s21 + $0x112c] sm:$0xf] }
 0x18b   : >> { %1483 = vst [vmem:[%s17854_s24 + $0x1128] sm:$0xf] %v1482_v37  ;;  %1485 = vst [vmem:[%s17854_s24 + $0x1130] sm:$0xf] %v1484_v38  ;;  %v1488_v40 = vld [vmem:[%s17858_s21 + $0x1140] sm:$0xf] }
 0x18c   : >> { %1487 = vst [vmem:[%s17854_s24 + $0x1138] sm:$0xf] %v1486_v39  ;;  %v1490_v41 = vld [vmem:[%s17858_s21 + $0x1144] sm:$0xf]  ;;  %v1492_v42 = vld [vmem:[%s17858_s21 + $0x1148] sm:$0xf] }
 0x18d   : >> { %1489 = vst [vmem:[%s17854_s24 + $0x1140] sm:$0xf] %v1488_v40  ;;  %1491 = vst [vmem:[%s17854_s24 + $0x1148] sm:$0xf] %v1490_v41  ;;  %v1494_v43 = vld [vmem:[%s17858_s21 + $0x114c] sm:$0xf] }
 0x18e   : >> { %1493 = vst [vmem:[%s17854_s24 + $0x1150] sm:$0xf] %v1492_v42  ;;  %v1496_v44 = vld [vmem:[%s17858_s21 + $0x1160] sm:$0xf]  ;;  %v1498_v45 = vld [vmem:[%s17858_s21 + $0x1164] sm:$0xf] }
 0x18f   : >> { %1495 = vst [vmem:[%s17854_s24 + $0x1158] sm:$0xf] %v1494_v43  ;;  %1497 = vst [vmem:[%s17854_s24 + $0x1160] sm:$0xf] %v1496_v44  ;;  %v1500_v46 = vld [vmem:[%s17858_s21 + $0x1168] sm:$0xf] }
 0x190   : >> { %1499 = vst [vmem:[%s17854_s24 + $0x1168] sm:$0xf] %v1498_v45  ;;  %v1502_v47 = vld [vmem:[%s17858_s21 + $0x116c] sm:$0xf]  ;;  %v1504_v48 = vld [vmem:[%s17858_s21 + $0x1180] sm:$0xf] }
 0x191   : >> { %1501 = vst [vmem:[%s17854_s24 + $0x1170] sm:$0xf] %v1500_v46  ;;  %1503 = vst [vmem:[%s17854_s24 + $0x1178] sm:$0xf] %v1502_v47  ;;  %v1506_v49 = vld [vmem:[%s17858_s21 + $0x1184] sm:$0xf] }
 0x192   : >> { %1505 = vst [vmem:[%s17854_s24 + $0x1180] sm:$0xf] %v1504_v48  ;;  %v1508_v50 = vld [vmem:[%s17858_s21 + $0x1188] sm:$0xf]  ;;  %v1510_v51 = vld [vmem:[%s17858_s21 + $0x118c] sm:$0xf] }
 0x193   : >> { %1507 = vst [vmem:[%s17854_s24 + $0x1188] sm:$0xf] %v1506_v49  ;;  %1509 = vst [vmem:[%s17854_s24 + $0x1190] sm:$0xf] %v1508_v50  ;;  %v1512_v52 = vld [vmem:[%s17858_s21 + $0x11a0] sm:$0xf] }
 0x194   : >> { %1511 = vst [vmem:[%s17854_s24 + $0x1198] sm:$0xf] %v1510_v51  ;;  %v1514_v53 = vld [vmem:[%s17858_s21 + $0x11a4] sm:$0xf]  ;;  %v1516_v54 = vld [vmem:[%s17858_s21 + $0x11a8] sm:$0xf] }
 0x195   : >> { %1513 = vst [vmem:[%s17854_s24 + $0x11a0] sm:$0xf] %v1512_v52  ;;  %1515 = vst [vmem:[%s17854_s24 + $0x11a8] sm:$0xf] %v1514_v53  ;;  %v1518_v55 = vld [vmem:[%s17858_s21 + $0x11ac] sm:$0xf] }
 0x196   : >> { %1517 = vst [vmem:[%s17854_s24 + $0x11b0] sm:$0xf] %v1516_v54  ;;  %v1520_v56 = vld [vmem:[%s17858_s21 + $0x11c0] sm:$0xf]  ;;  %v1522_v57 = vld [vmem:[%s17858_s21 + $0x11c4] sm:$0xf] }
 0x197   : >> { %1519 = vst [vmem:[%s17854_s24 + $0x11b8] sm:$0xf] %v1518_v55  ;;  %1521 = vst [vmem:[%s17854_s24 + $0x11c0] sm:$0xf] %v1520_v56  ;;  %v1524_v58 = vld [vmem:[%s17858_s21 + $0x11c8] sm:$0xf] }
 0x198   : >> { %1523 = vst [vmem:[%s17854_s24 + $0x11c8] sm:$0xf] %v1522_v57  ;;  %v1526_v59 = vld [vmem:[%s17858_s21 + $0x11cc] sm:$0xf]  ;;  %v1528_v60 = vld [vmem:[%s17858_s21 + $0x11e0] sm:$0xf] }
 0x199   : >> { %1525 = vst [vmem:[%s17854_s24 + $0x11d0] sm:$0xf] %v1524_v58  ;;  %1527 = vst [vmem:[%s17854_s24 + $0x11d8] sm:$0xf] %v1526_v59  ;;  %v1530_v61 = vld [vmem:[%s17858_s21 + $0x11e4] sm:$0xf] }
 0x19a   : >> { %1529 = vst [vmem:[%s17854_s24 + $0x11e0] sm:$0xf] %v1528_v60  ;;  %v1532_v62 = vld [vmem:[%s17858_s21 + $0x11e8] sm:$0xf]  ;;  %v1534_v63 = vld [vmem:[%s17858_s21 + $0x11ec] sm:$0xf] }
 0x19b   : >> { %1531 = vst [vmem:[%s17854_s24 + $0x11e8] sm:$0xf] %v1530_v61  ;;  %1533 = vst [vmem:[%s17854_s24 + $0x11f0] sm:$0xf] %v1532_v62  ;;  %v1536_v0 = vld [vmem:[%s17858_s21 + $0x1200] sm:$0xf] }
 0x19c   : >> { %1535 = vst [vmem:[%s17854_s24 + $0x11f8] sm:$0xf] %v1534_v63  ;;  %v1538_v1 = vld [vmem:[%s17858_s21 + $0x1204] sm:$0xf]  ;;  %v1540_v2 = vld [vmem:[%s17858_s21 + $0x1208] sm:$0xf] }
 0x19d   : >> { %1537 = vst [vmem:[%s17854_s24 + $0x1200] sm:$0xf] %v1536_v0  ;;  %1539 = vst [vmem:[%s17854_s24 + $0x1208] sm:$0xf] %v1538_v1  ;;  %v1542_v3 = vld [vmem:[%s17858_s21 + $0x120c] sm:$0xf] }
 0x19e   : >> { %1541 = vst [vmem:[%s17854_s24 + $0x1210] sm:$0xf] %v1540_v2  ;;  %v1544_v4 = vld [vmem:[%s17858_s21 + $0x1220] sm:$0xf]  ;;  %v1546_v5 = vld [vmem:[%s17858_s21 + $0x1224] sm:$0xf] }
 0x19f   : >> { %1543 = vst [vmem:[%s17854_s24 + $0x1218] sm:$0xf] %v1542_v3  ;;  %1545 = vst [vmem:[%s17854_s24 + $0x1220] sm:$0xf] %v1544_v4  ;;  %v1548_v6 = vld [vmem:[%s17858_s21 + $0x1228] sm:$0xf] }
 0x1a0   : >> { %1547 = vst [vmem:[%s17854_s24 + $0x1228] sm:$0xf] %v1546_v5  ;;  %v1550_v7 = vld [vmem:[%s17858_s21 + $0x122c] sm:$0xf]  ;;  %v1552_v8 = vld [vmem:[%s17858_s21 + $0x1240] sm:$0xf] }
 0x1a1   : >> { %1549 = vst [vmem:[%s17854_s24 + $0x1230] sm:$0xf] %v1548_v6  ;;  %1551 = vst [vmem:[%s17854_s24 + $0x1238] sm:$0xf] %v1550_v7  ;;  %v1554_v9 = vld [vmem:[%s17858_s21 + $0x1244] sm:$0xf] }
 0x1a2   : >> { %1553 = vst [vmem:[%s17854_s24 + $0x1240] sm:$0xf] %v1552_v8  ;;  %v1556_v10 = vld [vmem:[%s17858_s21 + $0x1248] sm:$0xf]  ;;  %v1558_v11 = vld [vmem:[%s17858_s21 + $0x124c] sm:$0xf] }
 0x1a3   : >> { %1555 = vst [vmem:[%s17854_s24 + $0x1248] sm:$0xf] %v1554_v9  ;;  %1557 = vst [vmem:[%s17854_s24 + $0x1250] sm:$0xf] %v1556_v10  ;;  %v1560_v12 = vld [vmem:[%s17858_s21 + $0x1260] sm:$0xf] }
 0x1a4   : >> { %1559 = vst [vmem:[%s17854_s24 + $0x1258] sm:$0xf] %v1558_v11  ;;  %v1562_v13 = vld [vmem:[%s17858_s21 + $0x1264] sm:$0xf]  ;;  %v1564_v14 = vld [vmem:[%s17858_s21 + $0x1268] sm:$0xf] }
 0x1a5   : >> { %1561 = vst [vmem:[%s17854_s24 + $0x1260] sm:$0xf] %v1560_v12  ;;  %1563 = vst [vmem:[%s17854_s24 + $0x1268] sm:$0xf] %v1562_v13  ;;  %v1566_v15 = vld [vmem:[%s17858_s21 + $0x126c] sm:$0xf] }
 0x1a6   : >> { %1565 = vst [vmem:[%s17854_s24 + $0x1270] sm:$0xf] %v1564_v14  ;;  %v1568_v16 = vld [vmem:[%s17858_s21 + $0x1280] sm:$0xf]  ;;  %v1570_v17 = vld [vmem:[%s17858_s21 + $0x1284] sm:$0xf] }
 0x1a7   : >> { %1567 = vst [vmem:[%s17854_s24 + $0x1278] sm:$0xf] %v1566_v15  ;;  %1569 = vst [vmem:[%s17854_s24 + $0x1280] sm:$0xf] %v1568_v16  ;;  %v1572_v18 = vld [vmem:[%s17858_s21 + $0x1288] sm:$0xf] }
 0x1a8   : >> { %1571 = vst [vmem:[%s17854_s24 + $0x1288] sm:$0xf] %v1570_v17  ;;  %v1574_v19 = vld [vmem:[%s17858_s21 + $0x128c] sm:$0xf]  ;;  %v1576_v20 = vld [vmem:[%s17858_s21 + $0x12a0] sm:$0xf] }
 0x1a9   : >> { %1573 = vst [vmem:[%s17854_s24 + $0x1290] sm:$0xf] %v1572_v18  ;;  %1575 = vst [vmem:[%s17854_s24 + $0x1298] sm:$0xf] %v1574_v19  ;;  %v1578_v21 = vld [vmem:[%s17858_s21 + $0x12a4] sm:$0xf] }
 0x1aa   : >> { %1577 = vst [vmem:[%s17854_s24 + $0x12a0] sm:$0xf] %v1576_v20  ;;  %v1580_v22 = vld [vmem:[%s17858_s21 + $0x12a8] sm:$0xf]  ;;  %v1582_v23 = vld [vmem:[%s17858_s21 + $0x12ac] sm:$0xf] }
 0x1ab   : >> { %1579 = vst [vmem:[%s17854_s24 + $0x12a8] sm:$0xf] %v1578_v21  ;;  %1581 = vst [vmem:[%s17854_s24 + $0x12b0] sm:$0xf] %v1580_v22  ;;  %v1584_v24 = vld [vmem:[%s17858_s21 + $0x12c0] sm:$0xf] }
 0x1ac   : >> { %1583 = vst [vmem:[%s17854_s24 + $0x12b8] sm:$0xf] %v1582_v23  ;;  %v1586_v25 = vld [vmem:[%s17858_s21 + $0x12c4] sm:$0xf]  ;;  %v1588_v26 = vld [vmem:[%s17858_s21 + $0x12c8] sm:$0xf] }
 0x1ad   : >> { %1585 = vst [vmem:[%s17854_s24 + $0x12c0] sm:$0xf] %v1584_v24  ;;  %1587 = vst [vmem:[%s17854_s24 + $0x12c8] sm:$0xf] %v1586_v25  ;;  %v1590_v27 = vld [vmem:[%s17858_s21 + $0x12cc] sm:$0xf] }
 0x1ae   : >> { %1589 = vst [vmem:[%s17854_s24 + $0x12d0] sm:$0xf] %v1588_v26  ;;  %v1592_v28 = vld [vmem:[%s17858_s21 + $0x12e0] sm:$0xf]  ;;  %v1594_v29 = vld [vmem:[%s17858_s21 + $0x12e4] sm:$0xf] }
 0x1af   : >> { %1591 = vst [vmem:[%s17854_s24 + $0x12d8] sm:$0xf] %v1590_v27  ;;  %1593 = vst [vmem:[%s17854_s24 + $0x12e0] sm:$0xf] %v1592_v28  ;;  %v1596_v30 = vld [vmem:[%s17858_s21 + $0x12e8] sm:$0xf] }
 0x1b0   : >> { %1595 = vst [vmem:[%s17854_s24 + $0x12e8] sm:$0xf] %v1594_v29  ;;  %v1598_v31 = vld [vmem:[%s17858_s21 + $0x12ec] sm:$0xf]  ;;  %v1600_v32 = vld [vmem:[%s17858_s21 + $0x1300] sm:$0xf] }
 0x1b1   : >> { %1597 = vst [vmem:[%s17854_s24 + $0x12f0] sm:$0xf] %v1596_v30  ;;  %1599 = vst [vmem:[%s17854_s24 + $0x12f8] sm:$0xf] %v1598_v31  ;;  %v1602_v33 = vld [vmem:[%s17858_s21 + $0x1304] sm:$0xf] }
 0x1b2   : >> { %1601 = vst [vmem:[%s17854_s24 + $0x1300] sm:$0xf] %v1600_v32  ;;  %v1604_v34 = vld [vmem:[%s17858_s21 + $0x1308] sm:$0xf]  ;;  %v1606_v35 = vld [vmem:[%s17858_s21 + $0x130c] sm:$0xf] }
 0x1b3   : >> { %1603 = vst [vmem:[%s17854_s24 + $0x1308] sm:$0xf] %v1602_v33  ;;  %1605 = vst [vmem:[%s17854_s24 + $0x1310] sm:$0xf] %v1604_v34  ;;  %v1608_v36 = vld [vmem:[%s17858_s21 + $0x1320] sm:$0xf] }
 0x1b4   : >> { %1607 = vst [vmem:[%s17854_s24 + $0x1318] sm:$0xf] %v1606_v35  ;;  %v1610_v37 = vld [vmem:[%s17858_s21 + $0x1324] sm:$0xf]  ;;  %v1612_v38 = vld [vmem:[%s17858_s21 + $0x1328] sm:$0xf] }
 0x1b5   : >> { %1609 = vst [vmem:[%s17854_s24 + $0x1320] sm:$0xf] %v1608_v36  ;;  %1611 = vst [vmem:[%s17854_s24 + $0x1328] sm:$0xf] %v1610_v37  ;;  %v1614_v39 = vld [vmem:[%s17858_s21 + $0x132c] sm:$0xf] }
 0x1b6   : >> { %1613 = vst [vmem:[%s17854_s24 + $0x1330] sm:$0xf] %v1612_v38  ;;  %v1616_v40 = vld [vmem:[%s17858_s21 + $0x1340] sm:$0xf]  ;;  %v1618_v41 = vld [vmem:[%s17858_s21 + $0x1344] sm:$0xf] }
 0x1b7   : >> { %1615 = vst [vmem:[%s17854_s24 + $0x1338] sm:$0xf] %v1614_v39  ;;  %1617 = vst [vmem:[%s17854_s24 + $0x1340] sm:$0xf] %v1616_v40  ;;  %v1620_v42 = vld [vmem:[%s17858_s21 + $0x1348] sm:$0xf] }
 0x1b8   : >> { %1619 = vst [vmem:[%s17854_s24 + $0x1348] sm:$0xf] %v1618_v41  ;;  %v1622_v43 = vld [vmem:[%s17858_s21 + $0x134c] sm:$0xf]  ;;  %v1624_v44 = vld [vmem:[%s17858_s21 + $0x1360] sm:$0xf] }
 0x1b9   : >> { %1621 = vst [vmem:[%s17854_s24 + $0x1350] sm:$0xf] %v1620_v42  ;;  %1623 = vst [vmem:[%s17854_s24 + $0x1358] sm:$0xf] %v1622_v43  ;;  %v1626_v45 = vld [vmem:[%s17858_s21 + $0x1364] sm:$0xf] }
 0x1ba   : >> { %1625 = vst [vmem:[%s17854_s24 + $0x1360] sm:$0xf] %v1624_v44  ;;  %v1628_v46 = vld [vmem:[%s17858_s21 + $0x1368] sm:$0xf]  ;;  %v1630_v47 = vld [vmem:[%s17858_s21 + $0x136c] sm:$0xf] }
 0x1bb   : >> { %1627 = vst [vmem:[%s17854_s24 + $0x1368] sm:$0xf] %v1626_v45  ;;  %1629 = vst [vmem:[%s17854_s24 + $0x1370] sm:$0xf] %v1628_v46  ;;  %v1632_v48 = vld [vmem:[%s17858_s21 + $0x1380] sm:$0xf] }
 0x1bc   : >> { %1631 = vst [vmem:[%s17854_s24 + $0x1378] sm:$0xf] %v1630_v47  ;;  %v1634_v49 = vld [vmem:[%s17858_s21 + $0x1384] sm:$0xf]  ;;  %v1636_v50 = vld [vmem:[%s17858_s21 + $0x1388] sm:$0xf] }
 0x1bd   : >> { %1633 = vst [vmem:[%s17854_s24 + $0x1380] sm:$0xf] %v1632_v48  ;;  %1635 = vst [vmem:[%s17854_s24 + $0x1388] sm:$0xf] %v1634_v49  ;;  %v1638_v51 = vld [vmem:[%s17858_s21 + $0x138c] sm:$0xf] }
 0x1be   : >> { %1637 = vst [vmem:[%s17854_s24 + $0x1390] sm:$0xf] %v1636_v50  ;;  %v1640_v52 = vld [vmem:[%s17858_s21 + $0x13a0] sm:$0xf]  ;;  %v1642_v53 = vld [vmem:[%s17858_s21 + $0x13a4] sm:$0xf] }
 0x1bf   : >> { %1639 = vst [vmem:[%s17854_s24 + $0x1398] sm:$0xf] %v1638_v51  ;;  %1641 = vst [vmem:[%s17854_s24 + $0x13a0] sm:$0xf] %v1640_v52  ;;  %v1644_v54 = vld [vmem:[%s17858_s21 + $0x13a8] sm:$0xf] }
 0x1c0   : >> { %1643 = vst [vmem:[%s17854_s24 + $0x13a8] sm:$0xf] %v1642_v53  ;;  %v1646_v55 = vld [vmem:[%s17858_s21 + $0x13ac] sm:$0xf]  ;;  %v1648_v56 = vld [vmem:[%s17858_s21 + $0x13c0] sm:$0xf] }
 0x1c1   : >> { %1645 = vst [vmem:[%s17854_s24 + $0x13b0] sm:$0xf] %v1644_v54  ;;  %1647 = vst [vmem:[%s17854_s24 + $0x13b8] sm:$0xf] %v1646_v55  ;;  %v1650_v57 = vld [vmem:[%s17858_s21 + $0x13c4] sm:$0xf] }
 0x1c2   : >> { %1649 = vst [vmem:[%s17854_s24 + $0x13c0] sm:$0xf] %v1648_v56  ;;  %v1652_v58 = vld [vmem:[%s17858_s21 + $0x13c8] sm:$0xf]  ;;  %v1654_v59 = vld [vmem:[%s17858_s21 + $0x13cc] sm:$0xf] }
 0x1c3   : >> { %1651 = vst [vmem:[%s17854_s24 + $0x13c8] sm:$0xf] %v1650_v57  ;;  %1653 = vst [vmem:[%s17854_s24 + $0x13d0] sm:$0xf] %v1652_v58  ;;  %v1656_v60 = vld [vmem:[%s17858_s21 + $0x13e0] sm:$0xf] }
 0x1c4   : >> { %1655 = vst [vmem:[%s17854_s24 + $0x13d8] sm:$0xf] %v1654_v59  ;;  %v1658_v61 = vld [vmem:[%s17858_s21 + $0x13e4] sm:$0xf]  ;;  %v1660_v62 = vld [vmem:[%s17858_s21 + $0x13e8] sm:$0xf] }
 0x1c5   : >> { %1657 = vst [vmem:[%s17854_s24 + $0x13e0] sm:$0xf] %v1656_v60  ;;  %1659 = vst [vmem:[%s17854_s24 + $0x13e8] sm:$0xf] %v1658_v61  ;;  %v1662_v63 = vld [vmem:[%s17858_s21 + $0x13ec] sm:$0xf] }
 0x1c6   : >> { %1661 = vst [vmem:[%s17854_s24 + $0x13f0] sm:$0xf] %v1660_v62  ;;  %v1664_v0 = vld [vmem:[%s17858_s21 + $0x1400] sm:$0xf]  ;;  %v1666_v1 = vld [vmem:[%s17858_s21 + $0x1404] sm:$0xf] }
 0x1c7   : >> { %1663 = vst [vmem:[%s17854_s24 + $0x13f8] sm:$0xf] %v1662_v63  ;;  %1665 = vst [vmem:[%s17854_s24 + $0x1400] sm:$0xf] %v1664_v0  ;;  %v1668_v2 = vld [vmem:[%s17858_s21 + $0x1408] sm:$0xf] }
 0x1c8   : >> { %1667 = vst [vmem:[%s17854_s24 + $0x1408] sm:$0xf] %v1666_v1  ;;  %v1670_v3 = vld [vmem:[%s17858_s21 + $0x140c] sm:$0xf]  ;;  %v1672_v4 = vld [vmem:[%s17858_s21 + $0x1420] sm:$0xf] }
 0x1c9   : >> { %1669 = vst [vmem:[%s17854_s24 + $0x1410] sm:$0xf] %v1668_v2  ;;  %1671 = vst [vmem:[%s17854_s24 + $0x1418] sm:$0xf] %v1670_v3  ;;  %v1674_v5 = vld [vmem:[%s17858_s21 + $0x1424] sm:$0xf] }
 0x1ca   : >> { %1673 = vst [vmem:[%s17854_s24 + $0x1420] sm:$0xf] %v1672_v4  ;;  %v1676_v6 = vld [vmem:[%s17858_s21 + $0x1428] sm:$0xf]  ;;  %v1678_v7 = vld [vmem:[%s17858_s21 + $0x142c] sm:$0xf] }
 0x1cb   : >> { %1675 = vst [vmem:[%s17854_s24 + $0x1428] sm:$0xf] %v1674_v5  ;;  %1677 = vst [vmem:[%s17854_s24 + $0x1430] sm:$0xf] %v1676_v6  ;;  %v1680_v8 = vld [vmem:[%s17858_s21 + $0x1440] sm:$0xf] }
 0x1cc   : >> { %1679 = vst [vmem:[%s17854_s24 + $0x1438] sm:$0xf] %v1678_v7  ;;  %v1682_v9 = vld [vmem:[%s17858_s21 + $0x1444] sm:$0xf]  ;;  %v1684_v10 = vld [vmem:[%s17858_s21 + $0x1448] sm:$0xf] }
 0x1cd   : >> { %1681 = vst [vmem:[%s17854_s24 + $0x1440] sm:$0xf] %v1680_v8  ;;  %1683 = vst [vmem:[%s17854_s24 + $0x1448] sm:$0xf] %v1682_v9  ;;  %v1686_v11 = vld [vmem:[%s17858_s21 + $0x144c] sm:$0xf] }
 0x1ce   : >> { %1685 = vst [vmem:[%s17854_s24 + $0x1450] sm:$0xf] %v1684_v10  ;;  %v1688_v12 = vld [vmem:[%s17858_s21 + $0x1460] sm:$0xf]  ;;  %v1690_v13 = vld [vmem:[%s17858_s21 + $0x1464] sm:$0xf] }
 0x1cf   : >> { %1687 = vst [vmem:[%s17854_s24 + $0x1458] sm:$0xf] %v1686_v11  ;;  %1689 = vst [vmem:[%s17854_s24 + $0x1460] sm:$0xf] %v1688_v12  ;;  %v1692_v14 = vld [vmem:[%s17858_s21 + $0x1468] sm:$0xf] }
 0x1d0   : >> { %1691 = vst [vmem:[%s17854_s24 + $0x1468] sm:$0xf] %v1690_v13  ;;  %v1694_v15 = vld [vmem:[%s17858_s21 + $0x146c] sm:$0xf]  ;;  %v1696_v16 = vld [vmem:[%s17858_s21 + $0x1480] sm:$0xf] }
 0x1d1   : >> { %1693 = vst [vmem:[%s17854_s24 + $0x1470] sm:$0xf] %v1692_v14  ;;  %1695 = vst [vmem:[%s17854_s24 + $0x1478] sm:$0xf] %v1694_v15  ;;  %v1698_v17 = vld [vmem:[%s17858_s21 + $0x1484] sm:$0xf] }
 0x1d2   : >> { %1697 = vst [vmem:[%s17854_s24 + $0x1480] sm:$0xf] %v1696_v16  ;;  %v1700_v18 = vld [vmem:[%s17858_s21 + $0x1488] sm:$0xf]  ;;  %v1702_v19 = vld [vmem:[%s17858_s21 + $0x148c] sm:$0xf] }
 0x1d3   : >> { %1699 = vst [vmem:[%s17854_s24 + $0x1488] sm:$0xf] %v1698_v17  ;;  %1701 = vst [vmem:[%s17854_s24 + $0x1490] sm:$0xf] %v1700_v18  ;;  %v1704_v20 = vld [vmem:[%s17858_s21 + $0x14a0] sm:$0xf] }
 0x1d4   : >> { %1703 = vst [vmem:[%s17854_s24 + $0x1498] sm:$0xf] %v1702_v19  ;;  %v1706_v21 = vld [vmem:[%s17858_s21 + $0x14a4] sm:$0xf]  ;;  %v1708_v22 = vld [vmem:[%s17858_s21 + $0x14a8] sm:$0xf] }
 0x1d5   : >> { %1705 = vst [vmem:[%s17854_s24 + $0x14a0] sm:$0xf] %v1704_v20  ;;  %1707 = vst [vmem:[%s17854_s24 + $0x14a8] sm:$0xf] %v1706_v21  ;;  %v1710_v23 = vld [vmem:[%s17858_s21 + $0x14ac] sm:$0xf] }
 0x1d6   : >> { %1709 = vst [vmem:[%s17854_s24 + $0x14b0] sm:$0xf] %v1708_v22  ;;  %v1712_v24 = vld [vmem:[%s17858_s21 + $0x14c0] sm:$0xf]  ;;  %v1714_v25 = vld [vmem:[%s17858_s21 + $0x14c4] sm:$0xf] }
 0x1d7   : >> { %1711 = vst [vmem:[%s17854_s24 + $0x14b8] sm:$0xf] %v1710_v23  ;;  %1713 = vst [vmem:[%s17854_s24 + $0x14c0] sm:$0xf] %v1712_v24  ;;  %v1716_v26 = vld [vmem:[%s17858_s21 + $0x14c8] sm:$0xf] }
 0x1d8   : >> { %1715 = vst [vmem:[%s17854_s24 + $0x14c8] sm:$0xf] %v1714_v25  ;;  %v1718_v27 = vld [vmem:[%s17858_s21 + $0x14cc] sm:$0xf]  ;;  %v1720_v28 = vld [vmem:[%s17858_s21 + $0x14e0] sm:$0xf] }
 0x1d9   : >> { %1717 = vst [vmem:[%s17854_s24 + $0x14d0] sm:$0xf] %v1716_v26  ;;  %1719 = vst [vmem:[%s17854_s24 + $0x14d8] sm:$0xf] %v1718_v27  ;;  %v1722_v29 = vld [vmem:[%s17858_s21 + $0x14e4] sm:$0xf] }
 0x1da   : >> { %1721 = vst [vmem:[%s17854_s24 + $0x14e0] sm:$0xf] %v1720_v28  ;;  %v1724_v30 = vld [vmem:[%s17858_s21 + $0x14e8] sm:$0xf]  ;;  %v1726_v31 = vld [vmem:[%s17858_s21 + $0x14ec] sm:$0xf] }
 0x1db   : >> { %1723 = vst [vmem:[%s17854_s24 + $0x14e8] sm:$0xf] %v1722_v29  ;;  %1725 = vst [vmem:[%s17854_s24 + $0x14f0] sm:$0xf] %v1724_v30  ;;  %v1728_v32 = vld [vmem:[%s17858_s21 + $0x1500] sm:$0xf] }
 0x1dc   : >> { %1727 = vst [vmem:[%s17854_s24 + $0x14f8] sm:$0xf] %v1726_v31  ;;  %v1730_v33 = vld [vmem:[%s17858_s21 + $0x1504] sm:$0xf]  ;;  %v1732_v34 = vld [vmem:[%s17858_s21 + $0x1508] sm:$0xf] }
 0x1dd   : >> { %1729 = vst [vmem:[%s17854_s24 + $0x1500] sm:$0xf] %v1728_v32  ;;  %1731 = vst [vmem:[%s17854_s24 + $0x1508] sm:$0xf] %v1730_v33  ;;  %v1734_v35 = vld [vmem:[%s17858_s21 + $0x150c] sm:$0xf] }
 0x1de   : >> { %1733 = vst [vmem:[%s17854_s24 + $0x1510] sm:$0xf] %v1732_v34  ;;  %v1736_v36 = vld [vmem:[%s17858_s21 + $0x1520] sm:$0xf]  ;;  %v1738_v37 = vld [vmem:[%s17858_s21 + $0x1524] sm:$0xf] }
 0x1df   : >> { %1735 = vst [vmem:[%s17854_s24 + $0x1518] sm:$0xf] %v1734_v35  ;;  %1737 = vst [vmem:[%s17854_s24 + $0x1520] sm:$0xf] %v1736_v36  ;;  %v1740_v38 = vld [vmem:[%s17858_s21 + $0x1528] sm:$0xf] }
 0x1e0   : >> { %1739 = vst [vmem:[%s17854_s24 + $0x1528] sm:$0xf] %v1738_v37  ;;  %v1742_v39 = vld [vmem:[%s17858_s21 + $0x152c] sm:$0xf]  ;;  %v1744_v40 = vld [vmem:[%s17858_s21 + $0x1540] sm:$0xf] }
 0x1e1   : >> { %1741 = vst [vmem:[%s17854_s24 + $0x1530] sm:$0xf] %v1740_v38  ;;  %1743 = vst [vmem:[%s17854_s24 + $0x1538] sm:$0xf] %v1742_v39  ;;  %v1746_v41 = vld [vmem:[%s17858_s21 + $0x1544] sm:$0xf] }
 0x1e2   : >> { %1745 = vst [vmem:[%s17854_s24 + $0x1540] sm:$0xf] %v1744_v40  ;;  %v1748_v42 = vld [vmem:[%s17858_s21 + $0x1548] sm:$0xf]  ;;  %v1750_v43 = vld [vmem:[%s17858_s21 + $0x154c] sm:$0xf] }
 0x1e3   : >> { %1747 = vst [vmem:[%s17854_s24 + $0x1548] sm:$0xf] %v1746_v41  ;;  %1749 = vst [vmem:[%s17854_s24 + $0x1550] sm:$0xf] %v1748_v42  ;;  %v1752_v44 = vld [vmem:[%s17858_s21 + $0x1560] sm:$0xf] }
 0x1e4   : >> { %1751 = vst [vmem:[%s17854_s24 + $0x1558] sm:$0xf] %v1750_v43  ;;  %v1754_v45 = vld [vmem:[%s17858_s21 + $0x1564] sm:$0xf]  ;;  %v1756_v46 = vld [vmem:[%s17858_s21 + $0x1568] sm:$0xf] }
 0x1e5   : >> { %1753 = vst [vmem:[%s17854_s24 + $0x1560] sm:$0xf] %v1752_v44  ;;  %1755 = vst [vmem:[%s17854_s24 + $0x1568] sm:$0xf] %v1754_v45  ;;  %v1758_v47 = vld [vmem:[%s17858_s21 + $0x156c] sm:$0xf] }
 0x1e6   : >> { %1757 = vst [vmem:[%s17854_s24 + $0x1570] sm:$0xf] %v1756_v46  ;;  %v1760_v48 = vld [vmem:[%s17858_s21 + $0x1580] sm:$0xf]  ;;  %v1762_v49 = vld [vmem:[%s17858_s21 + $0x1584] sm:$0xf] }
 0x1e7   : >> { %1759 = vst [vmem:[%s17854_s24 + $0x1578] sm:$0xf] %v1758_v47  ;;  %1761 = vst [vmem:[%s17854_s24 + $0x1580] sm:$0xf] %v1760_v48  ;;  %v1764_v50 = vld [vmem:[%s17858_s21 + $0x1588] sm:$0xf] }
 0x1e8   : >> { %1763 = vst [vmem:[%s17854_s24 + $0x1588] sm:$0xf] %v1762_v49  ;;  %v1766_v51 = vld [vmem:[%s17858_s21 + $0x158c] sm:$0xf]  ;;  %v1768_v52 = vld [vmem:[%s17858_s21 + $0x15a0] sm:$0xf] }
 0x1e9   : >> { %1765 = vst [vmem:[%s17854_s24 + $0x1590] sm:$0xf] %v1764_v50  ;;  %1767 = vst [vmem:[%s17854_s24 + $0x1598] sm:$0xf] %v1766_v51  ;;  %v1770_v53 = vld [vmem:[%s17858_s21 + $0x15a4] sm:$0xf] }
 0x1ea   : >> { %1769 = vst [vmem:[%s17854_s24 + $0x15a0] sm:$0xf] %v1768_v52  ;;  %v1772_v54 = vld [vmem:[%s17858_s21 + $0x15a8] sm:$0xf]  ;;  %v1774_v55 = vld [vmem:[%s17858_s21 + $0x15ac] sm:$0xf] }
 0x1eb   : >> { %1771 = vst [vmem:[%s17854_s24 + $0x15a8] sm:$0xf] %v1770_v53  ;;  %1773 = vst [vmem:[%s17854_s24 + $0x15b0] sm:$0xf] %v1772_v54  ;;  %v1776_v56 = vld [vmem:[%s17858_s21 + $0x15c0] sm:$0xf] }
 0x1ec   : >> { %1775 = vst [vmem:[%s17854_s24 + $0x15b8] sm:$0xf] %v1774_v55  ;;  %v1778_v57 = vld [vmem:[%s17858_s21 + $0x15c4] sm:$0xf]  ;;  %v1780_v58 = vld [vmem:[%s17858_s21 + $0x15c8] sm:$0xf] }
 0x1ed   : >> { %1777 = vst [vmem:[%s17854_s24 + $0x15c0] sm:$0xf] %v1776_v56  ;;  %1779 = vst [vmem:[%s17854_s24 + $0x15c8] sm:$0xf] %v1778_v57  ;;  %v1782_v59 = vld [vmem:[%s17858_s21 + $0x15cc] sm:$0xf] }
 0x1ee   : >> { %1781 = vst [vmem:[%s17854_s24 + $0x15d0] sm:$0xf] %v1780_v58  ;;  %v1784_v60 = vld [vmem:[%s17858_s21 + $0x15e0] sm:$0xf]  ;;  %v1786_v61 = vld [vmem:[%s17858_s21 + $0x15e4] sm:$0xf] }
 0x1ef   : >> { %1783 = vst [vmem:[%s17854_s24 + $0x15d8] sm:$0xf] %v1782_v59  ;;  %1785 = vst [vmem:[%s17854_s24 + $0x15e0] sm:$0xf] %v1784_v60  ;;  %v1788_v62 = vld [vmem:[%s17858_s21 + $0x15e8] sm:$0xf] }
 0x1f0   : >> { %1787 = vst [vmem:[%s17854_s24 + $0x15e8] sm:$0xf] %v1786_v61  ;;  %v1790_v63 = vld [vmem:[%s17858_s21 + $0x15ec] sm:$0xf]  ;;  %v1792_v0 = vld [vmem:[%s17858_s21 + $0x1600] sm:$0xf] }
 0x1f1   : >> { %1789 = vst [vmem:[%s17854_s24 + $0x15f0] sm:$0xf] %v1788_v62  ;;  %1791 = vst [vmem:[%s17854_s24 + $0x15f8] sm:$0xf] %v1790_v63  ;;  %v1794_v1 = vld [vmem:[%s17858_s21 + $0x1604] sm:$0xf] }
 0x1f2   : >> { %1793 = vst [vmem:[%s17854_s24 + $0x1600] sm:$0xf] %v1792_v0  ;;  %v1796_v2 = vld [vmem:[%s17858_s21 + $0x1608] sm:$0xf]  ;;  %v1798_v3 = vld [vmem:[%s17858_s21 + $0x160c] sm:$0xf] }
 0x1f3   : >> { %1795 = vst [vmem:[%s17854_s24 + $0x1608] sm:$0xf] %v1794_v1  ;;  %1797 = vst [vmem:[%s17854_s24 + $0x1610] sm:$0xf] %v1796_v2  ;;  %v1800_v4 = vld [vmem:[%s17858_s21 + $0x1620] sm:$0xf] }
 0x1f4   : >> { %1799 = vst [vmem:[%s17854_s24 + $0x1618] sm:$0xf] %v1798_v3  ;;  %v1802_v5 = vld [vmem:[%s17858_s21 + $0x1624] sm:$0xf]  ;;  %v1804_v6 = vld [vmem:[%s17858_s21 + $0x1628] sm:$0xf] }
 0x1f5   : >> { %1801 = vst [vmem:[%s17854_s24 + $0x1620] sm:$0xf] %v1800_v4  ;;  %1803 = vst [vmem:[%s17854_s24 + $0x1628] sm:$0xf] %v1802_v5  ;;  %v1806_v7 = vld [vmem:[%s17858_s21 + $0x162c] sm:$0xf] }
 0x1f6   : >> { %1805 = vst [vmem:[%s17854_s24 + $0x1630] sm:$0xf] %v1804_v6  ;;  %v1808_v8 = vld [vmem:[%s17858_s21 + $0x1640] sm:$0xf]  ;;  %v1810_v9 = vld [vmem:[%s17858_s21 + $0x1644] sm:$0xf] }
 0x1f7   : >> { %1807 = vst [vmem:[%s17854_s24 + $0x1638] sm:$0xf] %v1806_v7  ;;  %1809 = vst [vmem:[%s17854_s24 + $0x1640] sm:$0xf] %v1808_v8  ;;  %v1812_v10 = vld [vmem:[%s17858_s21 + $0x1648] sm:$0xf] }
 0x1f8   : >> { %1811 = vst [vmem:[%s17854_s24 + $0x1648] sm:$0xf] %v1810_v9  ;;  %v1814_v11 = vld [vmem:[%s17858_s21 + $0x164c] sm:$0xf]  ;;  %v1816_v12 = vld [vmem:[%s17858_s21 + $0x1660] sm:$0xf] }
 0x1f9   : >> { %1813 = vst [vmem:[%s17854_s24 + $0x1650] sm:$0xf] %v1812_v10  ;;  %1815 = vst [vmem:[%s17854_s24 + $0x1658] sm:$0xf] %v1814_v11  ;;  %v1818_v13 = vld [vmem:[%s17858_s21 + $0x1664] sm:$0xf] }
 0x1fa   : >> { %1817 = vst [vmem:[%s17854_s24 + $0x1660] sm:$0xf] %v1816_v12  ;;  %v1820_v14 = vld [vmem:[%s17858_s21 + $0x1668] sm:$0xf]  ;;  %v1822_v15 = vld [vmem:[%s17858_s21 + $0x166c] sm:$0xf] }
 0x1fb   : >> { %1819 = vst [vmem:[%s17854_s24 + $0x1668] sm:$0xf] %v1818_v13  ;;  %1821 = vst [vmem:[%s17854_s24 + $0x1670] sm:$0xf] %v1820_v14  ;;  %v1824_v16 = vld [vmem:[%s17858_s21 + $0x1680] sm:$0xf] }
 0x1fc   : >> { %1823 = vst [vmem:[%s17854_s24 + $0x1678] sm:$0xf] %v1822_v15  ;;  %v1826_v17 = vld [vmem:[%s17858_s21 + $0x1684] sm:$0xf]  ;;  %v1828_v18 = vld [vmem:[%s17858_s21 + $0x1688] sm:$0xf] }
 0x1fd   : >> { %1825 = vst [vmem:[%s17854_s24 + $0x1680] sm:$0xf] %v1824_v16  ;;  %1827 = vst [vmem:[%s17854_s24 + $0x1688] sm:$0xf] %v1826_v17  ;;  %v1830_v19 = vld [vmem:[%s17858_s21 + $0x168c] sm:$0xf] }
 0x1fe   : >> { %1829 = vst [vmem:[%s17854_s24 + $0x1690] sm:$0xf] %v1828_v18  ;;  %v1832_v20 = vld [vmem:[%s17858_s21 + $0x16a0] sm:$0xf]  ;;  %v1834_v21 = vld [vmem:[%s17858_s21 + $0x16a4] sm:$0xf] }
 0x1ff   : >> { %1831 = vst [vmem:[%s17854_s24 + $0x1698] sm:$0xf] %v1830_v19  ;;  %1833 = vst [vmem:[%s17854_s24 + $0x16a0] sm:$0xf] %v1832_v20  ;;  %v1836_v22 = vld [vmem:[%s17858_s21 + $0x16a8] sm:$0xf] }
 0x200   : >> { %1835 = vst [vmem:[%s17854_s24 + $0x16a8] sm:$0xf] %v1834_v21  ;;  %v1838_v23 = vld [vmem:[%s17858_s21 + $0x16ac] sm:$0xf]  ;;  %v1840_v24 = vld [vmem:[%s17858_s21 + $0x16c0] sm:$0xf] }
 0x201   : >> { %1837 = vst [vmem:[%s17854_s24 + $0x16b0] sm:$0xf] %v1836_v22  ;;  %1839 = vst [vmem:[%s17854_s24 + $0x16b8] sm:$0xf] %v1838_v23  ;;  %v1842_v25 = vld [vmem:[%s17858_s21 + $0x16c4] sm:$0xf] }
 0x202   : >> { %1841 = vst [vmem:[%s17854_s24 + $0x16c0] sm:$0xf] %v1840_v24  ;;  %v1844_v26 = vld [vmem:[%s17858_s21 + $0x16c8] sm:$0xf]  ;;  %v1846_v27 = vld [vmem:[%s17858_s21 + $0x16cc] sm:$0xf] }
 0x203   : >> { %1843 = vst [vmem:[%s17854_s24 + $0x16c8] sm:$0xf] %v1842_v25  ;;  %1845 = vst [vmem:[%s17854_s24 + $0x16d0] sm:$0xf] %v1844_v26  ;;  %v1848_v28 = vld [vmem:[%s17858_s21 + $0x16e0] sm:$0xf] }
 0x204   : >> { %1847 = vst [vmem:[%s17854_s24 + $0x16d8] sm:$0xf] %v1846_v27  ;;  %v1850_v29 = vld [vmem:[%s17858_s21 + $0x16e4] sm:$0xf]  ;;  %v1852_v30 = vld [vmem:[%s17858_s21 + $0x16e8] sm:$0xf] }
 0x205   : >> { %1849 = vst [vmem:[%s17854_s24 + $0x16e0] sm:$0xf] %v1848_v28  ;;  %1851 = vst [vmem:[%s17854_s24 + $0x16e8] sm:$0xf] %v1850_v29  ;;  %v1854_v31 = vld [vmem:[%s17858_s21 + $0x16ec] sm:$0xf] }
 0x206   : >> { %1853 = vst [vmem:[%s17854_s24 + $0x16f0] sm:$0xf] %v1852_v30  ;;  %v1856_v32 = vld [vmem:[%s17858_s21 + $0x1700] sm:$0xf]  ;;  %v1858_v33 = vld [vmem:[%s17858_s21 + $0x1704] sm:$0xf] }
 0x207   : >> { %1855 = vst [vmem:[%s17854_s24 + $0x16f8] sm:$0xf] %v1854_v31  ;;  %1857 = vst [vmem:[%s17854_s24 + $0x1700] sm:$0xf] %v1856_v32  ;;  %v1860_v34 = vld [vmem:[%s17858_s21 + $0x1708] sm:$0xf] }
 0x208   : >> { %1859 = vst [vmem:[%s17854_s24 + $0x1708] sm:$0xf] %v1858_v33  ;;  %v1862_v35 = vld [vmem:[%s17858_s21 + $0x170c] sm:$0xf]  ;;  %v1864_v36 = vld [vmem:[%s17858_s21 + $0x1720] sm:$0xf] }
 0x209   : >> { %1861 = vst [vmem:[%s17854_s24 + $0x1710] sm:$0xf] %v1860_v34  ;;  %1863 = vst [vmem:[%s17854_s24 + $0x1718] sm:$0xf] %v1862_v35  ;;  %v1866_v37 = vld [vmem:[%s17858_s21 + $0x1724] sm:$0xf] }
 0x20a   : >> { %1865 = vst [vmem:[%s17854_s24 + $0x1720] sm:$0xf] %v1864_v36  ;;  %v1868_v38 = vld [vmem:[%s17858_s21 + $0x1728] sm:$0xf]  ;;  %v1870_v39 = vld [vmem:[%s17858_s21 + $0x172c] sm:$0xf] }
 0x20b   : >> { %1867 = vst [vmem:[%s17854_s24 + $0x1728] sm:$0xf] %v1866_v37  ;;  %1869 = vst [vmem:[%s17854_s24 + $0x1730] sm:$0xf] %v1868_v38  ;;  %v1872_v40 = vld [vmem:[%s17858_s21 + $0x1740] sm:$0xf] }
 0x20c   : >> { %1871 = vst [vmem:[%s17854_s24 + $0x1738] sm:$0xf] %v1870_v39  ;;  %v1874_v41 = vld [vmem:[%s17858_s21 + $0x1744] sm:$0xf]  ;;  %v1876_v42 = vld [vmem:[%s17858_s21 + $0x1748] sm:$0xf] }
 0x20d   : >> { %1873 = vst [vmem:[%s17854_s24 + $0x1740] sm:$0xf] %v1872_v40  ;;  %1875 = vst [vmem:[%s17854_s24 + $0x1748] sm:$0xf] %v1874_v41  ;;  %v1878_v43 = vld [vmem:[%s17858_s21 + $0x174c] sm:$0xf] }
 0x20e   : >> { %1877 = vst [vmem:[%s17854_s24 + $0x1750] sm:$0xf] %v1876_v42  ;;  %v1880_v44 = vld [vmem:[%s17858_s21 + $0x1760] sm:$0xf]  ;;  %v1882_v45 = vld [vmem:[%s17858_s21 + $0x1764] sm:$0xf] }
 0x20f   : >> { %1879 = vst [vmem:[%s17854_s24 + $0x1758] sm:$0xf] %v1878_v43  ;;  %1881 = vst [vmem:[%s17854_s24 + $0x1760] sm:$0xf] %v1880_v44  ;;  %v1884_v46 = vld [vmem:[%s17858_s21 + $0x1768] sm:$0xf] }
 0x210   : >> { %1883 = vst [vmem:[%s17854_s24 + $0x1768] sm:$0xf] %v1882_v45  ;;  %v1886_v47 = vld [vmem:[%s17858_s21 + $0x176c] sm:$0xf]  ;;  %v1888_v48 = vld [vmem:[%s17858_s21 + $0x1780] sm:$0xf] }
 0x211   : >> { %1885 = vst [vmem:[%s17854_s24 + $0x1770] sm:$0xf] %v1884_v46  ;;  %1887 = vst [vmem:[%s17854_s24 + $0x1778] sm:$0xf] %v1886_v47  ;;  %v1890_v49 = vld [vmem:[%s17858_s21 + $0x1784] sm:$0xf] }
 0x212   : >> { %1889 = vst [vmem:[%s17854_s24 + $0x1780] sm:$0xf] %v1888_v48  ;;  %v1892_v50 = vld [vmem:[%s17858_s21 + $0x1788] sm:$0xf]  ;;  %v1894_v51 = vld [vmem:[%s17858_s21 + $0x178c] sm:$0xf] }
 0x213   : >> { %1891 = vst [vmem:[%s17854_s24 + $0x1788] sm:$0xf] %v1890_v49  ;;  %1893 = vst [vmem:[%s17854_s24 + $0x1790] sm:$0xf] %v1892_v50  ;;  %v1896_v52 = vld [vmem:[%s17858_s21 + $0x17a0] sm:$0xf] }
 0x214   : >> { %1895 = vst [vmem:[%s17854_s24 + $0x1798] sm:$0xf] %v1894_v51  ;;  %v1898_v53 = vld [vmem:[%s17858_s21 + $0x17a4] sm:$0xf]  ;;  %v1900_v54 = vld [vmem:[%s17858_s21 + $0x17a8] sm:$0xf] }
 0x215   : >> { %1897 = vst [vmem:[%s17854_s24 + $0x17a0] sm:$0xf] %v1896_v52  ;;  %1899 = vst [vmem:[%s17854_s24 + $0x17a8] sm:$0xf] %v1898_v53  ;;  %v1902_v55 = vld [vmem:[%s17858_s21 + $0x17ac] sm:$0xf] }
 0x216   : >> { %1901 = vst [vmem:[%s17854_s24 + $0x17b0] sm:$0xf] %v1900_v54  ;;  %v1904_v56 = vld [vmem:[%s17858_s21 + $0x17c0] sm:$0xf]  ;;  %v1906_v57 = vld [vmem:[%s17858_s21 + $0x17c4] sm:$0xf] }
 0x217   : >> { %1903 = vst [vmem:[%s17854_s24 + $0x17b8] sm:$0xf] %v1902_v55  ;;  %1905 = vst [vmem:[%s17854_s24 + $0x17c0] sm:$0xf] %v1904_v56  ;;  %v1908_v58 = vld [vmem:[%s17858_s21 + $0x17c8] sm:$0xf] }
 0x218   : >> { %1907 = vst [vmem:[%s17854_s24 + $0x17c8] sm:$0xf] %v1906_v57  ;;  %v1910_v59 = vld [vmem:[%s17858_s21 + $0x17cc] sm:$0xf]  ;;  %v1912_v60 = vld [vmem:[%s17858_s21 + $0x17e0] sm:$0xf] }
 0x219   : >> { %1909 = vst [vmem:[%s17854_s24 + $0x17d0] sm:$0xf] %v1908_v58  ;;  %1911 = vst [vmem:[%s17854_s24 + $0x17d8] sm:$0xf] %v1910_v59  ;;  %v1914_v61 = vld [vmem:[%s17858_s21 + $0x17e4] sm:$0xf] }
 0x21a   : >> { %1913 = vst [vmem:[%s17854_s24 + $0x17e0] sm:$0xf] %v1912_v60  ;;  %v1916_v62 = vld [vmem:[%s17858_s21 + $0x17e8] sm:$0xf]  ;;  %v1918_v63 = vld [vmem:[%s17858_s21 + $0x17ec] sm:$0xf] }
 0x21b   : >> { %1915 = vst [vmem:[%s17854_s24 + $0x17e8] sm:$0xf] %v1914_v61  ;;  %1917 = vst [vmem:[%s17854_s24 + $0x17f0] sm:$0xf] %v1916_v62  ;;  %v1920_v0 = vld [vmem:[%s17858_s21 + $0x1800] sm:$0xf] }
 0x21c   : >> { %1919 = vst [vmem:[%s17854_s24 + $0x17f8] sm:$0xf] %v1918_v63  ;;  %v1922_v1 = vld [vmem:[%s17858_s21 + $0x1804] sm:$0xf]  ;;  %v1924_v2 = vld [vmem:[%s17858_s21 + $0x1808] sm:$0xf] }
 0x21d   : >> { %1921 = vst [vmem:[%s17854_s24 + $0x1800] sm:$0xf] %v1920_v0  ;;  %1923 = vst [vmem:[%s17854_s24 + $0x1808] sm:$0xf] %v1922_v1  ;;  %v1926_v3 = vld [vmem:[%s17858_s21 + $0x180c] sm:$0xf] }
 0x21e   : >> { %1925 = vst [vmem:[%s17854_s24 + $0x1810] sm:$0xf] %v1924_v2  ;;  %v1928_v4 = vld [vmem:[%s17858_s21 + $0x1820] sm:$0xf]  ;;  %v1930_v5 = vld [vmem:[%s17858_s21 + $0x1824] sm:$0xf] }
 0x21f   : >> { %1927 = vst [vmem:[%s17854_s24 + $0x1818] sm:$0xf] %v1926_v3  ;;  %1929 = vst [vmem:[%s17854_s24 + $0x1820] sm:$0xf] %v1928_v4  ;;  %v1932_v6 = vld [vmem:[%s17858_s21 + $0x1828] sm:$0xf] }
 0x220   : >> { %1931 = vst [vmem:[%s17854_s24 + $0x1828] sm:$0xf] %v1930_v5  ;;  %v1934_v7 = vld [vmem:[%s17858_s21 + $0x182c] sm:$0xf]  ;;  %v1936_v8 = vld [vmem:[%s17858_s21 + $0x1840] sm:$0xf] }
 0x221   : >> { %1933 = vst [vmem:[%s17854_s24 + $0x1830] sm:$0xf] %v1932_v6  ;;  %1935 = vst [vmem:[%s17854_s24 + $0x1838] sm:$0xf] %v1934_v7  ;;  %v1938_v9 = vld [vmem:[%s17858_s21 + $0x1844] sm:$0xf] }
 0x222   : >> { %1937 = vst [vmem:[%s17854_s24 + $0x1840] sm:$0xf] %v1936_v8  ;;  %v1940_v10 = vld [vmem:[%s17858_s21 + $0x1848] sm:$0xf]  ;;  %v1942_v11 = vld [vmem:[%s17858_s21 + $0x184c] sm:$0xf] }
 0x223   : >> { %1939 = vst [vmem:[%s17854_s24 + $0x1848] sm:$0xf] %v1938_v9  ;;  %1941 = vst [vmem:[%s17854_s24 + $0x1850] sm:$0xf] %v1940_v10  ;;  %v1944_v12 = vld [vmem:[%s17858_s21 + $0x1860] sm:$0xf] }
 0x224   : >> { %1943 = vst [vmem:[%s17854_s24 + $0x1858] sm:$0xf] %v1942_v11  ;;  %v1946_v13 = vld [vmem:[%s17858_s21 + $0x1864] sm:$0xf]  ;;  %v1948_v14 = vld [vmem:[%s17858_s21 + $0x1868] sm:$0xf] }
 0x225   : >> { %1945 = vst [vmem:[%s17854_s24 + $0x1860] sm:$0xf] %v1944_v12  ;;  %1947 = vst [vmem:[%s17854_s24 + $0x1868] sm:$0xf] %v1946_v13  ;;  %v1950_v15 = vld [vmem:[%s17858_s21 + $0x186c] sm:$0xf] }
 0x226   : >> { %1949 = vst [vmem:[%s17854_s24 + $0x1870] sm:$0xf] %v1948_v14  ;;  %1951 = vst [vmem:[%s17854_s24 + $0x1878] sm:$0xf] %v1950_v15  ;;  %p1953_p11 = scmp.ge.s32.totalorder %s1952_s26, 2  ;;  %s380_s23 = sadd.s32 1, %s17866_s23  }
 0x227   : >> { %p377_p12 = scmp.ge.s32.totalorder %s380_s23, 2  }
 0x228   : >> { %s21866_s26 = smov (%p1953_p11, %s1952_s26), 0  ;;  %v19597_v16 = vld [vmem:[%s21831_s1 + $0x40] sm:$0xff] (%p377_p12)   ;;  %v19608_v18 = vld [vmem:[%s21831_s1 + $0x48] sm:$0xff] (%p377_p12)   ;;  %v19622_v20 = vld [vmem:[%s21831_s1 + $0x50] sm:$0xff] (%p377_p12)  }
 0x229   : >> { %s15089_s12 = sshll.u32 %s21866_s26, 4  ;;  %s15090_s13 = sshll.u32 %s21866_s26, 2  ;;  %v19602_v17 = vld [vmem:[%s21831_s1] sm:$0xff] (%p377_p12)   ;;  %15725 = vmatprep.subr.bf16.mxu1 (%p377_p12), %v19597_v16  ;;  %15673 = vmatprep.subr.bf16.mxu0 (%p377_p12), %v19597_v16  ;;  %v19615_v19 = vld [vmem:[%s21831_s1 + $0x8] sm:$0xff] (%p377_p12)   ;;  %v19629_v21 = vld [vmem:[%s21831_s1 + $0x10] sm:$0xff] (%p377_p12)  }
 0x22a   : >> { %s1957_s21 = scalar_lea.vmem %s21837_s7, %s15089_s12   ;;  %s1958_s24 = scalar_lea.vmem [#allocation2], %s15090_s13   ;;  %15726 = vmatpush3.bf16.msra.mxu1 (%p377_p12), %v19602_v17  ;;  %15674 = vmatpush3.bf16.msra.mxu0 (%p377_p12), %v19602_v17  ;;  %v19636_v22 = vld [vmem:[%s21831_s1 + $0x58] sm:$0xff] (%p377_p12)   ;;  %v19648_v24 = vld [vmem:[%s21831_s1 + $0x60] sm:$0xff] (%p377_p12)  }
 0x22b   : >> { %s21852_s19 = smov %s21866_s26  ;;  %379 = sbr.rel (!%p377_p12) target bundleno = 28 (0x1c), region = 201  ;;  %15727 = vmatprep.subr.bf16.mxu1 (%p377_p12), %v19608_v18  ;;  %15675 = vmatprep.subr.bf16.mxu0 (%p377_p12), %v19608_v18  ;;  %v19642_v23 = vld [vmem:[%s21831_s1 + $0x18] sm:$0xff] (%p377_p12)  }
 0x22e   : > { %15728 = vmatpush3.bf16.msra.mxu1 (%p377_p12), %v19615_v19  ;;  %15676 = vmatpush3.bf16.msra.mxu0 (%p377_p12), %v19615_v19 }
 0x22f   : > { %15729 = vmatprep.subr.bf16.mxu1 (%p377_p12), %v19622_v20  ;;  %15677 = vmatprep.subr.bf16.mxu0 (%p377_p12), %v19622_v20 }
 0x232   : > { %15730 = vmatpush3.bf16.msra.mxu1 %v19629_v21  ;;  %15678 = vmatpush3.bf16.msra.mxu0 %v19629_v21 }
 0x233   : > { %15731 = vmatprep.subr.bf16.mxu1 %v19636_v22 }
 0x234   : > { %6760 = vsyncadd [#allocation3], 100352  ;;  %15679 = vmatprep.subr.bf16.mxu0 %v19636_v22  ;;  %v19657_v25 = vld [vmem:[%s21831_s1 + $0x20] sm:$0xff]   ;;  %v19664_v26 = vld [vmem:[%s21831_s1 + $0x68] sm:$0xff]   ;;  %vm7377_vm0 = vcmask 261120   ;;  %vm11659_vm1 = vcmask 1043456  }
 0x235   : > { %v17349_v27 = vld [vmem:[%s17984_s16 + $0x5c] ss:$8 sps:$4 sm:$0xff]   ;;  %v19672_v28 = vld [vmem:[%s21831_s1 + $0x28] sm:$0xff]   ;;  %v19678_v29 = vld [vmem:[%s21831_s1 + $0x70] sm:$0xff]   ;;  %vm11660_vm2 = vsmask.f32 3328 }
 0x236   : > { %15732 = vmatpush3.bf16.msra.mxu1 %v19642_v23  ;;  %15680 = vmatpush3.bf16.msra.mxu0 %v19642_v23  ;;  %v17358_v30 = vld [vmem:[%s17984_s16 + $0x4] ss:$8 sps:$4 sm:$0xff]   ;;  %v19687_v31 = vld [vmem:[%s21831_s1 + $0x30] sm:$0xff]   ;;  %v19693_v32 = vld [vmem:[%s21831_s1 + $0x78] sm:$0xff]   ;;  %vm11690_vm3 = vsmask.f32 6400 }
 0x237   : > { %15733 = vmatprep.subr.bf16.mxu1 %v19648_v24  ;;  %15681 = vmatprep.subr.bf16.mxu0 %v19648_v24  ;;  %v19701_v33 = vld [vmem:[%s21831_s1 + $0x38] sm:$0xff]   ;;  %v17350_v35 = vld [vmem:[%s17984_s16 + $0x6c] ss:$8 sps:$4 sm:$0xff]   ;;  %v17356_v36 = vld [vmem:[%s17984_s16] ss:$8 sps:$4 sm:$0xff]   ;;  %vm11663_vm4 = vcmask 1046528  }
 0x238   : > { %7300 = vmatprep.mubr.bf16.mxu1 %v17349_v27  ;;  %7134 = vmatprep.mubr.bf16.mxu0 %v17358_v30  ;;  %v17347_v34 = vld [vmem:[%s17984_s16 + $0x58] ss:$8 sps:$4 sm:$0xff]   ;;  %v17362_v37 = vld [vmem:[%s17984_s16 + $0x14] ss:$8 sps:$4 sm:$0xff]   ;;  %v17352_v38 = vld [vmem:[%s17984_s16 + $0x68] ss:$8 sps:$4 sm:$0xff]  }
 0x239   : > { %v17353_v39 = vld [vmem:[%s17984_s16 + $0x7c] ss:$8 sps:$4 sm:$0xff]   ;;  %v17366_v40 = vld [vmem:[%s17984_s16 + $0x10] ss:$8 sps:$4 sm:$0xff]   ;;  %v17359_v43 = vld [vmem:[%s17984_s16 + $0x8c] ss:$8 sps:$4 sm:$0xff]  }
 0x23a   : > { %15734 = vmatpush3.bf16.msra.mxu1 %v19657_v25  ;;  %15682 = vmatpush3.bf16.msra.mxu0 %v19657_v25  ;;  %v17368_v41 = vld [vmem:[%s17984_s16 + $0x24] ss:$8 sps:$4 sm:$0xff]   ;;  %v17355_v42 = vld [vmem:[%s17984_s16 + $0x78] ss:$8 sps:$4 sm:$0xff]   ;;  %v17373_v45 = vld [vmem:[%s17984_s16 + $0x34] ss:$8 sps:$4 sm:$0xff]  }
 0x23b   : > { %15735 = vmatprep.subr.bf16.mxu1 %v19664_v26  ;;  %15683 = vmatprep.subr.bf16.mxu0 %v19664_v26  ;;  %v17371_v44 = vld [vmem:[%s17984_s16 + $0x20] ss:$8 sps:$4 sm:$0xff]   ;;  %v17364_v47 = vld [vmem:[%s17984_s16 + $0x9c] ss:$8 sps:$4 sm:$0xff]   ;;  %v17378_v48 = vld [vmem:[%s17984_s16 + $0x30] ss:$8 sps:$4 sm:$0xff]  }
 0x23c   : > { %v17361_v46 = vld [vmem:[%s17984_s16 + $0x88] ss:$8 sps:$4 sm:$0xff]   ;;  %v17379_v49 = vld [vmem:[%s17984_s16 + $0x44] ss:$8 sps:$4 sm:$0xff]   ;;  %v17367_v51 = vld [vmem:[%s17984_s16 + $0x98] ss:$8 sps:$4 sm:$0xff]  }
 0x23d   : > { %v15130_v50 = vld [vmem:[%s17984_s16 + $0xa8] sm:$0x11]  ;;  %v6942_v52 = vld [vmem:[%s17984_s16 + $0x50] sm:$0x11]  ;;  %v15169_v3 = vld [vmem:[%s17984_s16 + $0x100] sm:$0x11] }
 0x23e   : > { %15736 = vmatpush3.bf16.msra.mxu1 %v19672_v28  ;;  %15684 = vmatpush3.bf16.msra.mxu0 %v19672_v28  ;;  %v17383_v53 = vld [vmem:[%s17984_s16 + $0x40] ss:$8 sps:$4 sm:$0xff]   ;;  %v15142_v54 = vcombine.high %v15130_v50, %v15130_v50  ;;  %v15103_v55 = vcombine.high %v6942_v52, %v6942_v52  ;;  %v17377_v56 = vld [vmem:[%s17984_s16 + $0xb4] ss:$8 sps:$4 sm:$0xff]   ;;  %v15141_v57 = vcombine.low %v15130_v50, %v15130_v50  ;;  %v17375_v59 = vld [vmem:[%s17984_s16 + $0xb0] ss:$8 sps:$4 sm:$0xff]  }
 0x23f   : > { %15737 = vmatprep.subr.bf16.mxu1 %v19678_v29  ;;  %15685 = vmatprep.subr.bf16.mxu0 %v19678_v29  ;;  %v15102_v58 = vcombine.low %v6942_v52, %v6942_v52  ;;  %v17381_v60 = vld [vmem:[%s17984_s16 + $0xc4] ss:$8 sps:$4 sm:$0xff]   ;;  %v17384_v61 = vld [vmem:[%s17984_s16 + $0xc0] ss:$8 sps:$4 sm:$0xff]   ;;  %v17386_v62 = vld [vmem:[%s17984_s16 + $0xd4] ss:$8 sps:$4 sm:$0xff]   ;;  %v15181_v5 = vcombine.high %v15169_v3, %v15169_v3  ;;  %v15180_v7 = vcombine.low %v15169_v3, %v15169_v3 }
 0x240   : > { %v17389_v63 = vld [vmem:[%s17984_s16 + $0xd0] ss:$8 sps:$4 sm:$0xff]   ;;  %v17390_v0 = vld [vmem:[%s17984_s16 + $0xe4] ss:$8 sps:$4 sm:$0xff]   ;;  %v17392_v1 = vld [vmem:[%s17984_s16 + $0xe0] ss:$8 sps:$4 sm:$0xff]  }
 0x241   : > { %v17393_v2 = vld [vmem:[%s17984_s16 + $0xf4] ss:$8 sps:$4 sm:$0xff]   ;;  %v17395_v4 = vld [vmem:[%s17984_s16 + $0xf0] ss:$8 sps:$4 sm:$0xff]   ;;  %v17415_v27 = vld [vmem:[%s17984_s16 + $0x160] ss:$8 sps:$4 sm:$0xff]  }
 0x242   : > { %15738 = vmatpush3.bf16.msra.mxu1 %v19687_v31  ;;  %15686 = vmatpush3.bf16.msra.mxu0 %v19687_v31  ;;  %v17400_v6 = vld [vmem:[%s17984_s16 + $0x10c] ss:$8 sps:$4 sm:$0xff]   ;;  %v17398_v8 = vld [vmem:[%s17984_s16 + $0x108] ss:$8 sps:$4 sm:$0xff]   ;;  %v17401_v9 = vld [vmem:[%s17984_s16 + $0x11c] ss:$8 sps:$4 sm:$0xff]  }
 0x243   : > { %15739 = vmatprep.subr.bf16.mxu1 %v19693_v32  ;;  %15687 = vmatprep.subr.bf16.mxu0 %v19693_v32  ;;  %v17432_v10 = vld [vmem:[%s21833_s3 + $0x10] sm:$0xff]   ;;  %v17433_v11 = vld [vmem:[%s21833_s3 + $0x18] sm:$0xff]   ;;  %vm21107_vm5 = vmand %vm11659_vm1, %vm11660_vm2  ;;  %vm11796_vm6 = vsmask.f32 7424  ;;  %vm11653_vm7 = vcmask 1042432   ;;  %s17868_s21 = smov 64  }
 0x244   : > { %v17403_v12 = vld [vmem:[%s17984_s16 + $0x118] ss:$8 sps:$4 sm:$0xff]   ;;  %v17404_v13 = vld [vmem:[%s17984_s16 + $0x12c] ss:$8 sps:$4 sm:$0xff]   ;;  %v17406_v14 = vld [vmem:[%s17984_s16 + $0x128] ss:$8 sps:$4 sm:$0xff]  }
 0x245   : > { %v17407_v15 = vld [vmem:[%s17984_s16 + $0x13c] ss:$8 sps:$4 sm:$0xff]   ;;  %vm11667_vm8 = vsmask.f32 2304  ;;  %vm11675_vm9 = vsmask.f32 1280 }
 0x246   : > { %15740 = vmatpush3.bf16.msra.mxu1 %v19701_v33  ;;  %15688 = vmatpush3.bf16.msra.mxu0 %v19701_v33  ;;  %v17418_v30 = vld [vmem:[%s17984_s16 + $0x174] ss:$8 sps:$4 sm:$0xff]   ;;  %vm11706_vm10 = vsmask.f32 4352  ;;  %vm11670_vm11 = vcmask 1045504   ;;  %vm11674_vm12 = vcmask 1041408   ;;  %vm21186_vm13 = vmand %vm11653_vm7, %vm11667_vm8 }
 0x247   : > { %15793 = vmatprep.subr.bf16.mxu1 %v19597_v16  ;;  %16765 = vmatprep.subr.bf16.mxu0 %v17432_v10  ;;  %vm11868_vm14 = vsmask.f32 256  ;;  %vm11645_vm15 = vcmask 1044480  }
 0x249   : > { %7301 = vmatmul.mubr.bf16.vlgmr.msra.gmra.mrb[0].mxu1 %v17347_v34  ;;  %7135 = vmatmul.mubr.bf16.vlgmr.msra.gmra.mrb[0].mxu0 %v17356_v36  ;;  %v19822_v34 = vld [vmem:[%s21831_s1] sm:$0xff]   ;;  %v17420_v36 = vld [vmem:[%s17984_s16 + $0x170] ss:$8 sps:$4 sm:$0xff]  }
 0x24a   : > { %15794 = vmatpush3.bf16.msra.mxu1 %v19602_v17  ;;  %7308 = vmatprep.mubr.bf16.mxu1 %v17350_v35  ;;  %v19828_v35 = vld [vmem:[%s21831_s1 + $0x48] sm:$0xff]  }
 0x24b   : > { %15795 = vmatprep.subr.bf16.mxu1 %v19608_v18  ;;  %7142 = vmatprep.mubr.bf16.mxu0 %v17362_v37  ;;  %v17421_v37 = vld [vmem:[%s17984_s16 + $0x184] ss:$8 sps:$4 sm:$0xff]  }
 0x24c   : > { %16766 = vmatpush3.bf16.msra.mxu0 %v17432_v10 }
 0x24d   : > { %16767 = vmatprep.subr.bf16.mxu0 %v17433_v11 }
 0x24e   : > { %15796 = vmatpush3.bf16.msra.mxu1 %v19615_v19 }
 0x24f   : > { %15797 = vmatprep.subr.bf16.mxu1 %v19622_v20 }
 0x250   : > { %16768 = vmatpush3.bf16.msra.mxu0 %v17433_v11 }
 0x251   : > { %7309 = vmatmul.mubr.bf16.gmra.mrb[4].mxu1 %v17352_v38  ;;  %7143 = vmatmul.mubr.bf16.gmra.mrb[4].mxu0 %v17366_v40  ;;  %v19836_v38 = vld [vmem:[%s21831_s1 + $0x8] sm:$0xff]   ;;  %v19848_v40 = vld [vmem:[%s21831_s1 + $0x10] sm:$0xff]  }
 0x252   : > { %15798 = vmatpush3.bf16.msra.mxu1 %v19629_v21  ;;  %7316 = vmatprep.mubr.bf16.mxu1 %v17353_v39  ;;  %v19842_v39 = vld [vmem:[%s21831_s1 + $0x50] sm:$0xff]  }
 0x253   : > { %15799 = vmatprep.subr.bf16.mxu1 %v19636_v22  ;;  %7150 = vmatprep.mubr.bf16.mxu0 %v17368_v41  ;;  %v19854_v41 = vld [vmem:[%s21831_s1 + $0x58] sm:$0xff]  }
 0x256   : > { %15800 = vmatpush3.bf16.msra.mxu1 %v19642_v23 }
 0x257   : > { %15801 = vmatprep.subr.bf16.mxu1 %v19648_v24 }
 0x259   : > { %7317 = vmatmul.mubr.bf16.gmra.mrb[8].mxu1 %v17355_v42  ;;  %7151 = vmatmul.mubr.bf16.gmra.mrb[8].mxu0 %v17371_v44  ;;  %v17423_v42 = vld [vmem:[%s17984_s16 + $0x180] ss:$8 sps:$4 sm:$0xff]   ;;  %v19862_v44 = vld [vmem:[%s21831_s1 + $0x18] sm:$0xff]  }
 0x25a   : > { %7324 = vmatprep.mubr.bf16.mxu1 %v17359_v43  ;;  %15802 = vmatpush3.bf16.msra.mxu1 %v19657_v25  ;;  %v17424_v43 = vld [vmem:[%s17984_s16 + $0x194] ss:$8 sps:$4 sm:$0xff]  }
 0x25b   : > { %15803 = vmatprep.subr.bf16.mxu1 %v19664_v26  ;;  %7158 = vmatprep.mubr.bf16.mxu0 %v17373_v45  ;;  %v19868_v45 = vld [vmem:[%s21831_s1 + $0x60] sm:$0xff]  }
 0x25e   : > { %15804 = vmatpush3.bf16.msra.mxu1 %v19672_v28 }
 0x25f   : > { %15805 = vmatprep.subr.bf16.mxu1 %v19678_v29 }
 0x261   : > { %7325 = vmatmul.mubr.bf16.gmra.mrb[12].mxu1 %v17361_v46  ;;  %7159 = vmatmul.mubr.bf16.gmra.mrb[12].mxu0 %v17378_v48  ;;  %v17426_v46 = vld [vmem:[%s17984_s16 + $0x190] ss:$8 sps:$4 sm:$0xff]  }
 0x262   : > { %7332 = vmatprep.mubr.bf16.mxu1 %v17364_v47  ;;  %15806 = vmatpush3.bf16.msra.mxu1 %v19687_v31  ;;  %v17427_v47 = vld [vmem:[%s17984_s16 + $0x1a4] ss:$8 sps:$4 sm:$0xff]   ;;  %v15231_v48 = vld [vmem:[%s17984_s16 + $0x1b0] sm:$0x11] }
 0x263   : > { %15807 = vmatprep.subr.bf16.mxu1 %v19693_v32  ;;  %7166 = vmatprep.mubr.bf16.mxu0 %v17379_v49  ;;  %v17429_v49 = vld [vmem:[%s17984_s16 + $0x1a0] ss:$8 sps:$4 sm:$0xff]   ;;  %v15243_v50 = vcombine.high %v15231_v48, %v15231_v48 }
 0x266   : > { %15808 = vmatpush3.bf16.msra.mxu1 %v19701_v33 }
 0x267   : > { %15853 = vmatprep.subr.bf16.mxu1 %v19597_v16 }
 0x269   : > { %7333 = vmatmul.mubr.bf16.gmra.mrb[16].mxu1 %v17367_v51  ;;  %7167 = vmatmul.mubr.bf16.gmra.mrb[16].mxu0 %v17383_v53 }
 0x26a   : > { %7340 = vmatprep.mubr.bf16.mxu1 %v15142_v54  ;;  %7174 = vmatprep.mubr.bf16.mxu0 %v15103_v55 }
 0x271   : > { %7341 = vmatmul.mubr.bf16.gmra.mrb[20].mxu1 %v15141_v57  ;;  %7175 = vmatmul.mubr.bf16.gmra.mrb[20].mxu0 %v15102_v58 }
 0x272   : > { %7687 = vmatprep.mubr.bf16.mxu1 %v17377_v56 }
 0x279   : > { %7688 = vmatmul.mubr.bf16.vlgmr.msra.gmra.mrb[24].mxu1 %v17375_v59 }
 0x27a   : > { %15854 = vmatpush3.bf16.msra.mxu1 %v19602_v17  ;;  %7695 = vmatprep.mubr.bf16.mxu1 %v17381_v60 }
 0x27b   : > { %15855 = vmatprep.subr.bf16.mxu1 %v19608_v18 }
 0x27e   : > { %15856 = vmatpush3.bf16.msra.mxu1 %v19615_v19 }
 0x27f   : > { %15857 = vmatprep.subr.bf16.mxu1 %v19622_v20 }
 0x281   : > { %7696 = vmatmul.mubr.bf16.gmra.mrb[28].mxu1 %v17384_v61 }
 0x282   : > { %15858 = vmatpush3.bf16.msra.mxu1 %v19629_v21  ;;  %7703 = vmatprep.mubr.bf16.mxu1 %v17386_v62 }
 0x283   : > { %15859 = vmatprep.subr.bf16.mxu1 %v19636_v22 }
 0x286   : > { %15860 = vmatpush3.bf16.msra.mxu1 %v19642_v23 }
 0x287   : > { %15861 = vmatprep.subr.bf16.mxu1 %v19648_v24 }
 0x289   : > { %7704 = vmatmul.mubr.bf16.gmra.mrb[32].mxu1 %v17389_v63 }
 0x28a   : > { %7711 = vmatprep.mubr.bf16.mxu1 %v17390_v0  ;;  %15862 = vmatpush3.bf16.msra.mxu1 %v19657_v25 }
 0x28b   : > { %15863 = vmatprep.subr.bf16.mxu1 %v19664_v26 }
 0x28e   : > { %15864 = vmatpush3.bf16.msra.mxu1 %v19672_v28 }
 0x28f   : > { %15865 = vmatprep.subr.bf16.mxu1 %v19678_v29 }
 0x291   : > { %7712 = vmatmul.mubr.bf16.gmra.mrb[36].mxu1 %v17392_v1 }
 0x292   : > { %7719 = vmatprep.mubr.bf16.mxu1 %v17393_v2  ;;  %15866 = vmatpush3.bf16.msra.mxu1 %v19687_v31 }
 0x293   : > { %15867 = vmatprep.subr.bf16.mxu1 %v19693_v32 }
 0x296   : > { %15868 = vmatpush3.bf16.msra.mxu1 %v19701_v33 }
 0x297   : > { %15913 = vmatprep.subr.bf16.mxu1 %v19597_v16  ;;  %v17409_v16 = vld [vmem:[%s17984_s16 + $0x138] ss:$8 sps:$4 sm:$0xff]  }
 0x299   : > { %7720 = vmatmul.mubr.bf16.gmra.mrb[40].mxu1 %v17395_v4 }
 0x29a   : > { %7727 = vmatprep.mubr.bf16.mxu1 %v15181_v5 }
 0x2a1   : > { %7728 = vmatmul.mubr.bf16.gmra.mrb[44].mxu1 %v15180_v7 }
 0x2a2   : > { %7974 = vmatprep.mubr.bf16.mxu1 %v17400_v6 }
 0x2a9   : > { %7975 = vmatmul.mubr.bf16.vlgmr.msra.gmra.mrb[48].mxu1 %v17398_v8 }
 0x2aa   : > { %15914 = vmatpush3.bf16.msra.mxu1 %v19602_v17  ;;  %7982 = vmatprep.mubr.bf16.mxu1 %v17401_v9  ;;  %v17410_v17 = vld [vmem:[%s17984_s16 + $0x14c] ss:$8 sps:$4 sm:$0xff]  }
 0x2ab   : > { %15915 = vmatprep.subr.bf16.mxu1 %v19608_v18  ;;  %v15200_v18 = vld [vmem:[%s17984_s16 + $0x158] sm:$0x11] }
 0x2ae   : > { %15916 = vmatpush3.bf16.msra.mxu1 %v19615_v19  ;;  %v17412_v19 = vld [vmem:[%s17984_s16 + $0x148] ss:$8 sps:$4 sm:$0xff]  }
 0x2af   : > { %15917 = vmatprep.subr.bf16.mxu1 %v19622_v20  ;;  %v15212_v20 = vcombine.high %v15200_v18, %v15200_v18 }
 0x2b1   : > { %7983 = vmatmul.mubr.bf16.gmra.mrb[52].mxu1 %v17403_v12 }
 0x2b2   : > { %15918 = vmatpush3.bf16.msra.mxu1 %v19629_v21  ;;  %7990 = vmatprep.mubr.bf16.mxu1 %v17404_v13  ;;  %v19807_v21 = vld [vmem:[%s21831_s1 + $0x40] sm:$0xff]  }
 0x2b3   : > { %15919 = vmatprep.subr.bf16.mxu1 %v19636_v22  ;;  %v19813_v22 = vld [vmem:[%s21833_s3] sm:$0xff]  }
 0x2b4   : > { %16781 = vmatprep.subr.bf16.mxu0 %v19813_v22 }
 0x2b6   : > { %15920 = vmatpush3.bf16.msra.mxu1 %v19642_v23  ;;  %v15211_v23 = vcombine.low %v15200_v18, %v15200_v18 }
 0x2b7   : > { %15921 = vmatprep.subr.bf16.mxu1 %v19648_v24  ;;  %v17417_v24 = vld [vmem:[%s17984_s16 + $0x164] ss:$8 sps:$4 sm:$0xff]  }
 0x2b9   : > { %7991 = vmatmul.mubr.bf16.gmra.mrb[56].mxu1 %v17406_v14 }
 0x2ba   : > { %7998 = vmatprep.mubr.bf16.mxu1 %v17407_v15  ;;  %15922 = vmatpush3.bf16.msra.mxu1 %v19657_v25 }
 0x2bb   : > { %15923 = vmatprep.subr.bf16.mxu1 %v19664_v26 }
 0x2be   : > { %15924 = vmatpush3.bf16.msra.mxu1 %v19672_v28 }
 0x2bf   : > { %15925 = vmatprep.subr.bf16.mxu1 %v19678_v29 }
 0x2c1   : > { %7999 = vmatmul.mubr.bf16.gmra.mrb[60].mxu1 %v17409_v16 }
 0x2c2   : > { %8006 = vmatprep.mubr.bf16.mxu1 %v17410_v17  ;;  %15926 = vmatpush3.bf16.msra.mxu1 %v19687_v31 }
 0x2c3   : > { %15927 = vmatprep.subr.bf16.mxu1 %v19693_v32 }
 0x2c6   : > { %15928 = vmatpush3.bf16.msra.mxu1 %v19701_v33 }
 0x2c7   : > { %16033 = vmatprep.subr.bf16.mxu1 %v19807_v21 }
 0x2c9   : > { %8007 = vmatmul.mubr.bf16.gmra.mrb[64].mxu1 %v17412_v19 }
 0x2ca   : > { %8014 = vmatprep.mubr.bf16.mxu1 %v15212_v20 }
 0x2d1   : > { %8015 = vmatmul.mubr.bf16.gmra.mrb[68].mxu1 %v15211_v23 }
 0x2d2   : > { %8261 = vmatprep.mubr.bf16.mxu1 %v17417_v24 }
 0x2d9   : > { %8262 = vmatmul.mubr.bf16.vlgmr.msra.gmra.mrb[72].mxu1 %v17415_v27 }
 0x2da   : > { %8269 = vmatprep.mubr.bf16.mxu1 %v17418_v30  ;;  %16034 = vmatpush3.bf16.msra.mxu1 %v19822_v34 }
 0x2db   : > { %16035 = vmatprep.subr.bf16.mxu1 %v19828_v35 }
 0x2de   : > { %16036 = vmatpush3.bf16.msra.mxu1 %v19836_v38 }
 0x2df   : > { %16037 = vmatprep.subr.bf16.mxu1 %v19842_v39 }
 0x2e1   : > { %8270 = vmatmul.mubr.bf16.gmra.mrb[76].mxu1 %v17420_v36 }
 0x2e2   : > { %8277 = vmatprep.mubr.bf16.mxu1 %v17421_v37  ;;  %16038 = vmatpush3.bf16.msra.mxu1 %v19848_v40 }
 0x2e3   : > { %16039 = vmatprep.subr.bf16.mxu1 %v19854_v41 }
 0x2e6   : > { %16040 = vmatpush3.bf16.msra.mxu1 %v19862_v44 }
 0x2e7   : > { %16041 = vmatprep.subr.bf16.mxu1 %v19868_v45 }
 0x2e9   : > { %8278 = vmatmul.mubr.bf16.gmra.mrb[80].mxu1 %v17423_v42 }
 0x2ea   : > { %8285 = vmatprep.mubr.bf16.mxu1 %v17424_v43  ;;  %16042 = vmatpush3.bf16.msra.mxu1 %v19657_v25  ;;  %v15242_v25 = vcombine.low %v15231_v48, %v15231_v48 }
 0x2eb   : > { %16043 = vmatprep.subr.bf16.mxu1 %v19664_v26 }
 0x2ee   : > { %16044 = vmatpush3.bf16.msra.mxu1 %v19672_v28  ;;  %v19886_v28 = vld [vmem:[%s21832_s2] ss:$0 sm:$0xff] }
 0x2ef   : > { %16045 = vmatprep.subr.bf16.mxu1 %v19678_v29 }
 0x2f1   : > { %8286 = vmatmul.mubr.bf16.gmra.mrb[84].mxu1 %v17426_v46 }
 0x2f2   : > { %8293 = vmatprep.mubr.bf16.mxu1 %v17427_v47  ;;  %16046 = vmatpush3.bf16.msra.mxu1 %v19687_v31  ;;  %v17435_v47 = vld [vmem:[%s21833_s3 + $0x8] sm:$0xff]  }
 0x2f3   : > { %16047 = vmatprep.subr.bf16.mxu1 %v19693_v32 }
 0x2f6   : > { %16048 = vmatpush3.bf16.msra.mxu1 %v19701_v33 }
 0x2f7   : > { %16093 = vmatprep.subr.bf16.mxu1 %v19807_v21 }
 0x2f9   : > { %8294 = vmatmul.mubr.bf16.gmra.mrb[88].mxu1 %v17429_v49 }
 0x2fa   : > { %8301 = vmatprep.mubr.bf16.mxu1 %v15243_v50 }
 0x301   : > { %8302 = vmatmul.mubr.bf16.gmra.mrb[92].mxu1 %v15242_v25 }
 0x31c   : > { %v15741_v26 = vpop.f32.mrb[0].mxu1  ;;  %v15689_v32 = vpop.f32.mrb[0].mxu0 }
 0x31d   : > { %v15742_v29 = vpop.f32.mrb[1].mxu1  ;;  %v15690_v53 = vpop.f32.mrb[1].mxu0 }
 0x31e   : > { %v15743_v31 = vadd.f32 %v15742_v29, %v15741_v26  ;;  %v15744_v51 = vpop.f32.mrb[2].mxu1  ;;  %v15691_v55 = vadd.f32 %v15690_v53, %v15689_v32  ;;  %v15692_v56 = vpop.f32.mrb[2].mxu0 }
 0x31f   : > { %v15745_v52 = vpop.f32.mrb[3].mxu1  ;;  %v15693_v57 = vpop.f32.mrb[3].mxu0 }
 0x320   : > { %v7303_v33 = vadd.f32 %v15743_v31, %v19886_v28  ;;  %v15746_v54 = vadd.f32 %v15745_v52, %v15744_v51  ;;  %v7137_v59 = vadd.f32 %v15691_v55, %v19886_v28  ;;  %v15694_v60 = vadd.f32 %v15693_v57, %v15692_v56 }
 0x322   : > { %v7306_v58 = vadd.f32 %v15746_v54, %v19886_v28  ;;  %v7348_v61 = vmax.f32 %v7303_v33, 0.0  ;;  %v7182_v0 = vmax.f32 %v7137_v59, 0.0  ;;  %v7140_v1 = vadd.f32 %v15694_v60, %v19886_v28  ;;  %v19912_v33 = vld [vmem:[%s21833_s3 + $0x20] sm:$0xff]  }
 0x324   : > { %v7349_v62 = vmax.f32 %v7306_v58, 0.0  ;;  %v15747_v63 = vpop.f32.mrb[4].mxu1  ;;  %v7183_v6 = vmax.f32 %v7140_v1, 0.0  ;;  %v15695_v7 = vpop.f32.mrb[4].mxu0 }
 0x325   : > { %v15748_v2 = vpop.f32.mrb[5].mxu1  ;;  %v15696_v9 = vpop.f32.mrb[5].mxu0 }
 0x326   : > { %v15749_v3 = vadd.f32 %v15748_v2, %v15747_v63  ;;  %v15750_v4 = vpop.f32.mrb[6].mxu1  ;;  %v7359_v5 = vpack.c.bf16 %v7349_v62, %v7348_v61  ;;  %v19894_v12 = vpack.c.bf16 %v7183_v6, %v7182_v0  ;;  %v15697_v13 = vadd.f32 %v15696_v9, %v15695_v7  ;;  %v15698_v14 = vpop.f32.mrb[6].mxu0 }
 0x327   : > { %v15751_v8 = vpop.f32.mrb[7].mxu1  ;;  %v15699_v15 = vpop.f32.mrb[7].mxu0 }
 0x328   : > { %v7311_v10 = vadd.f32 %v15749_v3, %v19886_v28  ;;  %v15752_v11 = vadd.f32 %v15751_v8, %v15750_v4  ;;  %16769 = vmatprep.mubr.msk.bf16.mxu0 %vm7377_vm0, %v7359_v5  ;;  %v7145_v17 = vadd.f32 %v15697_v13, %v19886_v28  ;;  %v15700_v18 = vadd.f32 %v15699_v15, %v15698_v14 }
 0x32a   : > { %v7314_v16 = vadd.f32 %v15752_v11, %v19886_v28  ;;  %v7350_v19 = vmax.f32 %v7311_v10, 0.0  ;;  %v7184_v24 = vmax.f32 %v7145_v17, 0.0  ;;  %v7148_v27 = vadd.f32 %v15700_v18, %v19886_v28 }
 0x32c   : > { %v7351_v20 = vmax.f32 %v7314_v16, 0.0  ;;  %v15753_v23 = vpop.f32.mrb[8].mxu1  ;;  %v7185_v43 = vmax.f32 %v7148_v27, 0.0  ;;  %v15701_v46 = vpop.f32.mrb[8].mxu0 }
 0x32d   : > { %v15754_v30 = vpop.f32.mrb[9].mxu1  ;;  %v15702_v49 = vpop.f32.mrb[9].mxu0 }
 0x32e   : > { %v7360_v36 = vpack.c.bf16 %v7351_v20, %v7350_v19  ;;  %v15755_v37 = vadd.f32 %v15754_v30, %v15753_v23  ;;  %v15756_v42 = vpop.f32.mrb[10].mxu1  ;;  %v19904_v26 = vpack.c.bf16 %v7185_v43, %v7184_v24  ;;  %v15703_v29 = vadd.f32 %v15702_v49, %v15701_v46  ;;  %v15704_v31 = vpop.f32.mrb[10].mxu0 }
 0x32f   : > { %v15757_v48 = vpop.f32.mrb[11].mxu1  ;;  %v15705_v51 = vpop.f32.mrb[11].mxu0 }
 0x330   : > { %v7319_v50 = vadd.f32 %v15755_v37, %v19886_v28  ;;  %v15758_v25 = vadd.f32 %v15757_v48, %v15756_v42  ;;  %16770 = vmatmul.mubr.msk.bf16.vlgmr.msra.gmra.mrb[24].mxu0 %vm7377_vm0, %v7360_v36  ;;  %v7153_v52 = vadd.f32 %v15703_v29, %v19886_v28  ;;  %v15706_v53 = vadd.f32 %v15705_v51, %v15704_v31 }
 0x331   : > { %16782 = vmatpush3.bf16.msra.mxu0 %v19813_v22 }
 0x332   : > { %v7322_v32 = vadd.f32 %v15758_v25, %v19886_v28  ;;  %16783 = vmatprep.subr.bf16.mxu0 %v17435_v47  ;;  %v7352_v54 = vmax.f32 %v7319_v50, 0.0  ;;  %v7186_v57 = vmax.f32 %v7153_v52, 0.0  ;;  %v7156_v58 = vadd.f32 %v15706_v53, %v19886_v28 }
 0x334   : > { %v7353_v55 = vmax.f32 %v7322_v32, 0.0  ;;  %v15759_v56 = vpop.f32.mrb[12].mxu1  ;;  %v7187_v62 = vmax.f32 %v7156_v58, 0.0  ;;  %v15707_v63 = vpop.f32.mrb[12].mxu0 }
 0x335   : > { %v15760_v59 = vpop.f32.mrb[13].mxu1  ;;  %16784 = vmatpush3.bf16.msra.mxu0 %v17435_v47  ;;  %v15708_v1 = vpop.f32.mrb[13].mxu0 }
 0x336   : > { %v15761_v22 = vadd.f32 %v15760_v59, %v15759_v56  ;;  %v15762_v60 = vpop.f32.mrb[14].mxu1  ;;  %v7361_v61 = vpack.c.bf16 %v7353_v55, %v7352_v54  ;;  %16797 = vmatprep.subr.bf16.mxu0 %v19912_v33  ;;  %v19918_v4 = vpack.c.bf16 %v7187_v62, %v7186_v57  ;;  %v15709_v5 = vadd.f32 %v15708_v1, %v15707_v63  ;;  %v15710_v6 = vpop.f32.mrb[14].mxu0  ;;  %v17444_v1 = vld [vmem:[%s17984_s16 + $0x214] ss:$8 sps:$4 sm:$0xff]  }
 0x337   : > { %v15763_v0 = vpop.f32.mrb[15].mxu1  ;;  %v15711_v7 = vpop.f32.mrb[15].mxu0  ;;  %8835 = vmatprep.mubr.bf16.mxu1 %v17444_v1 }
 0x338   : > { %v7327_v2 = vadd.f32 %v15761_v22, %v19886_v28  ;;  %v15764_v3 = vadd.f32 %v15763_v0, %v15762_v60  ;;  %16773 = vmatprep.mubr.msk.bf16.mxu0 %vm7377_vm0, %v7361_v61  ;;  %v7161_v9 = vadd.f32 %v15709_v5, %v19886_v28  ;;  %v15712_v10 = vadd.f32 %v15711_v7, %v15710_v6  ;;  %v17442_v5 = vld [vmem:[%s17984_s16 + $0x210] ss:$8 sps:$4 sm:$0xff]  }
 0x339   : > { %8836 = vmatmul.mubr.bf16.vlgmr.msra.gmra.mrb[96].mxu1 %v17442_v5 }
 0x33a   : > { %v7330_v8 = vadd.f32 %v15764_v3, %v19886_v28  ;;  %v7354_v11 = vmax.f32 %v7327_v2, 0.0  ;;  %v7188_v15 = vmax.f32 %v7161_v9, 0.0  ;;  %v7164_v16 = vadd.f32 %v15712_v10, %v19886_v28  ;;  %16094 = vmatpush3.bf16.msra.mxu1 %v19822_v34 }
 0x33b   : > { %16095 = vmatprep.subr.bf16.mxu1 %v19828_v35 }
 0x33c   : > { %v7355_v13 = vmax.f32 %v7330_v8, 0.0  ;;  %v15765_v14 = vpop.f32.mrb[16].mxu1  ;;  %v7189_v23 = vmax.f32 %v7164_v16, 0.0  ;;  %v15713_v24 = vpop.f32.mrb[16].mxu0 }
 0x33d   : > { %v15766_v17 = vpop.f32.mrb[17].mxu1  ;;  %v15714_v30 = vpop.f32.mrb[17].mxu0 }
 0x33e   : > { %v15767_v18 = vadd.f32 %v15766_v17, %v15765_v14  ;;  %v15768_v19 = vpop.f32.mrb[18].mxu1  ;;  %v7362_v20 = vpack.c.bf16 %v7355_v13, %v7354_v11  ;;  %v19925_v42 = vpack.c.bf16 %v7189_v23, %v7188_v15  ;;  %v15715_v43 = vadd.f32 %v15714_v30, %v15713_v24  ;;  %v15716_v46 = vpop.f32.mrb[18].mxu0  ;;  %v17445_v14 = vld [vmem:[%s17984_s16 + $0x224] ss:$8 sps:$4 sm:$0xff]   ;;  %16096 = vmatpush3.bf16.msra.mxu1 %v19836_v38 }
 0x33f   : > { %v15769_v27 = vpop.f32.mrb[19].mxu1  ;;  %v15717_v47 = vpop.f32.mrb[19].mxu0  ;;  %16097 = vmatprep.subr.bf16.mxu1 %v19842_v39  ;;  %8843 = vmatprep.mubr.bf16.mxu1 %v17445_v14  ;;  %v17439_v14 = vld [vmem:[%s21833_s3 + $0x38] sm:$0xff]  }
 0x340   : > { %v7335_v36 = vadd.f32 %v15767_v18, %v19886_v28  ;;  %v15770_v37 = vadd.f32 %v15769_v27, %v15768_v19  ;;  %16774 = vmatmul.mubr.msk.bf16.gmra.mrb[28].mxu0 %vm7377_vm0, %v7362_v20  ;;  %v7169_v49 = vadd.f32 %v15715_v43, %v19886_v28  ;;  %v15718_v50 = vadd.f32 %v15717_v47, %v15716_v46  ;;  %v17437_v18 = vld [vmem:[%s21833_s3 + $0x28] sm:$0xff]   ;;  %v17448_v43 = vld [vmem:[%s17984_s16 + $0x234] ss:$8 sps:$4 sm:$0xff]  }
 0x342   : > { %v7338_v48 = vadd.f32 %v15770_v37, %v19886_v28  ;;  %v7356_v25 = vmax.f32 %v7335_v36, 0.0  ;;  %v7190_v51 = vmax.f32 %v7169_v49, 0.0  ;;  %v7172_v32 = vadd.f32 %v15718_v50, %v19886_v28  ;;  %v19959_v37 = vld [vmem:[%s21833_s3 + $0x30] sm:$0xff]   ;;  %16098 = vmatpush3.bf16.msra.mxu1 %v19848_v40 }
 0x343   : > { %16099 = vmatprep.subr.bf16.mxu1 %v19854_v41 }
 0x344   : > { %v7357_v29 = vmax.f32 %v7338_v48, 0.0  ;;  %v15771_v31 = vpop.f32.mrb[20].mxu1  ;;  %v7191_v56 = vmax.f32 %v7172_v32, 0.0  ;;  %v15719_v57 = vpop.f32.mrb[20].mxu0  ;;  %v17450_v48 = vld [vmem:[%s17984_s16 + $0x230] ss:$8 sps:$4 sm:$0xff]  }
 0x345   : > { %v15772_v52 = vpop.f32.mrb[21].mxu1  ;;  %v15720_v59 = vpop.f32.mrb[21].mxu0  ;;  %v17454_v32 = vld [vmem:[%s17984_s16 + $0x244] ss:$8 sps:$4 sm:$0xff]  }
 0x346   : > { %v15773_v53 = vadd.f32 %v15772_v52, %v15771_v31  ;;  %v15774_v54 = vpop.f32.mrb[22].mxu1  ;;  %v7363_v55 = vpack.c.bf16 %v7357_v29, %v7356_v25  ;;  %v19932_v60 = vpack.c.bf16 %v7191_v56, %v7190_v51  ;;  %v15721_v61 = vadd.f32 %v15720_v59, %v15719_v57  ;;  %v15722_v62 = vpop.f32.mrb[22].mxu0  ;;  %16100 = vmatpush3.bf16.msra.mxu1 %v19862_v44 }
 0x347   : > { %v15775_v58 = vpop.f32.mrb[23].mxu1  ;;  %v15723_v63 = vpop.f32.mrb[23].mxu0  ;;  %16101 = vmatprep.subr.bf16.mxu1 %v19868_v45  ;;  %v19979_v54 = vld [vmem:[%s21831_s1 + $0x20] sm:$0xff]   ;;  %v19999_v62 = vld [vmem:[%s21831_s1 + $0x70] sm:$0xff]  }
 0x348   : > { %v7343_v22 = vadd.f32 %v15773_v53, %v19886_v28  ;;  %16777 = vmatprep.mubr.msk.bf16.mxu0 %vm7377_vm0, %v7363_v55 }
 0x34a   : > { %v7358_v0 = vmax.f32 %v7343_v22, 0.0  ;;  %16102 = vmatpush3.bf16.msra.mxu1 %v19979_v54  ;;  %v17456_v22 = vld [vmem:[%s17984_s16 + $0x240] ss:$8 sps:$4 sm:$0xff]  }
 0x34c   : > { %v7364_v2 = vpack.c.bf16 %v7358_v0, %v7358_v0  ;;  %v15809_v3 = vpop.f32.mrb[24].mxu1 }
 0x34d   : > { %v15810_v6 = vpop.f32.mrb[25].mxu1 }
 0x34e   : > { %v15811_v7 = vadd.f32 %v15810_v6, %v15809_v3  ;;  %16778 = vmatmul.mubr.msk.bf16.gmra.mrb[32].mxu0 %vm7377_vm0, %v7364_v2  ;;  %v15812_v8 = vpop.f32.mrb[26].mxu1  ;;  %v17459_v3 = vld [vmem:[%s17984_s16 + $0x254] ss:$8 sps:$4 sm:$0xff]  }
 0x34f   : > { %v15813_v9 = vpop.f32.mrb[27].mxu1  ;;  %16785 = vmatprep.mubr.msk.bf16.mxu0 %vm7377_vm0, %v19894_v12  ;;  %v17447_v12 = vld [vmem:[%s17984_s16 + $0x220] ss:$8 sps:$4 sm:$0xff]  }
 0x350   : > { %v7690_v10 = vadd.f32 %v15811_v7, %v19886_v28  ;;  %v15814_v11 = vadd.f32 %v15813_v9, %v15812_v8  ;;  %8844 = vmatmul.mubr.bf16.gmra.mrb[100].mxu1 %v17447_v12  ;;  %v20009_v7 = vld [vmem:[%s21831_s1 + $0x30] sm:$0xff]   ;;  %v20015_v8 = vld [vmem:[%s21831_s1 + $0x78] sm:$0xff]  }
 0x351   : > { %8851 = vmatprep.mubr.bf16.mxu1 %v17448_v43 }
 0x352   : > { %v7693_v13 = vadd.f32 %v15814_v11, %v19886_v28  ;;  %v7735_v15 = vmax.f32 %v7690_v10, 0.0 }
 0x354   : > { %v7736_v16 = vmax.f32 %v7693_v13, 0.0  ;;  %v15815_v17 = vpop.f32.mrb[28].mxu1 }
 0x355   : > { %v15816_v19 = vpop.f32.mrb[29].mxu1 }
 0x356   : > { %v15817_v20 = vadd.f32 %v15816_v19, %v15815_v17  ;;  %16786 = vmatmul.mubr.msk.bf16.vlgmr.msra.gmra.mrb[24].mxu0 %vm7377_vm0, %v19904_v26  ;;  %v15818_v23 = vpop.f32.mrb[30].mxu1  ;;  %v7746_v24 = vpack.c.bf16 %v7736_v16, %v7735_v15  ;;  %v17462_v15 = vld [vmem:[%s17984_s16 + $0x250] ss:$8 sps:$4 sm:$0xff]  }
 0x357   : > { %v15819_v27 = vpop.f32.mrb[31].mxu1  ;;  %16789 = vmatprep.mubr.msk.bf16.mxu0 %vm7377_vm0, %v19918_v4  ;;  %16798 = vmatpush3.bf16.msra.mxu0 %v19912_v33  ;;  %v7177_v4 = vadd.f32 %v15721_v61, %v19886_v28  ;;  %v20026_v16 = vld [vmem:[%s21831_s1 + $0x38] sm:$0xff]  }
 0x358   : > { %v7698_v30 = vadd.f32 %v15817_v20, %v19886_v28  ;;  %v15820_v36 = vadd.f32 %v15819_v27, %v15818_v23  ;;  %16799 = vmatprep.subr.bf16.mxu0 %v17437_v18  ;;  %8852 = vmatmul.mubr.bf16.gmra.mrb[104].mxu1 %v17450_v48  ;;  %v15293_v23 = vld [vmem:[%s17984_s16 + $0x260] sm:$0x11] }
 0x359   : > { %v7192_v25 = vmax.f32 %v7177_v4, 0.0  ;;  %8859 = vmatprep.mubr.bf16.mxu1 %v17454_v32 }
 0x35a   : > { %v7701_v26 = vadd.f32 %v15820_v36, %v19886_v28  ;;  %v7737_v33 = vmax.f32 %v7698_v30, 0.0  ;;  %v20038_v30 = vld [vmem:[%s21833_s3 + $0x40] sm:$0xff]   ;;  %v15305_v36 = vcombine.high %v15293_v23, %v15293_v23 }
 0x35b   : > { %16800 = vmatpush3.bf16.msra.mxu0 %v17437_v18  ;;  %v7198_v55 = vpack.c.bf16 %v7192_v25, %v7192_v25  ;;  %v17472_v25 = vld [vmem:[%s17984_s16 + $0x26c] ss:$8 sps:$4 sm:$0xff]  }
 0x35c   : > { %v7738_v46 = vmax.f32 %v7701_v26, 0.0  ;;  %v15821_v47 = vpop.f32.mrb[32].mxu1  ;;  %16813 = vmatprep.subr.bf16.mxu0 %v19959_v37 }
 0x35d   : > { %v15822_v49 = vpop.f32.mrb[33].mxu1 }
 0x35e   : > { %v7747_v50 = vpack.c.bf16 %v7738_v46, %v7737_v33  ;;  %v15823_v29 = vadd.f32 %v15822_v49, %v15821_v47  ;;  %16790 = vmatmul.mubr.msk.bf16.gmra.mrb[28].mxu0 %vm7377_vm0, %v19925_v42  ;;  %v15824_v31 = vpop.f32.mrb[34].mxu1  ;;  %v19985_v42 = vld [vmem:[%s21831_s1 + $0x68] sm:$0xff]   ;;  %v15304_v33 = vcombine.low %v15293_v23, %v15293_v23 }
 0x35f   : > { %v15825_v51 = vpop.f32.mrb[35].mxu1  ;;  %16793 = vmatprep.mubr.msk.bf16.mxu0 %vm7377_vm0, %v19932_v60  ;;  %16103 = vmatprep.subr.bf16.mxu1 %v19985_v42  ;;  %v19993_v60 = vld [vmem:[%s21831_s1 + $0x28] sm:$0xff]  }
 0x360   : > { %v7706_v52 = vadd.f32 %v15823_v29, %v19886_v28  ;;  %v15826_v53 = vadd.f32 %v15825_v51, %v15824_v31  ;;  %16104 = vmatpush3.bf16.msra.mxu1 %v19993_v60  ;;  %v17470_v51 = vld [vmem:[%s17984_s16 + $0x268] ss:$8 sps:$4 sm:$0xff]  }
 0x361   : > { %16105 = vmatprep.subr.bf16.mxu1 %v19999_v62  ;;  %8860 = vmatmul.mubr.bf16.gmra.mrb[108].mxu1 %v17456_v22 }
 0x362   : > { %v7709_v56 = vadd.f32 %v15826_v53, %v19886_v28  ;;  %v7739_v57 = vmax.f32 %v7706_v52, 0.0  ;;  %8867 = vmatprep.mubr.bf16.mxu1 %v17459_v3 }
 0x364   : > { %v7740_v58 = vmax.f32 %v7709_v56, 0.0  ;;  %v15827_v59 = vpop.f32.mrb[36].mxu1  ;;  %16106 = vmatpush3.bf16.msra.mxu1 %v20009_v7 }
 0x365   : > { %v15828_v61 = vpop.f32.mrb[37].mxu1  ;;  %16107 = vmatprep.subr.bf16.mxu1 %v20015_v8 }
 0x366   : > { %v15829_v63 = vadd.f32 %v15828_v61, %v15827_v59  ;;  %16794 = vmatmul.mubr.msk.bf16.gmra.mrb[36].mxu0 %vm7377_vm0, %v7198_v55  ;;  %v15830_v0 = vpop.f32.mrb[38].mxu1  ;;  %v7748_v1 = vpack.c.bf16 %v7740_v58, %v7739_v57  ;;  %v17476_v58 = vld [vmem:[%s17984_s16 + $0x27c] ss:$8 sps:$4 sm:$0xff]  }
 0x367   : > { %v15831_v2 = vpop.f32.mrb[39].mxu1  ;;  %16801 = vmatprep.mubr.msk.bf16.mxu0 %vm7377_vm0, %v7746_v24 }
 0x368   : > { %v7714_v5 = vadd.f32 %v15829_v63, %v19886_v28  ;;  %v15832_v6 = vadd.f32 %v15831_v2, %v15830_v0  ;;  %16108 = vmatpush3.bf16.msra.mxu1 %v20026_v16  ;;  %v17479_v2 = vld [vmem:[%s17984_s16 + $0x278] ss:$8 sps:$4 sm:$0xff]  }
 0x369   : > { %16153 = vmatprep.subr.bf16.mxu1 %v19807_v21  ;;  %8868 = vmatmul.mubr.bf16.gmra.mrb[112].mxu1 %v17462_v15 }
 0x36a   : > { %v7717_v9 = vadd.f32 %v15832_v6, %v19886_v28  ;;  %v7741_v10 = vmax.f32 %v7714_v5, 0.0  ;;  %8875 = vmatprep.mubr.bf16.mxu1 %v15305_v36  ;;  %v17441_v36 = vld [vmem:[%s21833_s3 + $0x48] sm:$0xff]  }
 0x36c   : > { %v7742_v11 = vmax.f32 %v7717_v9, 0.0  ;;  %v15833_v13 = vpop.f32.mrb[40].mxu1 }
 0x36d   : > { %v15834_v17 = vpop.f32.mrb[41].mxu1 }
 0x36e   : > { %v15835_v18 = vadd.f32 %v15834_v17, %v15833_v13  ;;  %v15836_v12 = vpop.f32.mrb[42].mxu1  ;;  %16802 = vmatmul.mubr.msk.bf16.vlgmr.msra.gmra.mrb[24].mxu0 %vm7377_vm0, %v7747_v50  ;;  %v7749_v19 = vpack.c.bf16 %v7742_v11, %v7741_v10  ;;  %v17481_v11 = vld [vmem:[%s17984_s16 + $0x28c] ss:$8 sps:$4 sm:$0xff]  }
 0x36f   : > { %v15837_v20 = vpop.f32.mrb[43].mxu1  ;;  %16805 = vmatprep.mubr.msk.bf16.mxu0 %vm7377_vm0, %v7748_v1  ;;  %16814 = vmatpush3.bf16.msra.mxu0 %v19959_v37 }
 0x370   : > { %v7722_v24 = vadd.f32 %v15835_v18, %v19886_v28  ;;  %v15838_v27 = vadd.f32 %v15837_v20, %v15836_v12  ;;  %16815 = vmatprep.subr.bf16.mxu0 %v17439_v14 }
 0x371   : > { %8876 = vmatmul.mubr.bf16.gmra.mrb[116].mxu1 %v15304_v33 }
 0x372   : > { %v7725_v26 = vadd.f32 %v15838_v27, %v19886_v28  ;;  %v7743_v4 = vmax.f32 %v7722_v24, 0.0  ;;  %9122 = vmatprep.mubr.bf16.mxu1 %v17472_v25 }
 0x373   : > { %16816 = vmatpush3.bf16.msra.mxu0 %v17439_v14 }
 0x374   : > { %v7744_v43 = vmax.f32 %v7725_v26, 0.0  ;;  %v15839_v37 = vpop.f32.mrb[44].mxu1  ;;  %16829 = vmatprep.subr.bf16.mxu0 %v20038_v30  ;;  %v17485_v26 = vld [vmem:[%s17984_s16 + $0x29c] ss:$8 sps:$4 sm:$0xff]  }
 0x375   : > { %v15840_v46 = vpop.f32.mrb[45].mxu1 }
 0x376   : > { %v15841_v47 = vadd.f32 %v15840_v46, %v15839_v37  ;;  %v15842_v48 = vpop.f32.mrb[46].mxu1  ;;  %16806 = vmatmul.mubr.msk.bf16.gmra.mrb[28].mxu0 %vm7377_vm0, %v7749_v19  ;;  %v7750_v49 = vpack.c.bf16 %v7744_v43, %v7743_v4  ;;  %v17484_v19 = vld [vmem:[%s17984_s16 + $0x288] ss:$8 sps:$4 sm:$0xff]   ;;  %v17487_v46 = vld [vmem:[%s17984_s16 + $0x298] ss:$8 sps:$4 sm:$0xff]  }
 0x377   : > { %v15843_v50 = vpop.f32.mrb[47].mxu1 }
 0x378   : > { %v7730_v29 = vadd.f32 %v15841_v47, %v19886_v28  ;;  %16809 = vmatprep.mubr.msk.bf16.mxu0 %vm7377_vm0, %v7750_v49  ;;  %v17488_v47 = vld [vmem:[%s17984_s16 + $0x2ac] ss:$8 sps:$4 sm:$0xff]  }
 0x379   : > { %9123 = vmatmul.mubr.bf16.vlgmr.msra.gmra.mrb[120].mxu1 %v17470_v51 }
 0x37a   : > { %v7745_v31 = vmax.f32 %v7730_v29, 0.0  ;;  %16154 = vmatpush3.bf16.msra.mxu1 %v19822_v34  ;;  %9130 = vmatprep.mubr.bf16.mxu1 %v17476_v58 }
 0x37b   : > { %16155 = vmatprep.subr.bf16.mxu1 %v19828_v35 }
 0x37c   : > { %v7751_v32 = vpack.c.bf16 %v7745_v31, %v7745_v31  ;;  %v15869_v52 = vpop.f32.mrb[48].mxu1 }
 0x37d   : > { %v15870_v53 = vpop.f32.mrb[49].mxu1 }
 0x37e   : > { %v15871_v55 = vadd.f32 %v15870_v53, %v15869_v52  ;;  %16810 = vmatmul.mubr.msk.bf16.gmra.mrb[40].mxu0 %vm7377_vm0, %v7751_v32  ;;  %v15872_v56 = vpop.f32.mrb[50].mxu1  ;;  %16156 = vmatpush3.bf16.msra.mxu1 %v19836_v38 }
 0x37f   : > { %v15873_v57 = vpop.f32.mrb[51].mxu1  ;;  %16157 = vmatprep.subr.bf16.mxu1 %v19842_v39 }
 0x380   : > { %v7977_v59 = vadd.f32 %v15871_v55, %v19886_v28  ;;  %v15874_v22 = vadd.f32 %v15873_v57, %v15872_v56  ;;  %v17490_v55 = vld [vmem:[%s17984_s16 + $0x2a8] ss:$8 sps:$4 sm:$0xff]  }
 0x381   : > { %9131 = vmatmul.mubr.bf16.gmra.mrb[124].mxu1 %v17479_v2 }
 0x382   : > { %v7980_v61 = vadd.f32 %v15874_v22, %v19886_v28  ;;  %v8022_v63 = vmax.f32 %v7977_v59, 0.0  ;;  %16158 = vmatpush3.bf16.msra.mxu1 %v19848_v40  ;;  %9138 = vmatprep.mubr.bf16.mxu1 %v17481_v11 }
 0x383   : > { %16159 = vmatprep.subr.bf16.mxu1 %v19854_v41 }
 0x384   : > { %v8023_v0 = vmax.f32 %v7980_v61, 0.0  ;;  %v15875_v1 = vpop.f32.mrb[52].mxu1 }
 0x385   : > { %v15876_v3 = vpop.f32.mrb[53].mxu1 }
 0x386   : > { %v15877_v5 = vadd.f32 %v15876_v3, %v15875_v1  ;;  %v15878_v6 = vpop.f32.mrb[54].mxu1  ;;  %v8033_v9 = vpack.c.bf16 %v8023_v0, %v8022_v63  ;;  %16160 = vmatpush3.bf16.msra.mxu1 %v19862_v44 }
 0x387   : > { %v15879_v10 = vpop.f32.mrb[55].mxu1  ;;  %16161 = vmatprep.subr.bf16.mxu1 %v19868_v45 }
 0x388   : > { %v7985_v13 = vadd.f32 %v15877_v5, %v19886_v28  ;;  %v15880_v14 = vadd.f32 %v15879_v10, %v15878_v6  ;;  %16817 = vmatprep.mubr.msk.bf16.mxu0 %vm7377_vm0, %v8033_v9  ;;  %v15324_v5 = vld [vmem:[%s17984_s16 + $0x2b8] sm:$0x11] }
 0x389   : > { %9139 = vmatmul.mubr.bf16.gmra.mrb[128].mxu1 %v17484_v19  ;;  %v15336_v6 = vcombine.high %v15324_v5, %v15324_v5  ;;  %v15335_v11 = vcombine.low %v15324_v5, %v15324_v5 }
 0x38a   : > { %v7988_v15 = vadd.f32 %v15880_v14, %v19886_v28  ;;  %v8024_v17 = vmax.f32 %v7985_v13, 0.0  ;;  %16162 = vmatpush3.bf16.msra.mxu1 %v19979_v54  ;;  %9146 = vmatprep.mubr.bf16.mxu1 %v17485_v26  ;;  %v17495_v13 = vld [vmem:[%s17984_s16 + $0x2c4] ss:$8 sps:$4 sm:$0xff]  }
 0x38b   : > { %16163 = vmatprep.subr.bf16.mxu1 %v19985_v42 }
 0x38c   : > { %v8025_v18 = vmax.f32 %v7988_v15, 0.0  ;;  %v15881_v12 = vpop.f32.mrb[56].mxu1 }
 0x38d   : > { %v15882_v20 = vpop.f32.mrb[57].mxu1 }
 0x38e   : > { %v8034_v23 = vpack.c.bf16 %v8025_v18, %v8024_v17  ;;  %v15883_v24 = vadd.f32 %v15882_v20, %v15881_v12  ;;  %v15884_v27 = vpop.f32.mrb[58].mxu1  ;;  %16164 = vmatpush3.bf16.msra.mxu1 %v19993_v60 }
 0x38f   : > { %v15885_v4 = vpop.f32.mrb[59].mxu1  ;;  %16165 = vmatprep.subr.bf16.mxu1 %v19999_v62 }
 0x390   : > { %v7993_v43 = vadd.f32 %v15883_v24, %v19886_v28  ;;  %v15886_v37 = vadd.f32 %v15885_v4, %v15884_v27  ;;  %16818 = vmatmul.mubr.msk.bf16.vlgmr.msra.gmra.mrb[24].mxu0 %vm7377_vm0, %v8034_v23  ;;  %v17493_v23 = vld [vmem:[%s17984_s16 + $0x2c0] ss:$8 sps:$4 sm:$0xff]   ;;  %v17496_v24 = vld [vmem:[%s17984_s16 + $0x2d4] ss:$8 sps:$4 sm:$0xff]  }
 0x391   : > { %16830 = vmatpush3.bf16.msra.mxu0 %v20038_v30  ;;  %9147 = vmatmul.mubr.bf16.gmra.mrb[132].mxu1 %v17487_v46 }
 0x392   : > { %v7996_v33 = vadd.f32 %v15886_v37, %v19886_v28  ;;  %16831 = vmatprep.subr.bf16.mxu0 %v17441_v36  ;;  %v8026_v48 = vmax.f32 %v7993_v43, 0.0  ;;  %9154 = vmatprep.mubr.bf16.mxu1 %v17488_v47 }
 0x393   : > { %16166 = vmatpush3.bf16.msra.mxu1 %v20009_v7 }
 0x394   : > { %v8027_v49 = vmax.f32 %v7996_v33, 0.0  ;;  %v15887_v50 = vpop.f32.mrb[60].mxu1  ;;  %16167 = vmatprep.subr.bf16.mxu1 %v20015_v8 }
 0x395   : > { %v15888_v25 = vpop.f32.mrb[61].mxu1  ;;  %16832 = vmatpush3.bf16.msra.mxu0 %v17441_v36 }
 0x396   : > { %v8035_v29 = vpack.c.bf16 %v8027_v49, %v8026_v48  ;;  %v15889_v31 = vadd.f32 %v15888_v25, %v15887_v50  ;;  %v15890_v30 = vpop.f32.mrb[62].mxu1  ;;  %15973 = vmatprep.subr.bf16.mxu0 %v19807_v21  ;;  %v17498_v48 = vld [vmem:[%s17984_s16 + $0x2d0] ss:$8 sps:$4 sm:$0xff]  }
 0x397   : > { %v15891_v51 = vpop.f32.mrb[63].mxu1  ;;  %16168 = vmatpush3.bf16.msra.mxu1 %v20026_v16 }
 0x398   : > { %v8001_v32 = vadd.f32 %v15889_v31, %v19886_v28  ;;  %v15892_v52 = vadd.f32 %v15891_v51, %v15890_v30  ;;  %16821 = vmatprep.mubr.msk.bf16.mxu0 %vm7377_vm0, %v8035_v29  ;;  %16273 = vmatprep.subr.bf16.mxu1 %v19807_v21 }
 0x399   : > { %9155 = vmatmul.mubr.bf16.gmra.mrb[136].mxu1 %v17490_v55 }
 0x39a   : > { %v8004_v53 = vadd.f32 %v15892_v52, %v19886_v28  ;;  %v8028_v56 = vmax.f32 %v8001_v32, 0.0  ;;  %9162 = vmatprep.mubr.bf16.mxu1 %v15336_v6 }
 0x39c   : > { %v8029_v57 = vmax.f32 %v8004_v53, 0.0  ;;  %v15893_v58 = vpop.f32.mrb[64].mxu1 }
 0x39d   : > { %v15894_v59 = vpop.f32.mrb[65].mxu1 }
 0x39e   : > { %v8036_v22 = vpack.c.bf16 %v8029_v57, %v8028_v56  ;;  %v15895_v61 = vadd.f32 %v15894_v59, %v15893_v58  ;;  %v15896_v63 = vpop.f32.mrb[66].mxu1  ;;  %v17499_v56 = vld [vmem:[%s17984_s16 + $0x2e4] ss:$8 sps:$4 sm:$0xff]  }
 0x39f   : > { %v15897_v0 = vpop.f32.mrb[67].mxu1 }
 0x3a0   : > { %v8009_v1 = vadd.f32 %v15895_v61, %v19886_v28  ;;  %v15898_v2 = vadd.f32 %v15897_v0, %v15896_v63  ;;  %16822 = vmatmul.mubr.msk.bf16.gmra.mrb[28].mxu0 %vm7377_vm0, %v8036_v22  ;;  %v17501_v22 = vld [vmem:[%s17984_s16 + $0x2e0] ss:$8 sps:$4 sm:$0xff]   ;;  %v17502_v63 = vld [vmem:[%s17984_s16 + $0x2f4] ss:$8 sps:$4 sm:$0xff]  }
 0x3a1   : > { %9163 = vmatmul.mubr.bf16.gmra.mrb[140].mxu1 %v15335_v11 }
 0x3a2   : > { %v8012_v3 = vadd.f32 %v15898_v2, %v19886_v28  ;;  %v8030_v9 = vmax.f32 %v8009_v1, 0.0  ;;  %9409 = vmatprep.mubr.bf16.mxu1 %v17495_v13 }
 0x3a4   : > { %v8031_v10 = vmax.f32 %v8012_v3, 0.0  ;;  %v15899_v21 = vpop.f32.mrb[68].mxu1 }
 0x3a5   : > { %v15900_v14 = vpop.f32.mrb[69].mxu1 }
 0x3a6   : > { %v8037_v15 = vpack.c.bf16 %v8031_v10, %v8030_v9  ;;  %v15901_v17 = vadd.f32 %v15900_v14, %v15899_v21  ;;  %v15902_v18 = vpop.f32.mrb[70].mxu1  ;;  %v17504_v10 = vld [vmem:[%s17984_s16 + $0x2f0] ss:$8 sps:$4 sm:$0xff]   ;;  %v17505_v21 = vld [vmem:[%s17984_s16 + $0x304] ss:$8 sps:$4 sm:$0xff]  }
 0x3a7   : > { %v15903_v12 = vpop.f32.mrb[71].mxu1 }
 0x3a8   : > { %v8017_v19 = vadd.f32 %v15901_v17, %v19886_v28  ;;  %16825 = vmatprep.mubr.msk.bf16.mxu0 %vm7377_vm0, %v8037_v15 }
 0x3a9   : > { %9410 = vmatmul.mubr.bf16.vlgmr.msra.gmra.mrb[144].mxu1 %v17493_v23 }
 0x3aa   : > { %v8032_v20 = vmax.f32 %v8017_v19, 0.0  ;;  %9417 = vmatprep.mubr.bf16.mxu1 %v17496_v24  ;;  %16274 = vmatpush3.bf16.msra.mxu1 %v19822_v34 }
 0x3ab   : > { %16275 = vmatprep.subr.bf16.mxu1 %v19828_v35 }
 0x3ac   : > { %v8038_v27 = vpack.c.bf16 %v8032_v20, %v8032_v20  ;;  %v15929_v36 = vpop.f32.mrb[72].mxu1  ;;  %v17507_v20 = vld [vmem:[%s17984_s16 + $0x300] ss:$8 sps:$4 sm:$0xff]  }
 0x3ad   : > { %v15930_v26 = vpop.f32.mrb[73].mxu1 }
 0x3ae   : > { %v15931_v4 = vadd.f32 %v15930_v26, %v15929_v36  ;;  %16826 = vmatmul.mubr.msk.bf16.gmra.mrb[44].mxu0 %vm7377_vm0, %v8038_v27  ;;  %v15932_v43 = vpop.f32.mrb[74].mxu1  ;;  %16276 = vmatpush3.bf16.msra.mxu1 %v19836_v38  ;;  %v20140_v27 = vld [vmem:[%s21831_s1 + $0x40] sm:$0xff]  }
 0x3af   : > { %v15933_v37 = vpop.f32.mrb[75].mxu1  ;;  %16277 = vmatprep.subr.bf16.mxu1 %v19842_v39 }
 0x3b0   : > { %v8264_v33 = vadd.f32 %v15931_v4, %v19886_v28  ;;  %v15934_v46 = vadd.f32 %v15933_v37, %v15932_v43 }
 0x3b1   : > { %9418 = vmatmul.mubr.bf16.gmra.mrb[148].mxu1 %v17498_v48 }
 0x3b2   : > { %v8267_v47 = vadd.f32 %v15934_v46, %v19886_v28  ;;  %v8309_v49 = vmax.f32 %v8264_v33, 0.0  ;;  %16278 = vmatpush3.bf16.msra.mxu1 %v19848_v40  ;;  %9425 = vmatprep.mubr.bf16.mxu1 %v17499_v56  ;;  %v15355_v46 = vld [vmem:[%s17984_s16 + $0x310] sm:$0x11]  ;;  %v17478_v56 = vld [vmem:[%s17984_s16 + $0x1f8] ss:$8 sps:$4 sm:$0xff]  }
 0x3b3   : > { %16279 = vmatprep.subr.bf16.mxu1 %v19854_v41 }
 0x3b4   : > { %v8310_v50 = vmax.f32 %v8267_v47, 0.0  ;;  %v15935_v25 = vpop.f32.mrb[76].mxu1 }
 0x3b5   : > { %v15936_v29 = vpop.f32.mrb[77].mxu1 }
 0x3b6   : > { %v8320_v31 = vpack.c.bf16 %v8310_v50, %v8309_v49  ;;  %v15937_v30 = vadd.f32 %v15936_v29, %v15935_v25  ;;  %v15938_v51 = vpop.f32.mrb[78].mxu1  ;;  %16280 = vmatpush3.bf16.msra.mxu1 %v19862_v44 }
 0x3b7   : > { %v15939_v32 = vpop.f32.mrb[79].mxu1  ;;  %16281 = vmatprep.subr.bf16.mxu1 %v19868_v45 }
 0x3b8   : > { %v8272_v52 = vadd.f32 %v15937_v30, %v19886_v28  ;;  %v15940_v53 = vadd.f32 %v15939_v32, %v15938_v51  ;;  %16833 = vmatprep.mubr.msk.bf16.mxu0 %vm7377_vm0, %v8320_v31  ;;  %v17453_v30 = vld [vmem:[%s17984_s16 + $0x1bc] ss:$8 sps:$4 sm:$0xff]  }
 0x3b9   : > { %9426 = vmatmul.mubr.bf16.gmra.mrb[152].mxu1 %v17501_v22  ;;  %v17463_v32 = vld [vmem:[%s17984_s16 + $0x1dc] ss:$8 sps:$4 sm:$0xff]  }
 0x3ba   : > { %v8275_v55 = vadd.f32 %v15940_v53, %v19886_v28  ;;  %v8311_v57 = vmax.f32 %v8272_v52, 0.0  ;;  %9433 = vmatprep.mubr.bf16.mxu1 %v17502_v63  ;;  %16282 = vmatpush3.bf16.msra.mxu1 %v19979_v54  ;;  %v17468_v52 = vld [vmem:[%s17984_s16 + $0x1ec] ss:$8 sps:$4 sm:$0xff]   ;;  %v17473_v53 = vld [vmem:[%s17984_s16 + $0x1e8] ss:$8 sps:$4 sm:$0xff]  }
 0x3bb   : > { %16283 = vmatprep.subr.bf16.mxu1 %v19985_v42 }
 0x3bc   : > { %v8312_v58 = vmax.f32 %v8275_v55, 0.0  ;;  %v15941_v59 = vpop.f32.mrb[80].mxu1  ;;  %v15262_v55 = vld [vmem:[%s17984_s16 + $0x208] sm:$0x11] }
 0x3bd   : > { %v15942_v61 = vpop.f32.mrb[81].mxu1 }
 0x3be   : > { %v8321_v0 = vpack.c.bf16 %v8312_v58, %v8311_v57  ;;  %v15943_v1 = vadd.f32 %v15942_v61, %v15941_v59  ;;  %v15944_v2 = vpop.f32.mrb[82].mxu1  ;;  %16284 = vmatpush3.bf16.msra.mxu1 %v19993_v60  ;;  %v15274_v57 = vcombine.high %v15262_v55, %v15262_v55  ;;  %v17510_v58 = vld [vmem:[%s21833_s3 + $0x50] sm:$0xff]   ;;  %v15273_v59 = vcombine.low %v15262_v55, %v15262_v55  ;;  %v17511_v55 = vld [vmem:[%s21833_s3 + $0x58] sm:$0xff]  }
 0x3bf   : > { %v15945_v3 = vpop.f32.mrb[83].mxu1  ;;  %16285 = vmatprep.subr.bf16.mxu1 %v19999_v62 }
 0x3c0   : > { %v8280_v5 = vadd.f32 %v15943_v1, %v19886_v28  ;;  %v15946_v6 = vadd.f32 %v15945_v3, %v15944_v2  ;;  %16834 = vmatmul.mubr.msk.bf16.vlgmr.msra.gmra.mrb[24].mxu0 %vm7377_vm0, %v8321_v0 }
 0x3c1   : > { %15974 = vmatpush3.bf16.msra.mxu0 %v19822_v34  ;;  %9434 = vmatmul.mubr.bf16.gmra.mrb[156].mxu1 %v17504_v10 }
 0x3c2   : > { %v8283_v9 = vadd.f32 %v15946_v6, %v19886_v28  ;;  %15975 = vmatprep.subr.bf16.mxu0 %v19828_v35  ;;  %v8313_v11 = vmax.f32 %v8280_v5, 0.0  ;;  %9441 = vmatprep.mubr.bf16.mxu1 %v17505_v21 }
 0x3c3   : > { %16286 = vmatpush3.bf16.msra.mxu1 %v20009_v7 }
 0x3c4   : > { %v8314_v13 = vmax.f32 %v8283_v9, 0.0  ;;  %v15947_v14 = vpop.f32.mrb[84].mxu1  ;;  %16287 = vmatprep.subr.bf16.mxu1 %v20015_v8  ;;  %v20176_v9 = vld [vmem:[%s21832_s2] ss:$0 sm:$0xff] }
 0x3c5   : > { %v15948_v15 = vpop.f32.mrb[85].mxu1  ;;  %15976 = vmatpush3.bf16.msra.mxu0 %v19836_v38 }
 0x3c6   : > { %v8322_v17 = vpack.c.bf16 %v8314_v13, %v8313_v11  ;;  %v15949_v18 = vadd.f32 %v15948_v15, %v15947_v14  ;;  %v15950_v34 = vpop.f32.mrb[86].mxu1  ;;  %15977 = vmatprep.subr.bf16.mxu0 %v19842_v39 }
 0x3c7   : > { %v15951_v35 = vpop.f32.mrb[87].mxu1  ;;  %16288 = vmatpush3.bf16.msra.mxu1 %v20026_v16 }
 0x3c8   : > { %v8288_v12 = vadd.f32 %v15949_v18, %v19886_v28  ;;  %v15952_v19 = vadd.f32 %v15951_v35, %v15950_v34  ;;  %16837 = vmatprep.mubr.msk.bf16.mxu0 %vm7377_vm0, %v8322_v17  ;;  %16333 = vmatprep.subr.bf16.mxu1 %v20140_v27 }
 0x3c9   : > { %15978 = vmatpush3.bf16.msra.mxu0 %v19848_v40  ;;  %9442 = vmatmul.mubr.bf16.gmra.mrb[160].mxu1 %v17507_v20 }
 0x3ca   : > { %v8291_v38 = vadd.f32 %v15952_v19, %v19886_v28  ;;  %15979 = vmatprep.subr.bf16.mxu0 %v19854_v41  ;;  %v8315_v39 = vmax.f32 %v8288_v12, 0.0 }
 0x3cc   : > { %v8316_v23 = vmax.f32 %v8291_v38, 0.0  ;;  %v15953_v24 = vpop.f32.mrb[88].mxu1 }
 0x3cd   : > { %v15954_v36 = vpop.f32.mrb[89].mxu1  ;;  %15980 = vmatpush3.bf16.msra.mxu0 %v19862_v44  ;;  %v15367_v44 = vcombine.high %v15355_v46, %v15355_v46 }
 0x3ce   : > { %v8323_v40 = vpack.c.bf16 %v8316_v23, %v8315_v39  ;;  %v15955_v26 = vadd.f32 %v15954_v36, %v15953_v24  ;;  %v15956_v41 = vpop.f32.mrb[90].mxu1  ;;  %15981 = vmatprep.subr.bf16.mxu0 %v19868_v45  ;;  %v15366_v45 = vcombine.low %v15355_v46, %v15355_v46 }
 0x3cf   : > { %v15957_v4 = vpop.f32.mrb[91].mxu1  ;;  %9449 = vmatprep.mubr.bf16.mxu1 %v15367_v44 }
 0x3d0   : > { %v8296_v43 = vadd.f32 %v15955_v26, %v19886_v28  ;;  %v15958_v37 = vadd.f32 %v15957_v4, %v15956_v41  ;;  %16838 = vmatmul.mubr.msk.bf16.gmra.mrb[28].mxu0 %vm7377_vm0, %v8323_v40 }
 0x3d1   : > { %15982 = vmatpush3.bf16.msra.mxu0 %v19979_v54  ;;  %9450 = vmatmul.mubr.bf16.gmra.mrb[164].mxu1 %v15366_v45 }
 0x3d2   : > { %v8299_v33 = vadd.f32 %v15958_v37, %v19886_v28  ;;  %15983 = vmatprep.subr.bf16.mxu0 %v19985_v42  ;;  %v8317_v47 = vmax.f32 %v8296_v43, 0.0 }
 0x3d4   : > { %v8318_v48 = vmax.f32 %v8299_v33, 0.0  ;;  %v15959_v49 = vpop.f32.mrb[92].mxu1 }
 0x3d5   : > { %v15960_v50 = vpop.f32.mrb[93].mxu1  ;;  %15984 = vmatpush3.bf16.msra.mxu0 %v19993_v60 }
 0x3d6   : > { %v8324_v25 = vpack.c.bf16 %v8318_v48, %v8317_v47  ;;  %v15961_v29 = vadd.f32 %v15960_v50, %v15959_v49  ;;  %v15962_v54 = vpop.f32.mrb[94].mxu1  ;;  %15985 = vmatprep.subr.bf16.mxu0 %v19999_v62  ;;  %v17451_v62 = vld [vmem:[%s17984_s16 + $0x1b8] ss:$8 sps:$4 sm:$0xff]  }
 0x3d7   : > { %v15963_v42 = vpop.f32.mrb[95].mxu1 }
 0x3d8   : > { %v8304_v31 = vadd.f32 %v15961_v29, %v19886_v28  ;;  %16841 = vmatprep.mubr.msk.bf16.mxu0 %vm7377_vm0, %v8324_v25  ;;  %v17457_v28 = vld [vmem:[%s17984_s16 + $0x1cc] ss:$8 sps:$4 sm:$0xff]  }
 0x3d9   : > { %15986 = vmatpush3.bf16.msra.mxu0 %v20009_v7  ;;  %v17461_v7 = vld [vmem:[%s17984_s16 + $0x1c8] ss:$8 sps:$4 sm:$0xff]  }
 0x3da   : > { %v8319_v60 = vmax.f32 %v8304_v31, 0.0  ;;  %15987 = vmatprep.subr.bf16.mxu0 %v20015_v8  ;;  %v17466_v8 = vld [vmem:[%s17984_s16 + $0x1d8] ss:$8 sps:$4 sm:$0xff]  }
 0x3dc   : > { %v8325_v51 = vpack.c.bf16 %v8319_v60, %v8319_v60 }
 0x3dd   : > { %15988 = vmatpush3.bf16.msra.mxu0 %v20026_v16  ;;  %v17474_v16 = vld [vmem:[%s17984_s16 + $0x1fc] ss:$8 sps:$4 sm:$0xff]  }
 0x3de   : > { %16842 = vmatmul.mubr.msk.bf16.gmra.mrb[48].mxu0 %vm7377_vm0, %v8325_v51  ;;  %16845 = vmatprep.subr.bf16.mxu0 %v17510_v58 }
 0x3df   : > { %8548 = vmatprep.mubr.bf16.mxu0 %v17453_v30 }
 0x3e6   : > { %8549 = vmatmul.mubr.bf16.vlgmr.msra.gmra.mrb[52].mxu0 %v17451_v62 }
 0x3e7   : > { %8556 = vmatprep.mubr.bf16.mxu0 %v17457_v28  ;;  %16846 = vmatpush3.bf16.msra.mxu0 %v17510_v58 }
 0x3e8   : > { %16847 = vmatprep.subr.bf16.mxu0 %v17511_v55 }
 0x3eb   : > { %16848 = vmatpush3.bf16.msra.mxu0 %v17511_v55 }
 0x3ee   : > { %8557 = vmatmul.mubr.bf16.gmra.mrb[56].mxu0 %v17461_v7 }
 0x3ef   : > { %8564 = vmatprep.mubr.bf16.mxu0 %v17463_v32 }
 0x3f6   : > { %8565 = vmatmul.mubr.bf16.gmra.mrb[60].mxu0 %v17466_v8 }
 0x3f7   : > { %8572 = vmatprep.mubr.bf16.mxu0 %v17468_v52 }
 0x3fe   : > { %8573 = vmatmul.mubr.bf16.gmra.mrb[64].mxu0 %v17473_v53 }
 0x3ff   : > { %8580 = vmatprep.mubr.bf16.mxu0 %v17474_v16 }
 0x406   : > { %8581 = vmatmul.mubr.bf16.gmra.mrb[68].mxu0 %v17478_v56 }
 0x407   : > { %8588 = vmatprep.mubr.bf16.mxu0 %v15274_v57 }
 0x40c   : > { %v16049_v61 = vpop.f32.mrb[96].mxu1 }
 0x40d   : > { %v16050_v0 = vpop.f32.mrb[97].mxu1 }
 0x40e   : > { %8589 = vmatmul.mubr.bf16.gmra.mrb[72].mxu0 %v15273_v59  ;;  %v16051_v2 = vadd.f32 %v16050_v0, %v16049_v61  ;;  %v16052_v3 = vpop.f32.mrb[98].mxu1 }
 0x40f   : > { %v16053_v6 = vpop.f32.mrb[99].mxu1 }
 0x410   : > { %v8838_v10 = vadd.f32 %v20176_v9, %v16051_v2  ;;  %v16054_v21 = vadd.f32 %v16053_v6, %v16052_v3 }
 0x412   : > { %v8883_v11 = vmax.f32 %v8838_v10, 0.0  ;;  %v8841_v13 = vadd.f32 %v20176_v9, %v16054_v21 }
 0x414   : > { %v8884_v14 = vmax.f32 %v8841_v13, 0.0 }
 0x416   : > { %v20180_v18 = vpack.c.bf16 %v8884_v14, %v8883_v11 }
 0x421   : > { %v16779_v22 = vpop.f32.mrb[32].mxu0 }
 0x422   : > { %v7462_v63 = vpop.f32.mrb[33].mxu0 }
 0x423   : > { %v16780_v1 = vpop.f32.mrb[34].mxu0  ;;  %v16055_v15 = vpop.f32.mrb[100].mxu1 }
 0x424   : > { %v7465_v5 = vpop.f32.mrb[35].mxu0  ;;  %v16056_v17 = vpop.f32.mrb[101].mxu1 }
 0x425   : > { %v16057_v34 = vadd.f32 %v16056_v17, %v16055_v15  ;;  %v16058_v35 = vpop.f32.mrb[102].mxu1 }
 0x426   : > { %v16059_v19 = vpop.f32.mrb[103].mxu1 }
 0x427   : > { %v8846_v12 = vadd.f32 %v20176_v9, %v16057_v34  ;;  %v16060_v38 = vadd.f32 %v16059_v19, %v16058_v35 }
 0x429   : > { %v8885_v20 = vmax.f32 %v8846_v12, 0.0  ;;  %v8849_v39 = vadd.f32 %v20176_v9, %v16060_v38 }
 0x42b   : > { %v8886_v23 = vmax.f32 %v8849_v39, 0.0  ;;  %v16061_v24 = vpop.f32.mrb[104].mxu1 }
 0x42c   : > { %v16062_v36 = vpop.f32.mrb[105].mxu1 }
 0x42d   : > { %v20184_v40 = vpack.c.bf16 %v8886_v23, %v8885_v20  ;;  %v16063_v26 = vadd.f32 %v16062_v36, %v16061_v24  ;;  %v16064_v41 = vpop.f32.mrb[106].mxu1 }
 0x42e   : > { %v16065_v4 = vpop.f32.mrb[107].mxu1 }
 0x42f   : > { %v8854_v37 = vadd.f32 %v20176_v9, %v16063_v26  ;;  %v16066_v33 = vadd.f32 %v16065_v4, %v16064_v41 }
 0x431   : > { %v8887_v49 = vmax.f32 %v8854_v37, 0.0  ;;  %v8857_v45 = vadd.f32 %v20176_v9, %v16066_v33  ;;  %v20216_v37 = vld [vmem:[%s21833_s3 + $0x60] sm:$0xff]  }
 0x432   : > { %16861 = vmatprep.subr.bf16.mxu0 %v20216_v37 }
 0x433   : > { %v8888_v29 = vmax.f32 %v8857_v45, 0.0 }
 0x434   : > { %v16067_v54 = vpop.f32.mrb[108].mxu1 }
 0x435   : > { %v16068_v42 = vpop.f32.mrb[109].mxu1  ;;  %v20188_v31 = vpack.c.bf16 %v8888_v29, %v8887_v49 }
 0x436   : > { %v16070_v60 = vpop.f32.mrb[110].mxu1  ;;  %v16069_v51 = vadd.f32 %v16068_v42, %v16067_v54 }
 0x437   : > { %v16071_v30 = vpop.f32.mrb[111].mxu1 }
 0x438   : > { %v16072_v62 = vadd.f32 %v16071_v30, %v16070_v60  ;;  %v8862_v28 = vadd.f32 %v20176_v9, %v16069_v51 }
 0x439   : > { %v16795_v43 = vpop.f32.mrb[36].mxu0 }
 0x43a   : > { %v7581_v46 = vadd.f32 %v16795_v43, %v16779_v22  ;;  %v7572_v44 = vpop.f32.mrb[37].mxu0  ;;  %v8865_v7 = vadd.f32 %v20176_v9, %v16072_v62  ;;  %v8889_v32 = vmax.f32 %v8862_v28, 0.0 }
 0x43b   : > { %v7573_v47 = vadd.f32 %v7572_v44, %v7462_v63  ;;  %v16796_v48 = vpop.f32.mrb[38].mxu0 }
 0x43c   : > { %v7575_v50 = vpop.f32.mrb[39].mxu0  ;;  %v8890_v8 = vmax.f32 %v8865_v7, 0.0  ;;  %v16073_v52 = vpop.f32.mrb[112].mxu1 }
 0x43d   : > { %v7576_v25 = vadd.f32 %v7575_v50, %v7465_v5  ;;  %v16074_v53 = vpop.f32.mrb[113].mxu1 }
 0x43e   : > { %v20192_v16 = vpack.c.bf16 %v8890_v8, %v8889_v32  ;;  %v16076_v56 = vpop.f32.mrb[114].mxu1  ;;  %v16075_v58 = vadd.f32 %v16074_v53, %v16073_v52 }
 0x43f   : > { %v16077_v57 = vpop.f32.mrb[115].mxu1 }
 0x440   : > { %v16078_v59 = vadd.f32 %v16077_v57, %v16076_v56  ;;  %v8870_v22 = vadd.f32 %v20176_v9, %v16075_v58 }
 0x442   : > { %v8873_v61 = vadd.f32 %v20176_v9, %v16078_v59  ;;  %v8891_v63 = vmax.f32 %v8870_v22, 0.0 }
 0x444   : > { %v8892_v0 = vmax.f32 %v8873_v61, 0.0  ;;  %v16079_v1 = vpop.f32.mrb[116].mxu1 }
 0x445   : > { %v16080_v2 = vpop.f32.mrb[117].mxu1 }
 0x446   : > { %v20199_v3 = vpack.c.bf16 %v8892_v0, %v8891_v63  ;;  %v16082_v5 = vpop.f32.mrb[118].mxu1  ;;  %v20201_v21 = vadd.f32 %v16080_v2, %v16079_v1 }
 0x447   : > { %v16083_v6 = vpop.f32.mrb[119].mxu1 }
 0x44c   : > { %v16109_v35 = vpop.f32.mrb[120].mxu1 }
 0x44d   : > { %v16110_v12 = vpop.f32.mrb[121].mxu1 }
 0x44e   : > { %v16112_v19 = vpop.f32.mrb[122].mxu1  ;;  %v16111_v20 = vadd.f32 %v16110_v12, %v16109_v35 }
 0x44f   : > { %v16113_v38 = vpop.f32.mrb[123].mxu1 }
 0x450   : > { %v16114_v39 = vadd.f32 %v16113_v38, %v16112_v19  ;;  %v9125_v23 = vadd.f32 %v20176_v9, %v16111_v20 }
 0x451   : > { %v16811_v10 = vpop.f32.mrb[40].mxu0 }
 0x452   : > { %v20203_v11 = vadd.f32 %v16811_v10, %v7581_v46  ;;  %v7848_v13 = vpop.f32.mrb[41].mxu0  ;;  %v9128_v24 = vadd.f32 %v20176_v9, %v16114_v39  ;;  %v9170_v36 = vmax.f32 %v9125_v23, 0.0 }
 0x453   : > { %v20205_v14 = vadd.f32 %v7848_v13, %v7573_v47  ;;  %v16812_v15 = vpop.f32.mrb[42].mxu0 }
 0x454   : > { %v7851_v17 = vpop.f32.mrb[43].mxu0  ;;  %v9171_v26 = vmax.f32 %v9128_v24, 0.0  ;;  %v16115_v41 = vpop.f32.mrb[124].mxu1 }
 0x455   : > { %v20207_v34 = vadd.f32 %v7851_v17, %v7576_v25  ;;  %v16116_v4 = vpop.f32.mrb[125].mxu1 }
 0x456   : > { %v20211_v43 = vpack.c.bf16 %v9171_v26, %v9170_v36  ;;  %v16118_v33 = vpop.f32.mrb[126].mxu1  ;;  %v16117_v44 = vadd.f32 %v16116_v4, %v16115_v41 }
 0x457   : > { %v16119_v46 = vpop.f32.mrb[127].mxu1 }
 0x458   : > { %v16120_v47 = vadd.f32 %v16119_v46, %v16118_v33  ;;  %v9133_v48 = vadd.f32 %v20176_v9, %v16117_v44 }
 0x45a   : > { %v9136_v49 = vadd.f32 %v20176_v9, %v16120_v47  ;;  %v9172_v45 = vmax.f32 %v9133_v48, 0.0 }
 0x45c   : > { %v9173_v50 = vmax.f32 %v9136_v49, 0.0  ;;  %v16121_v25 = vpop.f32.mrb[128].mxu1 }
 0x45d   : > { %v16122_v29 = vpop.f32.mrb[129].mxu1 }
 0x45e   : > { %v20221_v54 = vpack.c.bf16 %v9173_v50, %v9172_v45  ;;  %v16124_v42 = vpop.f32.mrb[130].mxu1  ;;  %v16123_v30 = vadd.f32 %v16122_v29, %v16121_v25 }
 0x45f   : > { %v16125_v60 = vpop.f32.mrb[131].mxu1 }
 0x460   : > { %v16126_v51 = vadd.f32 %v16125_v60, %v16124_v42  ;;  %v9141_v62 = vadd.f32 %v20176_v9, %v16123_v30 }
 0x462   : > { %v9144_v28 = vadd.f32 %v20176_v9, %v16126_v51  ;;  %v9174_v32 = vmax.f32 %v9141_v62, 0.0 }
 0x464   : > { %v16127_v7 = vpop.f32.mrb[132].mxu1  ;;  %v9175_v8 = vmax.f32 %v9144_v28, 0.0 }
 0x465   : > { %v16128_v52 = vpop.f32.mrb[133].mxu1 }
 0x466   : > { %v16129_v53 = vadd.f32 %v16128_v52, %v16127_v7  ;;  %v16130_v55 = vpop.f32.mrb[134].mxu1  ;;  %v20225_v56 = vpack.c.bf16 %v9175_v8, %v9174_v32 }
 0x467   : > { %v16131_v57 = vpop.f32.mrb[135].mxu1 }
 0x468   : > { %v9149_v58 = vadd.f32 %v20176_v9, %v16129_v53  ;;  %v16132_v59 = vadd.f32 %v16131_v57, %v16130_v55 }
 0x46a   : > { %v9176_v22 = vmax.f32 %v9149_v58, 0.0  ;;  %v9152_v61 = vadd.f32 %v20176_v9, %v16132_v59 }
 0x46c   : > { %v9177_v63 = vmax.f32 %v9152_v61, 0.0  ;;  %v16133_v0 = vpop.f32.mrb[136].mxu1 }
 0x46d   : > { %v16134_v1 = vpop.f32.mrb[137].mxu1 }
 0x46e   : > { %v20229_v2 = vpack.c.bf16 %v9177_v63, %v9176_v22  ;;  %v16135_v5 = vadd.f32 %v16134_v1, %v16133_v0  ;;  %v16136_v6 = vpop.f32.mrb[138].mxu1 }
 0x46f   : > { %v16137_v10 = vpop.f32.mrb[139].mxu1 }
 0x470   : > { %v9157_v13 = vadd.f32 %v20176_v9, %v16135_v5  ;;  %v16138_v15 = vadd.f32 %v16137_v10, %v16136_v6 }
 0x472   : > { %v9178_v17 = vmax.f32 %v9157_v13, 0.0  ;;  %v9160_v35 = vadd.f32 %v20176_v9, %v16138_v15 }
 0x474   : > { %v9179_v12 = vmax.f32 %v9160_v35, 0.0  ;;  %v16139_v19 = vpop.f32.mrb[140].mxu1 }
 0x475   : > { %v16140_v38 = vpop.f32.mrb[141].mxu1 }
 0x476   : > { %v20233_v20 = vpack.c.bf16 %v9179_v12, %v9178_v17  ;;  %v20235_v39 = vadd.f32 %v16140_v38, %v16139_v19  ;;  %v16142_v23 = vpop.f32.mrb[142].mxu1 }
 0x477   : > { %v16143_v24 = vpop.f32.mrb[143].mxu1 }
 0x47c   : > { %v16169_v44 = vpop.f32.mrb[144].mxu1 }
 0x47d   : > { %v16170_v48 = vpop.f32.mrb[145].mxu1 }
 0x47e   : > { %v16171_v49 = vadd.f32 %v16170_v48, %v16169_v44  ;;  %v16172_v45 = vpop.f32.mrb[146].mxu1 }
 0x47f   : > { %v16173_v50 = vpop.f32.mrb[147].mxu1 }
 0x480   : > { %v9412_v25 = vadd.f32 %v20176_v9, %v16171_v49  ;;  %v16174_v29 = vadd.f32 %v16173_v50, %v16172_v45  ;;  %v17518_v50 = vld [vmem:[%s17984_s16 + $0x370] ss:$8 sps:$4 sm:$0xff]  }
 0x481   : > { %v16827_v36 = vpop.f32.mrb[44].mxu0 }
 0x482   : > { %v20238_v26 = vadd.f32 %v16827_v36, %v20203_v11  ;;  %v8135_v41 = vpop.f32.mrb[45].mxu0  ;;  %v9457_v42 = vmax.f32 %v9412_v25, 0.0  ;;  %v9415_v11 = vadd.f32 %v20176_v9, %v16174_v29  ;;  %v17520_v25 = vld [vmem:[%s17984_s16 + $0x374] ss:$8 sps:$4 sm:$0xff]  }
 0x483   : > { %v20241_v4 = vadd.f32 %v8135_v41, %v20205_v14  ;;  %v16828_v33 = vpop.f32.mrb[46].mxu0  ;;  %9983 = vmatprep.mubr.bf16.mxu1 %v17520_v25  ;;  %v17532_v25 = vld [vmem:[%s17984_s16 + $0x3a0] ss:$8 sps:$4 sm:$0xff]  }
 0x484   : > { %v8138_v46 = vpop.f32.mrb[47].mxu0  ;;  %v9458_v60 = vmax.f32 %v9415_v11, 0.0  ;;  %v16175_v30 = vpop.f32.mrb[148].mxu1  ;;  %9984 = vmatmul.mubr.bf16.vlgmr.msra.gmra.mrb[168].mxu1 %v17518_v50 }
 0x485   : > { %v20244_v47 = vadd.f32 %v8138_v46, %v20207_v34  ;;  %v16176_v14 = vpop.f32.mrb[149].mxu1 }
 0x486   : > { %v20248_v51 = vpack.c.bf16 %v9458_v60, %v9457_v42  ;;  %v16177_v62 = vadd.f32 %v16176_v14, %v16175_v30  ;;  %v16178_v28 = vpop.f32.mrb[150].mxu1 }
 0x487   : > { %v16179_v7 = vpop.f32.mrb[151].mxu1 }
 0x488   : > { %v9420_v34 = vadd.f32 %v20176_v9, %v16177_v62  ;;  %v16180_v32 = vadd.f32 %v16179_v7, %v16178_v28  ;;  %v20271_v7 = vld [vmem:[%s21831_s1] sm:$0xff]  }
 0x489   : > { %16334 = vmatpush3.bf16.msra.mxu1 %v20271_v7 }
 0x48a   : > { %v9459_v8 = vmax.f32 %v9420_v34, 0.0  ;;  %v9423_v52 = vadd.f32 %v20176_v9, %v16180_v32  ;;  %v20277_v32 = vld [vmem:[%s21831_s1 + $0x48] sm:$0xff]  }
 0x48b   : > { %16335 = vmatprep.subr.bf16.mxu1 %v20277_v32 }
 0x48c   : > { %v9460_v53 = vmax.f32 %v9423_v52, 0.0  ;;  %v16181_v55 = vpop.f32.mrb[152].mxu1  ;;  %v17521_v52 = vld [vmem:[%s17984_s16 + $0x384] ss:$8 sps:$4 sm:$0xff]  }
 0x48d   : > { %v16182_v57 = vpop.f32.mrb[153].mxu1  ;;  %9991 = vmatprep.mubr.bf16.mxu1 %v17521_v52 }
 0x48e   : > { %v20252_v58 = vpack.c.bf16 %v9460_v53, %v9459_v8  ;;  %v16183_v59 = vadd.f32 %v16182_v57, %v16181_v55  ;;  %v16184_v22 = vpop.f32.mrb[154].mxu1  ;;  %v20286_v53 = vld [vmem:[%s21831_s1 + $0x8] sm:$0xff]  }
 0x48f   : > { %v16185_v61 = vpop.f32.mrb[155].mxu1  ;;  %16336 = vmatpush3.bf16.msra.mxu1 %v20286_v53  ;;  %v17523_v57 = vld [vmem:[%s17984_s16 + $0x380] ss:$8 sps:$4 sm:$0xff]  }
 0x490   : > { %v9428_v63 = vadd.f32 %v20176_v9, %v16183_v59  ;;  %v16186_v0 = vadd.f32 %v16185_v61, %v16184_v22  ;;  %v20293_v59 = vld [vmem:[%s21831_s1 + $0x50] sm:$0xff]   ;;  %9992 = vmatmul.mubr.bf16.gmra.mrb[172].mxu1 %v17523_v57  ;;  %v20371_v57 = vld [vmem:[%s21831_s1 + $0x78] sm:$0xff]  }
 0x491   : > { %16337 = vmatprep.subr.bf16.mxu1 %v20293_v59 }
 0x492   : > { %v9461_v1 = vmax.f32 %v9428_v63, 0.0  ;;  %v9431_v5 = vadd.f32 %v20176_v9, %v16186_v0 }
 0x494   : > { %v9462_v6 = vmax.f32 %v9431_v5, 0.0  ;;  %v16187_v10 = vpop.f32.mrb[156].mxu1  ;;  %v20305_v5 = vld [vmem:[%s21831_s1 + $0x10] sm:$0xff]  }
 0x495   : > { %v16188_v13 = vpop.f32.mrb[157].mxu1  ;;  %16338 = vmatpush3.bf16.msra.mxu1 %v20305_v5 }
 0x496   : > { %v20256_v15 = vpack.c.bf16 %v9462_v6, %v9461_v1  ;;  %v16189_v17 = vadd.f32 %v16188_v13, %v16187_v10  ;;  %v16190_v35 = vpop.f32.mrb[158].mxu1  ;;  %v20321_v10 = vld [vmem:[%s21831_s1 + $0x18] sm:$0xff]  }
 0x497   : > { %v16191_v12 = vpop.f32.mrb[159].mxu1 }
 0x498   : > { %v9436_v19 = vadd.f32 %v20176_v9, %v16189_v17  ;;  %v16192_v38 = vadd.f32 %v16191_v12, %v16190_v35  ;;  %v17526_v17 = vld [vmem:[%s17984_s16 + $0x390] ss:$8 sps:$4 sm:$0xff]  }
 0x49a   : > { %v9463_v23 = vmax.f32 %v9436_v19, 0.0  ;;  %v9439_v24 = vadd.f32 %v20176_v9, %v16192_v38 }
 0x49c   : > { %v9464_v36 = vmax.f32 %v9439_v24, 0.0  ;;  %v16193_v41 = vpop.f32.mrb[160].mxu1 }
 0x49d   : > { %v16194_v33 = vpop.f32.mrb[161].mxu1 }
 0x49e   : > { %v20260_v46 = vpack.c.bf16 %v9464_v36, %v9463_v23  ;;  %v16195_v44 = vadd.f32 %v16194_v33, %v16193_v41  ;;  %v16196_v48 = vpop.f32.mrb[162].mxu1  ;;  %v20334_v23 = vld [vmem:[%s21831_s1 + $0x20] sm:$0xff]   ;;  %v20341_v41 = vld [vmem:[%s21831_s1 + $0x68] sm:$0xff]  }
 0x49f   : > { %v16197_v45 = vpop.f32.mrb[163].mxu1 }
 0x4a0   : > { %v9444_v49 = vadd.f32 %v20176_v9, %v16195_v44  ;;  %v16198_v29 = vadd.f32 %v16197_v45, %v16196_v48  ;;  %v17530_v44 = vld [vmem:[%s17984_s16 + $0x3a4] ss:$8 sps:$4 sm:$0xff]  }
 0x4a1   : > { %v20349_v48 = vld [vmem:[%s21831_s1 + $0x28] sm:$0xff]  }
 0x4a2   : > { %v9465_v60 = vmax.f32 %v9444_v49, 0.0  ;;  %v9447_v30 = vadd.f32 %v20176_v9, %v16198_v29  ;;  %v20356_v29 = vld [vmem:[%s21831_s1 + $0x70] sm:$0xff]  }
 0x4a4   : > { %v16199_v42 = vpop.f32.mrb[164].mxu1  ;;  %v9466_v34 = vmax.f32 %v9447_v30, 0.0 }
 0x4a5   : > { %v16200_v11 = vpop.f32.mrb[165].mxu1 }
 0x4a6   : > { %v20266_v14 = vadd.f32 %v16200_v11, %v16199_v42  ;;  %v16202_v62 = vpop.f32.mrb[166].mxu1  ;;  %v20280_v8 = vpack.c.bf16 %v9466_v34, %v9465_v60  ;;  %v20363_v34 = vld [vmem:[%s21831_s1 + $0x30] sm:$0xff]  }
 0x4a7   : > { %v16203_v28 = vpop.f32.mrb[167].mxu1 }
 0x4a8   : > { %v17535_v28 = vld [vmem:[%s17984_s16 + $0x3b4] ss:$8 sps:$4 sm:$0xff]  }
 0x4b1   : > { %v16843_v55 = vpop.f32.mrb[48].mxu0 }
 0x4b2   : > { %v20297_v22 = vadd.f32 %v16843_v55, %v20238_v26  ;;  %v8422_v61 = vpop.f32.mrb[49].mxu0  ;;  %v20314_v26 = vld [vmem:[%s21831_s1 + $0x58] sm:$0xff]  }
 0x4b3   : > { %v20300_v63 = vadd.f32 %v8422_v61, %v20241_v4  ;;  %v16844_v0 = vpop.f32.mrb[50].mxu0  ;;  %16339 = vmatprep.subr.bf16.mxu1 %v20314_v26  ;;  %v17524_v4 = vld [vmem:[%s17984_s16 + $0x394] ss:$8 sps:$4 sm:$0xff]  }
 0x4b4   : > { %v8425_v1 = vpop.f32.mrb[51].mxu0  ;;  %16340 = vmatpush3.bf16.msra.mxu1 %v20321_v10  ;;  %9999 = vmatprep.mubr.bf16.mxu1 %v17524_v4  ;;  %v20378_v0 = vld [vmem:[%s21831_s1 + $0x38] sm:$0xff]  }
 0x4b5   : > { %v20309_v6 = vadd.f32 %v8425_v1, %v20244_v47  ;;  %v20328_v47 = vld [vmem:[%s21831_s1 + $0x60] sm:$0xff]   ;;  %10000 = vmatmul.mubr.bf16.gmra.mrb[176].mxu1 %v17526_v17  ;;  %v17538_v17 = vld [vmem:[%s17984_s16 + $0x3b0] ss:$8 sps:$4 sm:$0xff]  }
 0x4b6   : > { %16341 = vmatprep.subr.bf16.mxu1 %v20328_v47  ;;  %10007 = vmatprep.mubr.bf16.mxu1 %v17530_v44 }
 0x4b8   : > { %16342 = vmatpush3.bf16.msra.mxu1 %v20334_v23 }
 0x4b9   : > { %v15989_v13 = vpop.f32.mrb[52].mxu0  ;;  %16343 = vmatprep.subr.bf16.mxu1 %v20341_v41 }
 0x4ba   : > { %v15990_v35 = vpop.f32.mrb[53].mxu0 }
 0x4bb   : > { %v15991_v12 = vadd.f32 %v15990_v35, %v15989_v13  ;;  %v15992_v19 = vpop.f32.mrb[54].mxu0 }
 0x4bc   : > { %v15993_v38 = vpop.f32.mrb[55].mxu0  ;;  %16344 = vmatpush3.bf16.msra.mxu1 %v20349_v48 }
 0x4bd   : > { %v8551_v24 = vadd.f32 %v20176_v9, %v15991_v12  ;;  %v15994_v36 = vadd.f32 %v15993_v38, %v15992_v19  ;;  %16345 = vmatprep.subr.bf16.mxu1 %v20356_v29  ;;  %10008 = vmatmul.mubr.bf16.gmra.mrb[180].mxu1 %v17532_v25  ;;  %v20394_v25 = vld [vmem:[%s21833_s3 + $0x70] sm:$0xff]  }
 0x4be   : > { %10015 = vmatprep.mubr.bf16.mxu1 %v17535_v28 }
 0x4bf   : > { %v8554_v33 = vadd.f32 %v20176_v9, %v15994_v36  ;;  %v8596_v49 = vmax.f32 %v8551_v24, 0.0  ;;  %v17513_v24 = vld [vmem:[%s21833_s3 + $0x68] sm:$0xff]  }
 0x4c0   : > { %16346 = vmatpush3.bf16.msra.mxu1 %v20363_v34 }
 0x4c1   : > { %v8597_v45 = vmax.f32 %v8554_v33, 0.0  ;;  %v15995_v50 = vpop.f32.mrb[56].mxu0  ;;  %16347 = vmatprep.subr.bf16.mxu1 %v20371_v57  ;;  %v15417_v33 = vld [vmem:[%s17984_s16 + $0x3c0] sm:$0x11] }
 0x4c2   : > { %v15996_v42 = vpop.f32.mrb[57].mxu0 }
 0x4c3   : > { %v8607_v11 = vpack.c.bf16 %v8597_v45, %v8596_v49  ;;  %v15997_v60 = vadd.f32 %v15996_v42, %v15995_v50  ;;  %v15998_v30 = vpop.f32.mrb[58].mxu0  ;;  %v15429_v45 = vcombine.high %v15417_v33, %v15417_v33 }
 0x4c4   : > { %v15999_v62 = vpop.f32.mrb[59].mxu0  ;;  %16348 = vmatpush3.bf16.msra.mxu1 %v20378_v0 }
 0x4c5   : > { %v8559_v52 = vadd.f32 %v20176_v9, %v15997_v60  ;;  %v16000_v55 = vadd.f32 %v15999_v62, %v15998_v30  ;;  %16849 = vmatprep.mubr.msk.bf16.mxu0 %vm7377_vm0, %v8607_v11  ;;  %16393 = vmatprep.subr.bf16.mxu1 %v20140_v27  ;;  %v15428_v30 = vcombine.low %v15417_v33, %v15417_v33 }
 0x4c6   : > { %10016 = vmatmul.mubr.bf16.gmra.mrb[184].mxu1 %v17538_v17  ;;  %v17546_v17 = vld [vmem:[%s17984_s16 + $0x3c8] ss:$8 sps:$4 sm:$0xff]  }
 0x4c7   : > { %v8562_v61 = vadd.f32 %v20176_v9, %v16000_v55  ;;  %v8598_v1 = vmax.f32 %v8559_v52, 0.0  ;;  %10023 = vmatprep.mubr.bf16.mxu1 %v15429_v45 }
 0x4c9   : > { %v8599_v4 = vmax.f32 %v8562_v61, 0.0  ;;  %v16001_v13 = vpop.f32.mrb[60].mxu0  ;;  %v17548_v61 = vld [vmem:[%s17984_s16 + $0x3cc] ss:$8 sps:$4 sm:$0xff]  }
 0x4ca   : > { %v16002_v35 = vpop.f32.mrb[61].mxu0 }
 0x4cb   : > { %v8608_v12 = vpack.c.bf16 %v8599_v4, %v8598_v1  ;;  %v16003_v19 = vadd.f32 %v16002_v35, %v16001_v13  ;;  %v16004_v38 = vpop.f32.mrb[62].mxu0 }
 0x4cc   : > { %v16005_v36 = vpop.f32.mrb[63].mxu0 }
 0x4cd   : > { %v8567_v44 = vadd.f32 %v20176_v9, %v16003_v19  ;;  %v16006_v49 = vadd.f32 %v16005_v36, %v16004_v38  ;;  %16850 = vmatmul.mubr.msk.bf16.vlgmr.msra.gmra.mrb[24].mxu0 %vm7377_vm0, %v8608_v12 }
 0x4ce   : > { %16862 = vmatpush3.bf16.msra.mxu0 %v20216_v37  ;;  %10024 = vmatmul.mubr.bf16.gmra.mrb[188].mxu1 %v15428_v30 }
 0x4cf   : > { %v8570_v50 = vadd.f32 %v20176_v9, %v16006_v49  ;;  %16863 = vmatprep.subr.bf16.mxu0 %v17513_v24  ;;  %v8600_v42 = vmax.f32 %v8567_v44, 0.0  ;;  %10270 = vmatprep.mubr.bf16.mxu1 %v17548_v61  ;;  %v17552_v49 = vld [vmem:[%s17984_s16 + $0x3dc] ss:$8 sps:$4 sm:$0xff]  }
 0x4d1   : > { %v8601_v11 = vmax.f32 %v8570_v50, 0.0  ;;  %v16007_v60 = vpop.f32.mrb[64].mxu0 }
 0x4d2   : > { %v16008_v62 = vpop.f32.mrb[65].mxu0  ;;  %16864 = vmatpush3.bf16.msra.mxu0 %v17513_v24 }
 0x4d3   : > { %v8609_v28 = vpack.c.bf16 %v8601_v11, %v8600_v42  ;;  %v16009_v52 = vadd.f32 %v16008_v62, %v16007_v60  ;;  %v16010_v37 = vpop.f32.mrb[66].mxu0  ;;  %16877 = vmatprep.subr.bf16.mxu0 %v20394_v25  ;;  %v17555_v62 = vld [vmem:[%s17984_s16 + $0x3d8] ss:$8 sps:$4 sm:$0xff]  }
 0x4d4   : > { %v16011_v55 = vpop.f32.mrb[67].mxu0 }
 0x4d5   : > { %v8575_v1 = vadd.f32 %v20176_v9, %v16009_v52  ;;  %v16012_v4 = vadd.f32 %v16011_v55, %v16010_v37  ;;  %16853 = vmatprep.mubr.msk.bf16.mxu0 %vm7377_vm0, %v8609_v28 }
 0x4d6   : > { %10271 = vmatmul.mubr.bf16.vlgmr.msra.gmra.mrb[192].mxu1 %v17546_v17 }
 0x4d7   : > { %v8578_v13 = vadd.f32 %v20176_v9, %v16012_v4  ;;  %v8602_v35 = vmax.f32 %v8575_v1, 0.0  ;;  %16394 = vmatpush3.bf16.msra.mxu1 %v20271_v7  ;;  %10278 = vmatprep.mubr.bf16.mxu1 %v17552_v49  ;;  %v17557_v1 = vld [vmem:[%s17984_s16 + $0x3ec] ss:$8 sps:$4 sm:$0xff]  }
 0x4d8   : > { %16395 = vmatprep.subr.bf16.mxu1 %v20277_v32  ;;  %v17571_v49 = vld [vmem:[%s17984_s16 + $0x424] ss:$8 sps:$4 sm:$0xff]  }
 0x4d9   : > { %v8603_v12 = vmax.f32 %v8578_v13, 0.0  ;;  %v16013_v19 = vpop.f32.mrb[68].mxu0 }
 0x4da   : > { %v16014_v38 = vpop.f32.mrb[69].mxu0 }
 0x4db   : > { %v8610_v24 = vpack.c.bf16 %v8603_v12, %v8602_v35  ;;  %v16015_v36 = vadd.f32 %v16014_v38, %v16013_v19  ;;  %v16016_v33 = vpop.f32.mrb[70].mxu0  ;;  %16396 = vmatpush3.bf16.msra.mxu1 %v20286_v53  ;;  %v17560_v35 = vld [vmem:[%s17984_s16 + $0x3e8] ss:$8 sps:$4 sm:$0xff]   ;;  %v17561_v12 = vld [vmem:[%s17984_s16 + $0x3fc] ss:$8 sps:$4 sm:$0xff]  }
 0x4dc   : > { %v16017_v44 = vpop.f32.mrb[71].mxu0  ;;  %16397 = vmatprep.subr.bf16.mxu1 %v20293_v59  ;;  %v17563_v19 = vld [vmem:[%s17984_s16 + $0x3f8] ss:$8 sps:$4 sm:$0xff]  }
 0x4dd   : > { %v8583_v45 = vadd.f32 %v20176_v9, %v16015_v36  ;;  %v16018_v50 = vadd.f32 %v16017_v44, %v16016_v33  ;;  %16854 = vmatmul.mubr.msk.bf16.gmra.mrb[28].mxu0 %vm7377_vm0, %v8610_v24  ;;  %v17515_v38 = vld [vmem:[%s21833_s3 + $0x78] sm:$0xff]   ;;  %v17564_v24 = vld [vmem:[%s17984_s16 + $0x40c] ss:$8 sps:$4 sm:$0xff]   ;;  %v17566_v33 = vld [vmem:[%s17984_s16 + $0x408] ss:$8 sps:$4 sm:$0xff]  }
 0x4de   : > { %10279 = vmatmul.mubr.bf16.gmra.mrb[196].mxu1 %v17555_v62  ;;  %v15448_v36 = vld [vmem:[%s17984_s16 + $0x418] sm:$0x11] }
 0x4df   : > { %v8586_v42 = vadd.f32 %v20176_v9, %v16018_v50  ;;  %v8604_v11 = vmax.f32 %v8583_v45, 0.0  ;;  %16398 = vmatpush3.bf16.msra.mxu1 %v20305_v5  ;;  %10286 = vmatprep.mubr.bf16.mxu1 %v17557_v1  ;;  %v15459_v44 = vcombine.low %v15448_v36, %v15448_v36  ;;  %v17572_v45 = vld [vmem:[%s17984_s16 + $0x434] ss:$8 sps:$4 sm:$0xff]   ;;  %v17575_v50 = vld [vmem:[%s17984_s16 + $0x444] ss:$8 sps:$4 sm:$0xff]  }
 0x4e0   : > { %16399 = vmatprep.subr.bf16.mxu1 %v20314_v26 }
 0x4e1   : > { %v8605_v60 = vmax.f32 %v8586_v42, 0.0  ;;  %v16019_v30 = vpop.f32.mrb[72].mxu0  ;;  %v9165_v42 = vadd.f32 %v20176_v9, %v20235_v39 }
 0x4e2   : > { %v16020_v28 = vpop.f32.mrb[73].mxu0 }
 0x4e3   : > { %v8611_v52 = vpack.c.bf16 %v8605_v60, %v8604_v11  ;;  %v16021_v37 = vadd.f32 %v16020_v28, %v16019_v30  ;;  %v16022_v55 = vpop.f32.mrb[74].mxu0  ;;  %16400 = vmatpush3.bf16.msra.mxu1 %v20321_v10  ;;  %v9452_v11 = vadd.f32 %v20176_v9, %v20266_v14  ;;  %v17583_v60 = vld [vmem:[%s17984_s16 + $0x460] ss:$8 sps:$4 sm:$0xff]  }
 0x4e4   : > { %v16023_v61 = vpop.f32.mrb[75].mxu0  ;;  %16401 = vmatprep.subr.bf16.mxu1 %v20328_v47 }
 0x4e5   : > { %v8591_v4 = vadd.f32 %v20176_v9, %v16021_v37  ;;  %16857 = vmatprep.mubr.msk.bf16.mxu0 %vm7377_vm0, %v8611_v52 }
 0x4e6   : > { %10287 = vmatmul.mubr.bf16.gmra.mrb[200].mxu1 %v17560_v35 }
 0x4e7   : > { %v8606_v13 = vmax.f32 %v8591_v4, 0.0  ;;  %16402 = vmatpush3.bf16.msra.mxu1 %v20334_v23  ;;  %10294 = vmatprep.mubr.bf16.mxu1 %v17561_v12 }
 0x4e8   : > { %16403 = vmatprep.subr.bf16.mxu1 %v20341_v41 }
 0x4e9   : > { %v8612_v17 = vpack.c.bf16 %v8606_v13, %v8606_v13  ;;  %v17586_v13 = vld [vmem:[%s21833_s3 + $0x90] sm:$0xff]  }
 0x4eb   : > { %16858 = vmatmul.mubr.msk.bf16.gmra.mrb[76].mxu0 %vm7377_vm0, %v8612_v17  ;;  %16404 = vmatpush3.bf16.msra.mxu1 %v20349_v48 }
 0x4ec   : > { %16865 = vmatprep.mubr.msk.bf16.mxu0 %vm7377_vm0, %v20180_v18  ;;  %16405 = vmatprep.subr.bf16.mxu1 %v20356_v29  ;;  %v17516_v18 = vld [vmem:[%s21833_s3 + $0x80] sm:$0xff]  }
 0x4ee   : > { %10295 = vmatmul.mubr.bf16.gmra.mrb[204].mxu1 %v17563_v19 }
 0x4ef   : > { %10302 = vmatprep.mubr.bf16.mxu1 %v17564_v24  ;;  %16406 = vmatpush3.bf16.msra.mxu1 %v20363_v34 }
 0x4f0   : > { %16407 = vmatprep.subr.bf16.mxu1 %v20371_v57 }
 0x4f3   : > { %16866 = vmatmul.mubr.msk.bf16.vlgmr.msra.gmra.mrb[24].mxu0 %vm7377_vm0, %v20184_v40  ;;  %v15460_v40 = vcombine.high %v15448_v36, %v15448_v36  ;;  %16408 = vmatpush3.bf16.msra.mxu1 %v20378_v0 }
 0x4f4   : > { %16869 = vmatprep.mubr.msk.bf16.mxu0 %vm7377_vm0, %v20188_v31  ;;  %16878 = vmatpush3.bf16.msra.mxu0 %v20394_v25  ;;  %v8878_v31 = vadd.f32 %v20176_v9, %v20201_v21 }
 0x4f5   : > { %16879 = vmatprep.subr.bf16.mxu0 %v17515_v38  ;;  %16513 = vmatprep.subr.bf16.mxu1 %v20140_v27 }
 0x4f6   : > { %10303 = vmatmul.mubr.bf16.gmra.mrb[208].mxu1 %v17566_v33  ;;  %v8893_v25 = vmax.f32 %v8878_v31, 0.0 }
 0x4f7   : > { %10310 = vmatprep.mubr.bf16.mxu1 %v15460_v40 }
 0x4f8   : > { %16880 = vmatpush3.bf16.msra.mxu0 %v17515_v38  ;;  %v8899_v21 = vpack.c.bf16 %v8893_v25, %v8893_v25 }
 0x4f9   : > { %16893 = vmatprep.subr.bf16.mxu0 %v17516_v18 }
 0x4fb   : > { %16870 = vmatmul.mubr.msk.bf16.gmra.mrb[28].mxu0 %vm7377_vm0, %v20192_v16  ;;  %v17569_v16 = vld [vmem:[%s17984_s16 + $0x420] ss:$8 sps:$4 sm:$0xff]  }
 0x4fc   : > { %16873 = vmatprep.mubr.msk.bf16.mxu0 %vm7377_vm0, %v20199_v3  ;;  %v17517_v3 = vld [vmem:[%s21833_s3 + $0x88] sm:$0xff]  }
 0x4fe   : > { %10311 = vmatmul.mubr.bf16.gmra.mrb[212].mxu1 %v15459_v44 }
 0x4ff   : > { %10557 = vmatprep.mubr.bf16.mxu1 %v17571_v49 }
 0x503   : > { %16874 = vmatmul.mubr.msk.bf16.gmra.mrb[80].mxu0 %vm7377_vm0, %v8899_v21 }
 0x504   : > { %16881 = vmatprep.mubr.msk.bf16.mxu0 %vm7377_vm0, %v20211_v43  ;;  %v17574_v43 = vld [vmem:[%s17984_s16 + $0x430] ss:$8 sps:$4 sm:$0xff]  }
 0x506   : > { %10558 = vmatmul.mubr.bf16.vlgmr.msra.gmra.mrb[216].mxu1 %v17569_v16  ;;  %v20555_v16 = vld [vmem:[%s21832_s2] ss:$0 sm:$0xff] }
 0x507   : > { %10565 = vmatprep.mubr.bf16.mxu1 %v17572_v45  ;;  %16514 = vmatpush3.bf16.msra.mxu1 %v20271_v7 }
 0x508   : > { %16515 = vmatprep.subr.bf16.mxu1 %v20277_v32 }
 0x50b   : > { %16882 = vmatmul.mubr.msk.bf16.vlgmr.msra.gmra.mrb[24].mxu0 %vm7377_vm0, %v20221_v54  ;;  %16516 = vmatpush3.bf16.msra.mxu1 %v20286_v53  ;;  %v9180_v54 = vmax.f32 %v9165_v42, 0.0 }
 0x50c   : > { %16885 = vmatprep.mubr.msk.bf16.mxu0 %vm7377_vm0, %v20225_v56  ;;  %16894 = vmatpush3.bf16.msra.mxu0 %v17516_v18  ;;  %v17577_v56 = vld [vmem:[%s17984_s16 + $0x440] ss:$8 sps:$4 sm:$0xff]  }
 0x50d   : > { %16895 = vmatprep.subr.bf16.mxu0 %v17517_v3  ;;  %16517 = vmatprep.subr.bf16.mxu1 %v20293_v59  ;;  %v9186_v39 = vpack.c.bf16 %v9180_v54, %v9180_v54 }
 0x50e   : > { %10566 = vmatmul.mubr.bf16.gmra.mrb[220].mxu1 %v17574_v43 }
 0x50f   : > { %10573 = vmatprep.mubr.bf16.mxu1 %v17575_v50  ;;  %16518 = vmatpush3.bf16.msra.mxu1 %v20305_v5 }
 0x510   : > { %16896 = vmatpush3.bf16.msra.mxu0 %v17517_v3  ;;  %16519 = vmatprep.subr.bf16.mxu1 %v20314_v26 }
 0x511   : > { %16213 = vmatprep.subr.bf16.mxu0 %v20140_v27  ;;  %v17578_v27 = vld [vmem:[%s17984_s16 + $0x454] ss:$8 sps:$4 sm:$0xff]  }
 0x513   : > { %16886 = vmatmul.mubr.msk.bf16.gmra.mrb[28].mxu0 %vm7377_vm0, %v20229_v2  ;;  %16520 = vmatpush3.bf16.msra.mxu1 %v20321_v10  ;;  %v17580_v2 = vld [vmem:[%s17984_s16 + $0x450] ss:$8 sps:$4 sm:$0xff]  }
 0x514   : > { %16889 = vmatprep.mubr.msk.bf16.mxu0 %vm7377_vm0, %v20233_v20  ;;  %16521 = vmatprep.subr.bf16.mxu1 %v20328_v47  ;;  %v17581_v20 = vld [vmem:[%s17984_s16 + $0x464] ss:$8 sps:$4 sm:$0xff]  }
 0x516   : > { %10574 = vmatmul.mubr.bf16.gmra.mrb[224].mxu1 %v17577_v56 }
 0x517   : > { %10581 = vmatprep.mubr.bf16.mxu1 %v17578_v27  ;;  %16522 = vmatpush3.bf16.msra.mxu1 %v20334_v23 }
 0x518   : > { %16523 = vmatprep.subr.bf16.mxu1 %v20341_v41 }
 0x51b   : > { %16890 = vmatmul.mubr.msk.bf16.gmra.mrb[84].mxu0 %vm7377_vm0, %v9186_v39  ;;  %16524 = vmatpush3.bf16.msra.mxu1 %v20349_v48 }
 0x51c   : > { %16897 = vmatprep.mubr.msk.bf16.mxu0 %vm7377_vm0, %v20248_v51  ;;  %v15479_v51 = vld [vmem:[%s17984_s16 + $0x470] sm:$0x11]  ;;  %16525 = vmatprep.subr.bf16.mxu1 %v20356_v29 }
 0x51e   : > { %10582 = vmatmul.mubr.bf16.gmra.mrb[228].mxu1 %v17580_v2 }
 0x51f   : > { %10589 = vmatprep.mubr.bf16.mxu1 %v17581_v20  ;;  %16526 = vmatpush3.bf16.msra.mxu1 %v20363_v34 }
 0x520   : > { %16527 = vmatprep.subr.bf16.mxu1 %v20371_v57 }
 0x523   : > { %16898 = vmatmul.mubr.msk.bf16.vlgmr.msra.gmra.mrb[24].mxu0 %vm7377_vm0, %v20252_v58  ;;  %v15491_v58 = vcombine.high %v15479_v51, %v15479_v51  ;;  %16528 = vmatpush3.bf16.msra.mxu1 %v20378_v0 }
 0x524   : > { %16214 = vmatpush3.bf16.msra.mxu0 %v20271_v7  ;;  %16901 = vmatprep.mubr.msk.bf16.mxu0 %vm7377_vm0, %v20256_v15  ;;  %v9467_v15 = vmax.f32 %v9452_v11, 0.0  ;;  %v15490_v7 = vcombine.low %v15479_v51, %v15479_v51 }
 0x525   : > { %16215 = vmatprep.subr.bf16.mxu0 %v20277_v32  ;;  %v20517_v32 = vld [vmem:[%s21831_s1 + $0x40] sm:$0xff]  }
 0x526   : > { %10590 = vmatmul.mubr.bf16.gmra.mrb[232].mxu1 %v17583_v60  ;;  %v9473_v14 = vpack.c.bf16 %v9467_v15, %v9467_v15  ;;  %16573 = vmatprep.subr.bf16.mxu1 %v20517_v32 }
 0x527   : > { %10597 = vmatprep.mubr.bf16.mxu1 %v15491_v58 }
 0x528   : > { %16216 = vmatpush3.bf16.msra.mxu0 %v20286_v53  ;;  %v17533_v53 = vld [vmem:[%s17984_s16 + $0x32c] ss:$8 sps:$4 sm:$0xff]  }
 0x529   : > { %16217 = vmatprep.subr.bf16.mxu0 %v20293_v59  ;;  %v17537_v59 = vld [vmem:[%s17984_s16 + $0x328] ss:$8 sps:$4 sm:$0xff]  }
 0x52b   : > { %16902 = vmatmul.mubr.msk.bf16.gmra.mrb[28].mxu0 %vm7377_vm0, %v20260_v46  ;;  %v17529_v46 = vld [vmem:[%s17984_s16 + $0x31c] ss:$8 sps:$4 sm:$0xff]  }
 0x52c   : > { %16218 = vmatpush3.bf16.msra.mxu0 %v20305_v5  ;;  %16905 = vmatprep.mubr.msk.bf16.mxu0 %vm7377_vm0, %v20280_v8  ;;  %v17527_v8 = vld [vmem:[%s17984_s16 + $0x318] ss:$8 sps:$4 sm:$0xff]   ;;  %v17539_v5 = vld [vmem:[%s17984_s16 + $0x33c] ss:$8 sps:$4 sm:$0xff]  }
 0x52d   : > { %16219 = vmatprep.subr.bf16.mxu0 %v20314_v26  ;;  %v17542_v26 = vld [vmem:[%s17984_s16 + $0x338] ss:$8 sps:$4 sm:$0xff]  }
 0x52e   : > { %10598 = vmatmul.mubr.bf16.gmra.mrb[236].mxu1 %v15490_v7 }
 0x530   : > { %16220 = vmatpush3.bf16.msra.mxu0 %v20321_v10  ;;  %v17544_v10 = vld [vmem:[%s17984_s16 + $0x34c] ss:$8 sps:$4 sm:$0xff]  }
 0x531   : > { %16221 = vmatprep.subr.bf16.mxu0 %v20328_v47  ;;  %v17549_v47 = vld [vmem:[%s17984_s16 + $0x348] ss:$8 sps:$4 sm:$0xff]  }
 0x533   : > { %16906 = vmatmul.mubr.msk.bf16.gmra.mrb[88].mxu0 %vm7377_vm0, %v9473_v14 }
 0x534   : > { %16222 = vmatpush3.bf16.msra.mxu0 %v20334_v23  ;;  %9696 = vmatprep.mubr.bf16.mxu0 %v17529_v46  ;;  %v17550_v23 = vld [vmem:[%s17984_s16 + $0x35c] ss:$8 sps:$4 sm:$0xff]  }
 0x535   : > { %16223 = vmatprep.subr.bf16.mxu0 %v20341_v41  ;;  %v15386_v41 = vld [vmem:[%s17984_s16 + $0x368] sm:$0x11] }
 0x538   : > { %16224 = vmatpush3.bf16.msra.mxu0 %v20349_v48  ;;  %v17554_v48 = vld [vmem:[%s17984_s16 + $0x358] ss:$8 sps:$4 sm:$0xff]  }
 0x539   : > { %16225 = vmatprep.subr.bf16.mxu0 %v20356_v29  ;;  %v15398_v29 = vcombine.high %v15386_v41, %v15386_v41 }
 0x53c   : > { %16226 = vmatpush3.bf16.msra.mxu0 %v20363_v34  ;;  %v15397_v34 = vcombine.low %v15386_v41, %v15386_v41 }
 0x53d   : > { %16227 = vmatprep.subr.bf16.mxu0 %v20371_v57 }
 0x540   : > { %16228 = vmatpush3.bf16.msra.mxu0 %v20378_v0 }
 0x541   : > { %16909 = vmatprep.subr.bf16.mxu0 %v17586_v13 }
 0x543   : > { %9697 = vmatmul.mubr.bf16.vlgmr.msra.gmra.mrb[92].mxu0 %v17527_v8  ;;  %v17587_v8 = vld [vmem:[%s21833_s3 + $0x98] sm:$0xff]  }
 0x544   : > { %9704 = vmatprep.mubr.bf16.mxu0 %v17533_v53  ;;  %16910 = vmatpush3.bf16.msra.mxu0 %v17586_v13 }
 0x545   : > { %16911 = vmatprep.subr.bf16.mxu0 %v17587_v8 }
 0x548   : > { %16912 = vmatpush3.bf16.msra.mxu0 %v17587_v8 }
 0x54b   : > { %9705 = vmatmul.mubr.bf16.gmra.mrb[96].mxu0 %v17537_v59 }
 0x54c   : > { %9712 = vmatprep.mubr.bf16.mxu0 %v17539_v5 }
 0x553   : > { %9713 = vmatmul.mubr.bf16.gmra.mrb[100].mxu0 %v17542_v26 }
 0x554   : > { %9720 = vmatprep.mubr.bf16.mxu0 %v17544_v10 }
 0x557   : > { %v16289_v57 = vpop.f32.mrb[168].mxu1 }
 0x558   : > { %v16290_v0 = vpop.f32.mrb[169].mxu1 }
 0x559   : > { %v16291_v30 = vadd.f32 %v16290_v0, %v16289_v57  ;;  %v16292_v62 = vpop.f32.mrb[170].mxu1 }
 0x55a   : > { %v16293_v28 = vpop.f32.mrb[171].mxu1 }
 0x55b   : > { %9721 = vmatmul.mubr.bf16.gmra.mrb[104].mxu0 %v17549_v47  ;;  %v9986_v52 = vadd.f32 %v20176_v9, %v16291_v30  ;;  %v16294_v37 = vadd.f32 %v16293_v28, %v16292_v62 }
 0x55c   : > { %9728 = vmatprep.mubr.bf16.mxu0 %v17550_v23 }
 0x55d   : > { %v10031_v55 = vmax.f32 %v9986_v52, 0.0  ;;  %v9989_v61 = vadd.f32 %v20176_v9, %v16294_v37 }
 0x55f   : > { %v10032_v1 = vmax.f32 %v9989_v61, 0.0 }
 0x561   : > { %v20543_v4 = vpack.c.bf16 %v10032_v1, %v10031_v55 }
 0x563   : > { %9729 = vmatmul.mubr.bf16.gmra.mrb[108].mxu0 %v17554_v48  ;;  %v16295_v17 = vpop.f32.mrb[172].mxu1 }
 0x564   : > { %9736 = vmatprep.mubr.bf16.mxu0 %v15398_v29  ;;  %v16296_v35 = vpop.f32.mrb[173].mxu1 }
 0x565   : > { %v16297_v12 = vadd.f32 %v16296_v35, %v16295_v17  ;;  %v16298_v19 = vpop.f32.mrb[174].mxu1 }
 0x566   : > { %v16299_v38 = vpop.f32.mrb[175].mxu1 }
 0x567   : > { %v9994_v24 = vadd.f32 %v20176_v9, %v16297_v12  ;;  %v16300_v18 = vadd.f32 %v16299_v38, %v16298_v19 }
 0x569   : > { %v10033_v40 = vmax.f32 %v9994_v24, 0.0  ;;  %v9997_v31 = vadd.f32 %v20176_v9, %v16300_v18  ;;  %v20581_v24 = vld [vmem:[%s21833_s3 + $0xa0] sm:$0xff]  }
 0x56a   : > { %16925 = vmatprep.subr.bf16.mxu0 %v20581_v24 }
 0x56b   : > { %9737 = vmatmul.mubr.bf16.gmra.mrb[112].mxu0 %v15397_v34  ;;  %v10034_v49 = vmax.f32 %v9997_v31, 0.0 }
 0x56d   : > { %v20550_v21 = vpack.c.bf16 %v10034_v49, %v10033_v40 }
 0x588   : > { %v16301_v36 = vpop.f32.mrb[176].mxu1 }
 0x589   : > { %v16302_v33 = vpop.f32.mrb[177].mxu1 }
 0x58a   : > { %v16303_v25 = vadd.f32 %v16302_v33, %v16301_v36  ;;  %v16304_v44 = vpop.f32.mrb[178].mxu1 }
 0x58b   : > { %v16305_v45 = vpop.f32.mrb[179].mxu1 }
 0x58c   : > { %v10002_v3 = vadd.f32 %v20555_v16, %v16303_v25  ;;  %v16306_v43 = vadd.f32 %v16305_v45, %v16304_v44 }
 0x58e   : > { %v10035_v50 = vmax.f32 %v10002_v3, 0.0  ;;  %v10005_v42 = vadd.f32 %v20555_v16, %v16306_v43 }
 0x590   : > { %v10036_v54 = vmax.f32 %v10005_v42, 0.0  ;;  %v16307_v56 = vpop.f32.mrb[180].mxu1 }
 0x591   : > { %v16308_v9 = vpop.f32.mrb[181].mxu1 }
 0x592   : > { %v20559_v27 = vpack.c.bf16 %v10036_v54, %v10035_v50  ;;  %v16310_v39 = vpop.f32.mrb[182].mxu1  ;;  %v16309_v20 = vadd.f32 %v16308_v9, %v16307_v56 }
 0x593   : > { %v16311_v2 = vpop.f32.mrb[183].mxu1 }
 0x594   : > { %v16312_v51 = vadd.f32 %v16311_v2, %v16310_v39  ;;  %v10010_v11 = vadd.f32 %v20555_v16, %v16309_v20 }
 0x596   : > { %v10013_v60 = vadd.f32 %v20555_v16, %v16312_v51  ;;  %v10037_v58 = vmax.f32 %v10010_v11, 0.0 }
 0x598   : > { %v10038_v15 = vmax.f32 %v10013_v60, 0.0 }
 0x599   : > { %v16313_v14 = vpop.f32.mrb[184].mxu1 }
 0x59a   : > { %v16314_v7 = vpop.f32.mrb[185].mxu1  ;;  %v20563_v46 = vpack.c.bf16 %v10038_v15, %v10037_v58 }
 0x59b   : > { %v16316_v53 = vpop.f32.mrb[186].mxu1  ;;  %v16315_v5 = vadd.f32 %v16314_v7, %v16313_v14 }
 0x59c   : > { %v16317_v59 = vpop.f32.mrb[187].mxu1 }
 0x59d   : > { %v16318_v26 = vadd.f32 %v16317_v59, %v16316_v53  ;;  %v10018_v10 = vadd.f32 %v20555_v16, %v16315_v5 }
 0x59f   : > { %v10021_v47 = vadd.f32 %v20555_v16, %v16318_v26  ;;  %v10039_v23 = vmax.f32 %v10018_v10, 0.0 }
 0x5a1   : > { %v10040_v41 = vmax.f32 %v10021_v47, 0.0  ;;  %v16319_v48 = vpop.f32.mrb[188].mxu1 }
 0x5a2   : > { %v16320_v29 = vpop.f32.mrb[189].mxu1 }
 0x5a3   : > { %v20570_v34 = vpack.c.bf16 %v10040_v41, %v10039_v23  ;;  %v16322_v57 = vpop.f32.mrb[190].mxu1  ;;  %v20572_v30 = vadd.f32 %v16320_v29, %v16319_v48 }
 0x5a4   : > { %v16323_v0 = vpop.f32.mrb[191].mxu1 }
 0x5a9   : > { %v16349_v62 = vpop.f32.mrb[192].mxu1 }
 0x5aa   : > { %v16350_v28 = vpop.f32.mrb[193].mxu1 }
 0x5ab   : > { %v16352_v52 = vpop.f32.mrb[194].mxu1  ;;  %v16351_v55 = vadd.f32 %v16350_v28, %v16349_v62 }
 0x5ac   : > { %v16353_v37 = vpop.f32.mrb[195].mxu1 }
 0x5ad   : > { %v16354_v61 = vadd.f32 %v16353_v37, %v16352_v52  ;;  %v10273_v1 = vadd.f32 %v20555_v16, %v16351_v55 }
 0x5af   : > { %v10276_v13 = vadd.f32 %v20555_v16, %v16354_v61  ;;  %v10318_v17 = vmax.f32 %v10273_v1, 0.0 }
 0x5b1   : > { %v10319_v35 = vmax.f32 %v10276_v13, 0.0  ;;  %v16355_v12 = vpop.f32.mrb[196].mxu1 }
 0x5b2   : > { %v16356_v19 = vpop.f32.mrb[197].mxu1 }
 0x5b3   : > { %v20576_v38 = vpack.c.bf16 %v10319_v35, %v10318_v17  ;;  %v16358_v18 = vpop.f32.mrb[198].mxu1  ;;  %v16357_v40 = vadd.f32 %v16356_v19, %v16355_v12 }
 0x5b4   : > { %v16359_v36 = vpop.f32.mrb[199].mxu1 }
 0x5b5   : > { %v16360_v31 = vadd.f32 %v16359_v36, %v16358_v18  ;;  %v10281_v45 = vadd.f32 %v20555_v16, %v16357_v40 }
 0x5b7   : > { %v10284_v43 = vadd.f32 %v20555_v16, %v16360_v31  ;;  %v10320_v54 = vmax.f32 %v10281_v45, 0.0 }
 0x5b9   : > { %v10321_v56 = vmax.f32 %v10284_v43, 0.0  ;;  %v16361_v9 = vpop.f32.mrb[200].mxu1 }
 0x5ba   : > { %v16362_v39 = vpop.f32.mrb[201].mxu1 }
 0x5bb   : > { %v20589_v2 = vpack.c.bf16 %v10321_v56, %v10320_v54  ;;  %v16364_v20 = vpop.f32.mrb[202].mxu1 }
 0x5bc   : > { %v16365_v51 = vpop.f32.mrb[203].mxu1 }
 0x5bd   : > { %v16366_v11 = vadd.f32 %v16365_v51, %v16364_v20 }
 0x5be   : > { %v16859_v33 = vpop.f32.mrb[76].mxu0 }
 0x5bf   : > { %v8733_v25 = vadd.f32 %v16859_v33, %v20297_v22  ;;  %v8709_v44 = vpop.f32.mrb[77].mxu0  ;;  %v16363_v22 = vadd.f32 %v16362_v39, %v16361_v9  ;;  %v10292_v60 = vadd.f32 %v20555_v16, %v16366_v11 }
 0x5c0   : > { %v8731_v49 = vadd.f32 %v8709_v44, %v20300_v63  ;;  %v16860_v3 = vpop.f32.mrb[78].mxu0 }
 0x5c1   : > { %v8712_v50 = vpop.f32.mrb[79].mxu0  ;;  %v10289_v63 = vadd.f32 %v20555_v16, %v16363_v22  ;;  %v16367_v58 = vpop.f32.mrb[204].mxu1  ;;  %v10323_v14 = vmax.f32 %v10292_v60, 0.0 }
 0x5c2   : > { %v8732_v42 = vadd.f32 %v8712_v50, %v20309_v6  ;;  %v16368_v7 = vpop.f32.mrb[205].mxu1 }
 0x5c3   : > { %v10322_v15 = vmax.f32 %v10289_v63, 0.0  ;;  %v16369_v8 = vadd.f32 %v16368_v7, %v16367_v58  ;;  %v16370_v6 = vpop.f32.mrb[206].mxu1 }
 0x5c4   : > { %v16371_v59 = vpop.f32.mrb[207].mxu1 }
 0x5c5   : > { %v20593_v53 = vpack.c.bf16 %v10323_v14, %v10322_v15  ;;  %v10297_v5 = vadd.f32 %v20555_v16, %v16369_v8  ;;  %v16372_v26 = vadd.f32 %v16371_v59, %v16370_v6 }
 0x5c7   : > { %v10324_v10 = vmax.f32 %v10297_v5, 0.0  ;;  %v10300_v47 = vadd.f32 %v20555_v16, %v16372_v26 }
 0x5c9   : > { %v10325_v23 = vmax.f32 %v10300_v47, 0.0  ;;  %v16373_v41 = vpop.f32.mrb[208].mxu1 }
 0x5ca   : > { %v16374_v48 = vpop.f32.mrb[209].mxu1 }
 0x5cb   : > { %v20597_v29 = vpack.c.bf16 %v10325_v23, %v10324_v10  ;;  %v16375_v57 = vadd.f32 %v16374_v48, %v16373_v41  ;;  %v16376_v0 = vpop.f32.mrb[210].mxu1 }
 0x5cc   : > { %v16377_v62 = vpop.f32.mrb[211].mxu1 }
 0x5cd   : > { %v10305_v28 = vadd.f32 %v20555_v16, %v16375_v57  ;;  %v16378_v52 = vadd.f32 %v16377_v62, %v16376_v0 }
 0x5cf   : > { %v10326_v1 = vmax.f32 %v10305_v28, 0.0  ;;  %v10308_v13 = vadd.f32 %v20555_v16, %v16378_v52 }
 0x5d1   : > { %v10327_v19 = vmax.f32 %v10308_v13, 0.0  ;;  %v16379_v18 = vpop.f32.mrb[212].mxu1 }
 0x5d2   : > { %v16380_v33 = vpop.f32.mrb[213].mxu1 }
 0x5d3   : > { %v20601_v40 = vpack.c.bf16 %v10327_v19, %v10326_v1  ;;  %v20603_v31 = vadd.f32 %v16380_v33, %v16379_v18  ;;  %v16382_v44 = vpop.f32.mrb[214].mxu1 }
 0x5d4   : > { %v16383_v3 = vpop.f32.mrb[215].mxu1 }
 0x5d6   : > { %v16875_v37 = vpop.f32.mrb[80].mxu0 }
 0x5d7   : > { %v9020_v55 = vadd.f32 %v16875_v37, %v8733_v25  ;;  %v8996_v61 = vpop.f32.mrb[81].mxu0 }
 0x5d8   : > { %v9018_v17 = vadd.f32 %v8996_v61, %v8731_v49  ;;  %v16876_v35 = vpop.f32.mrb[82].mxu0 }
 0x5d9   : > { %v8999_v12 = vpop.f32.mrb[83].mxu0  ;;  %v16409_v45 = vpop.f32.mrb[216].mxu1 }
 0x5da   : > { %v9019_v36 = vadd.f32 %v8999_v12, %v8732_v42  ;;  %v16410_v43 = vpop.f32.mrb[217].mxu1 }
 0x5db   : > { %v16411_v25 = vadd.f32 %v16410_v43, %v16409_v45  ;;  %v16412_v50 = vpop.f32.mrb[218].mxu1 }
 0x5dc   : > { %v16413_v54 = vpop.f32.mrb[219].mxu1 }
 0x5dd   : > { %v10560_v56 = vadd.f32 %v20555_v16, %v16411_v25  ;;  %v16414_v49 = vadd.f32 %v16413_v54, %v16412_v50 }
 0x5df   : > { %v10605_v9 = vmax.f32 %v10560_v56, 0.0  ;;  %v10563_v39 = vadd.f32 %v20555_v16, %v16414_v49 }
 0x5e1   : > { %v10606_v20 = vmax.f32 %v10563_v39, 0.0  ;;  %v16415_v42 = vpop.f32.mrb[220].mxu1 }
 0x5e2   : > { %v16416_v51 = vpop.f32.mrb[221].mxu1 }
 0x5e3   : > { %v20607_v22 = vpack.c.bf16 %v10606_v20, %v10605_v9  ;;  %v16417_v11 = vadd.f32 %v16416_v51, %v16415_v42  ;;  %v16418_v63 = vpop.f32.mrb[222].mxu1 }
 0x5e4   : > { %v16419_v60 = vpop.f32.mrb[223].mxu1 }
 0x5e5   : > { %v10568_v58 = vadd.f32 %v20555_v16, %v16417_v11  ;;  %v16420_v15 = vadd.f32 %v16419_v60, %v16418_v63 }
 0x5e7   : > { %v10607_v6 = vmax.f32 %v10568_v58, 0.0  ;;  %v10571_v59 = vadd.f32 %v20555_v16, %v16420_v15 }
 0x5e9   : > { %v10608_v47 = vmax.f32 %v10571_v59, 0.0  ;;  %v16421_v23 = vpop.f32.mrb[224].mxu1 }
 0x5ea   : > { %v16422_v48 = vpop.f32.mrb[225].mxu1 }
 0x5eb   : > { %v20611_v57 = vpack.c.bf16 %v10608_v47, %v10607_v6  ;;  %v16423_v0 = vadd.f32 %v16422_v48, %v16421_v23  ;;  %v16424_v62 = vpop.f32.mrb[226].mxu1 }
 0x5ec   : > { %v16425_v28 = vpop.f32.mrb[227].mxu1 }
 0x5ed   : > { %v10576_v52 = vadd.f32 %v20555_v16, %v16423_v0  ;;  %v16426_v37 = vadd.f32 %v16425_v28, %v16424_v62 }
 0x5ee   : > { %v16891_v14 = vpop.f32.mrb[84].mxu0 }
 0x5ef   : > { %v9307_v7 = vadd.f32 %v16891_v14, %v9020_v55  ;;  %v9283_v8 = vpop.f32.mrb[85].mxu0  ;;  %v10609_v55 = vmax.f32 %v10576_v52, 0.0  ;;  %v10579_v61 = vadd.f32 %v20555_v16, %v16426_v37  ;;  %v17596_v37 = vld [vmem:[%s17984_s16 + $0x4d4] ss:$8 sps:$4 sm:$0xff]  }
 0x5f0   : > { %v9305_v5 = vadd.f32 %v9283_v8, %v9018_v17  ;;  %v16892_v26 = vpop.f32.mrb[86].mxu0  ;;  %11131 = vmatprep.mubr.bf16.mxu1 %v17596_v37 }
 0x5f1   : > { %v9286_v10 = vpop.f32.mrb[87].mxu0  ;;  %v10610_v1 = vmax.f32 %v10579_v61, 0.0  ;;  %v16427_v13 = vpop.f32.mrb[228].mxu1  ;;  %v17594_v61 = vld [vmem:[%s17984_s16 + $0x4d0] ss:$8 sps:$4 sm:$0xff]  }
 0x5f2   : > { %v9306_v41 = vadd.f32 %v9286_v10, %v9019_v36  ;;  %v16428_v17 = vpop.f32.mrb[229].mxu1  ;;  %11132 = vmatmul.mubr.bf16.vlgmr.msra.gmra.mrb[240].mxu1 %v17594_v61  ;;  %v20707_v61 = vld [vmem:[%s21831_s1 + $0x20] sm:$0xff]  }
 0x5f3   : > { %v20615_v35 = vpack.c.bf16 %v10610_v1, %v10609_v55  ;;  %v16429_v12 = vadd.f32 %v16428_v17, %v16427_v13  ;;  %v16430_v19 = vpop.f32.mrb[230].mxu1 }
 0x5f4   : > { %v16431_v18 = vpop.f32.mrb[231].mxu1 }
 0x5f5   : > { %v10584_v36 = vadd.f32 %v20555_v16, %v16429_v12  ;;  %v16432_v33 = vadd.f32 %v16431_v18, %v16430_v19  ;;  %v20640_v12 = vld [vmem:[%s21831_s1] sm:$0xff]  }
 0x5f6   : > { %16574 = vmatpush3.bf16.msra.mxu1 %v20640_v12 }
 0x5f7   : > { %v10611_v44 = vmax.f32 %v10584_v36, 0.0  ;;  %v10587_v3 = vadd.f32 %v20555_v16, %v16432_v33  ;;  %v17600_v33 = vld [vmem:[%s17984_s16 + $0x4e4] ss:$8 sps:$4 sm:$0xff]  }
 0x5f8   : > { %11139 = vmatprep.mubr.bf16.mxu1 %v17600_v33 }
 0x5f9   : > { %v10612_v45 = vmax.f32 %v10587_v3, 0.0  ;;  %v16433_v43 = vpop.f32.mrb[232].mxu1 }
 0x5fa   : > { %v16434_v25 = vpop.f32.mrb[233].mxu1 }
 0x5fb   : > { %v20619_v50 = vpack.c.bf16 %v10612_v45, %v10611_v44  ;;  %v16435_v54 = vadd.f32 %v16434_v25, %v16433_v43  ;;  %v16436_v56 = vpop.f32.mrb[234].mxu1  ;;  %v20647_v44 = vld [vmem:[%s21831_s1 + $0x48] sm:$0xff]  }
 0x5fc   : > { %v16437_v9 = vpop.f32.mrb[235].mxu1  ;;  %16575 = vmatprep.subr.bf16.mxu1 %v20647_v44  ;;  %v17604_v25 = vld [vmem:[%s17984_s16 + $0x4e0] ss:$8 sps:$4 sm:$0xff]  }
 0x5fd   : > { %v10592_v49 = vadd.f32 %v20555_v16, %v16435_v54  ;;  %v16438_v20 = vadd.f32 %v16437_v9, %v16436_v56  ;;  %v20656_v54 = vld [vmem:[%s21831_s1 + $0x8] sm:$0xff]   ;;  %11140 = vmatmul.mubr.bf16.gmra.mrb[244].mxu1 %v17604_v25  ;;  %v20731_v25 = vld [vmem:[%s21831_s1 + $0x70] sm:$0xff]  }
 0x5fe   : > { %16576 = vmatpush3.bf16.msra.mxu1 %v20656_v54 }
 0x5ff   : > { %v10613_v15 = vmax.f32 %v10592_v49, 0.0  ;;  %v10595_v14 = vadd.f32 %v20555_v16, %v16438_v20  ;;  %v20663_v49 = vld [vmem:[%s21831_s1 + $0x50] sm:$0xff]  }
 0x600   : > { %16577 = vmatprep.subr.bf16.mxu1 %v20663_v49 }
 0x601   : > { %v16439_v42 = vpop.f32.mrb[236].mxu1  ;;  %v10614_v47 = vmax.f32 %v10595_v14, 0.0  ;;  %v17589_v14 = vld [vmem:[%s21833_s3 + $0xa8] sm:$0xff]  }
 0x602   : > { %v16440_v63 = vpop.f32.mrb[237].mxu1 }
 0x603   : > { %v20627_v8 = vadd.f32 %v16440_v63, %v16439_v42  ;;  %v16442_v6 = vpop.f32.mrb[238].mxu1 }
 0x604   : > { %v16443_v26 = vpop.f32.mrb[239].mxu1  ;;  %v17606_v6 = vld [vmem:[%s17984_s16 + $0x4f4] ss:$8 sps:$4 sm:$0xff]  }
 0x605   : > { %11147 = vmatprep.mubr.bf16.mxu1 %v17606_v6  ;;  %v20744_v6 = vld [vmem:[%s21831_s1 + $0x78] sm:$0xff]  }
 0x606   : > { %v16907_v39 = vpop.f32.mrb[88].mxu0 }
 0x607   : > { %v20622_v51 = vadd.f32 %v16907_v39, %v9307_v7  ;;  %v9570_v11 = vpop.f32.mrb[89].mxu0  ;;  %v20631_v7 = vpack.c.bf16 %v10614_v47, %v10613_v15 }
 0x608   : > { %v20624_v60 = vadd.f32 %v9570_v11, %v9305_v5  ;;  %v16908_v58 = vpop.f32.mrb[90].mxu0  ;;  %v20669_v11 = vld [vmem:[%s21831_s1 + $0x10] sm:$0xff]  }
 0x609   : > { %v9573_v59 = vpop.f32.mrb[91].mxu0  ;;  %16578 = vmatpush3.bf16.msra.mxu1 %v20669_v11 }
 0x60a   : > { %v20629_v10 = vadd.f32 %v9573_v59, %v9306_v41  ;;  %v20679_v59 = vld [vmem:[%s21831_s1 + $0x58] sm:$0xff]  }
 0x60b   : > { %16579 = vmatprep.subr.bf16.mxu1 %v20679_v59 }
 0x616   : > { %v16229_v23 = vpop.f32.mrb[92].mxu0 }
 0x617   : > { %v16230_v48 = vpop.f32.mrb[93].mxu0 }
 0x618   : > { %v16231_v5 = vadd.f32 %v16230_v48, %v16229_v23  ;;  %v16232_v0 = vpop.f32.mrb[94].mxu0  ;;  %v17610_v48 = vld [vmem:[%s17984_s16 + $0x4f0] ss:$8 sps:$4 sm:$0xff]  }
 0x619   : > { %v16233_v62 = vpop.f32.mrb[95].mxu0  ;;  %11148 = vmatmul.mubr.bf16.gmra.mrb[248].mxu1 %v17610_v48  ;;  %v17618_v48 = vld [vmem:[%s17984_s16 + $0x510] ss:$8 sps:$4 sm:$0xff]  }
 0x61a   : > { %v9699_v28 = vadd.f32 %v20555_v16, %v16231_v5  ;;  %v16234_v52 = vadd.f32 %v16233_v62, %v16232_v0  ;;  %v20689_v5 = vld [vmem:[%s21831_s1 + $0x18] sm:$0xff]   ;;  %v20696_v62 = vld [vmem:[%s21833_s3 + $0xb0] sm:$0xff]  }
 0x61b   : > { %16580 = vmatpush3.bf16.msra.mxu1 %v20689_v5 }
 0x61c   : > { %v9702_v55 = vadd.f32 %v20555_v16, %v16234_v52  ;;  %v9744_v1 = vmax.f32 %v9699_v28, 0.0 }
 0x61e   : > { %v9745_v41 = vmax.f32 %v9702_v55, 0.0  ;;  %v16235_v13 = vpop.f32.mrb[96].mxu0 }
 0x61f   : > { %v16236_v17 = vpop.f32.mrb[97].mxu0 }
 0x620   : > { %v9755_v19 = vpack.c.bf16 %v9745_v41, %v9744_v1  ;;  %v16237_v18 = vadd.f32 %v16236_v17, %v16235_v13  ;;  %v16238_v36 = vpop.f32.mrb[98].mxu0  ;;  %v17612_v17 = vld [vmem:[%s17984_s16 + $0x504] ss:$8 sps:$4 sm:$0xff]  }
 0x621   : > { %v16239_v3 = vpop.f32.mrb[99].mxu0  ;;  %11155 = vmatprep.mubr.bf16.mxu1 %v17612_v17 }
 0x622   : > { %v9707_v45 = vadd.f32 %v20555_v16, %v16237_v18  ;;  %v16240_v43 = vadd.f32 %v16239_v3, %v16238_v36  ;;  %16913 = vmatprep.mubr.msk.bf16.mxu0 %vm7377_vm0, %v9755_v19  ;;  %v20715_v19 = vld [vmem:[%s21831_s1 + $0x68] sm:$0xff]  }
 0x623   : > { %v17616_v3 = vld [vmem:[%s17984_s16 + $0x500] ss:$8 sps:$4 sm:$0xff]  }
 0x624   : > { %v9710_v56 = vadd.f32 %v20555_v16, %v16240_v43  ;;  %v9746_v9 = vmax.f32 %v9707_v45, 0.0  ;;  %v20724_v45 = vld [vmem:[%s21831_s1 + $0x28] sm:$0xff]   ;;  %11156 = vmatmul.mubr.bf16.gmra.mrb[252].mxu1 %v17616_v3 }
 0x626   : > { %v9747_v39 = vmax.f32 %v9710_v56, 0.0  ;;  %v16241_v20 = vpop.f32.mrb[100].mxu0 }
 0x627   : > { %v16242_v42 = vpop.f32.mrb[101].mxu0 }
 0x628   : > { %v9756_v63 = vpack.c.bf16 %v9747_v39, %v9746_v9  ;;  %v16243_v58 = vadd.f32 %v16242_v42, %v16241_v20  ;;  %v16244_v15 = vpop.f32.mrb[102].mxu0  ;;  %v20737_v42 = vld [vmem:[%s21831_s1 + $0x30] sm:$0xff]  }
 0x629   : > { %v16245_v26 = vpop.f32.mrb[103].mxu0 }
 0x62a   : > { %v9715_v47 = vadd.f32 %v20555_v16, %v16243_v58  ;;  %v16246_v23 = vadd.f32 %v16245_v26, %v16244_v15  ;;  %16914 = vmatmul.mubr.msk.bf16.vlgmr.msra.gmra.mrb[24].mxu0 %vm7377_vm0, %v9756_v63 }
 0x62b   : > { %16926 = vmatpush3.bf16.msra.mxu0 %v20581_v24  ;;  %v20701_v24 = vld [vmem:[%s21831_s1 + $0x60] sm:$0xff]  }
 0x62c   : > { %v9718_v0 = vadd.f32 %v20555_v16, %v16246_v23  ;;  %16927 = vmatprep.subr.bf16.mxu0 %v17589_v14  ;;  %16581 = vmatprep.subr.bf16.mxu1 %v20701_v24  ;;  %v9748_v28 = vmax.f32 %v9715_v47, 0.0 }
 0x62d   : > { %16582 = vmatpush3.bf16.msra.mxu1 %v20707_v61 }
 0x62e   : > { %v9749_v52 = vmax.f32 %v9718_v0, 0.0  ;;  %v16247_v37 = vpop.f32.mrb[104].mxu0  ;;  %16583 = vmatprep.subr.bf16.mxu1 %v20715_v19  ;;  %v20753_v0 = vld [vmem:[%s21831_s1 + $0x38] sm:$0xff]  }
 0x62f   : > { %v16248_v55 = vpop.f32.mrb[105].mxu0  ;;  %16928 = vmatpush3.bf16.msra.mxu0 %v17589_v14  ;;  %v17620_v14 = vld [vmem:[%s17984_s16 + $0x514] ss:$8 sps:$4 sm:$0xff]  }
 0x630   : > { %v9757_v1 = vpack.c.bf16 %v9749_v52, %v9748_v28  ;;  %v16249_v41 = vadd.f32 %v16248_v55, %v16247_v37  ;;  %v16250_v13 = vpop.f32.mrb[106].mxu0  ;;  %16941 = vmatprep.subr.bf16.mxu0 %v20696_v62  ;;  %11163 = vmatprep.mubr.bf16.mxu1 %v17620_v14  ;;  %v17636_v14 = vld [vmem:[%s17984_s16 + $0x54c] ss:$8 sps:$4 sm:$0xff]  }
 0x631   : > { %v16251_v18 = vpop.f32.mrb[107].mxu0  ;;  %16584 = vmatpush3.bf16.msra.mxu1 %v20724_v45 }
 0x632   : > { %v9723_v36 = vadd.f32 %v20555_v16, %v16249_v41  ;;  %v16252_v33 = vadd.f32 %v16251_v18, %v16250_v13  ;;  %16917 = vmatprep.mubr.msk.bf16.mxu0 %vm7377_vm0, %v9757_v1  ;;  %16585 = vmatprep.subr.bf16.mxu1 %v20731_v25  ;;  %v15541_v18 = vld [vmem:[%s17984_s16 + $0x520] sm:$0x11] }
 0x633   : > { %11164 = vmatmul.mubr.bf16.gmra.mrb[0].mxu1 %v17618_v48  ;;  %v17640_v48 = vld [vmem:[%s17984_s16 + $0x568] ss:$8 sps:$4 sm:$0xff]  }
 0x634   : > { %v9726_v43 = vadd.f32 %v20555_v16, %v16252_v33  ;;  %v9750_v56 = vmax.f32 %v9723_v36, 0.0  ;;  %v15553_v33 = vcombine.high %v15541_v18, %v15541_v18 }
 0x635   : > { %16586 = vmatpush3.bf16.msra.mxu1 %v20737_v42 }
 0x636   : > { %v9751_v9 = vmax.f32 %v9726_v43, 0.0  ;;  %v16253_v39 = vpop.f32.mrb[108].mxu0  ;;  %16587 = vmatprep.subr.bf16.mxu1 %v20744_v6  ;;  %v15552_v43 = vcombine.low %v15541_v18, %v15541_v18  ;;  %11171 = vmatprep.mubr.bf16.mxu1 %v15553_v33 }
 0x637   : > { %v16254_v20 = vpop.f32.mrb[109].mxu0 }
 0x638   : > { %v9758_v63 = vpack.c.bf16 %v9751_v9, %v9750_v56  ;;  %v16255_v58 = vadd.f32 %v16254_v20, %v16253_v39  ;;  %v16256_v15 = vpop.f32.mrb[110].mxu0  ;;  %v17630_v39 = vld [vmem:[%s17984_s16 + $0x52c] ss:$8 sps:$4 sm:$0xff]   ;;  %v17628_v20 = vld [vmem:[%s17984_s16 + $0x528] ss:$8 sps:$4 sm:$0xff]  }
 0x639   : > { %v16257_v26 = vpop.f32.mrb[111].mxu0  ;;  %16588 = vmatpush3.bf16.msra.mxu1 %v20753_v0 }
 0x63a   : > { %v9731_v47 = vadd.f32 %v20555_v16, %v16255_v58  ;;  %v16258_v23 = vadd.f32 %v16257_v26, %v16256_v15  ;;  %16918 = vmatmul.mubr.msk.bf16.gmra.mrb[28].mxu0 %vm7377_vm0, %v9758_v63  ;;  %v17633_v63 = vld [vmem:[%s17984_s16 + $0x53c] ss:$8 sps:$4 sm:$0xff]   ;;  %v17631_v15 = vld [vmem:[%s17984_s16 + $0x538] ss:$8 sps:$4 sm:$0xff]   ;;  %v10026_v26 = vadd.f32 %v20555_v16, %v20572_v30 }
 0x63b   : > { %11172 = vmatmul.mubr.bf16.gmra.mrb[4].mxu1 %v15552_v43  ;;  %v17591_v58 = vld [vmem:[%s21833_s3 + $0xb8] sm:$0xff]  }
 0x63c   : > { %v9734_v28 = vadd.f32 %v20555_v16, %v16258_v23  ;;  %v9752_v52 = vmax.f32 %v9731_v47, 0.0  ;;  %11418 = vmatprep.mubr.bf16.mxu1 %v17630_v39  ;;  %v17637_v30 = vld [vmem:[%s17984_s16 + $0x558] ss:$8 sps:$4 sm:$0xff]   ;;  %v17642_v23 = vld [vmem:[%s17984_s16 + $0x56c] ss:$8 sps:$4 sm:$0xff]  }
 0x63e   : > { %v9753_v37 = vmax.f32 %v9734_v28, 0.0  ;;  %v16259_v55 = vpop.f32.mrb[112].mxu0 }
 0x63f   : > { %v16260_v1 = vpop.f32.mrb[113].mxu0 }
 0x640   : > { %v9759_v41 = vpack.c.bf16 %v9753_v37, %v9752_v52  ;;  %v16261_v13 = vadd.f32 %v16260_v1, %v16259_v55  ;;  %v16262_v17 = vpop.f32.mrb[114].mxu0 }
 0x641   : > { %v16263_v36 = vpop.f32.mrb[115].mxu0 }
 0x642   : > { %v9739_v3 = vadd.f32 %v20555_v16, %v16261_v13  ;;  %16921 = vmatprep.mubr.msk.bf16.mxu0 %vm7377_vm0, %v9759_v41 }
 0x643   : > { %11419 = vmatmul.mubr.bf16.vlgmr.msra.gmra.mrb[8].mxu1 %v17628_v20 }
 0x644   : > { %v9754_v56 = vmax.f32 %v9739_v3, 0.0  ;;  %11426 = vmatprep.mubr.bf16.mxu1 %v17633_v63 }
 0x646   : > { %v9760_v9 = vpack.c.bf16 %v9754_v56, %v9754_v56 }
 0x648   : > { %16922 = vmatmul.mubr.msk.bf16.gmra.mrb[116].mxu0 %vm7377_vm0, %v9760_v9  ;;  %v17646_v9 = vld [vmem:[%s21833_s3 + $0xd8] sm:$0xff]  }
 0x649   : > { %16929 = vmatprep.mubr.msk.bf16.mxu0 %vm7377_vm0, %v20543_v4  ;;  %v17592_v4 = vld [vmem:[%s21833_s3 + $0xc0] sm:$0xff]  }
 0x64b   : > { %11427 = vmatmul.mubr.bf16.gmra.mrb[12].mxu1 %v17631_v15 }
 0x64c   : > { %11434 = vmatprep.mubr.bf16.mxu1 %v17636_v14 }
 0x650   : > { %16930 = vmatmul.mubr.msk.bf16.vlgmr.msra.gmra.mrb[24].mxu0 %vm7377_vm0, %v20550_v21  ;;  %v10041_v21 = vmax.f32 %v10026_v26, 0.0 }
 0x651   : > { %16933 = vmatprep.mubr.msk.bf16.mxu0 %vm7377_vm0, %v20559_v27  ;;  %16942 = vmatpush3.bf16.msra.mxu0 %v20696_v62  ;;  %v17634_v27 = vld [vmem:[%s17984_s16 + $0x548] ss:$8 sps:$4 sm:$0xff]   ;;  %v17639_v62 = vld [vmem:[%s17984_s16 + $0x55c] ss:$8 sps:$4 sm:$0xff]  }
 0x652   : > { %16943 = vmatprep.subr.bf16.mxu0 %v17591_v58  ;;  %v10047_v47 = vpack.c.bf16 %v10041_v21, %v10041_v21 }
 0x653   : > { %11435 = vmatmul.mubr.bf16.gmra.mrb[16].mxu1 %v17634_v27 }
 0x654   : > { %11442 = vmatprep.mubr.bf16.mxu1 %v17639_v62 }
 0x655   : > { %16944 = vmatpush3.bf16.msra.mxu0 %v17591_v58 }
 0x656   : > { %16957 = vmatprep.subr.bf16.mxu0 %v17592_v4 }
 0x658   : > { %16934 = vmatmul.mubr.msk.bf16.gmra.mrb[28].mxu0 %vm7377_vm0, %v20563_v46  ;;  %v17593_v46 = vld [vmem:[%s21833_s3 + $0xc8] sm:$0xff]  }
 0x659   : > { %16937 = vmatprep.mubr.msk.bf16.mxu0 %vm7377_vm0, %v20570_v34  ;;  %v15572_v34 = vld [vmem:[%s17984_s16 + $0x578] sm:$0x11] }
 0x65a   : > { %v15584_v28 = vcombine.high %v15572_v34, %v15572_v34 }
 0x65b   : > { %11443 = vmatmul.mubr.bf16.gmra.mrb[20].mxu1 %v17637_v30 }
 0x65c   : > { %11450 = vmatprep.mubr.bf16.mxu1 %v17642_v23 }
 0x660   : > { %16938 = vmatmul.mubr.msk.bf16.gmra.mrb[120].mxu0 %vm7377_vm0, %v10047_v47 }
 0x661   : > { %16945 = vmatprep.mubr.msk.bf16.mxu0 %vm7377_vm0, %v20576_v38  ;;  %v10313_v38 = vadd.f32 %v20555_v16, %v20603_v31  ;;  %v17599_v31 = vld [vmem:[%s17984_s16 + $0x47c] ss:$8 sps:$4 sm:$0xff]  }
 0x663   : > { %11451 = vmatmul.mubr.bf16.gmra.mrb[24].mxu1 %v17640_v48 }
 0x664   : > { %11458 = vmatprep.mubr.bf16.mxu1 %v15584_v28 }
 0x668   : > { %16946 = vmatmul.mubr.msk.bf16.vlgmr.msra.gmra.mrb[24].mxu0 %vm7377_vm0, %v20589_v2  ;;  %v10328_v2 = vmax.f32 %v10313_v38, 0.0 }
 0x669   : > { %16949 = vmatprep.mubr.msk.bf16.mxu0 %vm7377_vm0, %v20593_v53  ;;  %16958 = vmatpush3.bf16.msra.mxu0 %v17592_v4  ;;  %v15583_v53 = vcombine.low %v15572_v34, %v15572_v34 }
 0x66a   : > { %16959 = vmatprep.subr.bf16.mxu0 %v17593_v46  ;;  %v10334_v52 = vpack.c.bf16 %v10328_v2, %v10328_v2 }
 0x66b   : > { %11459 = vmatmul.mubr.bf16.gmra.mrb[28].mxu1 %v15583_v53 }
 0x66d   : > { %16960 = vmatpush3.bf16.msra.mxu0 %v17593_v46 }
 0x66e   : > { %16453 = vmatprep.subr.bf16.mxu0 %v20517_v32  ;;  %v10600_v32 = vadd.f32 %v20555_v16, %v20627_v8  ;;  %v17611_v8 = vld [vmem:[%s17984_s16 + $0x498] ss:$8 sps:$4 sm:$0xff]  }
 0x670   : > { %16950 = vmatmul.mubr.msk.bf16.gmra.mrb[28].mxu0 %vm7377_vm0, %v20597_v29  ;;  %v10615_v29 = vmax.f32 %v10600_v32, 0.0 }
 0x671   : > { %16953 = vmatprep.mubr.msk.bf16.mxu0 %vm7377_vm0, %v20601_v40 }
 0x672   : > { %v10621_v40 = vpack.c.bf16 %v10615_v29, %v10615_v29 }
 0x678   : > { %16954 = vmatmul.mubr.msk.bf16.gmra.mrb[124].mxu0 %vm7377_vm0, %v10334_v52 }
 0x679   : > { %16961 = vmatprep.mubr.msk.bf16.mxu0 %vm7377_vm0, %v20607_v22  ;;  %v17597_v22 = vld [vmem:[%s17984_s16 + $0x478] ss:$8 sps:$4 sm:$0xff]  }
 0x680   : > { %16962 = vmatmul.mubr.msk.bf16.vlgmr.msra.gmra.mrb[24].mxu0 %vm7377_vm0, %v20611_v57  ;;  %v17602_v57 = vld [vmem:[%s17984_s16 + $0x48c] ss:$8 sps:$4 sm:$0xff]  }
 0x681   : > { %16454 = vmatpush3.bf16.msra.mxu0 %v20640_v12  ;;  %16965 = vmatprep.mubr.msk.bf16.mxu0 %vm7377_vm0, %v20615_v35  ;;  %v17605_v35 = vld [vmem:[%s17984_s16 + $0x488] ss:$8 sps:$4 sm:$0xff]  }
 0x682   : > { %16455 = vmatprep.subr.bf16.mxu0 %v20647_v44  ;;  %v17617_v12 = vld [vmem:[%s17984_s16 + $0x4a8] ss:$8 sps:$4 sm:$0xff]   ;;  %v17621_v44 = vld [vmem:[%s17984_s16 + $0x4bc] ss:$8 sps:$4 sm:$0xff]  }
 0x685   : > { %16456 = vmatpush3.bf16.msra.mxu0 %v20656_v54  ;;  %v15510_v54 = vld [vmem:[%s17984_s16 + $0x4c8] sm:$0x11] }
 0x686   : > { %16457 = vmatprep.subr.bf16.mxu0 %v20663_v49  ;;  %v17623_v49 = vld [vmem:[%s17984_s16 + $0x4b8] ss:$8 sps:$4 sm:$0xff]  }
 0x688   : > { %16966 = vmatmul.mubr.msk.bf16.gmra.mrb[28].mxu0 %vm7377_vm0, %v20619_v50  ;;  %v17608_v50 = vld [vmem:[%s17984_s16 + $0x49c] ss:$8 sps:$4 sm:$0xff]  }
 0x689   : > { %16458 = vmatpush3.bf16.msra.mxu0 %v20669_v11  ;;  %16969 = vmatprep.mubr.msk.bf16.mxu0 %vm7377_vm0, %v20631_v7  ;;  %v17614_v7 = vld [vmem:[%s17984_s16 + $0x4ac] ss:$8 sps:$4 sm:$0xff]   ;;  %v15522_v11 = vcombine.high %v15510_v54, %v15510_v54 }
 0x68a   : > { %16459 = vmatprep.subr.bf16.mxu0 %v20679_v59  ;;  %v15521_v59 = vcombine.low %v15510_v54, %v15510_v54  ;;  %v20875_v54 = vld [vmem:[%s21833_s3 + $0xe0] sm:$0xff]  }
 0x68d   : > { %16460 = vmatpush3.bf16.msra.mxu0 %v20689_v5  ;;  %v17645_v5 = vld [vmem:[%s21833_s3 + $0xd0] sm:$0xff]  }
 0x68e   : > { %16461 = vmatprep.subr.bf16.mxu0 %v20701_v24 }
 0x690   : > { %16970 = vmatmul.mubr.msk.bf16.gmra.mrb[128].mxu0 %vm7377_vm0, %v10621_v40 }
 0x691   : > { %16462 = vmatpush3.bf16.msra.mxu0 %v20707_v61  ;;  %10844 = vmatprep.mubr.bf16.mxu0 %v17599_v31 }
 0x692   : > { %16463 = vmatprep.subr.bf16.mxu0 %v20715_v19 }
 0x695   : > { %16464 = vmatpush3.bf16.msra.mxu0 %v20724_v45 }
 0x696   : > { %16465 = vmatprep.subr.bf16.mxu0 %v20731_v25 }
 0x699   : > { %16466 = vmatpush3.bf16.msra.mxu0 %v20737_v42 }
 0x69a   : > { %16467 = vmatprep.subr.bf16.mxu0 %v20744_v6 }
 0x69d   : > { %16468 = vmatpush3.bf16.msra.mxu0 %v20753_v0 }
 0x69e   : > { %16973 = vmatprep.subr.bf16.mxu0 %v17645_v5 }
 0x6a0   : > { %10845 = vmatmul.mubr.bf16.vlgmr.msra.gmra.mrb[132].mxu0 %v17597_v22 }
 0x6a1   : > { %10852 = vmatprep.mubr.bf16.mxu0 %v17602_v57  ;;  %16974 = vmatpush3.bf16.msra.mxu0 %v17645_v5 }
 0x6a2   : > { %16975 = vmatprep.subr.bf16.mxu0 %v17646_v9 }
 0x6a5   : > { %16976 = vmatpush3.bf16.msra.mxu0 %v17646_v9 }
 0x6a6   : > { %16989 = vmatprep.subr.bf16.mxu0 %v20875_v54 }
 0x6a8   : > { %10853 = vmatmul.mubr.bf16.gmra.mrb[136].mxu0 %v17605_v35 }
 0x6a9   : > { %10860 = vmatprep.mubr.bf16.mxu0 %v17608_v50 }
 0x6b0   : > { %10861 = vmatmul.mubr.bf16.gmra.mrb[140].mxu0 %v17611_v8 }
 0x6b1   : > { %10868 = vmatprep.mubr.bf16.mxu0 %v17614_v7 }
 0x6b8   : > { %10869 = vmatmul.mubr.bf16.gmra.mrb[144].mxu0 %v17617_v12 }
 0x6b9   : > { %10876 = vmatprep.mubr.bf16.mxu0 %v17621_v44 }
 0x6c0   : > { %10877 = vmatmul.mubr.bf16.gmra.mrb[148].mxu0 %v17623_v49 }
 0x6c1   : > { %10884 = vmatprep.mubr.bf16.mxu0 %v15522_v11 }
 0x6c5   : > { %v16529_v24 = vpop.f32.mrb[240].mxu1 }
 0x6c6   : > { %v16530_v61 = vpop.f32.mrb[241].mxu1 }
 0x6c7   : > { %v16531_v19 = vadd.f32 %v16530_v61, %v16529_v24  ;;  %v16532_v45 = vpop.f32.mrb[242].mxu1 }
 0x6c8   : > { %10885 = vmatmul.mubr.bf16.gmra.mrb[152].mxu0 %v15521_v59  ;;  %v16533_v25 = vpop.f32.mrb[243].mxu1 }
 0x6c9   : > { %v11134_v42 = vadd.f32 %v20555_v16, %v16531_v19  ;;  %v16534_v6 = vadd.f32 %v16533_v25, %v16532_v45 }
 0x6cb   : > { %v11179_v0 = vmax.f32 %v11134_v42, 0.0  ;;  %v11137_v37 = vadd.f32 %v20555_v16, %v16534_v6 }
 0x6cd   : > { %v11180_v55 = vmax.f32 %v11137_v37, 0.0 }
 0x6cf   : > { %v20853_v13 = vpack.c.bf16 %v11180_v55, %v11179_v0 }
 0x6d0   : > { %v16535_v1 = vpop.f32.mrb[244].mxu1 }
 0x6d1   : > { %v16536_v41 = vpop.f32.mrb[245].mxu1 }
 0x6d2   : > { %v16538_v17 = vpop.f32.mrb[246].mxu1  ;;  %v16537_v36 = vadd.f32 %v16536_v41, %v16535_v1 }
 0x6d3   : > { %v16539_v18 = vpop.f32.mrb[247].mxu1 }
 0x6d4   : > { %v16540_v33 = vadd.f32 %v16539_v18, %v16538_v17  ;;  %v11142_v3 = vadd.f32 %v20555_v16, %v16537_v36 }
 0x6d6   : > { %v11145_v43 = vadd.f32 %v20555_v16, %v16540_v33  ;;  %v11181_v56 = vmax.f32 %v11142_v3, 0.0 }
 0x6d8   : > { %v11182_v39 = vmax.f32 %v11145_v43, 0.0 }
 0x6da   : > { %v20860_v58 = vpack.c.bf16 %v11182_v39, %v11181_v56 }
 0x6ec   : > { %v16541_v20 = vpop.f32.mrb[248].mxu1 }
 0x6ed   : > { %v16542_v63 = vpop.f32.mrb[249].mxu1 }
 0x6ee   : > { %v16544_v4 = vpop.f32.mrb[250].mxu1  ;;  %v16543_v14 = vadd.f32 %v16542_v63, %v16541_v20 }
 0x6ef   : > { %v16545_v15 = vpop.f32.mrb[251].mxu1 }
 0x6f0   : > { %v16546_v26 = vadd.f32 %v16545_v15, %v16544_v4  ;;  %v11150_v21 = vadd.f32 %v20555_v16, %v16543_v14 }
 0x6f2   : > { %v11153_v27 = vadd.f32 %v20555_v16, %v16546_v26  ;;  %v11183_v62 = vmax.f32 %v11150_v21, 0.0 }
 0x6f4   : > { %v11184_v47 = vmax.f32 %v11153_v27, 0.0 }
 0x6f6   : > { %v20864_v46 = vpack.c.bf16 %v11184_v47, %v11183_v62 }
 0x6f7   : > { %v16547_v30 = vpop.f32.mrb[252].mxu1 }
 0x6f8   : > { %v16548_v23 = vpop.f32.mrb[253].mxu1 }
 0x6f9   : > { %v16550_v34 = vpop.f32.mrb[254].mxu1  ;;  %v16549_v28 = vadd.f32 %v16548_v23, %v16547_v30 }
 0x6fa   : > { %v16551_v48 = vpop.f32.mrb[255].mxu1 }
 0x6fb   : > { %v16552_v38 = vadd.f32 %v16551_v48, %v16550_v34  ;;  %v11158_v2 = vadd.f32 %v20555_v16, %v16549_v28 }
 0x6fd   : > { %v11161_v53 = vadd.f32 %v20555_v16, %v16552_v38  ;;  %v11185_v52 = vmax.f32 %v11158_v2, 0.0 }
 0x6ff   : > { %v11186_v32 = vmax.f32 %v11161_v53, 0.0  ;;  %v20896_v53 = vld [vmem:[%s21832_s2] ss:$0 sm:$0xff] }
 0x701   : > { %v20868_v31 = vpack.c.bf16 %v11186_v32, %v11185_v52 }
 0x706   : > { %v16553_v29 = vpop.f32.mrb[0].mxu1 }
 0x707   : > { %v16554_v40 = vpop.f32.mrb[1].mxu1 }
 0x708   : > { %v16556_v22 = vpop.f32.mrb[2].mxu1  ;;  %v16555_v35 = vadd.f32 %v16554_v40, %v16553_v29 }
 0x709   : > { %v16557_v57 = vpop.f32.mrb[3].mxu1 }
 0x70a   : > { %v16558_v50 = vadd.f32 %v16557_v57, %v16556_v22  ;;  %v11166_v8 = vadd.f32 %v20555_v16, %v16555_v35 }
 0x70c   : > { %v11169_v7 = vadd.f32 %v20555_v16, %v16558_v50  ;;  %v11187_v12 = vmax.f32 %v11166_v8, 0.0 }
 0x70e   : > { %v11188_v44 = vmax.f32 %v11169_v7, 0.0  ;;  %v16559_v49 = vpop.f32.mrb[4].mxu1 }
 0x70f   : > { %v16560_v11 = vpop.f32.mrb[5].mxu1 }
 0x710   : > { %v20877_v5 = vpack.c.bf16 %v11188_v44, %v11187_v12  ;;  %v16562_v24 = vpop.f32.mrb[6].mxu1  ;;  %v20882_v6 = vadd.f32 %v16560_v11, %v16559_v49 }
 0x711   : > { %v16563_v45 = vpop.f32.mrb[7].mxu1 }
 0x716   : > { %v16589_v55 = vpop.f32.mrb[8].mxu1 }
 0x717   : > { %v16590_v1 = vpop.f32.mrb[9].mxu1 }
 0x718   : > { %v16591_v41 = vadd.f32 %v16590_v1, %v16589_v55  ;;  %v16592_v17 = vpop.f32.mrb[10].mxu1 }
 0x719   : > { %v16593_v18 = vpop.f32.mrb[11].mxu1 }
 0x71a   : > { %v11421_v36 = vadd.f32 %v20555_v16, %v16591_v41  ;;  %v16594_v33 = vadd.f32 %v16593_v18, %v16592_v17 }
 0x71b   : > { %v16923_v59 = vpop.f32.mrb[116].mxu0 }
 0x71c   : > { %v9881_v61 = vadd.f32 %v16923_v59, %v20622_v51  ;;  %v9857_v19 = vpop.f32.mrb[117].mxu0  ;;  %v11466_v3 = vmax.f32 %v11421_v36, 0.0  ;;  %v11424_v51 = vadd.f32 %v20555_v16, %v16594_v33 }
 0x71d   : > { %v9879_v25 = vadd.f32 %v9857_v19, %v20624_v60  ;;  %v16924_v42 = vpop.f32.mrb[118].mxu0 }
 0x71e   : > { %v9860_v0 = vpop.f32.mrb[119].mxu0  ;;  %v11467_v43 = vmax.f32 %v11424_v51, 0.0  ;;  %v16595_v56 = vpop.f32.mrb[12].mxu1 }
 0x71f   : > { %v9880_v37 = vadd.f32 %v9860_v0, %v20629_v10  ;;  %v16596_v60 = vpop.f32.mrb[13].mxu1 }
 0x720   : > { %v20887_v9 = vpack.c.bf16 %v11467_v43, %v11466_v3  ;;  %v16597_v39 = vadd.f32 %v16596_v60, %v16595_v56  ;;  %v16598_v20 = vpop.f32.mrb[14].mxu1 }
 0x721   : > { %v16599_v63 = vpop.f32.mrb[15].mxu1 }
 0x722   : > { %v11429_v10 = vadd.f32 %v20555_v16, %v16597_v39  ;;  %v16600_v4 = vadd.f32 %v16599_v63, %v16598_v20 }
 0x724   : > { %v11468_v15 = vmax.f32 %v11429_v10, 0.0  ;;  %v11432_v14 = vadd.f32 %v20555_v16, %v16600_v4 }
 0x726   : > { %v11469_v26 = vmax.f32 %v11432_v14, 0.0  ;;  %v16601_v21 = vpop.f32.mrb[16].mxu1 }
 0x727   : > { %v16602_v27 = vpop.f32.mrb[17].mxu1 }
 0x728   : > { %v20891_v47 = vpack.c.bf16 %v11469_v26, %v11468_v15  ;;  %v16603_v30 = vadd.f32 %v16602_v27, %v16601_v21  ;;  %v16604_v23 = vpop.f32.mrb[18].mxu1 }
 0x729   : > { %v16605_v28 = vpop.f32.mrb[19].mxu1 }
 0x72a   : > { %v11437_v16 = vadd.f32 %v20896_v53, %v16603_v30  ;;  %v16606_v52 = vadd.f32 %v16605_v28, %v16604_v23 }
 0x72c   : > { %v11470_v40 = vmax.f32 %v11437_v16, 0.0  ;;  %v11440_v22 = vadd.f32 %v20896_v53, %v16606_v52 }
 0x72e   : > { %v11471_v57 = vmax.f32 %v11440_v22, 0.0  ;;  %v16607_v35 = vpop.f32.mrb[20].mxu1 }
 0x72f   : > { %v16608_v50 = vpop.f32.mrb[21].mxu1 }
 0x730   : > { %v20900_v8 = vpack.c.bf16 %v11471_v57, %v11470_v40  ;;  %v16609_v7 = vadd.f32 %v16608_v50, %v16607_v35  ;;  %v16610_v12 = vpop.f32.mrb[22].mxu1 }
 0x731   : > { %v16611_v44 = vpop.f32.mrb[23].mxu1 }
 0x732   : > { %v11445_v49 = vadd.f32 %v20896_v53, %v16609_v7  ;;  %v16612_v11 = vadd.f32 %v16611_v44, %v16610_v12 }
 0x733   : > { %v16939_v62 = vpop.f32.mrb[120].mxu0 }
 0x734   : > { %v10168_v34 = vadd.f32 %v16939_v62, %v9881_v61  ;;  %v10144_v48 = vpop.f32.mrb[121].mxu0  ;;  %v11472_v59 = vmax.f32 %v11445_v49, 0.0  ;;  %v11448_v24 = vadd.f32 %v20896_v53, %v16612_v11 }
 0x735   : > { %v10166_v38 = vadd.f32 %v10144_v48, %v9879_v25  ;;  %v16940_v2 = vpop.f32.mrb[122].mxu0 }
 0x736   : > { %v10147_v32 = vpop.f32.mrb[123].mxu0  ;;  %v11473_v61 = vmax.f32 %v11448_v24, 0.0  ;;  %v16613_v19 = vpop.f32.mrb[24].mxu1 }
 0x737   : > { %v10167_v29 = vadd.f32 %v10147_v32, %v9880_v37  ;;  %v16614_v45 = vpop.f32.mrb[25].mxu1 }
 0x738   : > { %v20904_v25 = vpack.c.bf16 %v11473_v61, %v11472_v59  ;;  %v16615_v42 = vadd.f32 %v16614_v45, %v16613_v19  ;;  %v16616_v0 = vpop.f32.mrb[26].mxu1 }
 0x739   : > { %v16617_v37 = vpop.f32.mrb[27].mxu1 }
 0x73a   : > { %v11453_v55 = vadd.f32 %v20896_v53, %v16615_v42  ;;  %v16618_v1 = vadd.f32 %v16617_v37, %v16616_v0  ;;  %v17648_v37 = vld [vmem:[%s21833_s3 + $0xe8] sm:$0xff]  }
 0x73c   : > { %v11474_v41 = vmax.f32 %v11453_v55, 0.0  ;;  %v11456_v17 = vadd.f32 %v20896_v53, %v16618_v1 }
 0x73e   : > { %v11475_v18 = vmax.f32 %v11456_v17, 0.0  ;;  %v16619_v36 = vpop.f32.mrb[28].mxu1 }
 0x73f   : > { %v16620_v33 = vpop.f32.mrb[29].mxu1 }
 0x740   : > { %v20908_v51 = vpack.c.bf16 %v11475_v18, %v11474_v41  ;;  %v20910_v43 = vadd.f32 %v16620_v33, %v16619_v36  ;;  %v16622_v56 = vpop.f32.mrb[30].mxu1  ;;  %v17649_v18 = vld [vmem:[%s21833_s3 + $0xf0] sm:$0xff]  }
 0x741   : > { %v16623_v20 = vpop.f32.mrb[31].mxu1 }
 0x74b   : > { %v16955_v3 = vpop.f32.mrb[124].mxu0 }
 0x74c   : > { %v10455_v60 = vadd.f32 %v16955_v3, %v10168_v34  ;;  %v10431_v39 = vpop.f32.mrb[125].mxu0 }
 0x74d   : > { %v10453_v63 = vadd.f32 %v10431_v39, %v10166_v38  ;;  %v16956_v10 = vpop.f32.mrb[126].mxu0 }
 0x74e   : > { %v10434_v4 = vpop.f32.mrb[127].mxu0 }
 0x74f   : > { %v10454_v15 = vadd.f32 %v10434_v4, %v10167_v29 }
 0x763   : > { %v16971_v14 = vpop.f32.mrb[128].mxu0 }
 0x764   : > { %v20912_v26 = vadd.f32 %v16971_v14, %v10455_v60  ;;  %v10718_v21 = vpop.f32.mrb[129].mxu0 }
 0x765   : > { %v20914_v27 = vadd.f32 %v10718_v21, %v10453_v63  ;;  %v16972_v62 = vpop.f32.mrb[130].mxu0 }
 0x766   : > { %v10721_v30 = vpop.f32.mrb[131].mxu0 }
 0x767   : > { %v20916_v23 = vadd.f32 %v10721_v30, %v10454_v15 }
 0x773   : > { %v16469_v48 = vpop.f32.mrb[132].mxu0 }
 0x774   : > { %v16470_v28 = vpop.f32.mrb[133].mxu0 }
 0x775   : > { %v16471_v2 = vadd.f32 %v16470_v28, %v16469_v48  ;;  %v16472_v34 = vpop.f32.mrb[134].mxu0 }
 0x776   : > { %v16473_v16 = vpop.f32.mrb[135].mxu0 }
 0x777   : > { %v10847_v38 = vadd.f32 %v20896_v53, %v16471_v2  ;;  %v16474_v52 = vadd.f32 %v16473_v16, %v16472_v34 }
 0x779   : > { %v10850_v32 = vadd.f32 %v20896_v53, %v16474_v52  ;;  %v10892_v29 = vmax.f32 %v10847_v38, 0.0 }
 0x77b   : > { %v10893_v40 = vmax.f32 %v10850_v32, 0.0  ;;  %v16475_v22 = vpop.f32.mrb[136].mxu0 }
 0x77c   : > { %v16476_v57 = vpop.f32.mrb[137].mxu0 }
 0x77d   : > { %v10903_v35 = vpack.c.bf16 %v10893_v40, %v10892_v29  ;;  %v16477_v50 = vadd.f32 %v16476_v57, %v16475_v22  ;;  %v16478_v7 = vpop.f32.mrb[138].mxu0 }
 0x77e   : > { %v16479_v12 = vpop.f32.mrb[139].mxu0 }
 0x77f   : > { %v10855_v44 = vadd.f32 %v20896_v53, %v16477_v50  ;;  %v16480_v49 = vadd.f32 %v16479_v12, %v16478_v7  ;;  %16977 = vmatprep.mubr.msk.bf16.mxu0 %vm7377_vm0, %v10903_v35 }
 0x781   : > { %v10858_v11 = vadd.f32 %v20896_v53, %v16480_v49  ;;  %v10894_v59 = vmax.f32 %v10855_v44, 0.0  ;;  %v17650_v49 = vld [vmem:[%s21833_s3 + $0xf8] sm:$0xff]  }
 0x783   : > { %v10895_v24 = vmax.f32 %v10858_v11, 0.0  ;;  %v16481_v61 = vpop.f32.mrb[140].mxu0  ;;  %v11174_v11 = vadd.f32 %v20896_v53, %v20882_v6  ;;  %v17652_v6 = vld [vmem:[%s21835_s5] sm:$0xff]  }
 0x784   : > { %v16482_v19 = vpop.f32.mrb[141].mxu0 }
 0x785   : > { %v10904_v45 = vpack.c.bf16 %v10895_v24, %v10894_v59  ;;  %v16483_v42 = vadd.f32 %v16482_v19, %v16481_v61  ;;  %v16484_v0 = vpop.f32.mrb[142].mxu0  ;;  %v17668_v24 = vld [vmem:[%s21835_s5 + $0x88] sm:$0xff]   ;;  %v17657_v61 = vld [vmem:[%s21835_s5 + $0x58] sm:$0xff]  }
 0x786   : > { %v16485_v55 = vpop.f32.mrb[143].mxu0  ;;  %v17658_v19 = vld [vmem:[%s21835_s5 + $0x18] sm:$0xff]  }
 0x787   : > { %v10863_v1 = vadd.f32 %v20896_v53, %v16483_v42  ;;  %v16486_v41 = vadd.f32 %v16485_v55, %v16484_v0  ;;  %16978 = vmatmul.mubr.msk.bf16.vlgmr.msra.gmra.mrb[24].mxu0 %vm7377_vm0, %v10904_v45  ;;  %v17659_v45 = vld [vmem:[%s21835_s5 + $0x60] sm:$0xff]   ;;  %v17661_v0 = vld [vmem:[%s21835_s5 + $0x68] sm:$0xff]   ;;  %v17665_v55 = vld [vmem:[%s21835_s5 + $0x70] sm:$0xff]  }
 0x788   : > { %16990 = vmatpush3.bf16.msra.mxu0 %v20875_v54  ;;  %v17660_v42 = vld [vmem:[%s21835_s5 + $0x20] sm:$0xff]  }
 0x789   : > { %v10866_v17 = vadd.f32 %v20896_v53, %v16486_v41  ;;  %16991 = vmatprep.subr.bf16.mxu0 %v17648_v37  ;;  %v10896_v36 = vmax.f32 %v10863_v1, 0.0  ;;  %v17666_v1 = vld [vmem:[%s21835_s5 + $0x30] sm:$0xff]  }
 0x78b   : > { %v10897_v33 = vmax.f32 %v10866_v17, 0.0  ;;  %v16487_v3 = vpop.f32.mrb[144].mxu0 }
 0x78c   : > { %v16488_v56 = vpop.f32.mrb[145].mxu0  ;;  %16992 = vmatpush3.bf16.msra.mxu0 %v17648_v37  ;;  %v17662_v37 = vld [vmem:[%s21835_s5 + $0x28] sm:$0xff]  }
 0x78d   : > { %v10905_v60 = vpack.c.bf16 %v10897_v33, %v10896_v36  ;;  %v16489_v39 = vadd.f32 %v16488_v56, %v16487_v3  ;;  %v16490_v20 = vpop.f32.mrb[146].mxu0  ;;  %17005 = vmatprep.subr.bf16.mxu0 %v17649_v18 }
 0x78e   : > { %v16491_v63 = vpop.f32.mrb[147].mxu0 }
 0x78f   : > { %v10871_v10 = vadd.f32 %v20896_v53, %v16489_v39  ;;  %v16492_v54 = vadd.f32 %v16491_v63, %v16490_v20  ;;  %16981 = vmatprep.mubr.msk.bf16.mxu0 %vm7377_vm0, %v10905_v60 }
 0x791   : > { %v10874_v4 = vadd.f32 %v20896_v53, %v16492_v54  ;;  %v10898_v15 = vmax.f32 %v10871_v10, 0.0 }
 0x793   : > { %v10899_v14 = vmax.f32 %v10874_v4, 0.0  ;;  %v16493_v21 = vpop.f32.mrb[148].mxu0 }
 0x794   : > { %v16494_v62 = vpop.f32.mrb[149].mxu0 }
 0x795   : > { %v10906_v30 = vpack.c.bf16 %v10899_v14, %v10898_v15  ;;  %v16495_v48 = vadd.f32 %v16494_v62, %v16493_v21  ;;  %v16496_v28 = vpop.f32.mrb[150].mxu0 }
 0x796   : > { %v16497_v2 = vpop.f32.mrb[151].mxu0 }
 0x797   : > { %v10879_v34 = vadd.f32 %v20896_v53, %v16495_v48  ;;  %v16498_v16 = vadd.f32 %v16497_v2, %v16496_v28  ;;  %16982 = vmatmul.mubr.msk.bf16.gmra.mrb[28].mxu0 %vm7377_vm0, %v10906_v30  ;;  %v17669_v28 = vld [vmem:[%s21835_s5 + $0x78] sm:$0xff]   ;;  %v17670_v2 = vld [vmem:[%s21835_s5 + $0xd0] sm:$0xff]  }
 0x799   : > { %v10882_v38 = vadd.f32 %v20896_v53, %v16498_v16  ;;  %v10900_v52 = vmax.f32 %v10879_v34, 0.0  ;;  %v17671_v34 = vld [vmem:[%s21835_s5 + $0x38] sm:$0xff]  }
 0x79b   : > { %v10901_v32 = vmax.f32 %v10882_v38, 0.0  ;;  %v16499_v29 = vpop.f32.mrb[152].mxu0 }
 0x79c   : > { %v16500_v40 = vpop.f32.mrb[153].mxu0 }
 0x79d   : > { %v10907_v22 = vpack.c.bf16 %v10901_v32, %v10900_v52  ;;  %v16501_v57 = vadd.f32 %v16500_v40, %v16499_v29  ;;  %v16502_v35 = vpop.f32.mrb[154].mxu0  ;;  %v17672_v29 = vld [vmem:[%s21835_s5 + $0x90] sm:$0xff]  }
 0x79e   : > { %v16503_v50 = vpop.f32.mrb[155].mxu0 }
 0x79f   : > { %v10887_v7 = vadd.f32 %v20896_v53, %v16501_v57  ;;  %16985 = vmatprep.mubr.msk.bf16.mxu0 %vm7377_vm0, %v10907_v22 }
 0x7a1   : > { %v10902_v12 = vmax.f32 %v10887_v7, 0.0 }
 0x7a3   : > { %v10908_v44 = vpack.c.bf16 %v10902_v12, %v10902_v12 }
 0x7a5   : > { %16986 = vmatmul.mubr.msk.bf16.gmra.mrb[156].mxu0 %vm7377_vm0, %v10908_v44  ;;  %v17673_v44 = vld [vmem:[%s21835_s5 + $0xd8] sm:$0xff]  }
 0x7a6   : > { %16993 = vmatprep.mubr.msk.bf16.mxu0 %vm7377_vm0, %v20853_v13  ;;  %v11189_v13 = vmax.f32 %v11174_v11, 0.0 }
 0x7a8   : > { %v11195_v59 = vpack.c.bf16 %v11189_v13, %v11189_v13 }
 0x7ad   : > { %16994 = vmatmul.mubr.msk.bf16.vlgmr.msra.gmra.mrb[24].mxu0 %vm7377_vm0, %v20860_v58  ;;  %v11461_v58 = vadd.f32 %v20896_v53, %v20910_v43  ;;  %v17655_v53 = vld [vmem:[%s21835_s5 + $0x50] sm:$0xff]  }
 0x7ae   : > { %16997 = vmatprep.mubr.msk.bf16.mxu0 %vm7377_vm0, %v20864_v46  ;;  %17006 = vmatpush3.bf16.msra.mxu0 %v17649_v18  ;;  %v17656_v43 = vld [vmem:[%s21835_s5 + $0x10] sm:$0xff]  }
 0x7af   : > { %17007 = vmatprep.subr.bf16.mxu0 %v17650_v49  ;;  %v11476_v46 = vmax.f32 %v11461_v58, 0.0  ;;  %v17674_v58 = vld [vmem:[%s21835_s5 + $0x98] sm:$0xff]  }
 0x7b2   : > { %17008 = vmatpush3.bf16.msra.mxu0 %v17650_v49 }
 0x7b5   : > { %16998 = vmatmul.mubr.msk.bf16.gmra.mrb[28].mxu0 %vm7377_vm0, %v20868_v31  ;;  %v11482_v31 = vpack.c.bf16 %v11476_v46, %v11476_v46  ;;  %v21082_v46 = vld [vmem:[%s21835_s5 + $0x100] sm:$0xff]  }
 0x7b6   : > { %17001 = vmatprep.mubr.msk.bf16.mxu0 %vm7377_vm0, %v20877_v5  ;;  %v17651_v5 = vld [vmem:[%s21835_s5 + $0x40] sm:$0xff]  }
 0x7b7   : > { %16633 = vmatprep.subr.bf16.mxu1 %v17651_v5 }
 0x7b8   : > { %16634 = vmatpush3.bf16.msra.mxu1 %v17652_v6 }
 0x7bd   : > { %17002 = vmatmul.mubr.msk.bf16.gmra.mrb[160].mxu0 %vm7377_vm0, %v11195_v59 }
 0x7be   : > { %17009 = vmatprep.mubr.msk.bf16.mxu0 %vm7377_vm0, %v20887_v9  ;;  %v17653_v9 = vld [vmem:[%s21835_s5 + $0x48] sm:$0xff]  }
 0x7bf   : > { %16635 = vmatprep.subr.bf16.mxu1 %v17653_v9 }
 0x7c5   : > { %17010 = vmatmul.mubr.msk.bf16.vlgmr.msra.gmra.mrb[24].mxu0 %vm7377_vm0, %v20891_v47  ;;  %v17654_v47 = vld [vmem:[%s21835_s5 + $0x8] sm:$0xff]  }
 0x7c6   : > { %17013 = vmatprep.mubr.msk.bf16.mxu0 %vm7377_vm0, %v20900_v8  ;;  %v17663_v8 = vld [vmem:[%s21835_s5 + $0xc0] sm:$0xff]   ;;  %16636 = vmatpush3.bf16.msra.mxu1 %v17654_v47 }
 0x7c7   : > { %16673 = vmatprep.subr.bf16.mxu0 %v17663_v8  ;;  %16637 = vmatprep.subr.bf16.mxu1 %v17655_v53  ;;  %v17676_v53 = vld [vmem:[%s21835_s5 + $0xe0] sm:$0xff]  }
 0x7ca   : > { %16638 = vmatpush3.bf16.msra.mxu1 %v17656_v43 }
 0x7cb   : > { %16639 = vmatprep.subr.bf16.mxu1 %v17657_v61 }
 0x7cd   : > { %17014 = vmatmul.mubr.msk.bf16.gmra.mrb[28].mxu0 %vm7377_vm0, %v20904_v25  ;;  %v17664_v25 = vld [vmem:[%s21835_s5 + $0x80] sm:$0xff]  }
 0x7ce   : > { %17017 = vmatprep.mubr.msk.bf16.mxu0 %vm7377_vm0, %v20908_v51  ;;  %v17667_v51 = vld [vmem:[%s21835_s5 + $0xc8] sm:$0xff]   ;;  %16674 = vmatpush3.bf16.msra.mxu0 %v17664_v25 }
 0x7cf   : > { %16675 = vmatprep.subr.bf16.mxu0 %v17667_v51  ;;  %16640 = vmatpush3.bf16.msra.mxu1 %v17658_v19 }
 0x7d0   : > { %16641 = vmatprep.subr.bf16.mxu1 %v17659_v45 }
 0x7d2   : > { %16676 = vmatpush3.bf16.msra.mxu0 %v17668_v24 }
 0x7d3   : > { %16642 = vmatpush3.bf16.msra.mxu1 %v17660_v42  ;;  %16677 = vmatprep.subr.bf16.mxu0 %v17670_v2 }
 0x7d4   : > { %16643 = vmatprep.subr.bf16.mxu1 %v17661_v0 }
 0x7d5   : > { %17018 = vmatmul.mubr.msk.bf16.gmra.mrb[164].mxu0 %vm7377_vm0, %v11482_v31  ;;  %vm11807_vm0 = vsmask.f32 5376 }
 0x7d6   : > { %16678 = vmatpush3.bf16.msra.mxu0 %v17672_v29 }
 0x7d7   : > { %16644 = vmatpush3.bf16.msra.mxu1 %v17662_v37  ;;  %16679 = vmatprep.subr.bf16.mxu0 %v17673_v44 }
 0x7d8   : > { %16645 = vmatprep.subr.bf16.mxu1 %v17665_v55 }
 0x7da   : > { %16680 = vmatpush3.bf16.msra.mxu0 %v17674_v58 }
 0x7db   : > { %16646 = vmatpush3.bf16.msra.mxu1 %v17666_v1  ;;  %16681 = vmatprep.subr.bf16.mxu0 %v17676_v53  ;;  %v17677_v1 = vld [vmem:[%s21835_s5 + $0xa0] sm:$0xff]  }
 0x7dc   : > { %16647 = vmatprep.subr.bf16.mxu1 %v17669_v28 }
 0x7de   : > { %16682 = vmatpush3.bf16.msra.mxu0 %v17677_v1 }
 0x7df   : > { %16648 = vmatpush3.bf16.msra.mxu1 %v17671_v34 }
 0x7e0   : > { %17021 = vmatprep.subr.bf16.mxu1 %v21082_v46 }
 0x878   : > { %v16987_v41 = vpop.f32.mrb[156].mxu0 }
 0x879   : > { %v11029_v17 = vadd.f32 %v16987_v41, %v20912_v26  ;;  %v11005_v18 = vpop.f32.mrb[157].mxu0  ;;  %v21037_v26 = vld [vmem:[%s21834_s4] ss:$0 sm:$0xff] }
 0x87a   : > { %v11027_v36 = vadd.f32 %v11005_v18, %v20914_v27  ;;  %v16988_v33 = vpop.f32.mrb[158].mxu0 }
 0x87b   : > { %v11008_v3 = vpop.f32.mrb[159].mxu0 }
 0x87c   : > { %v11028_v56 = vadd.f32 %v11008_v3, %v20916_v23 }
 0x890   : > { %v17003_v60 = vpop.f32.mrb[160].mxu0 }
 0x891   : > { %v21028_v39 = vadd.f32 %v17003_v60, %v11029_v17  ;;  %v11292_v20 = vpop.f32.mrb[161].mxu0 }
 0x892   : > { %v21030_v63 = vadd.f32 %v11292_v20, %v11027_v36  ;;  %v17004_v10 = vpop.f32.mrb[162].mxu0 }
 0x893   : > { %v11295_v54 = vpop.f32.mrb[163].mxu0 }
 0x894   : > { %v21032_v4 = vadd.f32 %v11295_v54, %v11028_v56  ;;  %v17678_v54 = vld [vmem:[%s21835_s5 + $0xe8] sm:$0xff]  }
 0x895   : > { %16683 = vmatprep.subr.bf16.mxu0 %v17678_v54 }
 0x898   : > { %v17011_v27 = vpop.f32.mrb[24].mxu0 }
 0x899   : > { %v11612_v15 = vadd.f32 %v17011_v27, %v21037_v26  ;;  %v11547_v14 = vpop.f32.mrb[25].mxu0 }
 0x89a   : > { %v11610_v23 = vadd.f32 %v21037_v26, %v11547_v14  ;;  %v17012_v21 = vpop.f32.mrb[26].mxu0 }
 0x89b   : > { %v11613_v62 = vadd.f32 %v17012_v21, %v21037_v26  ;;  %v11550_v30 = vpop.f32.mrb[27].mxu0  ;;  %v11623_v16 = vmax.f32 %v11612_v15, 0.0 }
 0x89c   : > { %v11611_v48 = vadd.f32 %v21037_v26, %v11550_v30  ;;  %v11621_v52 = vmax.f32 %v11610_v23, 0.0 }
 0x89d   : > { %v11624_v38 = vmax.f32 %v11613_v62, 0.0 }
 0x89e   : > { %v11622_v32 = vmax.f32 %v11611_v48, 0.0 }
 0x89f   : > { %v21055_v40 = vpack.c.bf16 %v11624_v38, %v11623_v16 }
 0x8a0   : > { %v21057_v22 = vpack.c.bf16 %v11622_v32, %v11621_v52  ;;  %v17015_v57 = vpop.f32.mrb[28].mxu0  ;;  %v17679_v52 = vld [vmem:[%s21835_s5 + $0xa8] sm:$0xff]  }
 0x8a1   : > { %v11616_v35 = vadd.f32 %v17015_v57, %v21037_v26  ;;  %v11563_v50 = vpop.f32.mrb[29].mxu0  ;;  %v21061_v7 = vshll.u32 %v21055_v40, 16  ;;  %v21064_v12 = vshrl.u32 %v21055_v40, 16  ;;  %v21138_v28 = vrot.slane %v21055_v40, 2  ;;  %16684 = vmatpush3.bf16.msra.mxu0 %v17679_v52 }
 0x8a2   : > { %v11614_v49 = vadd.f32 %v21037_v26, %v11563_v50  ;;  %v17016_v11 = vpop.f32.mrb[30].mxu0  ;;  %v21071_v13 = vshrl.u32 %v21057_v22, 16  ;;  %v21074_v59 = vshll.u32 %v21057_v22, 16  ;;  %v17681_v50 = vld [vmem:[%s21835_s5 + $0xf0] sm:$0xff]  }
 0x8a3   : > { %v11627_v31 = vmax.f32 %v11616_v35, 0.0  ;;  %v11617_v5 = vadd.f32 %v17016_v11, %v21037_v26  ;;  %v11566_v6 = vpop.f32.mrb[31].mxu0  ;;  %v11781_v9 = vrot.slane %v21064_v12, 5  ;;  %v11782_v47 = vrot.slane %v21061_v7, 6  ;;  %16685 = vmatprep.subr.bf16.mxu0 %v17681_v50 }
 0x8a4   : > { %v11625_v8 = vmax.f32 %v11614_v49, 0.0  ;;  %v11615_v25 = vadd.f32 %v21037_v26, %v11566_v6  ;;  %v11777_v51 = vrot.slane %v21071_v13, 4  ;;  %v11778_v43 = vrot.slane %v21074_v59, 5 }
 0x8a5   : > { %v11628_v24 = vmax.f32 %v11617_v5, 0.0  ;;  %v21094_v61 = vor.u32 %v11782_v47, %v11781_v9  ;;  %v11785_v19 = vrot.slane %v21064_v12, 6  ;;  %v11786_v45 = vrot.slane %v21061_v7, 7 }
 0x8a6   : > { %v11626_v42 = vmax.f32 %v11615_v25, 0.0  ;;  %v11779_v0 = vor.u32 %v11778_v43, %v11777_v51  ;;  %v11687_v37 = vrot.slane %v21074_v59, 1  ;;  %v11691_v55 = vrot.slane %v21071_v13, 1 }
 0x8a7   : > { %v21103_v41 = vpack.c.bf16 %v11628_v24, %v11627_v31  ;;  %v21111_v18 = vor.u32 %v11786_v45, %v11785_v19  ;;  %v11692_v36 = vrot.slane %v21074_v59, 2  ;;  %v11697_v33 = vrot.slane %v21061_v7, 2  ;;  %v17682_v24 = vld [vmem:[%s21835_s5 + $0xb0] sm:$0xff]  }
 0x8a8   : > { %v21115_v3 = vpack.c.bf16 %v11626_v42, %v11625_v8  ;;  %v17019_v56 = vpop.f32.mrb[164].mxu0  ;;  %v11818_v60 = vsel %vm21107_vm5, %v11779_v0, %v21094_v61  ;;  %v11688_v20 = vor.u32 %v11687_v37, %v21071_v13  ;;  %v11702_v10 = vrot.slane %v21064_v12, 2  ;;  %16686 = vmatpush3.bf16.msra.mxu0 %v17682_v24 }
 0x8a9   : > { %v11603_v27 = vadd.f32 %v17019_v56, %v21028_v39  ;;  %v11579_v15 = vpop.f32.mrb[165].mxu0  ;;  %v11821_v14 = vsel %vm11663_vm4, %v11818_v60, %v21111_v18  ;;  %v11693_v23 = vor.u32 %v11692_v36, %v11691_v55  ;;  %v11703_v21 = vrot.slane %v21061_v7, 3 }
 0x8aa   : > { %v11601_v62 = vadd.f32 %v11579_v15, %v21030_v63  ;;  %11978 = vrot.lane.b32.xlu0 %v11821_v14, %s17868_s21  ;;  %v17020_v30 = vpop.f32.mrb[166].mxu0  ;;  %v21132_v48 = vshrl.u32 %v21115_v3, 16  ;;  %v21135_v39 = vshll.u32 %v21115_v3, 16  ;;  %v21149_v38 = vshll.u32 %v21103_v41, 16 }
 0x8ab   : > { %v21141_v2 = vadd.f32 %v21037_v26, %v11603_v27  ;;  %v11582_v34 = vpop.f32.mrb[167].mxu0  ;;  %v11698_v63 = vsel %vm11690_vm3, %v11693_v23, %v11697_v33  ;;  %v21146_v16 = vor.u32 %v11703_v21, %v11702_v10  ;;  %v11707_v58 = vrot.slane %v21064_v12, 3  ;;  %v17683_v27 = vld [vmem:[%s21835_s5 + $0xf8] sm:$0xff]  }
 0x8ac   : > { %v11618_v32 = vadd.f32 %v21037_v26, %v11601_v62  ;;  %v11602_v29 = vadd.f32 %v11582_v34, %v21032_v4  ;;  %v11740_v57 = vsel %vm21107_vm5, %v11688_v20, %v11698_v63  ;;  %v11788_v35 = vrot.slane %v21132_v48, 6  ;;  %v17684_v62 = vld [vmem:[%s21835_s5 + $0xb8] sm:$0xff]   ;;  %16687 = vmatprep.subr.bf16.mxu0 %v17683_v27 }
 0x8ad   : > { %v11743_v44 = vsel %vm11663_vm4, %v11740_v57, %v21146_v16  ;;  %v11789_v49 = vrot.slane %v21135_v39, 7  ;;  %v11793_v11 = vrot.slane %v21132_v48, 7  ;;  %v11797_v5 = vrot.slane %v21135_v39, 1  ;;  %16688 = vmatpush3.bf16.msra.mxu0 %v17684_v62 }
 0x8ae   : > { %v11629_v4 = vmax.f32 %v11618_v32, 0.0  ;;  %v11619_v31 = vadd.f32 %v21037_v26, %v11602_v29  ;;  %11967 = vrot.lane.b32.xlu0 %v11743_v44, %s17868_s21  ;;  %v11639_v6 = vrot.slane %v21057_v22, 1  ;;  %v11799_v53 = vrot.slane %v21149_v38, 1 }
 0x8af   : > { %v11790_v9 = vor.u32 %v11789_v49, %v11788_v35  ;;  %v21172_v47 = vor.u32 %v11793_v11, %v21135_v39  ;;  %v11708_v8 = vrot.slane %v21061_v7, 4  ;;  %v21177_v51 = vor.u32 %v11797_v5, %v21132_v48 }
 0x8b0   : > { %v11630_v25 = vmax.f32 %v11619_v31, 0.0  ;;  %v11713_v26 = vrot.slane %v21132_v48, 3  ;;  %v11716_v43 = vrot.slane %v21135_v39, 4  ;;  %v11720_v0 = vrot.slane %v21132_v48, 4 }
 0x8b1   : > { %v11791_v45 = vsel %vm11675_vm9, %v21111_v18, %v11790_v9  ;;  %v11709_v42 = vor.u32 %v11708_v8, %v11707_v58  ;;  %v11721_v37 = vrot.slane %v21135_v39, 5  ;;  %v11800_v1 = vsel %vm11796_vm6, %v21177_v51, %v11799_v53  ;;  %vm21249_vm6 = vmand %vm11674_vm12, %vm11675_vm9 }
 0x8b2   : > { %v21194_v55 = vpack.c.bf16 %v11630_v25, %v11629_v4  ;;  %v11822_v36 = vsel %vm21186_vm13, %v11791_v45, %v21172_v47  ;;  %v21201_v56 = vor.u32 %v11716_v43, %v11713_v26  ;;  %v11724_v10 = vrot.slane %v21132_v48, 5  ;;  %v17680_v26 = vld [vmem:[%s21835_s5 + $0x108] sm:$0xff]  }
 0x8b3   : > { %v11825_v60 = vsel %vm11670_vm11, %v11822_v36, %v11800_v1  ;;  %v21204_v20 = vor.u32 %v11721_v37, %v11720_v0  ;;  %v11725_v54 = vrot.slane %v21135_v39, 6  ;;  %v21215_v14 = vshrl.u32 %v21103_v41, 16 }
 0x8b4   : > { %11980 = vrot.lane.b32.xlu1 %v11825_v60, %s17868_s21  ;;  %v11718_v15 = vsel %vm11706_vm10, %v11709_v42, %v21201_v56  ;;  %v11733_v23 = vrot.slane %v21149_v38, 6  ;;  %v11738_v21 = vrot.slane %v21149_v38, 7  ;;  %v11804_v63 = vrot.slane %v21149_v38, 2 }
 0x8b5   : > { %v11744_v30 = vsel %vm21186_vm13, %v21146_v16, %v11718_v15  ;;  %v11726_v34 = vor.u32 %v11725_v54, %v11724_v10  ;;  %v21227_v52 = vshrl.u32 %v21194_v55, 16  ;;  %v11730_v29 = vrot.slane %v21215_v14, 5 }
 0x8b6   : > { %v11747_v32 = vsel %vm11670_vm11, %v11744_v30, %v21204_v20  ;;  %v11737_v57 = vrot.slane %v21215_v14, 6  ;;  %v11801_v35 = vor.u32 %v11799_v53, %v21215_v14  ;;  %v11803_v50 = vrot.slane %v21215_v14, 1 }
 0x8b7   : > { %v11808_v44 = vrot.slane %v21215_v14, 2  ;;  %v11812_v49 = vrot.slane %v21227_v52, 2  ;;  %v11813_v11 = vshll.u32 %v21194_v55, 16  ;;  %v21239_v58 = vor.u32 %v11733_v23, %v11730_v29 }
 0x8b8   : > { %11969 = vrot.lane.b32.xlu1 %v11747_v32, %s17868_s21  ;;  %v11739_v4 = vor.u32 %v11738_v21, %v11737_v57  ;;  %v11862_v31 = vrot.slane %v21071_v13, 5  ;;  %v11863_v5 = vrot.slane %v21074_v59, 6  ;;  %v11805_v9 = vor.u32 %v11804_v63, %v11803_v50 }
 0x8b9   : > { %v11815_v53 = vrot.slane %v11813_v11, 3  ;;  %v11869_v8 = vrot.slane %v21064_v12, 7  ;;  %v11920_v25 = vrot.slane %v21064_v12, 1  ;;  %v11735_v43 = vsel %vm11667_vm8, %v11726_v34, %v21239_v58 }
 0x8ba   : > { %v11864_v24 = vor.u32 %v11863_v5, %v11862_v31  ;;  %v11923_v13 = vrot.slane %v21132_v48, 2  ;;  %v11924_v59 = vrot.slane %v21135_v39, 3  ;;  %v11748_v45 = vsel %vm21249_vm6, %v21204_v20, %v11735_v43 }
 0x8bb   : > { %v11816_v12 = vor.u32 %v11815_v53, %v11812_v49  ;;  %v11826_v42 = vsel %vm21249_vm6, %v11801_v35, %v11805_v9  ;;  %v11870_v0 = vor.u32 %v11869_v8, %v21061_v7  ;;  %v11751_v37 = vsel %vm11645_vm15, %v11748_v45, %v11739_v4 }
 0x8bc   : > { %v11865_v1 = vsel %vm11667_vm8, %v11864_v24, %v21094_v61  ;;  %v11921_v39 = vor.u32 %v11920_v25, %v11697_v33  ;;  %v11925_v36 = vor.u32 %v11924_v59, %v11923_v13  ;;  %11971 = vrot.lane.b32.xlu1 %v11751_v37, %s17868_s21  ;;  %v11871_v54 = vsel %vm11868_vm14, %v11869_v8, %v21172_v47 }
 0x8bd   : > { %v11817_v60 = vsel %vm11807_vm0, %v11808_v44, %v11816_v12  ;;  %v11882_v10 = vsel %vm21107_vm5, %v11865_v1, %v21111_v18  ;;  %v11874_v27 = vrot.slane %v21132_v48, 1  ;;  %v11886_v33 = vsel %vm21186_vm13, %v11871_v54, %v21177_v51 }
 0x8be   : > { %v11829_v15 = vsel %vm11645_vm15, %v11826_v42, %v11817_v60  ;;  %v11885_v61 = vsel %vm11663_vm4, %v11882_v10, %v11870_v0  ;;  %v11926_v7 = vsel %vm11807_vm0, %v21146_v16, %v11925_v36  ;;  %v11929_v48 = vrot.slane %v21215_v14, 4 }
 0x8bf   : > { %11982 = vrot.lane.b32.xlu0 %v11829_v15, %s17868_s21  ;;  %v11941_v18 = vsel %vm21107_vm5, %v11921_v39, %v11926_v7  ;;  %v11875_v47 = vsel %vm11690_vm3, %v11874_v27, %v11805_v9  ;;  %v11930_v23 = vrot.slane %v21149_v38, 5  ;;  %v11876_v62 = vrot.slane %v21149_v38, 3 }
 0x8c0   : > { %v11944_v21 = vsel %vm11663_vm4, %v11941_v18, %v21201_v56  ;;  %v11889_v16 = vsel %vm11670_vm11, %v11886_v33, %v11875_v47  ;;  %v11879_v51 = vrot.slane %v21227_v52, 3  ;;  %11989 = vrot.lane.b32.xlu1 %v11885_v61, %s17868_s21  ;;  %v11880_v34 = vrot.slane %v11813_v11, 4 }
 0x8c1   : > { %v11931_v30 = vor.u32 %v11930_v23, %v11929_v48  ;;  %v11935_v63 = vrot.slane %v21227_v52, 6  ;;  %v11936_v32 = vrot.slane %v11813_v11, 7  ;;  %v11877_v29 = vor.u32 %v11876_v62, %v11808_v44 }
 0x8c2   : > { %v11939_v35 = vrot.slane %v21227_v52, 7  ;;  %v11646_v50 = vrot.slane %v21055_v40, 3  ;;  %v11753_v4 = vrot.slane %v21057_v22, 2  ;;  %v11881_v31 = vor.u32 %v11880_v34, %v11879_v51 }
 0x8c3   : > { %12000 = vrot.lane.b32.xlu0 %v11944_v21, %s17868_s21  ;;  %v11932_v38 = vsel %vm11660_vm2, %v21204_v20, %v11931_v30  ;;  %v11937_v5 = vor.u32 %v11936_v32, %v11935_v63  ;;  %v11662_v44 = vsel %vm21107_vm5, %v21057_v22, %v11639_v6  ;;  %v11890_v8 = vsel %vm21249_vm6, %v11805_v9, %v11877_v29 }
 0x8c4   : > { %v11945_v53 = vsel %vm21186_vm13, %v21201_v56, %v11932_v38  ;;  %v11940_v20 = vor.u32 %v11939_v35, %v11813_v11  ;;  %v11754_v25 = vsel %vm11670_vm11, %v11753_v4, %v21138_v28  ;;  %11973 = vrot.lane.b32.xlu1 %v11737_v57, %s17868_s21  ;;  %v11893_v24 = vsel %vm11645_vm15, %v11890_v8, %v11881_v31 }
 0x8c5   : > { %v11948_v43 = vsel %vm11670_vm11, %v11945_v53, %v21239_v58  ;;  %v11949_v56 = vsel %vm21249_vm6, %v21239_v58, %v11937_v5  ;;  %v11765_v11 = vsel %vm21107_vm5, %v11639_v6, %v11754_v25  ;;  %vm11836_vm2 = vcmask 1040384  }
 0x8c6   : > { %v11952_v9 = vsel %vm11645_vm15, %v11949_v56, %v11940_v20  ;;  %v21335_v14 = vsel %vm11663_vm4, %v11765_v11, %v11646_v50  ;;  %v21339_v57 = vsel %vm11663_vm4, %v11662_v44, %v21138_v28  ;;  %v11650_v13 = vrot.slane %v21115_v3, 4 }
 0x8c7   : > { %11984 = vrot.lane.b32.xlu0 %v11812_v49, %s17868_s21  ;;  %v11654_v58 = vrot.slane %v21115_v3, 5  ;;  %v11757_v6 = vrot.slane %v21055_v40, 4  ;;  %v11647_v59 = vrot.slane %v21115_v3, 3  ;;  %v11655_v45 = vrot.slane %v21103_v41, 5 }
 0x8c8   : > { %v21350_v12 = vrot.slane %v21103_v41, 6  ;;  %v11761_v42 = vrot.slane %v21115_v3, 6  ;;  %v11764_v0 = vrot.slane %v21103_v41, 7  ;;  %v11830_v37 = vrot.slane %v21057_v22, 5  ;;  %11991 = vrot.lane.b32.xlu1 %v11889_v16, %s17868_s21 }
 0x8c9   : > { %v11758_v49 = vsel %vm11659_vm1, %v11757_v6, %v11650_v13  ;;  %v11648_v1 = vsel %vm11645_vm15, %v11646_v50, %v11647_v59  ;;  %v11656_v39 = vsel %vm11653_vm7, %v11654_v58, %v11655_v45  ;;  %v11831_v36 = vrot.slane %v21055_v40, 5 }
 0x8ca   : > { %v11769_v60 = vsel %vm21186_vm13, %v11646_v50, %v11758_v49  ;;  %v11669_v10 = vsel %vm21186_vm13, %v21138_v28, %v11648_v1  ;;  %v11677_v22 = vsel %vm21249_vm6, %v11650_v13, %v11656_v39  ;;  %v11958_v54 = vsel %vm21186_vm13, %v11650_v13, %v11656_v39  ;;  %v17686_v49 = vld [vmem:[%s21835_s5 + $0x118] sm:$0xff]  }
 0x8cb   : > { %12002 = vrot.lane.b32.xlu0 %v11948_v43, %s17868_s21  ;;  %v11772_v27 = vsel %vm11670_vm11, %v11769_v60, %v11654_v58  ;;  %v21372_v15 = vsel %vm11670_vm11, %v11669_v10, %v11650_v13  ;;  %v21376_v61 = vsel %vm11645_vm15, %v11677_v22, %v21350_v12  ;;  %v21380_v7 = vsel %vm11670_vm11, %v11958_v54, %v21350_v12 }
 0x8cc   : > { %v11762_v33 = vsel %vm11674_vm12, %v11761_v42, %v21350_v12  ;;  %v11832_v18 = vsel %vm11653_vm7, %v11830_v37, %v11831_v36  ;;  %v11834_v47 = vrot.slane %v21055_v40, 6  ;;  %v11837_v48 = vrot.slane %v21055_v40, 7  ;;  %11993 = vrot.lane.b32.xlu1 %v11893_v24, %s17868_s21  ;;  %v17685_v42 = vld [vmem:[%s21835_s5 + $0x110] sm:$0xff]  }
 0x8cd   : > { %v11773_v23 = vsel %vm21249_vm6, %v11654_v58, %v11762_v33  ;;  %v11894_v21 = vrot.slane %v21055_v40, 1  ;;  %v11896_v16 = vrot.slane %v21115_v3, 2  ;;  %v11900_v62 = vrot.slane %v21103_v41, 4 }
 0x8ce   : > { %v11776_v30 = vsel %vm11645_vm15, %v11773_v23, %v11764_v0  ;;  %v11850_v34 = vsel %vm21107_vm5, %v11832_v18, %v11834_v47  ;;  %v11955_v63 = vsel %vm21107_vm5, %v21138_v28, %v11648_v1  ;;  %v11838_v32 = vrot.slane %v21115_v3, 7 }
 0x8cf   : > { %12004 = vrot.lane.b32.xlu0 %v11952_v9, %s17868_s21  ;;  %v11853_v40 = vsel %vm11663_vm4, %v11850_v34, %v11837_v48  ;;  %v11897_v29 = vsel %vm11670_vm11, %v21138_v28, %v11896_v16  ;;  %v11901_v50 = vsel %vm11659_vm1, %v11650_v13, %v11900_v62  ;;  %v21408_v4 = vsel %vm11663_vm4, %v11955_v63, %v11650_v13 }
 0x8d0   : > { %v11908_v38 = vsel %vm21107_vm5, %v11894_v21, %v11897_v29  ;;  %v11912_v31 = vsel %vm21186_vm13, %v11647_v59, %v11901_v50  ;;  %v11839_v5 = vsel %vm11836_vm2, %v11837_v48, %v11838_v32  ;;  %v11842_v44 = vrot.slane %v21115_v3, 1  ;;  %11995 = vrot.lane.b32.xlu1 %v11879_v51, %s17868_s21 }
 0x8d1   : > { %v11911_v28 = vsel %vm11663_vm4, %v11908_v38, %v11647_v59  ;;  %v11915_v53 = vsel %vm11670_vm11, %v11912_v31, %v11655_v45  ;;  %v11843_v8 = vrot.slane %v21103_v41, 1  ;;  %v11854_v17 = vsel %vm21186_vm13, %v11839_v5, %v21115_v3 }
 0x8d2   : > { %v11904_v20 = vrot.slane %v21194_v55, 6  ;;  %v21427_v25 = vrot.slane %v21194_v55, 7  ;;  %v11846_v43 = vrot.slane %v21103_v41, 2  ;;  %v11849_v24 = vrot.slane %v21194_v55, 3 }
 0x8d3   : > { %12006 = vrot.lane.b32.xlu0 %v11939_v35, %s17868_s21  ;;  %v11844_v51 = vsel %vm11663_vm4, %v11842_v44, %v11843_v8  ;;  %vm12008_vm1 = vcmask 523264   ;;  %v11631_v62 = vmax.f32 %v21141_v2, 0.0 }
 0x8d4   : > { %v11857_v56 = vsel %vm11670_vm11, %v11854_v17, %v11844_v51  ;;  %v11905_v3 = vsel %vm11674_vm12, %v21350_v12, %v11904_v20  ;;  %v11961_v19 = vsel %vm21249_vm6, %v21350_v12, %v21427_v25  ;;  %v11858_v11 = vsel %vm21249_vm6, %v11843_v8, %v11846_v43 }
 0x8d5   : > { %v11916_v9 = vsel %vm21249_vm6, %v11655_v45, %v11905_v3  ;;  %v11963_v52 = vsel %vm11645_vm15, %v11961_v19, %v21194_v55  ;;  %v11861_v35 = vsel %vm11645_vm15, %v11858_v11, %v11849_v24  ;;  %v11637_v63 = vpack.c.bf16 %v11631_v62, %v11631_v62  ;;  %v15594_v55 = vld [vmem:[%s21836_s6] ss:$0 sm:$0xff] }
 0x8d6   : > { %v11919_v13 = vsel %vm11645_vm15, %v11916_v9, %v21427_v25 }
 0x91c   : > { %v11979_v58 = vpop.permute.xlu0 %11978 }
 0x91d   : > { %v12022_v6 = vsel %vm12008_vm1, %v21335_v14, %v11979_v58 }
 0x91e   : > { %12320 = vmatprep.mubr.bf16.mxu1 %v12022_v6 }
 0x920   : > { %v11968_v59 = vpop.permute.xlu0 %11967 }
 0x921   : > { %v12010_v45 = vsel %vm12008_vm1, %v21339_v57, %v11968_v59 }
 0x922   : > { %12321 = vmatmul.mubr.bf16.vlgmr.msra.gmra.mrb[32].mxu1 %v12010_v45 }
 0x923   : > { %17022 = vmatpush3.bf16.msra.mxu1 %v21082_v46 }
 0x924   : > { %17023 = vmatprep.subr.bf16.mxu1 %v17680_v26 }
 0x926   : > { %v11981_v37 = vpop.permute.xlu1 %11980 }
 0x927   : > { %v12025_v14 = vsel %vm12008_vm1, %v11772_v27, %v11981_v37  ;;  %17024 = vmatpush3.bf16.msra.mxu1 %v17680_v26 }
 0x928   : > { %12328 = vmatprep.mubr.bf16.mxu1 %v12025_v14  ;;  %17025 = vmatprep.subr.bf16.mxu1 %v17685_v42 }
 0x92a   : > { %v11970_v1 = vpop.permute.xlu1 %11969 }
 0x92b   : > { %v12013_v57 = vsel %vm12008_vm1, %v21372_v15, %v11970_v1  ;;  %17026 = vmatpush3.bf16.msra.mxu1 %v17685_v42 }
 0x92c   : > { %12329 = vmatmul.mubr.bf16.gmra.mrb[36].mxu1 %v12013_v57  ;;  %17027 = vmatprep.subr.bf16.mxu1 %v17686_v49 }
 0x92e   : > { %v11972_v46 = vpop.permute.xlu1 %11971 }
 0x92f   : > { %17028 = vmatpush3.bf16.msra.mxu1 %v17686_v49  ;;  %v12016_v60 = vsel %vm12008_vm1, %v21376_v61, %v11972_v46 }
 0x931   : > { %v11983_v39 = vpop.permute.xlu0 %11982 }
 0x932   : > { %v12028_v36 = vsel %vm12008_vm1, %v11776_v30, %v11983_v39  ;;  %v11990_v10 = vpop.permute.xlu1 %11989 }
 0x933   : > { %12336 = vmatprep.mubr.bf16.mxu1 %v12028_v36  ;;  %v12034_v27 = vsel %vm12008_vm1, %v11853_v40, %v11990_v10 }
 0x934   : > { %12337 = vmatmul.mubr.bf16.gmra.mrb[40].mxu1 %v12016_v60 }
 0x935   : > { %v12001_v22 = vpop.permute.xlu0 %12000 }
 0x936   : > { %v12046_v54 = vsel %vm12008_vm1, %v11911_v28, %v12001_v22  ;;  %v11974_v15 = vpop.permute.xlu1 %11973 }
 0x937   : > { %12384 = vmatprep.mubr.bf16.mxu0 %v12046_v54  ;;  %v12019_v47 = vsel %vm12008_vm1, %v21350_v12, %v11974_v15 }
 0x938   : > { %12385 = vmatmul.mubr.bf16.vlgmr.msra.gmra.mrb[168].mxu0 %v12034_v27 }
 0x939   : > { %v11985_v33 = vpop.permute.xlu0 %11984 }
 0x93a   : > { %v12031_v18 = vsel %vm12008_vm1, %v11764_v0, %v11985_v33  ;;  %v11992_v61 = vpop.permute.xlu1 %11991 }
 0x93b   : > { %12344 = vmatprep.mubr.bf16.mxu1 %v12031_v18  ;;  %v12037_v21 = vsel %vm12008_vm1, %v11857_v56, %v11992_v61 }
 0x93c   : > { %12345 = vmatmul.mubr.bf16.gmra.mrb[44].mxu1 %v12019_v47 }
 0x93d   : > { %v12003_v48 = vpop.permute.xlu0 %12002  ;;  %17029 = vmatprep.mubr.msk.bf16.mxu1 %vm12008_vm1, %v21408_v4 }
 0x93e   : > { %v12049_v23 = vsel %vm12008_vm1, %v11915_v53, %v12003_v48  ;;  %v11994_v0 = vpop.permute.xlu1 %11993 }
 0x93f   : > { %12392 = vmatprep.mubr.bf16.mxu0 %v12049_v23  ;;  %v12040_v30 = vsel %vm12008_vm1, %v11861_v35, %v11994_v0 }
 0x940   : > { %12393 = vmatmul.mubr.bf16.gmra.mrb[172].mxu0 %v12037_v21 }
 0x941   : > { %v12005_v16 = vpop.permute.xlu0 %12004 }
 0x942   : > { %v12052_v41 = vsel %vm12008_vm1, %v11919_v13, %v12005_v16  ;;  %v11996_v32 = vpop.permute.xlu1 %11995 }
 0x943   : > { %12400 = vmatprep.mubr.bf16.mxu0 %v12052_v41 }
 0x944   : > { %17030 = vmatmul.mubr.msk.bf16.vlgmr.msra.gmra.mrb[48].mxu1 %vm12008_vm1, %v21380_v7  ;;  %v12043_v7 = vsel %vm12008_vm1, %v11849_v24, %v11996_v32 }
 0x945   : > { %v12007_v12 = vpop.permute.xlu0 %12006  ;;  %17033 = vmatprep.mubr.msk.bf16.mxu1 %vm12008_vm1, %v11963_v52 }
 0x946   : > { %v12055_v34 = vsel %vm12008_vm1, %v21427_v25, %v12007_v12 }
 0x948   : > { %12401 = vmatmul.mubr.bf16.gmra.mrb[176].mxu0 %v12040_v30 }
 0x949   : > { %12408 = vmatprep.mubr.bf16.mxu0 %v12055_v34 }
 0x94c   : > { %17034 = vmatmul.mubr.msk.bf16.gmra.mrb[52].mxu1 %vm12008_vm1, %v11637_v63 }
 0x950   : > { %12409 = vmatmul.mubr.bf16.gmra.mrb[180].mxu0 %v12043_v7 }
 0x9f5   : > { %v16649_v40 = vpop.f32.mrb[32].mxu1 }
 0x9f6   : > { %v16650_v29 = vpop.f32.mrb[33].mxu1 }
 0x9f7   : > { %v16651_v50 = vadd.f32 %v16650_v29, %v16649_v40  ;;  %v16652_v2 = vpop.f32.mrb[34].mxu1 }
 0x9f8   : > { %v16653_v4 = vpop.f32.mrb[35].mxu1 }
 0x9f9   : > { %v16654_v38 = vadd.f32 %v16653_v4, %v16652_v2  ;;  %v12323_v19 = vadd.f32 %v16651_v50, %v15594_v55 }
 0x9fb   : > { %v12326_v35 = vadd.f32 %v16654_v38, %v15594_v55 }
 0x9ff   : > { %v16655_v31 = vpop.f32.mrb[36].mxu1 }
 0xa00   : > { %v16656_v5 = vpop.f32.mrb[37].mxu1 }
 0xa01   : > { %v16657_v44 = vadd.f32 %v16656_v5, %v16655_v31  ;;  %v16658_v28 = vpop.f32.mrb[38].mxu1 }
 0xa02   : > { %v16659_v53 = vpop.f32.mrb[39].mxu1 }
 0xa03   : > { %v16660_v8 = vadd.f32 %v16659_v53, %v16658_v28  ;;  %v12331_v57 = vadd.f32 %v16657_v44, %v15594_v55 }
 0xa05   : > { %v12334_v60 = vadd.f32 %v16660_v8, %v15594_v55 }
 0xa07   : > { %v16661_v17 = vpop.f32.mrb[40].mxu1 }
 0xa08   : > { %v16662_v20 = vpop.f32.mrb[41].mxu1 }
 0xa09   : > { %v16663_v25 = vadd.f32 %v16662_v20, %v16661_v17  ;;  %v16664_v43 = vpop.f32.mrb[42].mxu1 }
 0xa0a   : > { %v16665_v24 = vpop.f32.mrb[43].mxu1 }
 0xa0b   : > { %v16689_v51 = vpop.f32.mrb[168].mxu0  ;;  %v16666_v56 = vadd.f32 %v16665_v24, %v16664_v43  ;;  %v12339_v16 = vadd.f32 %v16663_v25, %v15594_v55 }
 0xa0c   : > { %v16690_v3 = vpop.f32.mrb[169].mxu0 }
 0xa0d   : > { %v16691_v11 = vadd.f32 %v16690_v3, %v16689_v51  ;;  %v16692_v9 = vpop.f32.mrb[170].mxu0  ;;  %v12342_v32 = vadd.f32 %v16666_v56, %v15594_v55 }
 0xa0e   : > { %v16693_v52 = vpop.f32.mrb[171].mxu0 }
 0xa0f   : > { %v16694_v13 = vadd.f32 %v16693_v52, %v16692_v9  ;;  %v16667_v58 = vpop.f32.mrb[44].mxu1  ;;  %v12387_v6 = vadd.f32 %v16691_v11, %v12323_v19 }
 0xa10   : > { %v16668_v59 = vpop.f32.mrb[45].mxu1 }
 0xa11   : > { %v16669_v26 = vadd.f32 %v16668_v59, %v16667_v58  ;;  %v16670_v45 = vpop.f32.mrb[46].mxu1  ;;  %v12390_v42 = vadd.f32 %v16694_v13, %v12326_v35 }
 0xa12   : > { %v16671_v37 = vpop.f32.mrb[47].mxu1 }
 0xa13   : > { %v12347_v14 = vadd.f32 %v16669_v26, %v15594_v55  ;;  %v16695_v49 = vpop.f32.mrb[172].mxu0 }
 0xa14   : > { %v16696_v1 = vpop.f32.mrb[173].mxu0 }
 0xa15   : > { %v16697_v46 = vadd.f32 %v16696_v1, %v16695_v49  ;;  %v16698_v39 = vpop.f32.mrb[174].mxu0 }
 0xa16   : > { %v16699_v36 = vpop.f32.mrb[175].mxu0 }
 0xa17   : > { %v16700_v10 = vadd.f32 %v16699_v36, %v16698_v39  ;;  %v12395_v22 = vadd.f32 %v16697_v46, %v12331_v57  ;;  %v17031_v54 = vpop.f32.mrb[48].mxu1 }
 0xa18   : > { %v12450_v27 = vpop.f32.mrb[49].mxu1 }
 0xa19   : > { %v12459_v15 = vadd.f32 %v17031_v54, %v12395_v22  ;;  %v12451_v33 = vadd.f32 %v12450_v27, %v12387_v6  ;;  %v12398_v18 = vadd.f32 %v16700_v10, %v12334_v60  ;;  %v17032_v47 = vpop.f32.mrb[50].mxu1 }
 0xa1a   : > { %v12453_v61 = vpop.f32.mrb[51].mxu1 }
 0xa1b   : > { %v16701_v48 = vpop.f32.mrb[176].mxu0  ;;  %v12462_v23 = vadd.f32 %v17032_v47, %v12398_v18  ;;  %v12454_v21 = vadd.f32 %v12453_v61, %v12390_v42  ;;  %v12482_v41 = vmax.f32 %v12459_v15, 0.0  ;;  %v12480_v12 = vmax.f32 %v12451_v33, 0.0 }
 0xa1c   : > { %v16702_v0 = vpop.f32.mrb[177].mxu0 }
 0xa1d   : > { %v12483_v62 = vmax.f32 %v12462_v23, 0.0  ;;  %v16703_v30 = vadd.f32 %v16702_v0, %v16701_v48  ;;  %v12481_v34 = vmax.f32 %v12454_v21, 0.0  ;;  %v16704_v63 = vpop.f32.mrb[178].mxu0 }
 0xa1e   : > { %v16705_v7 = vpop.f32.mrb[179].mxu0 }
 0xa1f   : > { %v21499_v40 = vpack.c.bf16 %v12483_v62, %v12482_v41  ;;  %v21501_v29 = vpack.c.bf16 %v12481_v34, %v12480_v12  ;;  %v16706_v50 = vadd.f32 %v16705_v7, %v16704_v63  ;;  %v17035_v2 = vpop.f32.mrb[52].mxu1  ;;  %v12403_v4 = vadd.f32 %v16703_v30, %v12339_v16 }
 0xa20   : > { %v12466_v38 = vpop.f32.mrb[53].mxu1 }
 0xa21   : > { %v12467_v31 = vadd.f32 %v12466_v38, %v12403_v4  ;;  %v17036_v5 = vpop.f32.mrb[54].mxu1  ;;  %v12406_v44 = vadd.f32 %v16706_v50, %v12342_v32  ;;  %v12557_v28 = vshrl.u32 %v21499_v40, 16  ;;  %v12492_v56 = vshrl.u32 %v21501_v29, 16 }
 0xa22   : > { %v12469_v53 = vpop.f32.mrb[55].mxu1  ;;  %v12562_v47 = vrot.slane %v21499_v40, 1  ;;  %v12570_v16 = vrot.slane %v21499_v40, 3  ;;  %v12566_v12 = vrot.slane %v21499_v40, 2  ;;  %v12578_v34 = vrot.slane %v21499_v40, 5 }
 0xa23   : > { %v16707_v8 = vpop.f32.mrb[180].mxu0  ;;  %v12470_v17 = vadd.f32 %v12469_v53, %v12406_v44  ;;  %12559 = vrot.lane.b32.xlu0 %v12557_v28, %s17868_s21  ;;  %v12563_v20 = vrot.slane %v12557_v28, 1  ;;  %v12484_v43 = vmax.f32 %v12467_v31, 0.0  ;;  %v12571_v9 = vrot.slane %v12557_v28, 3 }
 0xa24   : > { %v16708_v25 = vpop.f32.mrb[181].mxu0  ;;  %v12567_v35 = vrot.slane %v12557_v28, 2  ;;  %v12579_v58 = vrot.slane %v12557_v28, 5  ;;  %v12575_v59 = vrot.slane %v12557_v28, 4  ;;  %v12587_v26 = vrot.slane %v12557_v28, 7 }
 0xa25   : > { %v12485_v55 = vmax.f32 %v12470_v17, 0.0  ;;  %v16709_v24 = vadd.f32 %v16708_v25, %v16707_v8  ;;  %v16710_v51 = vpop.f32.mrb[182].mxu0  ;;  %12564 = vrot.lane.b32.xlu1 %v12563_v20, %s17868_s21  ;;  %v12583_v45 = vrot.slane %v12557_v28, 6  ;;  %v12498_v42 = vrot.slane %v12492_v56, 1 }
 0xa26   : > { %v16711_v3 = vpop.f32.mrb[183].mxu0  ;;  %v12502_v37 = vrot.slane %v12492_v56, 2  ;;  %v12510_v49 = vrot.slane %v12492_v56, 4  ;;  %v12514_v1 = vrot.slane %v12492_v56, 5  ;;  %v12518_v57 = vrot.slane %v12492_v56, 6 }
 0xa27   : > { %v21507_v19 = vpack.c.bf16 %v12485_v55, %v12484_v43  ;;  %v12411_v11 = vadd.f32 %v16709_v24, %v12347_v14  ;;  %12494 = vrot.lane.b32.xlu0 %v12492_v56, %s17868_s21  ;;  %v12506_v14 = vrot.slane %v12492_v56, 3  ;;  %v12522_v46 = vrot.slane %v12492_v56, 7 }
 0xa28   : > { %v12574_v7 = vrot.slane %v21499_v40, 4  ;;  %v12586_v4 = vrot.slane %v21499_v40, 7  ;;  %v12582_v5 = vrot.slane %v21499_v40, 6  ;;  %v12497_v53 = vrot.slane %v21501_v29, 1 }
 0xa29   : > { %v12475_v52 = vadd.f32 %v17035_v2, %v12411_v11  ;;  %12572 = vrot.lane.b32.xlu1 %v12571_v9, %s17868_s21  ;;  %v12622_v39 = vshrl.u32 %v21507_v19, 16  ;;  %v12501_v20 = vrot.slane %v21501_v29, 2  ;;  %v12505_v55 = vrot.slane %v21501_v29, 3 }
 0xa2a   : > { %v12509_v51 = vrot.slane %v21501_v29, 4  ;;  %v12513_v11 = vrot.slane %v21501_v29, 5 }
 0xa2b   : > { %v12486_v13 = vmax.f32 %v12475_v52, 0.0  ;;  %12568 = vrot.lane.b32.xlu0 %v12567_v35, %s17868_s21  ;;  %v12628_v36 = vrot.slane %v12622_v39, 1  ;;  %v12632_v60 = vrot.slane %v12622_v39, 2  ;;  %v12636_v10 = vrot.slane %v12622_v39, 3 }
 0xa2c   : > { %v12640_v22 = vrot.slane %v12622_v39, 4  ;;  %v12644_v54 = vrot.slane %v12622_v39, 5  ;;  %v12648_v27 = vrot.slane %v12622_v39, 6  ;;  %v12652_v15 = vrot.slane %v12622_v39, 7 }
 0xa2d   : > { %v21512_v6 = vpack.c.bf16 %v12486_v13, %v12486_v13  ;;  %12580 = vrot.lane.b32.xlu1 %v12579_v58, %s17868_s21  ;;  %v12517_v35 = vrot.slane %v21501_v29, 6 }
 0xa2f   : > { %12576 = vrot.lane.b32.xlu0 %v12575_v59, %s17868_s21  ;;  %v12521_v59 = vrot.slane %v21501_v29, 7 }
 0xa31   : > { %12588 = vrot.lane.b32.xlu1 %v12587_v26, %s17868_s21 }
 0xa33   : > { %12584 = vrot.lane.b32.xlu0 %v12583_v45, %s17868_s21 }
 0xa35   : > { %12499 = vrot.lane.b32.xlu1 %v12498_v42, %s17868_s21 }
 0xa37   : > { %12503 = vrot.lane.b32.xlu0 %v12502_v37, %s17868_s21 }
 0xa39   : > { %12507 = vrot.lane.b32.xlu1 %v12506_v14, %s17868_s21  ;;  %v12627_v14 = vrot.slane %v21507_v19, 1 }
 0xa3b   : > { %12511 = vrot.lane.b32.xlu0 %v12510_v49, %s17868_s21 }
 0xa3d   : > { %12515 = vrot.lane.b32.xlu1 %v12514_v1, %s17868_s21 }
 0xa3f   : > { %12519 = vrot.lane.b32.xlu0 %v12518_v57, %s17868_s21  ;;  %v12631_v57 = vrot.slane %v21507_v19, 2 }
 0xa41   : > { %12523 = vrot.lane.b32.xlu1 %v12522_v46, %s17868_s21 }
 0xa43   : > { %12624 = vrot.lane.b32.xlu0 %v12622_v39, %s17868_s21  ;;  %v12635_v39 = vrot.slane %v21507_v19, 3 }
 0xa45   : > { %12629 = vrot.lane.b32.xlu1 %v12628_v36, %s17868_s21 }
 0xa47   : > { %12633 = vrot.lane.b32.xlu0 %v12632_v60, %s17868_s21 }
 0xa49   : > { %12637 = vrot.lane.b32.xlu1 %v12636_v10, %s17868_s21  ;;  %v12639_v10 = vrot.slane %v21507_v19, 4 }
 0xa4b   : > { %12641 = vrot.lane.b32.xlu0 %v12640_v22, %s17868_s21 }
 0xa4d   : > { %12645 = vrot.lane.b32.xlu1 %v12644_v54, %s17868_s21 }
 0xa4f   : > { %12649 = vrot.lane.b32.xlu0 %v12648_v27, %s17868_s21  ;;  %v12643_v27 = vrot.slane %v21507_v19, 5 }
 0xa51   : > { %12653 = vrot.lane.b32.xlu1 %v12652_v15, %s17868_s21 }
 0xa95   : > { %v12560_v33 = vpop.permute.xlu0 %12559 }
 0xa96   : > { %v21536_v18 = vsel %vm12008_vm1, %v21499_v40, %v12560_v33 }
 0xa97   : > { %v12565_v61 = vpop.permute.xlu1 %12564 }
 0xa98   : > { %v21540_v48 = vsel %vm12008_vm1, %v12562_v47, %v12565_v61  ;;  %v12647_v47 = vrot.slane %v21507_v19, 6 }
 0xa99   : > { %v12495_v23 = vpop.permute.xlu0 %12494 }
 0xa9a   : > { %v21544_v21 = vsel %vm12008_vm1, %v21501_v29, %v12495_v23 }
 0xa9b   : > { %v12573_v41 = vpop.permute.xlu1 %12572 }
 0xa9c   : > { %v21548_v0 = vsel %vm12008_vm1, %v12570_v16, %v12573_v41  ;;  %v12651_v16 = vrot.slane %v21507_v19, 7 }
 0xa9d   : > { %v12569_v62 = vpop.permute.xlu0 %12568 }
 0xa9e   : > { %v21552_v30 = vsel %vm12008_vm1, %v12566_v12, %v12569_v62 }
 0xa9f   : > { %v12581_v63 = vpop.permute.xlu1 %12580 }
 0xaa0   : > { %v21556_v32 = vsel %vm12008_vm1, %v12578_v34, %v12581_v63 }
 0xaa1   : > { %v12577_v50 = vpop.permute.xlu0 %12576 }
 0xaa2   : > { %v21560_v2 = vsel %vm12008_vm1, %v12574_v7, %v12577_v50 }
 0xaa3   : > { %v12589_v38 = vpop.permute.xlu1 %12588 }
 0xaa4   : > { %v21564_v31 = vsel %vm12008_vm1, %v12586_v4, %v12589_v38 }
 0xaa5   : > { %v12585_v44 = vpop.permute.xlu0 %12584 }
 0xaa6   : > { %v21568_v28 = vsel %vm12008_vm1, %v12582_v5, %v12585_v44 }
 0xaa7   : > { %v12500_v8 = vpop.permute.xlu1 %12499 }
 0xaa8   : > { %v12530_v17 = vsel %vm12008_vm1, %v12497_v53, %v12500_v8 }
 0xaa9   : > { %v12504_v25 = vpop.permute.xlu0 %12503 }
 0xaaa   : > { %v21574_v43 = vsel %vm12008_vm1, %v12501_v20, %v12504_v25 }
 0xaab   : > { %v12508_v24 = vpop.permute.xlu1 %12507 }
 0xaac   : > { %v21578_v40 = vsel %vm12008_vm1, %v12505_v55, %v12508_v24 }
 0xaad   : > { %v12512_v56 = vpop.permute.xlu0 %12511 }
 0xaae   : > { %v21582_v3 = vsel %vm12008_vm1, %v12509_v51, %v12512_v56 }
 0xaaf   : > { %v12516_v9 = vpop.permute.xlu1 %12515 }
 0xab0   : > { %v21586_v52 = vsel %vm12008_vm1, %v12513_v11, %v12516_v9 }
 0xab1   : > { %v12520_v13 = vpop.permute.xlu0 %12519 }
 0xab2   : > { %v21590_v58 = vsel %vm12008_vm1, %v12517_v35, %v12520_v13 }
 0xab3   : > { %v12524_v26 = vpop.permute.xlu1 %12523 }
 0xab4   : > { %v21594_v45 = vsel %vm12008_vm1, %v12521_v59, %v12524_v26 }
 0xab5   : > { %v12625_v42 = vpop.permute.xlu0 %12624 }
 0xab6   : > { %v21598_v37 = vsel %vm12008_vm1, %v21507_v19, %v12625_v42 }
 0xab7   : > { %v12630_v49 = vpop.permute.xlu1 %12629 }
 0xab8   : > { %v21602_v1 = vsel %vm12008_vm1, %v12627_v14, %v12630_v49 }
 0xab9   : > { %v12634_v46 = vpop.permute.xlu0 %12633 }
 0xaba   : > { %v21606_v29 = vsel %vm12008_vm1, %v12631_v57, %v12634_v46 }
 0xabb   : > { %v12638_v36 = vpop.permute.xlu1 %12637 }
 0xabc   : > { %v21610_v60 = vsel %vm12008_vm1, %v12635_v39, %v12638_v36 }
 0xabd   : > { %v12642_v22 = vpop.permute.xlu0 %12641 }
 0xabe   : > { %v21614_v54 = vsel %vm12008_vm1, %v12639_v10, %v12642_v22 }
 0xabf   : > { %v12646_v15 = vpop.permute.xlu1 %12645 }
 0xac0   : > { %v21618_v33 = vsel %vm12008_vm1, %v12643_v27, %v12646_v15 }
 0xac1   : > { %v12650_v61 = vpop.permute.xlu0 %12649 }
 0xac2   : > { %v21622_v23 = vsel %vm12008_vm1, %v12647_v47, %v12650_v61 }
 0xac3   : > { %v12654_v41 = vpop.permute.xlu1 %12653 }
 0xac4   : > { %v21626_v12 = vsel %vm12008_vm1, %v12651_v16, %v12654_v41 }
 0xac5   : > { %17830 = dma.done.wait [#allocation3], 100352 }
 0xac6   : > { %17831 = vsyncadd [#allocation3], 4294866944  ;;  %13531 = vmatprep.mubr.bf16.mxu0 %v12530_v17  ;;  %14064 = vmatprep.mubr.bf16.mxu1 %v12530_v17  ;;  %v12691_v62 = vld [vmem:[#allocation2 + $0x8] sm:$0xff]  ;;  %v12693_v34 = vld [vmem:[#allocation2 + $0x18] sm:$0xff]  ;;  %s14924_s14 = sshll.u32 %s17988_s22, 4  ;;  %s21785_s15 = scalar_lea.hbm %s21841_s11, %s17977_s30  ;;  %s21787_s14 = int_to_ptr.vmem [resolvable:$true] %s14924_s14 }
 0xac7   : > { %v12690_v63 = vld [vmem:[#allocation2] sm:$0xff]  ;;  %13499 = vmatprep.subr.bf16.mxu0 %v12691_v62  ;;  %14032 = vmatprep.subr.bf16.mxu1 %v12693_v34  ;;  %v12692_v7 = vld [vmem:[#allocation2 + $0x10] sm:$0xff]  ;;  %v12695_v50 = vld [vmem:[#allocation2 + $0x28] sm:$0xff]  ;;  %s21859_s21 = sand.u32 1, %s17842_s18   ;;  %s17770_s23 = scalar_lea.vmem %s21787_s14, 16 }
 0xac8   : > { %v12697_v4 = vld [vmem:[#allocation2 + $0x38] sm:$0xff]  ;;  %13500 = vmatpush1.bf16.msra.mxu0 %v12690_v63  ;;  %14033 = vmatpush1.bf16.msra.mxu1 %v12692_v7  ;;  %v12694_v19 = vld [vmem:[#allocation2 + $0x20] sm:$0xff]  ;;  %v12696_v38 = vld [vmem:[#allocation2 + $0x30] sm:$0xff]  ;;  %s14912_s19 = scalar_lea.sflag [#allocation5], %s21859_s21  ;;  %p17771_p13 = scmp.ne.s32.totalorder %s21787_s14, %s17770_s23 }
 0xac9   : > { %13501 = vmatprep.subr.bf16.mxu0 %v12695_v50  ;;  %14034 = vmatprep.subr.bf16.mxu1 %v12697_v4  ;;  %v12699_v5 = vld [vmem:[#allocation2 + $0x48] sm:$0xff]  ;;  %v12701_v44 = vld [vmem:[#allocation2 + $0x58] sm:$0xff]  ;;  %v12698_v53 = vld [vmem:[#allocation2 + $0x40] sm:$0xff]  ;;  %s17870_s29 = smov [#allocation4]  }
 0xaca   : > { %v12700_v8 = vld [vmem:[#allocation2 + $0x50] sm:$0xff]  ;;  %v12703_v17 = vld [vmem:[#allocation2 + $0x68] sm:$0xff]  ;;  %v12705_v20 = vld [vmem:[#allocation2 + $0x78] sm:$0xff]  ;;  %p17772_p0 = pnand %p17771_p13, %p17966_p5  ;;  %s17774_s24 = sshll.u32 %s17870_s29, 4  ;;  %s17775_s24 = int_to_ptr.vmem [resolvable:$false] %s17774_s24 }
 0xacb   : > { %v12702_v25 = vld [vmem:[#allocation2 + $0x60] sm:$0xff]  ;;  %v12704_v55 = vld [vmem:[#allocation2 + $0x70] sm:$0xff]  ;;  %v12707_v24 = vld [vmem:[#allocation2 + $0x88] sm:$0xff]  ;;  %s17776_s26 = scalar_lea.vmem %s17775_s24, 32  ;;  %p17777_p2 = scmp.lt.s32.totalorder %s21787_s14, %s17775_s24 }
 0xacc   : > { %13502 = vmatpush1.bf16.msra.mxu0 %v12694_v19  ;;  %14035 = vmatpush1.bf16.msra.mxu1 %v12696_v38  ;;  %v12709_v51 = vld [vmem:[#allocation2 + $0x98] sm:$0xff]  ;;  %v12706_v56 = vld [vmem:[#allocation2 + $0x80] sm:$0xff]  ;;  %v12708_v11 = vld [vmem:[#allocation2 + $0x90] sm:$0xff]  ;;  %p17773_p1 = pneg %p17772_p0  ;;  %p17778_p3 = scmp.lt.s32.totalorder %s17776_s26, %s17770_s23 }
 0xacd   : > { %13503 = vmatprep.subr.bf16.mxu0 %v12699_v5  ;;  %14036 = vmatprep.subr.bf16.mxu1 %v12701_v44  ;;  %v12711_v9 = vld [vmem:[#allocation2 + $0xa8] sm:$0xff]  ;;  %v12713_v35 = vld [vmem:[#allocation2 + $0xb8] sm:$0xff]  ;;  %v12710_v13 = vld [vmem:[#allocation2 + $0xa0] sm:$0xff] }
 0xace   : > { %v12712_v59 = vld [vmem:[#allocation2 + $0xb0] sm:$0xff]  ;;  %v12715_v26 = vld [vmem:[#allocation2 + $0xc8] sm:$0xff]  ;;  %v12717_v42 = vld [vmem:[#allocation2 + $0xd8] sm:$0xff]  ;;  %p17779_p4 = por %p17778_p3, %p17777_p2 }
 0xacf   : > { %v12714_v14 = vld [vmem:[#allocation2 + $0xc0] sm:$0xff]  ;;  %v12716_v49 = vld [vmem:[#allocation2 + $0xd0] sm:$0xff]  ;;  %v12719_v57 = vld [vmem:[#allocation2 + $0xe8] sm:$0xff] }
 0xad0   : > { %13504 = vmatpush1.bf16.msra.mxu0 %v12698_v53  ;;  %14037 = vmatpush1.bf16.msra.mxu1 %v12700_v8  ;;  %v12721_v46 = vld [vmem:[#allocation2 + $0xf8] sm:$0xff]  ;;  %v12718_v39 = vld [vmem:[#allocation2 + $0xe0] sm:$0xff]  ;;  %v12720_v36 = vld [vmem:[#allocation2 + $0xf0] sm:$0xff]  ;;  %p17780_p7 = pnand %p17779_p4, %p17773_p1 }
 0xad1   : > { %13505 = vmatprep.subr.bf16.mxu0 %v12703_v17  ;;  %14038 = vmatprep.subr.bf16.mxu1 %v12705_v20  ;;  %v12723_v10 = vld [vmem:[#allocation2 + $0x108] sm:$0xff]  ;;  %v12725_v22 = vld [vmem:[#allocation2 + $0x118] sm:$0xff]  ;;  %v12722_v27 = vld [vmem:[#allocation2 + $0x100] sm:$0xff] }
 0xad2   : > { %v12724_v15 = vld [vmem:[#allocation2 + $0x110] sm:$0xff]  ;;  %v12727_v47 = vld [vmem:[#allocation2 + $0x128] sm:$0xff]  ;;  %v12729_v61 = vld [vmem:[#allocation2 + $0x138] sm:$0xff] }
 0xad3   : > { %v12726_v16 = vld [vmem:[#allocation2 + $0x120] sm:$0xff]  ;;  %v12728_v41 = vld [vmem:[#allocation2 + $0x130] sm:$0xff]  ;;  %v12731_v62 = vld [vmem:[#allocation2 + $0x148] sm:$0xff] }
 0xad4   : > { %13506 = vmatpush1.bf16.msra.mxu0 %v12702_v25  ;;  %14039 = vmatpush1.bf16.msra.mxu1 %v12704_v55  ;;  %v12733_v34 = vld [vmem:[#allocation2 + $0x158] sm:$0xff]  ;;  %v12730_v63 = vld [vmem:[#allocation2 + $0x140] sm:$0xff]  ;;  %v12732_v7 = vld [vmem:[#allocation2 + $0x150] sm:$0xff] }
 0xad5   : > { %13507 = vmatprep.subr.bf16.mxu0 %v12707_v24  ;;  %14040 = vmatprep.subr.bf16.mxu1 %v12709_v51  ;;  %v12735_v50 = vld [vmem:[#allocation2 + $0x168] sm:$0xff]  ;;  %v12737_v4 = vld [vmem:[#allocation2 + $0x178] sm:$0xff]  ;;  %v12734_v19 = vld [vmem:[#allocation2 + $0x160] sm:$0xff] }
 0xad6   : > { %v12736_v38 = vld [vmem:[#allocation2 + $0x170] sm:$0xff]  ;;  %v12739_v5 = vld [vmem:[#allocation2 + $0x188] sm:$0xff]  ;;  %v12741_v44 = vld [vmem:[#allocation2 + $0x198] sm:$0xff] }
 0xad7   : > { %v12738_v53 = vld [vmem:[#allocation2 + $0x180] sm:$0xff]  ;;  %v12740_v8 = vld [vmem:[#allocation2 + $0x190] sm:$0xff]  ;;  %v12743_v17 = vld [vmem:[#allocation2 + $0x1a8] sm:$0xff] }
 0xad8   : > { %13508 = vmatpush1.bf16.msra.mxu0 %v12706_v56  ;;  %14041 = vmatpush1.bf16.msra.mxu1 %v12708_v11  ;;  %v12745_v20 = vld [vmem:[#allocation2 + $0x1b8] sm:$0xff]  ;;  %v12742_v25 = vld [vmem:[#allocation2 + $0x1a0] sm:$0xff]  ;;  %v12744_v55 = vld [vmem:[#allocation2 + $0x1b0] sm:$0xff] }
 0xad9   : > { %13509 = vmatprep.subr.bf16.mxu0 %v12711_v9  ;;  %14042 = vmatprep.subr.bf16.mxu1 %v12713_v35  ;;  %v12747_v24 = vld [vmem:[#allocation2 + $0x1c8] sm:$0xff]  ;;  %v12749_v51 = vld [vmem:[#allocation2 + $0x1d8] sm:$0xff]  ;;  %v12746_v56 = vld [vmem:[#allocation2 + $0x1c0] sm:$0xff] }
 0xada   : > { %v12748_v11 = vld [vmem:[#allocation2 + $0x1d0] sm:$0xff]  ;;  %v12751_v9 = vld [vmem:[#allocation2 + $0x1e8] sm:$0xff]  ;;  %v12753_v35 = vld [vmem:[#allocation2 + $0x1f8] sm:$0xff] }
 0xadc   : > { %13510 = vmatpush1.bf16.msra.mxu0 %v12710_v13  ;;  %14043 = vmatpush1.bf16.msra.mxu1 %v12712_v59  ;;  %v12750_v13 = vld [vmem:[#allocation2 + $0x1e0] sm:$0xff]  ;;  %v12752_v59 = vld [vmem:[#allocation2 + $0x1f0] sm:$0xff] }
 0xadd   : > { %13511 = vmatprep.subr.bf16.mxu0 %v12715_v26  ;;  %14044 = vmatprep.subr.bf16.mxu1 %v12717_v42  ;;  %v12755_v26 = vld [vmem:[#allocation2 + $0x208] sm:$0xff]  ;;  %v12757_v42 = vld [vmem:[#allocation2 + $0x218] sm:$0xff] }
 0xae0   : > { %13512 = vmatpush1.bf16.msra.mxu0 %v12714_v14  ;;  %14045 = vmatpush1.bf16.msra.mxu1 %v12716_v49  ;;  %v12754_v14 = vld [vmem:[#allocation2 + $0x200] sm:$0xff]  ;;  %v12756_v49 = vld [vmem:[#allocation2 + $0x210] sm:$0xff] }
 0xae1   : > { %13513 = vmatprep.subr.bf16.mxu0 %v12719_v57  ;;  %14046 = vmatprep.subr.bf16.mxu1 %v12721_v46  ;;  %v12759_v57 = vld [vmem:[#allocation2 + $0x228] sm:$0xff]  ;;  %v12761_v46 = vld [vmem:[#allocation2 + $0x238] sm:$0xff] }
 0xae4   : > { %13514 = vmatpush1.bf16.msra.mxu0 %v12718_v39  ;;  %14047 = vmatpush1.bf16.msra.mxu1 %v12720_v36  ;;  %v12758_v39 = vld [vmem:[#allocation2 + $0x220] sm:$0xff]  ;;  %v12760_v36 = vld [vmem:[#allocation2 + $0x230] sm:$0xff] }
 0xae5   : > { %13515 = vmatprep.subr.bf16.mxu0 %v12723_v10  ;;  %14048 = vmatprep.subr.bf16.mxu1 %v12725_v22  ;;  %v12763_v10 = vld [vmem:[#allocation2 + $0x248] sm:$0xff]  ;;  %v12765_v22 = vld [vmem:[#allocation2 + $0x258] sm:$0xff] }
 0xae8   : > { %13516 = vmatpush1.bf16.msra.mxu0 %v12722_v27  ;;  %14049 = vmatpush1.bf16.msra.mxu1 %v12724_v15  ;;  %v12762_v27 = vld [vmem:[#allocation2 + $0x240] sm:$0xff]  ;;  %v12764_v15 = vld [vmem:[#allocation2 + $0x250] sm:$0xff] }
 0xae9   : > { %13517 = vmatprep.subr.bf16.mxu0 %v12727_v47  ;;  %14050 = vmatprep.subr.bf16.mxu1 %v12729_v61  ;;  %v12767_v47 = vld [vmem:[#allocation2 + $0x268] sm:$0xff]  ;;  %v12766_v61 = vld [vmem:[#allocation2 + $0x260] sm:$0xff] }
 0xaec   : > { %13518 = vmatpush1.bf16.msra.mxu0 %v12726_v16  ;;  %14051 = vmatpush1.bf16.msra.mxu1 %v12728_v41  ;;  %v12768_v16 = vld [vmem:[#allocation2 + $0x270] sm:$0xff]  ;;  %v12771_v41 = vld [vmem:[#allocation2 + $0x288] sm:$0xff] }
 0xaed   : > { %13519 = vmatprep.subr.bf16.mxu0 %v12731_v62  ;;  %14052 = vmatprep.subr.bf16.mxu1 %v12733_v34  ;;  %v12773_v62 = vld [vmem:[#allocation2 + $0x298] sm:$0xff]  ;;  %v12770_v34 = vld [vmem:[#allocation2 + $0x280] sm:$0xff] }
 0xaf0   : > { %13520 = vmatpush1.bf16.msra.mxu0 %v12730_v63  ;;  %14053 = vmatpush1.bf16.msra.mxu1 %v12732_v7  ;;  %v12775_v63 = vld [vmem:[#allocation2 + $0x2a8] sm:$0xff]  ;;  %v12777_v7 = vld [vmem:[#allocation2 + $0x2b8] sm:$0xff] }
 0xaf1   : > { %13521 = vmatprep.subr.bf16.mxu0 %v12735_v50  ;;  %14054 = vmatprep.subr.bf16.mxu1 %v12737_v4  ;;  %v12774_v50 = vld [vmem:[#allocation2 + $0x2a0] sm:$0xff]  ;;  %v12776_v4 = vld [vmem:[#allocation2 + $0x2b0] sm:$0xff] }
 0xaf4   : > { %13522 = vmatpush1.bf16.msra.mxu0 %v12734_v19  ;;  %14055 = vmatpush1.bf16.msra.mxu1 %v12736_v38  ;;  %v12779_v19 = vld [vmem:[#allocation2 + $0x2c8] sm:$0xff]  ;;  %v12781_v38 = vld [vmem:[#allocation2 + $0x2d8] sm:$0xff] }
 0xaf5   : > { %13523 = vmatprep.subr.bf16.mxu0 %v12739_v5  ;;  %14056 = vmatprep.subr.bf16.mxu1 %v12741_v44  ;;  %v12778_v5 = vld [vmem:[#allocation2 + $0x2c0] sm:$0xff]  ;;  %v12780_v44 = vld [vmem:[#allocation2 + $0x2d0] sm:$0xff] }
 0xaf8   : > { %13524 = vmatpush1.bf16.msra.mxu0 %v12738_v53  ;;  %14057 = vmatpush1.bf16.msra.mxu1 %v12740_v8  ;;  %v12783_v53 = vld [vmem:[#allocation2 + $0x2e8] sm:$0xff]  ;;  %v12785_v8 = vld [vmem:[#allocation2 + $0x2f8] sm:$0xff] }
 0xaf9   : > { %13525 = vmatprep.subr.bf16.mxu0 %v12743_v17  ;;  %14058 = vmatprep.subr.bf16.mxu1 %v12745_v20  ;;  %v12782_v17 = vld [vmem:[#allocation2 + $0x2e0] sm:$0xff]  ;;  %v12784_v20 = vld [vmem:[#allocation2 + $0x2f0] sm:$0xff] }
 0xafc   : > { %13526 = vmatpush1.bf16.msra.mxu0 %v12742_v25  ;;  %14059 = vmatpush1.bf16.msra.mxu1 %v12744_v55  ;;  %v12787_v25 = vld [vmem:[#allocation2 + $0x308] sm:$0xff]  ;;  %v12789_v55 = vld [vmem:[#allocation2 + $0x318] sm:$0xff] }
 0xafd   : > { %13527 = vmatprep.subr.bf16.mxu0 %v12747_v24  ;;  %14060 = vmatprep.subr.bf16.mxu1 %v12749_v51  ;;  %v12786_v24 = vld [vmem:[#allocation2 + $0x300] sm:$0xff]  ;;  %v12788_v51 = vld [vmem:[#allocation2 + $0x310] sm:$0xff] }
 0xb00   : > { %13528 = vmatpush1.bf16.msra.mxu0 %v12746_v56  ;;  %14061 = vmatpush1.bf16.msra.mxu1 %v12748_v11  ;;  %v12791_v56 = vld [vmem:[#allocation2 + $0x328] sm:$0xff]  ;;  %v12793_v11 = vld [vmem:[#allocation2 + $0x338] sm:$0xff] }
 0xb01   : > { %13529 = vmatprep.subr.bf16.mxu0 %v12751_v9  ;;  %14062 = vmatprep.subr.bf16.mxu1 %v12753_v35  ;;  %v12790_v9 = vld [vmem:[#allocation2 + $0x320] sm:$0xff]  ;;  %v12792_v35 = vld [vmem:[#allocation2 + $0x330] sm:$0xff] }
 0xb04   : > { %13530 = vmatpush1.bf16.msra.mxu0 %v12750_v13  ;;  %14063 = vmatpush1.bf16.msra.mxu1 %v12752_v59  ;;  %v12795_v13 = vld [vmem:[#allocation2 + $0x348] sm:$0xff]  ;;  %v12797_v59 = vld [vmem:[#allocation2 + $0x358] sm:$0xff] }
 0xb05   : > { %13540 = vmatprep.subr.bf16.mxu0 %v12755_v26  ;;  %14073 = vmatprep.subr.bf16.mxu1 %v12757_v42  ;;  %v12794_v26 = vld [vmem:[#allocation2 + $0x340] sm:$0xff]  ;;  %v12796_v42 = vld [vmem:[#allocation2 + $0x350] sm:$0xff] }
 0xb07   : > { %13532 = vmatmul.mubr.bf16.vlgmr.msra.gmra.mrb[184].mxu0 %v21544_v21  ;;  %14065 = vmatmul.mubr.bf16.vlgmr.msra.gmra.mrb[56].mxu1 %v21544_v21  ;;  %v12769_v21 = vld [vmem:[#allocation2 + $0x278] sm:$0xff] }
 0xb08   : > { %13541 = vmatpush1.bf16.msra.mxu0 %v12754_v14  ;;  %14074 = vmatpush1.bf16.msra.mxu1 %v12756_v49  ;;  %v12799_v14 = vld [vmem:[#allocation2 + $0x368] sm:$0xff]  ;;  %v12801_v49 = vld [vmem:[#allocation2 + $0x378] sm:$0xff] }
 0xb09   : > { %13542 = vmatprep.subr.bf16.mxu0 %v12759_v57  ;;  %14075 = vmatprep.subr.bf16.mxu1 %v12761_v46  ;;  %v12798_v57 = vld [vmem:[#allocation2 + $0x360] sm:$0xff]  ;;  %v12800_v46 = vld [vmem:[#allocation2 + $0x370] sm:$0xff] }
 0xb0a   : > { %13572 = vmatprep.mubr.bf16.mxu0 %v21578_v40  ;;  %14105 = vmatprep.mubr.bf16.mxu1 %v21578_v40  ;;  %v12772_v40 = vld [vmem:[#allocation2 + $0x290] sm:$0xff] }
 0xb0c   : > { %13543 = vmatpush1.bf16.msra.mxu0 %v12758_v39  ;;  %14076 = vmatpush1.bf16.msra.mxu1 %v12760_v36  ;;  %v12803_v39 = vld [vmem:[#allocation2 + $0x388] sm:$0xff]  ;;  %v12805_v36 = vld [vmem:[#allocation2 + $0x398] sm:$0xff] }
 0xb0d   : > { %13544 = vmatprep.subr.bf16.mxu0 %v12763_v10  ;;  %14077 = vmatprep.subr.bf16.mxu1 %v12765_v22  ;;  %v12802_v10 = vld [vmem:[#allocation2 + $0x380] sm:$0xff]  ;;  %v12804_v22 = vld [vmem:[#allocation2 + $0x390] sm:$0xff] }
 0xb10   : > { %13545 = vmatpush1.bf16.msra.mxu0 %v12762_v27  ;;  %14078 = vmatpush1.bf16.msra.mxu1 %v12764_v15  ;;  %v12807_v27 = vld [vmem:[#allocation2 + $0x3a8] sm:$0xff]  ;;  %v12809_v15 = vld [vmem:[#allocation2 + $0x3b8] sm:$0xff] }
 0xb11   : > { %13546 = vmatprep.subr.bf16.mxu0 %v12767_v47  ;;  %14079 = vmatprep.subr.bf16.mxu1 %v12769_v21  ;;  %v12806_v47 = vld [vmem:[#allocation2 + $0x3a0] sm:$0xff]  ;;  %v12808_v21 = vld [vmem:[#allocation2 + $0x3b0] sm:$0xff] }
 0xb14   : > { %13547 = vmatpush1.bf16.msra.mxu0 %v12766_v61  ;;  %14080 = vmatpush1.bf16.msra.mxu1 %v12768_v16  ;;  %v12811_v61 = vld [vmem:[#allocation2 + $0x3c8] sm:$0xff]  ;;  %v12813_v16 = vld [vmem:[#allocation2 + $0x3d8] sm:$0xff] }
 0xb15   : > { %13548 = vmatprep.subr.bf16.mxu0 %v12771_v41  ;;  %14081 = vmatprep.subr.bf16.mxu1 %v12773_v62  ;;  %v12810_v41 = vld [vmem:[#allocation2 + $0x3c0] sm:$0xff]  ;;  %v12812_v62 = vld [vmem:[#allocation2 + $0x3d0] sm:$0xff] }
 0xb18   : > { %13549 = vmatpush1.bf16.msra.mxu0 %v12770_v34  ;;  %14082 = vmatpush1.bf16.msra.mxu1 %v12772_v40  ;;  %v12815_v34 = vld [vmem:[#allocation2 + $0x3e8] sm:$0xff]  ;;  %v12817_v40 = vld [vmem:[#allocation2 + $0x3f8] sm:$0xff] }
 0xb19   : > { %13550 = vmatprep.subr.bf16.mxu0 %v12775_v63  ;;  %14083 = vmatprep.subr.bf16.mxu1 %v12777_v7  ;;  %v12814_v63 = vld [vmem:[#allocation2 + $0x3e0] sm:$0xff]  ;;  %v12816_v7 = vld [vmem:[#allocation2 + $0x3f0] sm:$0xff] }
 0xb1c   : > { %13551 = vmatpush1.bf16.msra.mxu0 %v12774_v50  ;;  %14084 = vmatpush1.bf16.msra.mxu1 %v12776_v4  ;;  %v12819_v50 = vld [vmem:[#allocation2 + $0x408] sm:$0xff]  ;;  %v12821_v4 = vld [vmem:[#allocation2 + $0x418] sm:$0xff] }
 0xb1d   : > { %13552 = vmatprep.subr.bf16.mxu0 %v12779_v19  ;;  %14085 = vmatprep.subr.bf16.mxu1 %v12781_v38  ;;  %v12818_v19 = vld [vmem:[#allocation2 + $0x400] sm:$0xff]  ;;  %v12820_v38 = vld [vmem:[#allocation2 + $0x410] sm:$0xff] }
 0xb20   : > { %13553 = vmatpush1.bf16.msra.mxu0 %v12778_v5  ;;  %14086 = vmatpush1.bf16.msra.mxu1 %v12780_v44  ;;  %v12823_v5 = vld [vmem:[#allocation2 + $0x428] sm:$0xff]  ;;  %v12825_v44 = vld [vmem:[#allocation2 + $0x438] sm:$0xff] }
 0xb21   : > { %13554 = vmatprep.subr.bf16.mxu0 %v12783_v53  ;;  %14087 = vmatprep.subr.bf16.mxu1 %v12785_v8  ;;  %v12822_v53 = vld [vmem:[#allocation2 + $0x420] sm:$0xff]  ;;  %v12824_v8 = vld [vmem:[#allocation2 + $0x430] sm:$0xff] }
 0xb24   : > { %13555 = vmatpush1.bf16.msra.mxu0 %v12782_v17  ;;  %14088 = vmatpush1.bf16.msra.mxu1 %v12784_v20  ;;  %v12827_v17 = vld [vmem:[#allocation2 + $0x448] sm:$0xff]  ;;  %v12829_v20 = vld [vmem:[#allocation2 + $0x458] sm:$0xff] }
 0xb25   : > { %13556 = vmatprep.subr.bf16.mxu0 %v12787_v25  ;;  %14089 = vmatprep.subr.bf16.mxu1 %v12789_v55  ;;  %v12826_v25 = vld [vmem:[#allocation2 + $0x440] sm:$0xff]  ;;  %v12828_v55 = vld [vmem:[#allocation2 + $0x450] sm:$0xff] }
 0xb28   : > { %13557 = vmatpush1.bf16.msra.mxu0 %v12786_v24  ;;  %14090 = vmatpush1.bf16.msra.mxu1 %v12788_v51  ;;  %v12831_v24 = vld [vmem:[#allocation2 + $0x468] sm:$0xff]  ;;  %v12830_v51 = vld [vmem:[#allocation2 + $0x460] sm:$0xff] }
 0xb29   : > { %13558 = vmatprep.subr.bf16.mxu0 %v12791_v56  ;;  %14091 = vmatprep.subr.bf16.mxu1 %v12793_v11  ;;  %v12832_v56 = vld [vmem:[#allocation2 + $0x470] sm:$0xff]  ;;  %v12835_v11 = vld [vmem:[#allocation2 + $0x488] sm:$0xff] }
 0xb2c   : > { %13559 = vmatpush1.bf16.msra.mxu0 %v12790_v9  ;;  %14092 = vmatpush1.bf16.msra.mxu1 %v12792_v35  ;;  %v12837_v9 = vld [vmem:[#allocation2 + $0x498] sm:$0xff]  ;;  %v12836_v35 = vld [vmem:[#allocation2 + $0x490] sm:$0xff] }
 0xb2d   : > { %13560 = vmatprep.subr.bf16.mxu0 %v12795_v13  ;;  %14093 = vmatprep.subr.bf16.mxu1 %v12797_v59  ;;  %v12839_v13 = vld [vmem:[#allocation2 + $0x4a8] sm:$0xff]  ;;  %v12841_v59 = vld [vmem:[#allocation2 + $0x4b8] sm:$0xff] }
 0xb30   : > { %13561 = vmatpush1.bf16.msra.mxu0 %v12794_v26  ;;  %14094 = vmatpush1.bf16.msra.mxu1 %v12796_v42  ;;  %v12838_v26 = vld [vmem:[#allocation2 + $0x4a0] sm:$0xff]  ;;  %v12840_v42 = vld [vmem:[#allocation2 + $0x4b0] sm:$0xff] }
 0xb31   : > { %13562 = vmatprep.subr.bf16.mxu0 %v12799_v14  ;;  %14095 = vmatprep.subr.bf16.mxu1 %v12801_v49  ;;  %v12843_v14 = vld [vmem:[#allocation2 + $0x4c8] sm:$0xff]  ;;  %v12845_v49 = vld [vmem:[#allocation2 + $0x4d8] sm:$0xff] }
 0xb34   : > { %13563 = vmatpush1.bf16.msra.mxu0 %v12798_v57  ;;  %14096 = vmatpush1.bf16.msra.mxu1 %v12800_v46  ;;  %v12842_v57 = vld [vmem:[#allocation2 + $0x4c0] sm:$0xff]  ;;  %v12844_v46 = vld [vmem:[#allocation2 + $0x4d0] sm:$0xff] }
 0xb35   : > { %13564 = vmatprep.subr.bf16.mxu0 %v12803_v39  ;;  %14097 = vmatprep.subr.bf16.mxu1 %v12805_v36  ;;  %v12847_v39 = vld [vmem:[#allocation2 + $0x4e8] sm:$0xff]  ;;  %v12849_v36 = vld [vmem:[#allocation2 + $0x4f8] sm:$0xff] }
 0xb38   : > { %13565 = vmatpush1.bf16.msra.mxu0 %v12802_v10  ;;  %14098 = vmatpush1.bf16.msra.mxu1 %v12804_v22  ;;  %v12846_v10 = vld [vmem:[#allocation2 + $0x4e0] sm:$0xff]  ;;  %v12848_v22 = vld [vmem:[#allocation2 + $0x4f0] sm:$0xff] }
 0xb39   : > { %13566 = vmatprep.subr.bf16.mxu0 %v12807_v27  ;;  %14099 = vmatprep.subr.bf16.mxu1 %v12809_v15  ;;  %v12851_v27 = vld [vmem:[#allocation2 + $0x508] sm:$0xff]  ;;  %v12853_v15 = vld [vmem:[#allocation2 + $0x518] sm:$0xff] }
 0xb3c   : > { %13567 = vmatpush1.bf16.msra.mxu0 %v12806_v47  ;;  %14100 = vmatpush1.bf16.msra.mxu1 %v12808_v21  ;;  %v12850_v47 = vld [vmem:[#allocation2 + $0x500] sm:$0xff]  ;;  %v12852_v21 = vld [vmem:[#allocation2 + $0x510] sm:$0xff] }
 0xb3d   : > { %13568 = vmatprep.subr.bf16.mxu0 %v12811_v61  ;;  %14101 = vmatprep.subr.bf16.mxu1 %v12813_v16  ;;  %v12855_v61 = vld [vmem:[#allocation2 + $0x528] sm:$0xff]  ;;  %v12857_v16 = vld [vmem:[#allocation2 + $0x538] sm:$0xff] }
 0xb40   : > { %13569 = vmatpush1.bf16.msra.mxu0 %v12810_v41  ;;  %14102 = vmatpush1.bf16.msra.mxu1 %v12812_v62  ;;  %v12854_v41 = vld [vmem:[#allocation2 + $0x520] sm:$0xff]  ;;  %v12856_v62 = vld [vmem:[#allocation2 + $0x530] sm:$0xff] }
 0xb41   : > { %13570 = vmatprep.subr.bf16.mxu0 %v12815_v34  ;;  %14103 = vmatprep.subr.bf16.mxu1 %v12817_v40  ;;  %v12859_v34 = vld [vmem:[#allocation2 + $0x548] sm:$0xff]  ;;  %v12861_v40 = vld [vmem:[#allocation2 + $0x558] sm:$0xff] }
 0xb44   : > { %13571 = vmatpush1.bf16.msra.mxu0 %v12814_v63  ;;  %14104 = vmatpush1.bf16.msra.mxu1 %v12816_v7  ;;  %v12858_v63 = vld [vmem:[#allocation2 + $0x540] sm:$0xff]  ;;  %v12860_v7 = vld [vmem:[#allocation2 + $0x550] sm:$0xff] }
 0xb45   : > { %13581 = vmatprep.subr.bf16.mxu0 %v12819_v50  ;;  %14114 = vmatprep.subr.bf16.mxu1 %v12821_v4  ;;  %v12863_v50 = vld [vmem:[#allocation2 + $0x568] sm:$0xff]  ;;  %v12865_v4 = vld [vmem:[#allocation2 + $0x578] sm:$0xff] }
 0xb47   : > { %13573 = vmatmul.mubr.bf16.vlgmr.msra.gmra.mrb[184].mxu0 %v21574_v43  ;;  %14106 = vmatmul.mubr.bf16.vlgmr.msra.gmra.mrb[56].mxu1 %v21574_v43  ;;  %v12833_v43 = vld [vmem:[#allocation2 + $0x478] sm:$0xff] }
 0xb48   : > { %13582 = vmatpush1.bf16.msra.mxu0 %v12818_v19  ;;  %14115 = vmatpush1.bf16.msra.mxu1 %v12820_v38  ;;  %v12862_v19 = vld [vmem:[#allocation2 + $0x560] sm:$0xff]  ;;  %v12864_v38 = vld [vmem:[#allocation2 + $0x570] sm:$0xff] }
 0xb49   : > { %13583 = vmatprep.subr.bf16.mxu0 %v12823_v5  ;;  %14116 = vmatprep.subr.bf16.mxu1 %v12825_v44  ;;  %v12867_v5 = vld [vmem:[#allocation2 + $0x588] sm:$0xff]  ;;  %v12869_v44 = vld [vmem:[#allocation2 + $0x598] sm:$0xff] }
 0xb4a   : > { %13613 = vmatprep.mubr.bf16.mxu0 %v21586_v52  ;;  %14146 = vmatprep.mubr.bf16.mxu1 %v21586_v52  ;;  %v12834_v52 = vld [vmem:[#allocation2 + $0x480] sm:$0xff] }
 0xb4c   : > { %13584 = vmatpush1.bf16.msra.mxu0 %v12822_v53  ;;  %14117 = vmatpush1.bf16.msra.mxu1 %v12824_v8  ;;  %v12866_v53 = vld [vmem:[#allocation2 + $0x580] sm:$0xff]  ;;  %v12868_v8 = vld [vmem:[#allocation2 + $0x590] sm:$0xff] }
 0xb4d   : > { %13585 = vmatprep.subr.bf16.mxu0 %v12827_v17  ;;  %14118 = vmatprep.subr.bf16.mxu1 %v12829_v20  ;;  %v12871_v17 = vld [vmem:[#allocation2 + $0x5a8] sm:$0xff]  ;;  %v12873_v20 = vld [vmem:[#allocation2 + $0x5b8] sm:$0xff] }
 0xb50   : > { %13586 = vmatpush1.bf16.msra.mxu0 %v12826_v25  ;;  %14119 = vmatpush1.bf16.msra.mxu1 %v12828_v55  ;;  %v12870_v25 = vld [vmem:[#allocation2 + $0x5a0] sm:$0xff]  ;;  %v12872_v55 = vld [vmem:[#allocation2 + $0x5b0] sm:$0xff] }
 0xb51   : > { %13587 = vmatprep.subr.bf16.mxu0 %v12831_v24  ;;  %14120 = vmatprep.subr.bf16.mxu1 %v12833_v43  ;;  %v12875_v24 = vld [vmem:[#allocation2 + $0x5c8] sm:$0xff]  ;;  %v12877_v43 = vld [vmem:[#allocation2 + $0x5d8] sm:$0xff] }
 0xb54   : > { %13588 = vmatpush1.bf16.msra.mxu0 %v12830_v51  ;;  %14121 = vmatpush1.bf16.msra.mxu1 %v12832_v56  ;;  %v12874_v51 = vld [vmem:[#allocation2 + $0x5c0] sm:$0xff]  ;;  %v12876_v56 = vld [vmem:[#allocation2 + $0x5d0] sm:$0xff] }
 0xb55   : > { %13589 = vmatprep.subr.bf16.mxu0 %v12835_v11  ;;  %14122 = vmatprep.subr.bf16.mxu1 %v12837_v9  ;;  %v12879_v11 = vld [vmem:[#allocation2 + $0x5e8] sm:$0xff]  ;;  %v12881_v9 = vld [vmem:[#allocation2 + $0x5f8] sm:$0xff] }
 0xb58   : > { %13590 = vmatpush1.bf16.msra.mxu0 %v12834_v52  ;;  %14123 = vmatpush1.bf16.msra.mxu1 %v12836_v35  ;;  %v12878_v52 = vld [vmem:[#allocation2 + $0x5e0] sm:$0xff]  ;;  %v12880_v35 = vld [vmem:[#allocation2 + $0x5f0] sm:$0xff] }
 0xb59   : > { %13591 = vmatprep.subr.bf16.mxu0 %v12839_v13  ;;  %14124 = vmatprep.subr.bf16.mxu1 %v12841_v59  ;;  %v12883_v13 = vld [vmem:[#allocation2 + $0x608] sm:$0xff]  ;;  %v12885_v59 = vld [vmem:[#allocation2 + $0x618] sm:$0xff] }
 0xb5c   : > { %13592 = vmatpush1.bf16.msra.mxu0 %v12838_v26  ;;  %14125 = vmatpush1.bf16.msra.mxu1 %v12840_v42  ;;  %v12882_v26 = vld [vmem:[#allocation2 + $0x600] sm:$0xff]  ;;  %v12884_v42 = vld [vmem:[#allocation2 + $0x610] sm:$0xff] }
 0xb5d   : > { %13593 = vmatprep.subr.bf16.mxu0 %v12843_v14  ;;  %14126 = vmatprep.subr.bf16.mxu1 %v12845_v49  ;;  %v12887_v14 = vld [vmem:[#allocation2 + $0x628] sm:$0xff]  ;;  %v12889_v49 = vld [vmem:[#allocation2 + $0x638] sm:$0xff] }
 0xb60   : > { %13594 = vmatpush1.bf16.msra.mxu0 %v12842_v57  ;;  %14127 = vmatpush1.bf16.msra.mxu1 %v12844_v46  ;;  %v12886_v57 = vld [vmem:[#allocation2 + $0x620] sm:$0xff]  ;;  %v12888_v46 = vld [vmem:[#allocation2 + $0x630] sm:$0xff] }
 0xb61   : > { %13595 = vmatprep.subr.bf16.mxu0 %v12847_v39  ;;  %14128 = vmatprep.subr.bf16.mxu1 %v12849_v36  ;;  %v12891_v39 = vld [vmem:[#allocation2 + $0x648] sm:$0xff]  ;;  %v12893_v36 = vld [vmem:[#allocation2 + $0x658] sm:$0xff] }
 0xb64   : > { %13596 = vmatpush1.bf16.msra.mxu0 %v12846_v10  ;;  %14129 = vmatpush1.bf16.msra.mxu1 %v12848_v22  ;;  %v12890_v10 = vld [vmem:[#allocation2 + $0x640] sm:$0xff]  ;;  %v12892_v22 = vld [vmem:[#allocation2 + $0x650] sm:$0xff] }
 0xb65   : > { %13597 = vmatprep.subr.bf16.mxu0 %v12851_v27  ;;  %14130 = vmatprep.subr.bf16.mxu1 %v12853_v15  ;;  %v12895_v27 = vld [vmem:[#allocation2 + $0x668] sm:$0xff]  ;;  %v12894_v15 = vld [vmem:[#allocation2 + $0x660] sm:$0xff] }
 0xb68   : > { %13598 = vmatpush1.bf16.msra.mxu0 %v12850_v47  ;;  %14131 = vmatpush1.bf16.msra.mxu1 %v12852_v21  ;;  %v12896_v47 = vld [vmem:[#allocation2 + $0x670] sm:$0xff]  ;;  %v12899_v21 = vld [vmem:[#allocation2 + $0x688] sm:$0xff] }
 0xb69   : > { %13599 = vmatprep.subr.bf16.mxu0 %v12855_v61  ;;  %14132 = vmatprep.subr.bf16.mxu1 %v12857_v16  ;;  %v12901_v61 = vld [vmem:[#allocation2 + $0x698] sm:$0xff]  ;;  %v12900_v16 = vld [vmem:[#allocation2 + $0x690] sm:$0xff] }
 0xb6c   : > { %13600 = vmatpush1.bf16.msra.mxu0 %v12854_v41  ;;  %14133 = vmatpush1.bf16.msra.mxu1 %v12856_v62  ;;  %v12903_v41 = vld [vmem:[#allocation2 + $0x6a8] sm:$0xff]  ;;  %v12905_v62 = vld [vmem:[#allocation2 + $0x6b8] sm:$0xff] }
 0xb6d   : > { %13601 = vmatprep.subr.bf16.mxu0 %v12859_v34  ;;  %14134 = vmatprep.subr.bf16.mxu1 %v12861_v40  ;;  %v12902_v34 = vld [vmem:[#allocation2 + $0x6a0] sm:$0xff]  ;;  %v12904_v40 = vld [vmem:[#allocation2 + $0x6b0] sm:$0xff] }
 0xb70   : > { %13602 = vmatpush1.bf16.msra.mxu0 %v12858_v63  ;;  %14135 = vmatpush1.bf16.msra.mxu1 %v12860_v7  ;;  %v12907_v63 = vld [vmem:[#allocation2 + $0x6c8] sm:$0xff]  ;;  %v12909_v7 = vld [vmem:[#allocation2 + $0x6d8] sm:$0xff] }
 0xb71   : > { %13603 = vmatprep.subr.bf16.mxu0 %v12863_v50  ;;  %14136 = vmatprep.subr.bf16.mxu1 %v12865_v4  ;;  %v12906_v50 = vld [vmem:[#allocation2 + $0x6c0] sm:$0xff]  ;;  %v12908_v4 = vld [vmem:[#allocation2 + $0x6d0] sm:$0xff] }
 0xb74   : > { %13604 = vmatpush1.bf16.msra.mxu0 %v12862_v19  ;;  %14137 = vmatpush1.bf16.msra.mxu1 %v12864_v38  ;;  %v12911_v19 = vld [vmem:[#allocation2 + $0x6e8] sm:$0xff]  ;;  %v12913_v38 = vld [vmem:[#allocation2 + $0x6f8] sm:$0xff] }
 0xb75   : > { %13605 = vmatprep.subr.bf16.mxu0 %v12867_v5  ;;  %14138 = vmatprep.subr.bf16.mxu1 %v12869_v44  ;;  %v12910_v5 = vld [vmem:[#allocation2 + $0x6e0] sm:$0xff]  ;;  %v12912_v44 = vld [vmem:[#allocation2 + $0x6f0] sm:$0xff] }
 0xb78   : > { %13606 = vmatpush1.bf16.msra.mxu0 %v12866_v53  ;;  %14139 = vmatpush1.bf16.msra.mxu1 %v12868_v8  ;;  %v12915_v53 = vld [vmem:[#allocation2 + $0x708] sm:$0xff]  ;;  %v12917_v8 = vld [vmem:[#allocation2 + $0x718] sm:$0xff] }
 0xb79   : > { %13607 = vmatprep.subr.bf16.mxu0 %v12871_v17  ;;  %14140 = vmatprep.subr.bf16.mxu1 %v12873_v20  ;;  %v12914_v17 = vld [vmem:[#allocation2 + $0x700] sm:$0xff]  ;;  %v12916_v20 = vld [vmem:[#allocation2 + $0x710] sm:$0xff] }
 0xb7c   : > { %13608 = vmatpush1.bf16.msra.mxu0 %v12870_v25  ;;  %14141 = vmatpush1.bf16.msra.mxu1 %v12872_v55  ;;  %v12919_v25 = vld [vmem:[#allocation2 + $0x728] sm:$0xff]  ;;  %v12921_v55 = vld [vmem:[#allocation2 + $0x738] sm:$0xff] }
 0xb7d   : > { %13609 = vmatprep.subr.bf16.mxu0 %v12875_v24  ;;  %14142 = vmatprep.subr.bf16.mxu1 %v12877_v43  ;;  %v12918_v24 = vld [vmem:[#allocation2 + $0x720] sm:$0xff]  ;;  %v12920_v43 = vld [vmem:[#allocation2 + $0x730] sm:$0xff] }
 0xb80   : > { %13610 = vmatpush1.bf16.msra.mxu0 %v12874_v51  ;;  %14143 = vmatpush1.bf16.msra.mxu1 %v12876_v56  ;;  %v12923_v51 = vld [vmem:[#allocation2 + $0x748] sm:$0xff]  ;;  %v12925_v56 = vld [vmem:[#allocation2 + $0x758] sm:$0xff] }
 0xb81   : > { %13611 = vmatprep.subr.bf16.mxu0 %v12879_v11  ;;  %14144 = vmatprep.subr.bf16.mxu1 %v12881_v9  ;;  %v12922_v11 = vld [vmem:[#allocation2 + $0x740] sm:$0xff]  ;;  %v12924_v9 = vld [vmem:[#allocation2 + $0x750] sm:$0xff] }
 0xb84   : > { %13612 = vmatpush1.bf16.msra.mxu0 %v12878_v52  ;;  %14145 = vmatpush1.bf16.msra.mxu1 %v12880_v35  ;;  %v12927_v52 = vld [vmem:[#allocation2 + $0x768] sm:$0xff]  ;;  %v12929_v35 = vld [vmem:[#allocation2 + $0x778] sm:$0xff] }
 0xb85   : > { %13622 = vmatprep.subr.bf16.mxu0 %v12883_v13  ;;  %14155 = vmatprep.subr.bf16.mxu1 %v12885_v59  ;;  %v12926_v13 = vld [vmem:[#allocation2 + $0x760] sm:$0xff]  ;;  %v12928_v59 = vld [vmem:[#allocation2 + $0x770] sm:$0xff] }
 0xb87   : > { %13614 = vmatmul.mubr.bf16.vlgmr.msra.gmra.mrb[184].mxu0 %v21582_v3  ;;  %14147 = vmatmul.mubr.bf16.vlgmr.msra.gmra.mrb[56].mxu1 %v21582_v3  ;;  %v12897_v3 = vld [vmem:[#allocation2 + $0x678] sm:$0xff] }
 0xb88   : > { %13623 = vmatpush1.bf16.msra.mxu0 %v12882_v26  ;;  %14156 = vmatpush1.bf16.msra.mxu1 %v12884_v42  ;;  %v12931_v26 = vld [vmem:[#allocation2 + $0x788] sm:$0xff]  ;;  %v12933_v42 = vld [vmem:[#allocation2 + $0x798] sm:$0xff] }
 0xb89   : > { %13624 = vmatprep.subr.bf16.mxu0 %v12887_v14  ;;  %14157 = vmatprep.subr.bf16.mxu1 %v12889_v49  ;;  %v12930_v14 = vld [vmem:[#allocation2 + $0x780] sm:$0xff]  ;;  %v12932_v49 = vld [vmem:[#allocation2 + $0x790] sm:$0xff] }
 0xb8a   : > { %13654 = vmatprep.mubr.bf16.mxu0 %v21594_v45  ;;  %14187 = vmatprep.mubr.bf16.mxu1 %v21594_v45  ;;  %v12898_v45 = vld [vmem:[#allocation2 + $0x680] sm:$0xff] }
 0xb8c   : > { %13625 = vmatpush1.bf16.msra.mxu0 %v12886_v57  ;;  %14158 = vmatpush1.bf16.msra.mxu1 %v12888_v46  ;;  %v12935_v57 = vld [vmem:[#allocation2 + $0x7a8] sm:$0xff]  ;;  %v12937_v46 = vld [vmem:[#allocation2 + $0x7b8] sm:$0xff] }
 0xb8d   : > { %13626 = vmatprep.subr.bf16.mxu0 %v12891_v39  ;;  %14159 = vmatprep.subr.bf16.mxu1 %v12893_v36  ;;  %v12934_v39 = vld [vmem:[#allocation2 + $0x7a0] sm:$0xff]  ;;  %v12936_v36 = vld [vmem:[#allocation2 + $0x7b0] sm:$0xff] }
 0xb90   : > { %13627 = vmatpush1.bf16.msra.mxu0 %v12890_v10  ;;  %14160 = vmatpush1.bf16.msra.mxu1 %v12892_v22  ;;  %v12939_v10 = vld [vmem:[#allocation2 + $0x7c8] sm:$0xff]  ;;  %v12941_v22 = vld [vmem:[#allocation2 + $0x7d8] sm:$0xff] }
 0xb91   : > { %13628 = vmatprep.subr.bf16.mxu0 %v12895_v27  ;;  %14161 = vmatprep.subr.bf16.mxu1 %v12897_v3  ;;  %v12938_v27 = vld [vmem:[#allocation2 + $0x7c0] sm:$0xff]  ;;  %v12940_v3 = vld [vmem:[#allocation2 + $0x7d0] sm:$0xff] }
 0xb94   : > { %13629 = vmatpush1.bf16.msra.mxu0 %v12894_v15  ;;  %14162 = vmatpush1.bf16.msra.mxu1 %v12896_v47  ;;  %v12943_v15 = vld [vmem:[#allocation2 + $0x7e8] sm:$0xff]  ;;  %v12945_v47 = vld [vmem:[#allocation2 + $0x7f8] sm:$0xff] }
 0xb95   : > { %13630 = vmatprep.subr.bf16.mxu0 %v12899_v21  ;;  %14163 = vmatprep.subr.bf16.mxu1 %v12901_v61  ;;  %v12942_v21 = vld [vmem:[#allocation2 + $0x7e0] sm:$0xff]  ;;  %v12944_v61 = vld [vmem:[#allocation2 + $0x7f0] sm:$0xff] }
 0xb98   : > { %13631 = vmatpush1.bf16.msra.mxu0 %v12898_v45  ;;  %14164 = vmatpush1.bf16.msra.mxu1 %v12900_v16  ;;  %v12947_v45 = vld [vmem:[#allocation2 + $0x808] sm:$0xff]  ;;  %v12949_v16 = vld [vmem:[#allocation2 + $0x818] sm:$0xff] }
 0xb99   : > { %13632 = vmatprep.subr.bf16.mxu0 %v12903_v41  ;;  %14165 = vmatprep.subr.bf16.mxu1 %v12905_v62  ;;  %v12946_v41 = vld [vmem:[#allocation2 + $0x800] sm:$0xff]  ;;  %v12948_v62 = vld [vmem:[#allocation2 + $0x810] sm:$0xff] }
 0xb9c   : > { %13633 = vmatpush1.bf16.msra.mxu0 %v12902_v34  ;;  %14166 = vmatpush1.bf16.msra.mxu1 %v12904_v40  ;;  %v12951_v34 = vld [vmem:[#allocation2 + $0x828] sm:$0xff]  ;;  %v12953_v40 = vld [vmem:[#allocation2 + $0x838] sm:$0xff] }
 0xb9d   : > { %13634 = vmatprep.subr.bf16.mxu0 %v12907_v63  ;;  %14167 = vmatprep.subr.bf16.mxu1 %v12909_v7  ;;  %v12950_v63 = vld [vmem:[#allocation2 + $0x820] sm:$0xff]  ;;  %v12952_v7 = vld [vmem:[#allocation2 + $0x830] sm:$0xff] }
 0xba0   : > { %13635 = vmatpush1.bf16.msra.mxu0 %v12906_v50  ;;  %14168 = vmatpush1.bf16.msra.mxu1 %v12908_v4  ;;  %v12955_v50 = vld [vmem:[#allocation2 + $0x848] sm:$0xff]  ;;  %v12957_v4 = vld [vmem:[#allocation2 + $0x858] sm:$0xff] }
 0xba1   : > { %13636 = vmatprep.subr.bf16.mxu0 %v12911_v19  ;;  %14169 = vmatprep.subr.bf16.mxu1 %v12913_v38  ;;  %v12954_v19 = vld [vmem:[#allocation2 + $0x840] sm:$0xff]  ;;  %v12956_v38 = vld [vmem:[#allocation2 + $0x850] sm:$0xff] }
 0xba4   : > { %13637 = vmatpush1.bf16.msra.mxu0 %v12910_v5  ;;  %14170 = vmatpush1.bf16.msra.mxu1 %v12912_v44  ;;  %v12959_v5 = vld [vmem:[#allocation2 + $0x868] sm:$0xff]  ;;  %v12958_v44 = vld [vmem:[#allocation2 + $0x860] sm:$0xff] }
 0xba5   : > { %13638 = vmatprep.subr.bf16.mxu0 %v12915_v53  ;;  %14171 = vmatprep.subr.bf16.mxu1 %v12917_v8  ;;  %v12960_v53 = vld [vmem:[#allocation2 + $0x870] sm:$0xff]  ;;  %v12963_v8 = vld [vmem:[#allocation2 + $0x888] sm:$0xff] }
 0xba8   : > { %13639 = vmatpush1.bf16.msra.mxu0 %v12914_v17  ;;  %14172 = vmatpush1.bf16.msra.mxu1 %v12916_v20  ;;  %v12965_v17 = vld [vmem:[#allocation2 + $0x898] sm:$0xff]  ;;  %v12964_v20 = vld [vmem:[#allocation2 + $0x890] sm:$0xff] }
 0xba9   : > { %13640 = vmatprep.subr.bf16.mxu0 %v12919_v25  ;;  %14173 = vmatprep.subr.bf16.mxu1 %v12921_v55  ;;  %v12967_v25 = vld [vmem:[#allocation2 + $0x8a8] sm:$0xff]  ;;  %v12969_v55 = vld [vmem:[#allocation2 + $0x8b8] sm:$0xff] }
 0xbac   : > { %13641 = vmatpush1.bf16.msra.mxu0 %v12918_v24  ;;  %14174 = vmatpush1.bf16.msra.mxu1 %v12920_v43  ;;  %v12966_v24 = vld [vmem:[#allocation2 + $0x8a0] sm:$0xff]  ;;  %v12968_v43 = vld [vmem:[#allocation2 + $0x8b0] sm:$0xff] }
 0xbad   : > { %13642 = vmatprep.subr.bf16.mxu0 %v12923_v51  ;;  %14175 = vmatprep.subr.bf16.mxu1 %v12925_v56  ;;  %v12971_v51 = vld [vmem:[#allocation2 + $0x8c8] sm:$0xff]  ;;  %v12973_v56 = vld [vmem:[#allocation2 + $0x8d8] sm:$0xff] }
 0xbb0   : > { %13643 = vmatpush1.bf16.msra.mxu0 %v12922_v11  ;;  %14176 = vmatpush1.bf16.msra.mxu1 %v12924_v9  ;;  %v12970_v11 = vld [vmem:[#allocation2 + $0x8c0] sm:$0xff]  ;;  %v12972_v9 = vld [vmem:[#allocation2 + $0x8d0] sm:$0xff] }
 0xbb1   : > { %13644 = vmatprep.subr.bf16.mxu0 %v12927_v52  ;;  %14177 = vmatprep.subr.bf16.mxu1 %v12929_v35  ;;  %v12975_v52 = vld [vmem:[#allocation2 + $0x8e8] sm:$0xff]  ;;  %v12977_v35 = vld [vmem:[#allocation2 + $0x8f8] sm:$0xff] }
 0xbb4   : > { %13645 = vmatpush1.bf16.msra.mxu0 %v12926_v13  ;;  %14178 = vmatpush1.bf16.msra.mxu1 %v12928_v59  ;;  %v12974_v13 = vld [vmem:[#allocation2 + $0x8e0] sm:$0xff]  ;;  %v12976_v59 = vld [vmem:[#allocation2 + $0x8f0] sm:$0xff] }
 0xbb5   : > { %13646 = vmatprep.subr.bf16.mxu0 %v12931_v26  ;;  %14179 = vmatprep.subr.bf16.mxu1 %v12933_v42  ;;  %v12979_v26 = vld [vmem:[#allocation2 + $0x908] sm:$0xff]  ;;  %v12981_v42 = vld [vmem:[#allocation2 + $0x918] sm:$0xff] }
 0xbb8   : > { %13647 = vmatpush1.bf16.msra.mxu0 %v12930_v14  ;;  %14180 = vmatpush1.bf16.msra.mxu1 %v12932_v49  ;;  %v12978_v14 = vld [vmem:[#allocation2 + $0x900] sm:$0xff]  ;;  %v12980_v49 = vld [vmem:[#allocation2 + $0x910] sm:$0xff] }
 0xbb9   : > { %13648 = vmatprep.subr.bf16.mxu0 %v12935_v57  ;;  %14181 = vmatprep.subr.bf16.mxu1 %v12937_v46  ;;  %v12983_v57 = vld [vmem:[#allocation2 + $0x928] sm:$0xff]  ;;  %v12985_v46 = vld [vmem:[#allocation2 + $0x938] sm:$0xff] }
 0xbbc   : > { %13649 = vmatpush1.bf16.msra.mxu0 %v12934_v39  ;;  %14182 = vmatpush1.bf16.msra.mxu1 %v12936_v36  ;;  %v12982_v39 = vld [vmem:[#allocation2 + $0x920] sm:$0xff]  ;;  %v12984_v36 = vld [vmem:[#allocation2 + $0x930] sm:$0xff] }
 0xbbd   : > { %13650 = vmatprep.subr.bf16.mxu0 %v12939_v10  ;;  %14183 = vmatprep.subr.bf16.mxu1 %v12941_v22  ;;  %v12987_v10 = vld [vmem:[#allocation2 + $0x948] sm:$0xff]  ;;  %v12989_v22 = vld [vmem:[#allocation2 + $0x958] sm:$0xff] }
 0xbc0   : > { %13651 = vmatpush1.bf16.msra.mxu0 %v12938_v27  ;;  %14184 = vmatpush1.bf16.msra.mxu1 %v12940_v3  ;;  %v12986_v27 = vld [vmem:[#allocation2 + $0x940] sm:$0xff]  ;;  %v12988_v3 = vld [vmem:[#allocation2 + $0x950] sm:$0xff] }
 0xbc1   : > { %13652 = vmatprep.subr.bf16.mxu0 %v12943_v15  ;;  %14185 = vmatprep.subr.bf16.mxu1 %v12945_v47  ;;  %v12991_v15 = vld [vmem:[#allocation2 + $0x968] sm:$0xff]  ;;  %v12993_v47 = vld [vmem:[#allocation2 + $0x978] sm:$0xff] }
 0xbc4   : > { %13653 = vmatpush1.bf16.msra.mxu0 %v12942_v21  ;;  %14186 = vmatpush1.bf16.msra.mxu1 %v12944_v61  ;;  %v12990_v21 = vld [vmem:[#allocation2 + $0x960] sm:$0xff]  ;;  %v12992_v61 = vld [vmem:[#allocation2 + $0x970] sm:$0xff] }
 0xbc5   : > { %13663 = vmatprep.subr.bf16.mxu0 %v12947_v45  ;;  %14196 = vmatprep.subr.bf16.mxu1 %v12949_v16  ;;  %v12995_v45 = vld [vmem:[#allocation2 + $0x988] sm:$0xff]  ;;  %v12997_v16 = vld [vmem:[#allocation2 + $0x998] sm:$0xff] }
 0xbc7   : > { %13655 = vmatmul.mubr.bf16.vlgmr.msra.gmra.mrb[184].mxu0 %v21590_v58  ;;  %14188 = vmatmul.mubr.bf16.vlgmr.msra.gmra.mrb[56].mxu1 %v21590_v58  ;;  %v12961_v58 = vld [vmem:[#allocation2 + $0x878] sm:$0xff] }
 0xbc8   : > { %13664 = vmatpush1.bf16.msra.mxu0 %v12946_v41  ;;  %14197 = vmatpush1.bf16.msra.mxu1 %v12948_v62  ;;  %v12994_v41 = vld [vmem:[#allocation2 + $0x980] sm:$0xff]  ;;  %v12996_v62 = vld [vmem:[#allocation2 + $0x990] sm:$0xff] }
 0xbc9   : > { %13665 = vmatprep.subr.bf16.mxu0 %v12951_v34  ;;  %14198 = vmatprep.subr.bf16.mxu1 %v12953_v40  ;;  %v12999_v34 = vld [vmem:[#allocation2 + $0x9a8] sm:$0xff]  ;;  %v13001_v40 = vld [vmem:[#allocation2 + $0x9b8] sm:$0xff] }
 0xbca   : > { %13695 = vmatprep.mubr.bf16.mxu0 %v21540_v48  ;;  %14228 = vmatprep.mubr.bf16.mxu1 %v21540_v48  ;;  %v12962_v48 = vld [vmem:[#allocation2 + $0x880] sm:$0xff] }
 0xbcc   : > { %13666 = vmatpush1.bf16.msra.mxu0 %v12950_v63  ;;  %14199 = vmatpush1.bf16.msra.mxu1 %v12952_v7  ;;  %v12998_v63 = vld [vmem:[#allocation2 + $0x9a0] sm:$0xff]  ;;  %v13000_v7 = vld [vmem:[#allocation2 + $0x9b0] sm:$0xff] }
 0xbcd   : > { %13667 = vmatprep.subr.bf16.mxu0 %v12955_v50  ;;  %14200 = vmatprep.subr.bf16.mxu1 %v12957_v4  ;;  %v13003_v50 = vld [vmem:[#allocation2 + $0x9c8] sm:$0xff]  ;;  %v13005_v4 = vld [vmem:[#allocation2 + $0x9d8] sm:$0xff] }
 0xbd0   : > { %13668 = vmatpush1.bf16.msra.mxu0 %v12954_v19  ;;  %14201 = vmatpush1.bf16.msra.mxu1 %v12956_v38  ;;  %v13002_v19 = vld [vmem:[#allocation2 + $0x9c0] sm:$0xff]  ;;  %v13004_v38 = vld [vmem:[#allocation2 + $0x9d0] sm:$0xff] }
 0xbd1   : > { %13669 = vmatprep.subr.bf16.mxu0 %v12959_v5  ;;  %14202 = vmatprep.subr.bf16.mxu1 %v12961_v58  ;;  %v13007_v5 = vld [vmem:[#allocation2 + $0x9e8] sm:$0xff]  ;;  %v13009_v58 = vld [vmem:[#allocation2 + $0x9f8] sm:$0xff] }
 0xbd4   : > { %13670 = vmatpush1.bf16.msra.mxu0 %v12958_v44  ;;  %14203 = vmatpush1.bf16.msra.mxu1 %v12960_v53  ;;  %v13006_v44 = vld [vmem:[#allocation2 + $0x9e0] sm:$0xff]  ;;  %v13008_v53 = vld [vmem:[#allocation2 + $0x9f0] sm:$0xff] }
 0xbd5   : > { %13671 = vmatprep.subr.bf16.mxu0 %v12963_v8  ;;  %14204 = vmatprep.subr.bf16.mxu1 %v12965_v17  ;;  %v13011_v8 = vld [vmem:[#allocation2 + $0xa08] sm:$0xff]  ;;  %v13013_v17 = vld [vmem:[#allocation2 + $0xa18] sm:$0xff] }
 0xbd8   : > { %13672 = vmatpush1.bf16.msra.mxu0 %v12962_v48  ;;  %14205 = vmatpush1.bf16.msra.mxu1 %v12964_v20  ;;  %v13010_v48 = vld [vmem:[#allocation2 + $0xa00] sm:$0xff]  ;;  %v13012_v20 = vld [vmem:[#allocation2 + $0xa10] sm:$0xff] }
 0xbd9   : > { %13673 = vmatprep.subr.bf16.mxu0 %v12967_v25  ;;  %14206 = vmatprep.subr.bf16.mxu1 %v12969_v55  ;;  %v13015_v25 = vld [vmem:[#allocation2 + $0xa28] sm:$0xff]  ;;  %v13017_v55 = vld [vmem:[#allocation2 + $0xa38] sm:$0xff] }
 0xbdc   : > { %13674 = vmatpush1.bf16.msra.mxu0 %v12966_v24  ;;  %14207 = vmatpush1.bf16.msra.mxu1 %v12968_v43  ;;  %v13014_v24 = vld [vmem:[#allocation2 + $0xa20] sm:$0xff]  ;;  %v13016_v43 = vld [vmem:[#allocation2 + $0xa30] sm:$0xff] }
 0xbdd   : > { %13675 = vmatprep.subr.bf16.mxu0 %v12971_v51  ;;  %14208 = vmatprep.subr.bf16.mxu1 %v12973_v56  ;;  %v13019_v51 = vld [vmem:[#allocation2 + $0xa48] sm:$0xff]  ;;  %v13021_v56 = vld [vmem:[#allocation2 + $0xa58] sm:$0xff] }
 0xbe0   : > { %13676 = vmatpush1.bf16.msra.mxu0 %v12970_v11  ;;  %14209 = vmatpush1.bf16.msra.mxu1 %v12972_v9  ;;  %v13018_v11 = vld [vmem:[#allocation2 + $0xa40] sm:$0xff]  ;;  %v13020_v9 = vld [vmem:[#allocation2 + $0xa50] sm:$0xff] }
 0xbe1   : > { %13677 = vmatprep.subr.bf16.mxu0 %v12975_v52  ;;  %14210 = vmatprep.subr.bf16.mxu1 %v12977_v35  ;;  %v13023_v52 = vld [vmem:[#allocation2 + $0xa68] sm:$0xff]  ;;  %v13022_v35 = vld [vmem:[#allocation2 + $0xa60] sm:$0xff] }
 0xbe4   : > { %13678 = vmatpush1.bf16.msra.mxu0 %v12974_v13  ;;  %14211 = vmatpush1.bf16.msra.mxu1 %v12976_v59  ;;  %v13024_v13 = vld [vmem:[#allocation2 + $0xa70] sm:$0xff]  ;;  %v13027_v59 = vld [vmem:[#allocation2 + $0xa88] sm:$0xff] }
 0xbe5   : > { %13679 = vmatprep.subr.bf16.mxu0 %v12979_v26  ;;  %14212 = vmatprep.subr.bf16.mxu1 %v12981_v42  ;;  %v13029_v26 = vld [vmem:[#allocation2 + $0xa98] sm:$0xff]  ;;  %v13028_v42 = vld [vmem:[#allocation2 + $0xa90] sm:$0xff] }
 0xbe8   : > { %13680 = vmatpush1.bf16.msra.mxu0 %v12978_v14  ;;  %14213 = vmatpush1.bf16.msra.mxu1 %v12980_v49  ;;  %v13031_v14 = vld [vmem:[#allocation2 + $0xaa8] sm:$0xff]  ;;  %v13033_v49 = vld [vmem:[#allocation2 + $0xab8] sm:$0xff] }
 0xbe9   : > { %13681 = vmatprep.subr.bf16.mxu0 %v12983_v57  ;;  %14214 = vmatprep.subr.bf16.mxu1 %v12985_v46  ;;  %v13030_v57 = vld [vmem:[#allocation2 + $0xaa0] sm:$0xff]  ;;  %v13032_v46 = vld [vmem:[#allocation2 + $0xab0] sm:$0xff] }
 0xbec   : > { %13682 = vmatpush1.bf16.msra.mxu0 %v12982_v39  ;;  %14215 = vmatpush1.bf16.msra.mxu1 %v12984_v36  ;;  %v13035_v39 = vld [vmem:[#allocation2 + $0xac8] sm:$0xff]  ;;  %v13037_v36 = vld [vmem:[#allocation2 + $0xad8] sm:$0xff] }
 0xbed   : > { %13683 = vmatprep.subr.bf16.mxu0 %v12987_v10  ;;  %14216 = vmatprep.subr.bf16.mxu1 %v12989_v22  ;;  %v13034_v10 = vld [vmem:[#allocation2 + $0xac0] sm:$0xff]  ;;  %v13036_v22 = vld [vmem:[#allocation2 + $0xad0] sm:$0xff] }
 0xbf0   : > { %13684 = vmatpush1.bf16.msra.mxu0 %v12986_v27  ;;  %14217 = vmatpush1.bf16.msra.mxu1 %v12988_v3  ;;  %v13039_v27 = vld [vmem:[#allocation2 + $0xae8] sm:$0xff]  ;;  %v13041_v3 = vld [vmem:[#allocation2 + $0xaf8] sm:$0xff] }
 0xbf1   : > { %13685 = vmatprep.subr.bf16.mxu0 %v12991_v15  ;;  %14218 = vmatprep.subr.bf16.mxu1 %v12993_v47  ;;  %v13038_v15 = vld [vmem:[#allocation2 + $0xae0] sm:$0xff]  ;;  %v13040_v47 = vld [vmem:[#allocation2 + $0xaf0] sm:$0xff] }
 0xbf4   : > { %13686 = vmatpush1.bf16.msra.mxu0 %v12990_v21  ;;  %14219 = vmatpush1.bf16.msra.mxu1 %v12992_v61  ;;  %v13043_v21 = vld [vmem:[#allocation2 + $0xb08] sm:$0xff]  ;;  %v13045_v61 = vld [vmem:[#allocation2 + $0xb18] sm:$0xff] }
 0xbf5   : > { %13687 = vmatprep.subr.bf16.mxu0 %v12995_v45  ;;  %14220 = vmatprep.subr.bf16.mxu1 %v12997_v16  ;;  %v13042_v45 = vld [vmem:[#allocation2 + $0xb00] sm:$0xff]  ;;  %v13044_v16 = vld [vmem:[#allocation2 + $0xb10] sm:$0xff] }
 0xbf8   : > { %13688 = vmatpush1.bf16.msra.mxu0 %v12994_v41  ;;  %14221 = vmatpush1.bf16.msra.mxu1 %v12996_v62  ;;  %v13047_v41 = vld [vmem:[#allocation2 + $0xb28] sm:$0xff]  ;;  %v13049_v62 = vld [vmem:[#allocation2 + $0xb38] sm:$0xff] }
 0xbf9   : > { %13689 = vmatprep.subr.bf16.mxu0 %v12999_v34  ;;  %14222 = vmatprep.subr.bf16.mxu1 %v13001_v40  ;;  %v13046_v34 = vld [vmem:[#allocation2 + $0xb20] sm:$0xff]  ;;  %v13048_v40 = vld [vmem:[#allocation2 + $0xb30] sm:$0xff] }
 0xbfc   : > { %13690 = vmatpush1.bf16.msra.mxu0 %v12998_v63  ;;  %14223 = vmatpush1.bf16.msra.mxu1 %v13000_v7  ;;  %v13051_v63 = vld [vmem:[#allocation2 + $0xb48] sm:$0xff]  ;;  %v13053_v7 = vld [vmem:[#allocation2 + $0xb58] sm:$0xff] }
 0xbfd   : > { %13691 = vmatprep.subr.bf16.mxu0 %v13003_v50  ;;  %14224 = vmatprep.subr.bf16.mxu1 %v13005_v4  ;;  %v13050_v50 = vld [vmem:[#allocation2 + $0xb40] sm:$0xff]  ;;  %v13052_v4 = vld [vmem:[#allocation2 + $0xb50] sm:$0xff] }
 0xc00   : > { %13692 = vmatpush1.bf16.msra.mxu0 %v13002_v19  ;;  %14225 = vmatpush1.bf16.msra.mxu1 %v13004_v38  ;;  %v13055_v19 = vld [vmem:[#allocation2 + $0xb68] sm:$0xff]  ;;  %v13057_v38 = vld [vmem:[#allocation2 + $0xb78] sm:$0xff] }
 0xc01   : > { %13693 = vmatprep.subr.bf16.mxu0 %v13007_v5  ;;  %14226 = vmatprep.subr.bf16.mxu1 %v13009_v58  ;;  %v13054_v5 = vld [vmem:[#allocation2 + $0xb60] sm:$0xff]  ;;  %v13056_v58 = vld [vmem:[#allocation2 + $0xb70] sm:$0xff] }
 0xc04   : > { %13694 = vmatpush1.bf16.msra.mxu0 %v13006_v44  ;;  %14227 = vmatpush1.bf16.msra.mxu1 %v13008_v53  ;;  %v13059_v44 = vld [vmem:[#allocation2 + $0xb88] sm:$0xff]  ;;  %v13061_v53 = vld [vmem:[#allocation2 + $0xb98] sm:$0xff] }
 0xc05   : > { %13704 = vmatprep.subr.bf16.mxu0 %v13011_v8  ;;  %14237 = vmatprep.subr.bf16.mxu1 %v13013_v17  ;;  %v13058_v8 = vld [vmem:[#allocation2 + $0xb80] sm:$0xff]  ;;  %v13060_v17 = vld [vmem:[#allocation2 + $0xb90] sm:$0xff] }
 0xc07   : > { %13696 = vmatmul.mubr.bf16.vlgmr.msra.gmra.mrb[184].mxu0 %v21536_v18  ;;  %14229 = vmatmul.mubr.bf16.vlgmr.msra.gmra.mrb[56].mxu1 %v21536_v18  ;;  %v13025_v18 = vld [vmem:[#allocation2 + $0xa78] sm:$0xff] }
 0xc08   : > { %13705 = vmatpush1.bf16.msra.mxu0 %v13010_v48  ;;  %14238 = vmatpush1.bf16.msra.mxu1 %v13012_v20  ;;  %v13063_v48 = vld [vmem:[#allocation2 + $0xba8] sm:$0xff]  ;;  %v13065_v20 = vld [vmem:[#allocation2 + $0xbb8] sm:$0xff] }
 0xc09   : > { %13706 = vmatprep.subr.bf16.mxu0 %v13015_v25  ;;  %14239 = vmatprep.subr.bf16.mxu1 %v13017_v55  ;;  %v13062_v25 = vld [vmem:[#allocation2 + $0xba0] sm:$0xff]  ;;  %v13064_v55 = vld [vmem:[#allocation2 + $0xbb0] sm:$0xff] }
 0xc0a   : > { %13736 = vmatprep.mubr.bf16.mxu0 %v21548_v0  ;;  %14269 = vmatprep.mubr.bf16.mxu1 %v21548_v0  ;;  %v13026_v0 = vld [vmem:[#allocation2 + $0xa80] sm:$0xff] }
 0xc0c   : > { %13707 = vmatpush1.bf16.msra.mxu0 %v13014_v24  ;;  %14240 = vmatpush1.bf16.msra.mxu1 %v13016_v43  ;;  %v13067_v24 = vld [vmem:[#allocation2 + $0xbc8] sm:$0xff]  ;;  %v13069_v43 = vld [vmem:[#allocation2 + $0xbd8] sm:$0xff] }
 0xc0d   : > { %13708 = vmatprep.subr.bf16.mxu0 %v13019_v51  ;;  %14241 = vmatprep.subr.bf16.mxu1 %v13021_v56  ;;  %v13066_v51 = vld [vmem:[#allocation2 + $0xbc0] sm:$0xff]  ;;  %v13068_v56 = vld [vmem:[#allocation2 + $0xbd0] sm:$0xff] }
 0xc10   : > { %13709 = vmatpush1.bf16.msra.mxu0 %v13018_v11  ;;  %14242 = vmatpush1.bf16.msra.mxu1 %v13020_v9  ;;  %v13071_v11 = vld [vmem:[#allocation2 + $0xbe8] sm:$0xff]  ;;  %v13073_v9 = vld [vmem:[#allocation2 + $0xbf8] sm:$0xff] }
 0xc11   : > { %13710 = vmatprep.subr.bf16.mxu0 %v13023_v52  ;;  %14243 = vmatprep.subr.bf16.mxu1 %v13025_v18  ;;  %v13070_v52 = vld [vmem:[#allocation2 + $0xbe0] sm:$0xff]  ;;  %v13072_v18 = vld [vmem:[#allocation2 + $0xbf0] sm:$0xff] }
 0xc14   : > { %13711 = vmatpush1.bf16.msra.mxu0 %v13022_v35  ;;  %14244 = vmatpush1.bf16.msra.mxu1 %v13024_v13  ;;  %v13075_v35 = vld [vmem:[#allocation2 + $0xc08] sm:$0xff]  ;;  %v13077_v13 = vld [vmem:[#allocation2 + $0xc18] sm:$0xff] }
 0xc15   : > { %13712 = vmatprep.subr.bf16.mxu0 %v13027_v59  ;;  %14245 = vmatprep.subr.bf16.mxu1 %v13029_v26  ;;  %v13074_v59 = vld [vmem:[#allocation2 + $0xc00] sm:$0xff]  ;;  %v13076_v26 = vld [vmem:[#allocation2 + $0xc10] sm:$0xff] }
 0xc18   : > { %13713 = vmatpush1.bf16.msra.mxu0 %v13026_v0  ;;  %14246 = vmatpush1.bf16.msra.mxu1 %v13028_v42  ;;  %v13079_v0 = vld [vmem:[#allocation2 + $0xc28] sm:$0xff]  ;;  %v13081_v42 = vld [vmem:[#allocation2 + $0xc38] sm:$0xff] }
 0xc19   : > { %13714 = vmatprep.subr.bf16.mxu0 %v13031_v14  ;;  %14247 = vmatprep.subr.bf16.mxu1 %v13033_v49  ;;  %v13078_v14 = vld [vmem:[#allocation2 + $0xc20] sm:$0xff]  ;;  %v13080_v49 = vld [vmem:[#allocation2 + $0xc30] sm:$0xff] }
 0xc1c   : > { %13715 = vmatpush1.bf16.msra.mxu0 %v13030_v57  ;;  %14248 = vmatpush1.bf16.msra.mxu1 %v13032_v46  ;;  %v13083_v57 = vld [vmem:[#allocation2 + $0xc48] sm:$0xff]  ;;  %v13085_v46 = vld [vmem:[#allocation2 + $0xc58] sm:$0xff] }
 0xc1d   : > { %13716 = vmatprep.subr.bf16.mxu0 %v13035_v39  ;;  %14249 = vmatprep.subr.bf16.mxu1 %v13037_v36  ;;  %v13082_v39 = vld [vmem:[#allocation2 + $0xc40] sm:$0xff]  ;;  %v13084_v36 = vld [vmem:[#allocation2 + $0xc50] sm:$0xff] }
 0xc20   : > { %13717 = vmatpush1.bf16.msra.mxu0 %v13034_v10  ;;  %14250 = vmatpush1.bf16.msra.mxu1 %v13036_v22  ;;  %v13087_v10 = vld [vmem:[#allocation2 + $0xc68] sm:$0xff]  ;;  %v13086_v22 = vld [vmem:[#allocation2 + $0xc60] sm:$0xff] }
 0xc21   : > { %13718 = vmatprep.subr.bf16.mxu0 %v13039_v27  ;;  %14251 = vmatprep.subr.bf16.mxu1 %v13041_v3  ;;  %v13088_v27 = vld [vmem:[#allocation2 + $0xc70] sm:$0xff]  ;;  %v13091_v3 = vld [vmem:[#allocation2 + $0xc88] sm:$0xff] }
 0xc24   : > { %13719 = vmatpush1.bf16.msra.mxu0 %v13038_v15  ;;  %14252 = vmatpush1.bf16.msra.mxu1 %v13040_v47  ;;  %v13093_v15 = vld [vmem:[#allocation2 + $0xc98] sm:$0xff]  ;;  %v13092_v47 = vld [vmem:[#allocation2 + $0xc90] sm:$0xff] }
 0xc25   : > { %13720 = vmatprep.subr.bf16.mxu0 %v13043_v21  ;;  %14253 = vmatprep.subr.bf16.mxu1 %v13045_v61  ;;  %v13095_v21 = vld [vmem:[#allocation2 + $0xca8] sm:$0xff]  ;;  %v13097_v61 = vld [vmem:[#allocation2 + $0xcb8] sm:$0xff] }
 0xc28   : > { %13721 = vmatpush1.bf16.msra.mxu0 %v13042_v45  ;;  %14254 = vmatpush1.bf16.msra.mxu1 %v13044_v16  ;;  %v13094_v45 = vld [vmem:[#allocation2 + $0xca0] sm:$0xff]  ;;  %v13096_v16 = vld [vmem:[#allocation2 + $0xcb0] sm:$0xff] }
 0xc29   : > { %13722 = vmatprep.subr.bf16.mxu0 %v13047_v41  ;;  %14255 = vmatprep.subr.bf16.mxu1 %v13049_v62  ;;  %v13099_v41 = vld [vmem:[#allocation2 + $0xcc8] sm:$0xff]  ;;  %v13101_v62 = vld [vmem:[#allocation2 + $0xcd8] sm:$0xff] }
 0xc2c   : > { %13723 = vmatpush1.bf16.msra.mxu0 %v13046_v34  ;;  %14256 = vmatpush1.bf16.msra.mxu1 %v13048_v40  ;;  %v13098_v34 = vld [vmem:[#allocation2 + $0xcc0] sm:$0xff]  ;;  %v13100_v40 = vld [vmem:[#allocation2 + $0xcd0] sm:$0xff] }
 0xc2d   : > { %13724 = vmatprep.subr.bf16.mxu0 %v13051_v63  ;;  %14257 = vmatprep.subr.bf16.mxu1 %v13053_v7  ;;  %v13103_v63 = vld [vmem:[#allocation2 + $0xce8] sm:$0xff]  ;;  %v13105_v7 = vld [vmem:[#allocation2 + $0xcf8] sm:$0xff] }
 0xc30   : > { %13725 = vmatpush1.bf16.msra.mxu0 %v13050_v50  ;;  %14258 = vmatpush1.bf16.msra.mxu1 %v13052_v4  ;;  %v13102_v50 = vld [vmem:[#allocation2 + $0xce0] sm:$0xff]  ;;  %v13104_v4 = vld [vmem:[#allocation2 + $0xcf0] sm:$0xff] }
 0xc31   : > { %13726 = vmatprep.subr.bf16.mxu0 %v13055_v19  ;;  %14259 = vmatprep.subr.bf16.mxu1 %v13057_v38  ;;  %v13107_v19 = vld [vmem:[#allocation2 + $0xd08] sm:$0xff]  ;;  %v13109_v38 = vld [vmem:[#allocation2 + $0xd18] sm:$0xff] }
 0xc34   : > { %13727 = vmatpush1.bf16.msra.mxu0 %v13054_v5  ;;  %14260 = vmatpush1.bf16.msra.mxu1 %v13056_v58  ;;  %v13106_v5 = vld [vmem:[#allocation2 + $0xd00] sm:$0xff]  ;;  %v13108_v58 = vld [vmem:[#allocation2 + $0xd10] sm:$0xff] }
 0xc35   : > { %13728 = vmatprep.subr.bf16.mxu0 %v13059_v44  ;;  %14261 = vmatprep.subr.bf16.mxu1 %v13061_v53  ;;  %v13111_v44 = vld [vmem:[#allocation2 + $0xd28] sm:$0xff]  ;;  %v13113_v53 = vld [vmem:[#allocation2 + $0xd38] sm:$0xff] }
 0xc38   : > { %13729 = vmatpush1.bf16.msra.mxu0 %v13058_v8  ;;  %14262 = vmatpush1.bf16.msra.mxu1 %v13060_v17  ;;  %v13110_v8 = vld [vmem:[#allocation2 + $0xd20] sm:$0xff]  ;;  %v13112_v17 = vld [vmem:[#allocation2 + $0xd30] sm:$0xff] }
 0xc39   : > { %13730 = vmatprep.subr.bf16.mxu0 %v13063_v48  ;;  %14263 = vmatprep.subr.bf16.mxu1 %v13065_v20  ;;  %v13115_v48 = vld [vmem:[#allocation2 + $0xd48] sm:$0xff]  ;;  %v13117_v20 = vld [vmem:[#allocation2 + $0xd58] sm:$0xff] }
 0xc3c   : > { %13731 = vmatpush1.bf16.msra.mxu0 %v13062_v25  ;;  %14264 = vmatpush1.bf16.msra.mxu1 %v13064_v55  ;;  %v13114_v25 = vld [vmem:[#allocation2 + $0xd40] sm:$0xff]  ;;  %v13116_v55 = vld [vmem:[#allocation2 + $0xd50] sm:$0xff] }
 0xc3d   : > { %13732 = vmatprep.subr.bf16.mxu0 %v13067_v24  ;;  %14265 = vmatprep.subr.bf16.mxu1 %v13069_v43  ;;  %v13119_v24 = vld [vmem:[#allocation2 + $0xd68] sm:$0xff]  ;;  %v13121_v43 = vld [vmem:[#allocation2 + $0xd78] sm:$0xff] }
 0xc40   : > { %13733 = vmatpush1.bf16.msra.mxu0 %v13066_v51  ;;  %14266 = vmatpush1.bf16.msra.mxu1 %v13068_v56  ;;  %v13118_v51 = vld [vmem:[#allocation2 + $0xd60] sm:$0xff]  ;;  %v13120_v56 = vld [vmem:[#allocation2 + $0xd70] sm:$0xff] }
 0xc41   : > { %13734 = vmatprep.subr.bf16.mxu0 %v13071_v11  ;;  %14267 = vmatprep.subr.bf16.mxu1 %v13073_v9  ;;  %v13123_v11 = vld [vmem:[#allocation2 + $0xd88] sm:$0xff]  ;;  %v13125_v9 = vld [vmem:[#allocation2 + $0xd98] sm:$0xff] }
 0xc44   : > { %13735 = vmatpush1.bf16.msra.mxu0 %v13070_v52  ;;  %14268 = vmatpush1.bf16.msra.mxu1 %v13072_v18  ;;  %v13122_v52 = vld [vmem:[#allocation2 + $0xd80] sm:$0xff]  ;;  %v13124_v18 = vld [vmem:[#allocation2 + $0xd90] sm:$0xff] }
 0xc45   : > { %13745 = vmatprep.subr.bf16.mxu0 %v13075_v35  ;;  %14278 = vmatprep.subr.bf16.mxu1 %v13077_v13  ;;  %v13127_v35 = vld [vmem:[#allocation2 + $0xda8] sm:$0xff]  ;;  %v13129_v13 = vld [vmem:[#allocation2 + $0xdb8] sm:$0xff] }
 0xc47   : > { %13737 = vmatmul.mubr.bf16.vlgmr.msra.gmra.mrb[184].mxu0 %v21552_v30  ;;  %14270 = vmatmul.mubr.bf16.vlgmr.msra.gmra.mrb[56].mxu1 %v21552_v30  ;;  %v13089_v30 = vld [vmem:[#allocation2 + $0xc78] sm:$0xff] }
 0xc48   : > { %13746 = vmatpush1.bf16.msra.mxu0 %v13074_v59  ;;  %14279 = vmatpush1.bf16.msra.mxu1 %v13076_v26  ;;  %v13126_v59 = vld [vmem:[#allocation2 + $0xda0] sm:$0xff]  ;;  %v13128_v26 = vld [vmem:[#allocation2 + $0xdb0] sm:$0xff] }
 0xc49   : > { %13747 = vmatprep.subr.bf16.mxu0 %v13079_v0  ;;  %14280 = vmatprep.subr.bf16.mxu1 %v13081_v42  ;;  %v13131_v0 = vld [vmem:[#allocation2 + $0xdc8] sm:$0xff]  ;;  %v13133_v42 = vld [vmem:[#allocation2 + $0xdd8] sm:$0xff] }
 0xc4a   : > { %13777 = vmatprep.mubr.bf16.mxu0 %v21556_v32  ;;  %14310 = vmatprep.mubr.bf16.mxu1 %v21556_v32  ;;  %v13090_v32 = vld [vmem:[#allocation2 + $0xc80] sm:$0xff] }
 0xc4c   : > { %13748 = vmatpush1.bf16.msra.mxu0 %v13078_v14  ;;  %14281 = vmatpush1.bf16.msra.mxu1 %v13080_v49  ;;  %v13130_v14 = vld [vmem:[#allocation2 + $0xdc0] sm:$0xff]  ;;  %v13132_v49 = vld [vmem:[#allocation2 + $0xdd0] sm:$0xff] }
 0xc4d   : > { %13749 = vmatprep.subr.bf16.mxu0 %v13083_v57  ;;  %14282 = vmatprep.subr.bf16.mxu1 %v13085_v46  ;;  %v13135_v57 = vld [vmem:[#allocation2 + $0xde8] sm:$0xff]  ;;  %v13137_v46 = vld [vmem:[#allocation2 + $0xdf8] sm:$0xff] }
 0xc50   : > { %13750 = vmatpush1.bf16.msra.mxu0 %v13082_v39  ;;  %14283 = vmatpush1.bf16.msra.mxu1 %v13084_v36  ;;  %v13134_v39 = vld [vmem:[#allocation2 + $0xde0] sm:$0xff]  ;;  %v13136_v36 = vld [vmem:[#allocation2 + $0xdf0] sm:$0xff] }
 0xc51   : > { %13751 = vmatprep.subr.bf16.mxu0 %v13087_v10  ;;  %14284 = vmatprep.subr.bf16.mxu1 %v13089_v30  ;;  %v13139_v10 = vld [vmem:[#allocation2 + $0xe08] sm:$0xff]  ;;  %v13141_v30 = vld [vmem:[#allocation2 + $0xe18] sm:$0xff] }
 0xc54   : > { %13752 = vmatpush1.bf16.msra.mxu0 %v13086_v22  ;;  %14285 = vmatpush1.bf16.msra.mxu1 %v13088_v27  ;;  %v13138_v22 = vld [vmem:[#allocation2 + $0xe00] sm:$0xff]  ;;  %v13140_v27 = vld [vmem:[#allocation2 + $0xe10] sm:$0xff] }
 0xc55   : > { %13753 = vmatprep.subr.bf16.mxu0 %v13091_v3  ;;  %14286 = vmatprep.subr.bf16.mxu1 %v13093_v15  ;;  %v13143_v3 = vld [vmem:[#allocation2 + $0xe28] sm:$0xff]  ;;  %v13145_v15 = vld [vmem:[#allocation2 + $0xe38] sm:$0xff] }
 0xc58   : > { %13754 = vmatpush1.bf16.msra.mxu0 %v13090_v32  ;;  %14287 = vmatpush1.bf16.msra.mxu1 %v13092_v47  ;;  %v13142_v32 = vld [vmem:[#allocation2 + $0xe20] sm:$0xff]  ;;  %v13144_v47 = vld [vmem:[#allocation2 + $0xe30] sm:$0xff] }
 0xc59   : > { %13755 = vmatprep.subr.bf16.mxu0 %v13095_v21  ;;  %14288 = vmatprep.subr.bf16.mxu1 %v13097_v61  ;;  %v13147_v21 = vld [vmem:[#allocation2 + $0xe48] sm:$0xff]  ;;  %v13149_v61 = vld [vmem:[#allocation2 + $0xe58] sm:$0xff] }
 0xc5c   : > { %13756 = vmatpush1.bf16.msra.mxu0 %v13094_v45  ;;  %14289 = vmatpush1.bf16.msra.mxu1 %v13096_v16  ;;  %v13146_v45 = vld [vmem:[#allocation2 + $0xe40] sm:$0xff]  ;;  %v13148_v16 = vld [vmem:[#allocation2 + $0xe50] sm:$0xff] }
 0xc5d   : > { %13757 = vmatprep.subr.bf16.mxu0 %v13099_v41  ;;  %14290 = vmatprep.subr.bf16.mxu1 %v13101_v62  ;;  %v13151_v41 = vld [vmem:[#allocation2 + $0xe68] sm:$0xff]  ;;  %v13150_v62 = vld [vmem:[#allocation2 + $0xe60] sm:$0xff] }
 0xc60   : > { %13758 = vmatpush1.bf16.msra.mxu0 %v13098_v34  ;;  %14291 = vmatpush1.bf16.msra.mxu1 %v13100_v40  ;;  %v13152_v34 = vld [vmem:[#allocation2 + $0xe70] sm:$0xff]  ;;  %v13155_v40 = vld [vmem:[#allocation2 + $0xe88] sm:$0xff] }
 0xc61   : > { %13759 = vmatprep.subr.bf16.mxu0 %v13103_v63  ;;  %14292 = vmatprep.subr.bf16.mxu1 %v13105_v7  ;;  %v13157_v63 = vld [vmem:[#allocation2 + $0xe98] sm:$0xff]  ;;  %v13156_v7 = vld [vmem:[#allocation2 + $0xe90] sm:$0xff] }
 0xc64   : > { %13760 = vmatpush1.bf16.msra.mxu0 %v13102_v50  ;;  %14293 = vmatpush1.bf16.msra.mxu1 %v13104_v4  ;;  %v13159_v50 = vld [vmem:[#allocation2 + $0xea8] sm:$0xff]  ;;  %v13161_v4 = vld [vmem:[#allocation2 + $0xeb8] sm:$0xff] }
 0xc65   : > { %13761 = vmatprep.subr.bf16.mxu0 %v13107_v19  ;;  %14294 = vmatprep.subr.bf16.mxu1 %v13109_v38  ;;  %v13158_v19 = vld [vmem:[#allocation2 + $0xea0] sm:$0xff]  ;;  %v13160_v38 = vld [vmem:[#allocation2 + $0xeb0] sm:$0xff] }
 0xc68   : > { %13762 = vmatpush1.bf16.msra.mxu0 %v13106_v5  ;;  %14295 = vmatpush1.bf16.msra.mxu1 %v13108_v58  ;;  %v13163_v5 = vld [vmem:[#allocation2 + $0xec8] sm:$0xff]  ;;  %v13165_v58 = vld [vmem:[#allocation2 + $0xed8] sm:$0xff] }
 0xc69   : > { %13763 = vmatprep.subr.bf16.mxu0 %v13111_v44  ;;  %14296 = vmatprep.subr.bf16.mxu1 %v13113_v53  ;;  %v13162_v44 = vld [vmem:[#allocation2 + $0xec0] sm:$0xff]  ;;  %v13164_v53 = vld [vmem:[#allocation2 + $0xed0] sm:$0xff] }
 0xc6c   : > { %13764 = vmatpush1.bf16.msra.mxu0 %v13110_v8  ;;  %14297 = vmatpush1.bf16.msra.mxu1 %v13112_v17  ;;  %v13167_v8 = vld [vmem:[#allocation2 + $0xee8] sm:$0xff]  ;;  %v13169_v17 = vld [vmem:[#allocation2 + $0xef8] sm:$0xff] }
 0xc6d   : > { %13765 = vmatprep.subr.bf16.mxu0 %v13115_v48  ;;  %14298 = vmatprep.subr.bf16.mxu1 %v13117_v20  ;;  %v13166_v48 = vld [vmem:[#allocation2 + $0xee0] sm:$0xff]  ;;  %v13168_v20 = vld [vmem:[#allocation2 + $0xef0] sm:$0xff] }
 0xc70   : > { %13766 = vmatpush1.bf16.msra.mxu0 %v13114_v25  ;;  %14299 = vmatpush1.bf16.msra.mxu1 %v13116_v55  ;;  %v13171_v25 = vld [vmem:[#allocation2 + $0xf08] sm:$0xff]  ;;  %v13173_v55 = vld [vmem:[#allocation2 + $0xf18] sm:$0xff] }
 0xc71   : > { %13767 = vmatprep.subr.bf16.mxu0 %v13119_v24  ;;  %14300 = vmatprep.subr.bf16.mxu1 %v13121_v43  ;;  %v13170_v24 = vld [vmem:[#allocation2 + $0xf00] sm:$0xff]  ;;  %v13172_v43 = vld [vmem:[#allocation2 + $0xf10] sm:$0xff] }
 0xc74   : > { %13768 = vmatpush1.bf16.msra.mxu0 %v13118_v51  ;;  %14301 = vmatpush1.bf16.msra.mxu1 %v13120_v56  ;;  %v13175_v51 = vld [vmem:[#allocation2 + $0xf28] sm:$0xff]  ;;  %v13177_v56 = vld [vmem:[#allocation2 + $0xf38] sm:$0xff] }
 0xc75   : > { %13769 = vmatprep.subr.bf16.mxu0 %v13123_v11  ;;  %14302 = vmatprep.subr.bf16.mxu1 %v13125_v9  ;;  %v13174_v11 = vld [vmem:[#allocation2 + $0xf20] sm:$0xff]  ;;  %v13176_v9 = vld [vmem:[#allocation2 + $0xf30] sm:$0xff] }
 0xc78   : > { %13770 = vmatpush1.bf16.msra.mxu0 %v13122_v52  ;;  %14303 = vmatpush1.bf16.msra.mxu1 %v13124_v18  ;;  %v13179_v52 = vld [vmem:[#allocation2 + $0xf48] sm:$0xff]  ;;  %v13181_v18 = vld [vmem:[#allocation2 + $0xf58] sm:$0xff] }
 0xc79   : > { %13771 = vmatprep.subr.bf16.mxu0 %v13127_v35  ;;  %14304 = vmatprep.subr.bf16.mxu1 %v13129_v13  ;;  %v13178_v35 = vld [vmem:[#allocation2 + $0xf40] sm:$0xff]  ;;  %v13180_v13 = vld [vmem:[#allocation2 + $0xf50] sm:$0xff] }
 0xc7c   : > { %13772 = vmatpush1.bf16.msra.mxu0 %v13126_v59  ;;  %14305 = vmatpush1.bf16.msra.mxu1 %v13128_v26  ;;  %v13183_v59 = vld [vmem:[#allocation2 + $0xf68] sm:$0xff]  ;;  %v13185_v26 = vld [vmem:[#allocation2 + $0xf78] sm:$0xff] }
 0xc7d   : > { %13773 = vmatprep.subr.bf16.mxu0 %v13131_v0  ;;  %14306 = vmatprep.subr.bf16.mxu1 %v13133_v42  ;;  %v13182_v0 = vld [vmem:[#allocation2 + $0xf60] sm:$0xff]  ;;  %v13184_v42 = vld [vmem:[#allocation2 + $0xf70] sm:$0xff] }
 0xc80   : > { %13774 = vmatpush1.bf16.msra.mxu0 %v13130_v14  ;;  %14307 = vmatpush1.bf16.msra.mxu1 %v13132_v49  ;;  %v13187_v14 = vld [vmem:[#allocation2 + $0xf88] sm:$0xff]  ;;  %v13189_v49 = vld [vmem:[#allocation2 + $0xf98] sm:$0xff] }
 0xc81   : > { %13775 = vmatprep.subr.bf16.mxu0 %v13135_v57  ;;  %14308 = vmatprep.subr.bf16.mxu1 %v13137_v46  ;;  %v13186_v57 = vld [vmem:[#allocation2 + $0xf80] sm:$0xff]  ;;  %v13188_v46 = vld [vmem:[#allocation2 + $0xf90] sm:$0xff] }
 0xc84   : > { %13776 = vmatpush1.bf16.msra.mxu0 %v13134_v39  ;;  %14309 = vmatpush1.bf16.msra.mxu1 %v13136_v36  ;;  %v13191_v39 = vld [vmem:[#allocation2 + $0xfa8] sm:$0xff]  ;;  %v13193_v36 = vld [vmem:[#allocation2 + $0xfb8] sm:$0xff] }
 0xc85   : > { %13786 = vmatprep.subr.bf16.mxu0 %v13139_v10  ;;  %14319 = vmatprep.subr.bf16.mxu1 %v13141_v30  ;;  %v13190_v10 = vld [vmem:[#allocation2 + $0xfa0] sm:$0xff]  ;;  %v13192_v30 = vld [vmem:[#allocation2 + $0xfb0] sm:$0xff] }
 0xc87   : > { %13778 = vmatmul.mubr.bf16.vlgmr.msra.gmra.mrb[184].mxu0 %v21560_v2  ;;  %14311 = vmatmul.mubr.bf16.vlgmr.msra.gmra.mrb[56].mxu1 %v21560_v2  ;;  %v13153_v2 = vld [vmem:[#allocation2 + $0xe78] sm:$0xff] }
 0xc88   : > { %13787 = vmatpush1.bf16.msra.mxu0 %v13138_v22  ;;  %14320 = vmatpush1.bf16.msra.mxu1 %v13140_v27  ;;  %v13195_v22 = vld [vmem:[#allocation2 + $0xfc8] sm:$0xff]  ;;  %v13197_v27 = vld [vmem:[#allocation2 + $0xfd8] sm:$0xff] }
 0xc89   : > { %13788 = vmatprep.subr.bf16.mxu0 %v13143_v3  ;;  %14321 = vmatprep.subr.bf16.mxu1 %v13145_v15  ;;  %v13194_v3 = vld [vmem:[#allocation2 + $0xfc0] sm:$0xff]  ;;  %v13196_v15 = vld [vmem:[#allocation2 + $0xfd0] sm:$0xff] }
 0xc8a   : > { %13818 = vmatprep.mubr.bf16.mxu0 %v21564_v31  ;;  %14351 = vmatprep.mubr.bf16.mxu1 %v21564_v31  ;;  %v13154_v31 = vld [vmem:[#allocation2 + $0xe80] sm:$0xff] }
 0xc8c   : > { %13789 = vmatpush1.bf16.msra.mxu0 %v13142_v32  ;;  %14322 = vmatpush1.bf16.msra.mxu1 %v13144_v47  ;;  %v13199_v32 = vld [vmem:[#allocation2 + $0xfe8] sm:$0xff]  ;;  %v13201_v47 = vld [vmem:[#allocation2 + $0xff8] sm:$0xff] }
 0xc8d   : > { %13790 = vmatprep.subr.bf16.mxu0 %v13147_v21  ;;  %14323 = vmatprep.subr.bf16.mxu1 %v13149_v61  ;;  %v13198_v21 = vld [vmem:[#allocation2 + $0xfe0] sm:$0xff]  ;;  %v13200_v61 = vld [vmem:[#allocation2 + $0xff0] sm:$0xff] }
 0xc90   : > { %13791 = vmatpush1.bf16.msra.mxu0 %v13146_v45  ;;  %14324 = vmatpush1.bf16.msra.mxu1 %v13148_v16  ;;  %v13203_v45 = vld [vmem:[#allocation2 + $0x1008] sm:$0xff]  ;;  %v13205_v16 = vld [vmem:[#allocation2 + $0x1018] sm:$0xff] }
 0xc91   : > { %13792 = vmatprep.subr.bf16.mxu0 %v13151_v41  ;;  %14325 = vmatprep.subr.bf16.mxu1 %v13153_v2  ;;  %v13202_v41 = vld [vmem:[#allocation2 + $0x1000] sm:$0xff]  ;;  %v13204_v2 = vld [vmem:[#allocation2 + $0x1010] sm:$0xff] }
 0xc94   : > { %13793 = vmatpush1.bf16.msra.mxu0 %v13150_v62  ;;  %14326 = vmatpush1.bf16.msra.mxu1 %v13152_v34  ;;  %v13207_v62 = vld [vmem:[#allocation2 + $0x1028] sm:$0xff]  ;;  %v13209_v34 = vld [vmem:[#allocation2 + $0x1038] sm:$0xff] }
 0xc95   : > { %13794 = vmatprep.subr.bf16.mxu0 %v13155_v40  ;;  %14327 = vmatprep.subr.bf16.mxu1 %v13157_v63  ;;  %v13206_v40 = vld [vmem:[#allocation2 + $0x1020] sm:$0xff]  ;;  %v13208_v63 = vld [vmem:[#allocation2 + $0x1030] sm:$0xff] }
 0xc98   : > { %13795 = vmatpush1.bf16.msra.mxu0 %v13154_v31  ;;  %14328 = vmatpush1.bf16.msra.mxu1 %v13156_v7  ;;  %v13211_v31 = vld [vmem:[#allocation2 + $0x1048] sm:$0xff]  ;;  %v13213_v7 = vld [vmem:[#allocation2 + $0x1058] sm:$0xff] }
 0xc99   : > { %13796 = vmatprep.subr.bf16.mxu0 %v13159_v50  ;;  %14329 = vmatprep.subr.bf16.mxu1 %v13161_v4  ;;  %v13210_v50 = vld [vmem:[#allocation2 + $0x1040] sm:$0xff]  ;;  %v13212_v4 = vld [vmem:[#allocation2 + $0x1050] sm:$0xff] }
 0xc9c   : > { %13797 = vmatpush1.bf16.msra.mxu0 %v13158_v19  ;;  %14330 = vmatpush1.bf16.msra.mxu1 %v13160_v38  ;;  %v13215_v19 = vld [vmem:[#allocation2 + $0x1068] sm:$0xff]  ;;  %v13214_v38 = vld [vmem:[#allocation2 + $0x1060] sm:$0xff] }
 0xc9d   : > { %13798 = vmatprep.subr.bf16.mxu0 %v13163_v5  ;;  %14331 = vmatprep.subr.bf16.mxu1 %v13165_v58  ;;  %v13216_v5 = vld [vmem:[#allocation2 + $0x1070] sm:$0xff]  ;;  %v13219_v58 = vld [vmem:[#allocation2 + $0x1088] sm:$0xff] }
 0xca0   : > { %13799 = vmatpush1.bf16.msra.mxu0 %v13162_v44  ;;  %14332 = vmatpush1.bf16.msra.mxu1 %v13164_v53  ;;  %v13221_v44 = vld [vmem:[#allocation2 + $0x1098] sm:$0xff]  ;;  %v13220_v53 = vld [vmem:[#allocation2 + $0x1090] sm:$0xff] }
 0xca1   : > { %13800 = vmatprep.subr.bf16.mxu0 %v13167_v8  ;;  %14333 = vmatprep.subr.bf16.mxu1 %v13169_v17  ;;  %v13223_v8 = vld [vmem:[#allocation2 + $0x10a8] sm:$0xff]  ;;  %v13225_v17 = vld [vmem:[#allocation2 + $0x10b8] sm:$0xff] }
 0xca4   : > { %13801 = vmatpush1.bf16.msra.mxu0 %v13166_v48  ;;  %14334 = vmatpush1.bf16.msra.mxu1 %v13168_v20  ;;  %v13222_v48 = vld [vmem:[#allocation2 + $0x10a0] sm:$0xff]  ;;  %v13224_v20 = vld [vmem:[#allocation2 + $0x10b0] sm:$0xff] }
 0xca5   : > { %13802 = vmatprep.subr.bf16.mxu0 %v13171_v25  ;;  %14335 = vmatprep.subr.bf16.mxu1 %v13173_v55  ;;  %v13227_v25 = vld [vmem:[#allocation2 + $0x10c8] sm:$0xff]  ;;  %v13229_v55 = vld [vmem:[#allocation2 + $0x10d8] sm:$0xff] }
 0xca8   : > { %13803 = vmatpush1.bf16.msra.mxu0 %v13170_v24  ;;  %14336 = vmatpush1.bf16.msra.mxu1 %v13172_v43  ;;  %v13226_v24 = vld [vmem:[#allocation2 + $0x10c0] sm:$0xff]  ;;  %v13228_v43 = vld [vmem:[#allocation2 + $0x10d0] sm:$0xff] }
 0xca9   : > { %13804 = vmatprep.subr.bf16.mxu0 %v13175_v51  ;;  %14337 = vmatprep.subr.bf16.mxu1 %v13177_v56  ;;  %v13231_v51 = vld [vmem:[#allocation2 + $0x10e8] sm:$0xff]  ;;  %v13233_v56 = vld [vmem:[#allocation2 + $0x10f8] sm:$0xff] }
 0xcac   : > { %13805 = vmatpush1.bf16.msra.mxu0 %v13174_v11  ;;  %14338 = vmatpush1.bf16.msra.mxu1 %v13176_v9  ;;  %v13230_v11 = vld [vmem:[#allocation2 + $0x10e0] sm:$0xff]  ;;  %v13232_v9 = vld [vmem:[#allocation2 + $0x10f0] sm:$0xff] }
 0xcad   : > { %13806 = vmatprep.subr.bf16.mxu0 %v13179_v52  ;;  %14339 = vmatprep.subr.bf16.mxu1 %v13181_v18  ;;  %v13235_v52 = vld [vmem:[#allocation2 + $0x1108] sm:$0xff]  ;;  %v13237_v18 = vld [vmem:[#allocation2 + $0x1118] sm:$0xff] }
 0xcb0   : > { %13807 = vmatpush1.bf16.msra.mxu0 %v13178_v35  ;;  %14340 = vmatpush1.bf16.msra.mxu1 %v13180_v13  ;;  %v13234_v35 = vld [vmem:[#allocation2 + $0x1100] sm:$0xff]  ;;  %v13236_v13 = vld [vmem:[#allocation2 + $0x1110] sm:$0xff] }
 0xcb1   : > { %13808 = vmatprep.subr.bf16.mxu0 %v13183_v59  ;;  %14341 = vmatprep.subr.bf16.mxu1 %v13185_v26  ;;  %v13239_v59 = vld [vmem:[#allocation2 + $0x1128] sm:$0xff]  ;;  %v13241_v26 = vld [vmem:[#allocation2 + $0x1138] sm:$0xff] }
 0xcb4   : > { %13809 = vmatpush1.bf16.msra.mxu0 %v13182_v0  ;;  %14342 = vmatpush1.bf16.msra.mxu1 %v13184_v42  ;;  %v13238_v0 = vld [vmem:[#allocation2 + $0x1120] sm:$0xff]  ;;  %v13240_v42 = vld [vmem:[#allocation2 + $0x1130] sm:$0xff] }
 0xcb5   : > { %13810 = vmatprep.subr.bf16.mxu0 %v13187_v14  ;;  %14343 = vmatprep.subr.bf16.mxu1 %v13189_v49  ;;  %v13243_v14 = vld [vmem:[#allocation2 + $0x1148] sm:$0xff]  ;;  %v13245_v49 = vld [vmem:[#allocation2 + $0x1158] sm:$0xff] }
 0xcb8   : > { %13811 = vmatpush1.bf16.msra.mxu0 %v13186_v57  ;;  %14344 = vmatpush1.bf16.msra.mxu1 %v13188_v46  ;;  %v13242_v57 = vld [vmem:[#allocation2 + $0x1140] sm:$0xff]  ;;  %v13244_v46 = vld [vmem:[#allocation2 + $0x1150] sm:$0xff] }
 0xcb9   : > { %13812 = vmatprep.subr.bf16.mxu0 %v13191_v39  ;;  %14345 = vmatprep.subr.bf16.mxu1 %v13193_v36  ;;  %v13247_v39 = vld [vmem:[#allocation2 + $0x1168] sm:$0xff]  ;;  %v13249_v36 = vld [vmem:[#allocation2 + $0x1178] sm:$0xff] }
 0xcbc   : > { %13813 = vmatpush1.bf16.msra.mxu0 %v13190_v10  ;;  %14346 = vmatpush1.bf16.msra.mxu1 %v13192_v30  ;;  %v13246_v10 = vld [vmem:[#allocation2 + $0x1160] sm:$0xff]  ;;  %v13248_v30 = vld [vmem:[#allocation2 + $0x1170] sm:$0xff] }
 0xcbd   : > { %13814 = vmatprep.subr.bf16.mxu0 %v13195_v22  ;;  %14347 = vmatprep.subr.bf16.mxu1 %v13197_v27  ;;  %v13251_v22 = vld [vmem:[#allocation2 + $0x1188] sm:$0xff]  ;;  %v13253_v27 = vld [vmem:[#allocation2 + $0x1198] sm:$0xff] }
 0xcc0   : > { %13815 = vmatpush1.bf16.msra.mxu0 %v13194_v3  ;;  %14348 = vmatpush1.bf16.msra.mxu1 %v13196_v15  ;;  %v13250_v3 = vld [vmem:[#allocation2 + $0x1180] sm:$0xff]  ;;  %v13252_v15 = vld [vmem:[#allocation2 + $0x1190] sm:$0xff] }
 0xcc1   : > { %13816 = vmatprep.subr.bf16.mxu0 %v13199_v32  ;;  %14349 = vmatprep.subr.bf16.mxu1 %v13201_v47  ;;  %v13255_v32 = vld [vmem:[#allocation2 + $0x11a8] sm:$0xff]  ;;  %v13257_v47 = vld [vmem:[#allocation2 + $0x11b8] sm:$0xff] }
 0xcc4   : > { %13817 = vmatpush1.bf16.msra.mxu0 %v13198_v21  ;;  %14350 = vmatpush1.bf16.msra.mxu1 %v13200_v61  ;;  %v13254_v21 = vld [vmem:[#allocation2 + $0x11a0] sm:$0xff]  ;;  %v13256_v61 = vld [vmem:[#allocation2 + $0x11b0] sm:$0xff] }
 0xcc5   : > { %13827 = vmatprep.subr.bf16.mxu0 %v13203_v45  ;;  %14360 = vmatprep.subr.bf16.mxu1 %v13205_v16  ;;  %v13259_v45 = vld [vmem:[#allocation2 + $0x11c8] sm:$0xff]  ;;  %v13261_v16 = vld [vmem:[#allocation2 + $0x11d8] sm:$0xff] }
 0xcc7   : > { %13819 = vmatmul.mubr.bf16.vlgmr.msra.gmra.mrb[184].mxu0 %v21568_v28  ;;  %14352 = vmatmul.mubr.bf16.vlgmr.msra.gmra.mrb[56].mxu1 %v21568_v28  ;;  %v13217_v28 = vld [vmem:[#allocation2 + $0x1078] sm:$0xff] }
 0xcc8   : > { %13828 = vmatpush1.bf16.msra.mxu0 %v13202_v41  ;;  %14361 = vmatpush1.bf16.msra.mxu1 %v13204_v2  ;;  %v13258_v41 = vld [vmem:[#allocation2 + $0x11c0] sm:$0xff]  ;;  %v13260_v2 = vld [vmem:[#allocation2 + $0x11d0] sm:$0xff] }
 0xcc9   : > { %13829 = vmatprep.subr.bf16.mxu0 %v13207_v62  ;;  %14362 = vmatprep.subr.bf16.mxu1 %v13209_v34  ;;  %v13263_v62 = vld [vmem:[#allocation2 + $0x11e8] sm:$0xff]  ;;  %v13265_v34 = vld [vmem:[#allocation2 + $0x11f8] sm:$0xff] }
 0xcca   : > { %13859 = vmatprep.mubr.bf16.mxu0 %v21602_v1  ;;  %14392 = vmatprep.mubr.bf16.mxu1 %v21602_v1  ;;  %v13218_v1 = vld [vmem:[#allocation2 + $0x1080] sm:$0xff] }
 0xccc   : > { %13830 = vmatpush1.bf16.msra.mxu0 %v13206_v40  ;;  %14363 = vmatpush1.bf16.msra.mxu1 %v13208_v63  ;;  %v13262_v40 = vld [vmem:[#allocation2 + $0x11e0] sm:$0xff]  ;;  %v13264_v63 = vld [vmem:[#allocation2 + $0x11f0] sm:$0xff] }
 0xccd   : > { %13831 = vmatprep.subr.bf16.mxu0 %v13211_v31  ;;  %14364 = vmatprep.subr.bf16.mxu1 %v13213_v7  ;;  %v13267_v31 = vld [vmem:[#allocation2 + $0x1208] sm:$0xff]  ;;  %v13269_v7 = vld [vmem:[#allocation2 + $0x1218] sm:$0xff] }
 0xcd0   : > { %13832 = vmatpush1.bf16.msra.mxu0 %v13210_v50  ;;  %14365 = vmatpush1.bf16.msra.mxu1 %v13212_v4  ;;  %v13266_v50 = vld [vmem:[#allocation2 + $0x1200] sm:$0xff]  ;;  %v13268_v4 = vld [vmem:[#allocation2 + $0x1210] sm:$0xff] }
 0xcd1   : > { %13833 = vmatprep.subr.bf16.mxu0 %v13215_v19  ;;  %14366 = vmatprep.subr.bf16.mxu1 %v13217_v28  ;;  %v13271_v19 = vld [vmem:[#allocation2 + $0x1228] sm:$0xff]  ;;  %v13273_v28 = vld [vmem:[#allocation2 + $0x1238] sm:$0xff] }
 0xcd4   : > { %13834 = vmatpush1.bf16.msra.mxu0 %v13214_v38  ;;  %14367 = vmatpush1.bf16.msra.mxu1 %v13216_v5  ;;  %v13270_v38 = vld [vmem:[#allocation2 + $0x1220] sm:$0xff]  ;;  %v13272_v5 = vld [vmem:[#allocation2 + $0x1230] sm:$0xff] }
 0xcd5   : > { %13835 = vmatprep.subr.bf16.mxu0 %v13219_v58  ;;  %14368 = vmatprep.subr.bf16.mxu1 %v13221_v44  ;;  %v13275_v58 = vld [vmem:[#allocation2 + $0x1248] sm:$0xff]  ;;  %v13277_v44 = vld [vmem:[#allocation2 + $0x1258] sm:$0xff] }
 0xcd8   : > { %13836 = vmatpush1.bf16.msra.mxu0 %v13218_v1  ;;  %14369 = vmatpush1.bf16.msra.mxu1 %v13220_v53  ;;  %v13274_v1 = vld [vmem:[#allocation2 + $0x1240] sm:$0xff]  ;;  %v13276_v53 = vld [vmem:[#allocation2 + $0x1250] sm:$0xff] }
 0xcd9   : > { %13837 = vmatprep.subr.bf16.mxu0 %v13223_v8  ;;  %14370 = vmatprep.subr.bf16.mxu1 %v13225_v17  ;;  %v13279_v8 = vld [vmem:[#allocation2 + $0x1268] sm:$0xff]  ;;  %v13278_v17 = vld [vmem:[#allocation2 + $0x1260] sm:$0xff] }
 0xcdc   : > { %13838 = vmatpush1.bf16.msra.mxu0 %v13222_v48  ;;  %14371 = vmatpush1.bf16.msra.mxu1 %v13224_v20  ;;  %v13280_v48 = vld [vmem:[#allocation2 + $0x1270] sm:$0xff]  ;;  %v13283_v20 = vld [vmem:[#allocation2 + $0x1288] sm:$0xff] }
 0xcdd   : > { %13839 = vmatprep.subr.bf16.mxu0 %v13227_v25  ;;  %14372 = vmatprep.subr.bf16.mxu1 %v13229_v55  ;;  %v13285_v25 = vld [vmem:[#allocation2 + $0x1298] sm:$0xff]  ;;  %v13284_v55 = vld [vmem:[#allocation2 + $0x1290] sm:$0xff] }
 0xce0   : > { %13840 = vmatpush1.bf16.msra.mxu0 %v13226_v24  ;;  %14373 = vmatpush1.bf16.msra.mxu1 %v13228_v43  ;;  %v13287_v24 = vld [vmem:[#allocation2 + $0x12a8] sm:$0xff]  ;;  %v13289_v43 = vld [vmem:[#allocation2 + $0x12b8] sm:$0xff] }
 0xce1   : > { %13841 = vmatprep.subr.bf16.mxu0 %v13231_v51  ;;  %14374 = vmatprep.subr.bf16.mxu1 %v13233_v56  ;;  %v13286_v51 = vld [vmem:[#allocation2 + $0x12a0] sm:$0xff]  ;;  %v13288_v56 = vld [vmem:[#allocation2 + $0x12b0] sm:$0xff] }
 0xce4   : > { %13842 = vmatpush1.bf16.msra.mxu0 %v13230_v11  ;;  %14375 = vmatpush1.bf16.msra.mxu1 %v13232_v9  ;;  %v13291_v11 = vld [vmem:[#allocation2 + $0x12c8] sm:$0xff]  ;;  %v13293_v9 = vld [vmem:[#allocation2 + $0x12d8] sm:$0xff] }
 0xce5   : > { %13843 = vmatprep.subr.bf16.mxu0 %v13235_v52  ;;  %14376 = vmatprep.subr.bf16.mxu1 %v13237_v18  ;;  %v13290_v52 = vld [vmem:[#allocation2 + $0x12c0] sm:$0xff]  ;;  %v13292_v18 = vld [vmem:[#allocation2 + $0x12d0] sm:$0xff] }
 0xce8   : > { %13844 = vmatpush1.bf16.msra.mxu0 %v13234_v35  ;;  %14377 = vmatpush1.bf16.msra.mxu1 %v13236_v13  ;;  %v13295_v35 = vld [vmem:[#allocation2 + $0x12e8] sm:$0xff]  ;;  %v13297_v13 = vld [vmem:[#allocation2 + $0x12f8] sm:$0xff] }
 0xce9   : > { %13845 = vmatprep.subr.bf16.mxu0 %v13239_v59  ;;  %14378 = vmatprep.subr.bf16.mxu1 %v13241_v26  ;;  %v13294_v59 = vld [vmem:[#allocation2 + $0x12e0] sm:$0xff]  ;;  %v13296_v26 = vld [vmem:[#allocation2 + $0x12f0] sm:$0xff] }
 0xcec   : > { %13846 = vmatpush1.bf16.msra.mxu0 %v13238_v0  ;;  %14379 = vmatpush1.bf16.msra.mxu1 %v13240_v42  ;;  %v13299_v0 = vld [vmem:[#allocation2 + $0x1308] sm:$0xff]  ;;  %v13301_v42 = vld [vmem:[#allocation2 + $0x1318] sm:$0xff] }
 0xced   : > { %13847 = vmatprep.subr.bf16.mxu0 %v13243_v14  ;;  %14380 = vmatprep.subr.bf16.mxu1 %v13245_v49  ;;  %v13298_v14 = vld [vmem:[#allocation2 + $0x1300] sm:$0xff]  ;;  %v13300_v49 = vld [vmem:[#allocation2 + $0x1310] sm:$0xff] }
 0xcf0   : > { %13848 = vmatpush1.bf16.msra.mxu0 %v13242_v57  ;;  %14381 = vmatpush1.bf16.msra.mxu1 %v13244_v46  ;;  %v13303_v57 = vld [vmem:[#allocation2 + $0x1328] sm:$0xff]  ;;  %v13305_v46 = vld [vmem:[#allocation2 + $0x1338] sm:$0xff] }
 0xcf1   : > { %13849 = vmatprep.subr.bf16.mxu0 %v13247_v39  ;;  %14382 = vmatprep.subr.bf16.mxu1 %v13249_v36  ;;  %v13302_v39 = vld [vmem:[#allocation2 + $0x1320] sm:$0xff]  ;;  %v13304_v36 = vld [vmem:[#allocation2 + $0x1330] sm:$0xff] }
 0xcf4   : > { %13850 = vmatpush1.bf16.msra.mxu0 %v13246_v10  ;;  %14383 = vmatpush1.bf16.msra.mxu1 %v13248_v30  ;;  %v13307_v10 = vld [vmem:[#allocation2 + $0x1348] sm:$0xff]  ;;  %v13309_v30 = vld [vmem:[#allocation2 + $0x1358] sm:$0xff] }
 0xcf5   : > { %13851 = vmatprep.subr.bf16.mxu0 %v13251_v22  ;;  %14384 = vmatprep.subr.bf16.mxu1 %v13253_v27  ;;  %v13306_v22 = vld [vmem:[#allocation2 + $0x1340] sm:$0xff]  ;;  %v13308_v27 = vld [vmem:[#allocation2 + $0x1350] sm:$0xff] }
 0xcf8   : > { %13852 = vmatpush1.bf16.msra.mxu0 %v13250_v3  ;;  %14385 = vmatpush1.bf16.msra.mxu1 %v13252_v15  ;;  %v13311_v3 = vld [vmem:[#allocation2 + $0x1368] sm:$0xff]  ;;  %v13313_v15 = vld [vmem:[#allocation2 + $0x1378] sm:$0xff] }
 0xcf9   : > { %13853 = vmatprep.subr.bf16.mxu0 %v13255_v32  ;;  %14386 = vmatprep.subr.bf16.mxu1 %v13257_v47  ;;  %v13310_v32 = vld [vmem:[#allocation2 + $0x1360] sm:$0xff]  ;;  %v13312_v47 = vld [vmem:[#allocation2 + $0x1370] sm:$0xff] }
 0xcfc   : > { %13854 = vmatpush1.bf16.msra.mxu0 %v13254_v21  ;;  %14387 = vmatpush1.bf16.msra.mxu1 %v13256_v61  ;;  %v13315_v21 = vld [vmem:[#allocation2 + $0x1388] sm:$0xff]  ;;  %v13317_v61 = vld [vmem:[#allocation2 + $0x1398] sm:$0xff] }
 0xcfd   : > { %13855 = vmatprep.subr.bf16.mxu0 %v13259_v45  ;;  %14388 = vmatprep.subr.bf16.mxu1 %v13261_v16  ;;  %v13314_v45 = vld [vmem:[#allocation2 + $0x1380] sm:$0xff]  ;;  %v13316_v16 = vld [vmem:[#allocation2 + $0x1390] sm:$0xff] }
 0xd00   : > { %13856 = vmatpush1.bf16.msra.mxu0 %v13258_v41  ;;  %14389 = vmatpush1.bf16.msra.mxu1 %v13260_v2  ;;  %v13319_v41 = vld [vmem:[#allocation2 + $0x13a8] sm:$0xff]  ;;  %v13321_v2 = vld [vmem:[#allocation2 + $0x13b8] sm:$0xff] }
 0xd01   : > { %13857 = vmatprep.subr.bf16.mxu0 %v13263_v62  ;;  %14390 = vmatprep.subr.bf16.mxu1 %v13265_v34  ;;  %v13318_v62 = vld [vmem:[#allocation2 + $0x13a0] sm:$0xff]  ;;  %v13320_v34 = vld [vmem:[#allocation2 + $0x13b0] sm:$0xff] }
 0xd04   : > { %13858 = vmatpush1.bf16.msra.mxu0 %v13262_v40  ;;  %14391 = vmatpush1.bf16.msra.mxu1 %v13264_v63  ;;  %v13323_v40 = vld [vmem:[#allocation2 + $0x13c8] sm:$0xff]  ;;  %v13325_v63 = vld [vmem:[#allocation2 + $0x13d8] sm:$0xff] }
 0xd05   : > { %13868 = vmatprep.subr.bf16.mxu0 %v13267_v31  ;;  %14401 = vmatprep.subr.bf16.mxu1 %v13269_v7  ;;  %v13322_v31 = vld [vmem:[#allocation2 + $0x13c0] sm:$0xff]  ;;  %v13324_v7 = vld [vmem:[#allocation2 + $0x13d0] sm:$0xff] }
 0xd07   : > { %13860 = vmatmul.mubr.bf16.vlgmr.msra.gmra.mrb[184].mxu0 %v21598_v37  ;;  %14393 = vmatmul.mubr.bf16.vlgmr.msra.gmra.mrb[56].mxu1 %v21598_v37  ;;  %v13281_v37 = vld [vmem:[#allocation2 + $0x1278] sm:$0xff] }
 0xd08   : > { %13869 = vmatpush1.bf16.msra.mxu0 %v13266_v50  ;;  %14402 = vmatpush1.bf16.msra.mxu1 %v13268_v4  ;;  %v13327_v50 = vld [vmem:[#allocation2 + $0x13e8] sm:$0xff]  ;;  %v13329_v4 = vld [vmem:[#allocation2 + $0x13f8] sm:$0xff] }
 0xd09   : > { %13870 = vmatprep.subr.bf16.mxu0 %v13271_v19  ;;  %14403 = vmatprep.subr.bf16.mxu1 %v13273_v28  ;;  %v13326_v19 = vld [vmem:[#allocation2 + $0x13e0] sm:$0xff]  ;;  %v13328_v28 = vld [vmem:[#allocation2 + $0x13f0] sm:$0xff] }
 0xd0a   : > { %13900 = vmatprep.mubr.bf16.mxu0 %v21610_v60  ;;  %14433 = vmatprep.mubr.bf16.mxu1 %v21610_v60  ;;  %v13282_v60 = vld [vmem:[#allocation2 + $0x1280] sm:$0xff] }
 0xd0c   : > { %13871 = vmatpush1.bf16.msra.mxu0 %v13270_v38  ;;  %14404 = vmatpush1.bf16.msra.mxu1 %v13272_v5  ;;  %v13331_v38 = vld [vmem:[#allocation2 + $0x1408] sm:$0xff]  ;;  %v13333_v5 = vld [vmem:[#allocation2 + $0x1418] sm:$0xff] }
 0xd0d   : > { %13872 = vmatprep.subr.bf16.mxu0 %v13275_v58  ;;  %14405 = vmatprep.subr.bf16.mxu1 %v13277_v44  ;;  %v13330_v58 = vld [vmem:[#allocation2 + $0x1400] sm:$0xff]  ;;  %v13332_v44 = vld [vmem:[#allocation2 + $0x1410] sm:$0xff] }
 0xd10   : > { %13873 = vmatpush1.bf16.msra.mxu0 %v13274_v1  ;;  %14406 = vmatpush1.bf16.msra.mxu1 %v13276_v53  ;;  %v13335_v1 = vld [vmem:[#allocation2 + $0x1428] sm:$0xff]  ;;  %v13337_v53 = vld [vmem:[#allocation2 + $0x1438] sm:$0xff] }
 0xd11   : > { %13874 = vmatprep.subr.bf16.mxu0 %v13279_v8  ;;  %14407 = vmatprep.subr.bf16.mxu1 %v13281_v37  ;;  %v13334_v8 = vld [vmem:[#allocation2 + $0x1420] sm:$0xff]  ;;  %v13336_v37 = vld [vmem:[#allocation2 + $0x1430] sm:$0xff] }
 0xd14   : > { %13875 = vmatpush1.bf16.msra.mxu0 %v13278_v17  ;;  %14408 = vmatpush1.bf16.msra.mxu1 %v13280_v48  ;;  %v13339_v17 = vld [vmem:[#allocation2 + $0x1448] sm:$0xff]  ;;  %v13341_v48 = vld [vmem:[#allocation2 + $0x1458] sm:$0xff] }
 0xd15   : > { %13876 = vmatprep.subr.bf16.mxu0 %v13283_v20  ;;  %14409 = vmatprep.subr.bf16.mxu1 %v13285_v25  ;;  %v13338_v20 = vld [vmem:[#allocation2 + $0x1440] sm:$0xff]  ;;  %v13340_v25 = vld [vmem:[#allocation2 + $0x1450] sm:$0xff] }
 0xd18   : > { %13877 = vmatpush1.bf16.msra.mxu0 %v13282_v60  ;;  %14410 = vmatpush1.bf16.msra.mxu1 %v13284_v55  ;;  %v13343_v60 = vld [vmem:[#allocation2 + $0x1468] sm:$0xff]  ;;  %v13342_v55 = vld [vmem:[#allocation2 + $0x1460] sm:$0xff] }
 0xd19   : > { %13878 = vmatprep.subr.bf16.mxu0 %v13287_v24  ;;  %14411 = vmatprep.subr.bf16.mxu1 %v13289_v43  ;;  %v13344_v24 = vld [vmem:[#allocation2 + $0x1470] sm:$0xff]  ;;  %v13347_v43 = vld [vmem:[#allocation2 + $0x1488] sm:$0xff] }
 0xd1c   : > { %13879 = vmatpush1.bf16.msra.mxu0 %v13286_v51  ;;  %14412 = vmatpush1.bf16.msra.mxu1 %v13288_v56  ;;  %v13349_v51 = vld [vmem:[#allocation2 + $0x1498] sm:$0xff]  ;;  %v13348_v56 = vld [vmem:[#allocation2 + $0x1490] sm:$0xff] }
 0xd1d   : > { %13880 = vmatprep.subr.bf16.mxu0 %v13291_v11  ;;  %14413 = vmatprep.subr.bf16.mxu1 %v13293_v9  ;;  %v13351_v11 = vld [vmem:[#allocation2 + $0x14a8] sm:$0xff]  ;;  %v13353_v9 = vld [vmem:[#allocation2 + $0x14b8] sm:$0xff] }
 0xd20   : > { %13881 = vmatpush1.bf16.msra.mxu0 %v13290_v52  ;;  %14414 = vmatpush1.bf16.msra.mxu1 %v13292_v18  ;;  %v13350_v52 = vld [vmem:[#allocation2 + $0x14a0] sm:$0xff]  ;;  %v13352_v18 = vld [vmem:[#allocation2 + $0x14b0] sm:$0xff] }
 0xd21   : > { %13882 = vmatprep.subr.bf16.mxu0 %v13295_v35  ;;  %14415 = vmatprep.subr.bf16.mxu1 %v13297_v13  ;;  %v13355_v35 = vld [vmem:[#allocation2 + $0x14c8] sm:$0xff]  ;;  %v13357_v13 = vld [vmem:[#allocation2 + $0x14d8] sm:$0xff] }
 0xd24   : > { %13883 = vmatpush1.bf16.msra.mxu0 %v13294_v59  ;;  %14416 = vmatpush1.bf16.msra.mxu1 %v13296_v26  ;;  %v13354_v59 = vld [vmem:[#allocation2 + $0x14c0] sm:$0xff]  ;;  %v13356_v26 = vld [vmem:[#allocation2 + $0x14d0] sm:$0xff] }
 0xd25   : > { %13884 = vmatprep.subr.bf16.mxu0 %v13299_v0  ;;  %14417 = vmatprep.subr.bf16.mxu1 %v13301_v42  ;;  %v13359_v0 = vld [vmem:[#allocation2 + $0x14e8] sm:$0xff]  ;;  %v13361_v42 = vld [vmem:[#allocation2 + $0x14f8] sm:$0xff] }
 0xd28   : > { %13885 = vmatpush1.bf16.msra.mxu0 %v13298_v14  ;;  %14418 = vmatpush1.bf16.msra.mxu1 %v13300_v49  ;;  %v13358_v14 = vld [vmem:[#allocation2 + $0x14e0] sm:$0xff]  ;;  %v13360_v49 = vld [vmem:[#allocation2 + $0x14f0] sm:$0xff] }
 0xd29   : > { %13886 = vmatprep.subr.bf16.mxu0 %v13303_v57  ;;  %14419 = vmatprep.subr.bf16.mxu1 %v13305_v46  ;;  %v13363_v57 = vld [vmem:[#allocation2 + $0x1508] sm:$0xff]  ;;  %v13365_v46 = vld [vmem:[#allocation2 + $0x1518] sm:$0xff] }
 0xd2c   : > { %13887 = vmatpush1.bf16.msra.mxu0 %v13302_v39  ;;  %14420 = vmatpush1.bf16.msra.mxu1 %v13304_v36  ;;  %v13362_v39 = vld [vmem:[#allocation2 + $0x1500] sm:$0xff]  ;;  %v13364_v36 = vld [vmem:[#allocation2 + $0x1510] sm:$0xff] }
 0xd2d   : > { %13888 = vmatprep.subr.bf16.mxu0 %v13307_v10  ;;  %14421 = vmatprep.subr.bf16.mxu1 %v13309_v30  ;;  %v13367_v10 = vld [vmem:[#allocation2 + $0x1528] sm:$0xff]  ;;  %v13369_v30 = vld [vmem:[#allocation2 + $0x1538] sm:$0xff] }
 0xd30   : > { %13889 = vmatpush1.bf16.msra.mxu0 %v13306_v22  ;;  %14422 = vmatpush1.bf16.msra.mxu1 %v13308_v27  ;;  %v13366_v22 = vld [vmem:[#allocation2 + $0x1520] sm:$0xff]  ;;  %v13368_v27 = vld [vmem:[#allocation2 + $0x1530] sm:$0xff] }
 0xd31   : > { %13890 = vmatprep.subr.bf16.mxu0 %v13311_v3  ;;  %14423 = vmatprep.subr.bf16.mxu1 %v13313_v15  ;;  %v13371_v3 = vld [vmem:[#allocation2 + $0x1548] sm:$0xff]  ;;  %v13373_v15 = vld [vmem:[#allocation2 + $0x1558] sm:$0xff] }
 0xd34   : > { %13891 = vmatpush1.bf16.msra.mxu0 %v13310_v32  ;;  %14424 = vmatpush1.bf16.msra.mxu1 %v13312_v47  ;;  %v13370_v32 = vld [vmem:[#allocation2 + $0x1540] sm:$0xff]  ;;  %v13372_v47 = vld [vmem:[#allocation2 + $0x1550] sm:$0xff] }
 0xd35   : > { %13892 = vmatprep.subr.bf16.mxu0 %v13315_v21  ;;  %14425 = vmatprep.subr.bf16.mxu1 %v13317_v61  ;;  %v13375_v21 = vld [vmem:[#allocation2 + $0x1568] sm:$0xff]  ;;  %v13377_v61 = vld [vmem:[#allocation2 + $0x1578] sm:$0xff] }
 0xd38   : > { %13893 = vmatpush1.bf16.msra.mxu0 %v13314_v45  ;;  %14426 = vmatpush1.bf16.msra.mxu1 %v13316_v16  ;;  %v13374_v45 = vld [vmem:[#allocation2 + $0x1560] sm:$0xff]  ;;  %v13376_v16 = vld [vmem:[#allocation2 + $0x1570] sm:$0xff] }
 0xd39   : > { %13894 = vmatprep.subr.bf16.mxu0 %v13319_v41  ;;  %14427 = vmatprep.subr.bf16.mxu1 %v13321_v2  ;;  %v13379_v41 = vld [vmem:[#allocation2 + $0x1588] sm:$0xff]  ;;  %v13381_v2 = vld [vmem:[#allocation2 + $0x1598] sm:$0xff] }
 0xd3c   : > { %13895 = vmatpush1.bf16.msra.mxu0 %v13318_v62  ;;  %14428 = vmatpush1.bf16.msra.mxu1 %v13320_v34  ;;  %v13378_v62 = vld [vmem:[#allocation2 + $0x1580] sm:$0xff]  ;;  %v13380_v34 = vld [vmem:[#allocation2 + $0x1590] sm:$0xff] }
 0xd3d   : > { %13896 = vmatprep.subr.bf16.mxu0 %v13323_v40  ;;  %14429 = vmatprep.subr.bf16.mxu1 %v13325_v63  ;;  %v13383_v40 = vld [vmem:[#allocation2 + $0x15a8] sm:$0xff]  ;;  %v13385_v63 = vld [vmem:[#allocation2 + $0x15b8] sm:$0xff] }
 0xd40   : > { %13897 = vmatpush1.bf16.msra.mxu0 %v13322_v31  ;;  %14430 = vmatpush1.bf16.msra.mxu1 %v13324_v7  ;;  %v13382_v31 = vld [vmem:[#allocation2 + $0x15a0] sm:$0xff]  ;;  %v13384_v7 = vld [vmem:[#allocation2 + $0x15b0] sm:$0xff] }
 0xd41   : > { %13898 = vmatprep.subr.bf16.mxu0 %v13327_v50  ;;  %14431 = vmatprep.subr.bf16.mxu1 %v13329_v4  ;;  %v13387_v50 = vld [vmem:[#allocation2 + $0x15c8] sm:$0xff]  ;;  %v13389_v4 = vld [vmem:[#allocation2 + $0x15d8] sm:$0xff] }
 0xd44   : > { %13899 = vmatpush1.bf16.msra.mxu0 %v13326_v19  ;;  %14432 = vmatpush1.bf16.msra.mxu1 %v13328_v28  ;;  %v13386_v19 = vld [vmem:[#allocation2 + $0x15c0] sm:$0xff]  ;;  %v13388_v28 = vld [vmem:[#allocation2 + $0x15d0] sm:$0xff] }
 0xd45   : > { %13909 = vmatprep.subr.bf16.mxu0 %v13331_v38  ;;  %14442 = vmatprep.subr.bf16.mxu1 %v13333_v5  ;;  %v13391_v38 = vld [vmem:[#allocation2 + $0x15e8] sm:$0xff]  ;;  %v13393_v5 = vld [vmem:[#allocation2 + $0x15f8] sm:$0xff] }
 0xd47   : > { %13901 = vmatmul.mubr.bf16.vlgmr.msra.gmra.mrb[184].mxu0 %v21606_v29  ;;  %14434 = vmatmul.mubr.bf16.vlgmr.msra.gmra.mrb[56].mxu1 %v21606_v29  ;;  %v13345_v29 = vld [vmem:[#allocation2 + $0x1478] sm:$0xff] }
 0xd48   : > { %13910 = vmatpush1.bf16.msra.mxu0 %v13330_v58  ;;  %14443 = vmatpush1.bf16.msra.mxu1 %v13332_v44  ;;  %v13390_v58 = vld [vmem:[#allocation2 + $0x15e0] sm:$0xff]  ;;  %v13392_v44 = vld [vmem:[#allocation2 + $0x15f0] sm:$0xff] }
 0xd49   : > { %13911 = vmatprep.subr.bf16.mxu0 %v13335_v1  ;;  %14444 = vmatprep.subr.bf16.mxu1 %v13337_v53  ;;  %v13395_v1 = vld [vmem:[#allocation2 + $0x1608] sm:$0xff]  ;;  %v13397_v53 = vld [vmem:[#allocation2 + $0x1618] sm:$0xff] }
 0xd4a   : > { %13941 = vmatprep.mubr.bf16.mxu0 %v21618_v33  ;;  %14474 = vmatprep.mubr.bf16.mxu1 %v21618_v33  ;;  %v13346_v33 = vld [vmem:[#allocation2 + $0x1480] sm:$0xff] }
 0xd4c   : > { %13912 = vmatpush1.bf16.msra.mxu0 %v13334_v8  ;;  %14445 = vmatpush1.bf16.msra.mxu1 %v13336_v37  ;;  %v13394_v8 = vld [vmem:[#allocation2 + $0x1600] sm:$0xff]  ;;  %v13396_v37 = vld [vmem:[#allocation2 + $0x1610] sm:$0xff] }
 0xd4d   : > { %13913 = vmatprep.subr.bf16.mxu0 %v13339_v17  ;;  %14446 = vmatprep.subr.bf16.mxu1 %v13341_v48  ;;  %v13399_v17 = vld [vmem:[#allocation2 + $0x1628] sm:$0xff]  ;;  %v13401_v48 = vld [vmem:[#allocation2 + $0x1638] sm:$0xff] }
 0xd50   : > { %13914 = vmatpush1.bf16.msra.mxu0 %v13338_v20  ;;  %14447 = vmatpush1.bf16.msra.mxu1 %v13340_v25  ;;  %v13398_v20 = vld [vmem:[#allocation2 + $0x1620] sm:$0xff]  ;;  %v13400_v25 = vld [vmem:[#allocation2 + $0x1630] sm:$0xff] }
 0xd51   : > { %13915 = vmatprep.subr.bf16.mxu0 %v13343_v60  ;;  %14448 = vmatprep.subr.bf16.mxu1 %v13345_v29  ;;  %v13403_v60 = vld [vmem:[#allocation2 + $0x1648] sm:$0xff]  ;;  %v13405_v29 = vld [vmem:[#allocation2 + $0x1658] sm:$0xff] }
 0xd54   : > { %13916 = vmatpush1.bf16.msra.mxu0 %v13342_v55  ;;  %14449 = vmatpush1.bf16.msra.mxu1 %v13344_v24  ;;  %v13402_v55 = vld [vmem:[#allocation2 + $0x1640] sm:$0xff]  ;;  %v13404_v24 = vld [vmem:[#allocation2 + $0x1650] sm:$0xff] }
 0xd55   : > { %13917 = vmatprep.subr.bf16.mxu0 %v13347_v43  ;;  %14450 = vmatprep.subr.bf16.mxu1 %v13349_v51  ;;  %v13407_v43 = vld [vmem:[#allocation2 + $0x1668] sm:$0xff]  ;;  %v13406_v51 = vld [vmem:[#allocation2 + $0x1660] sm:$0xff] }
 0xd58   : > { %13918 = vmatpush1.bf16.msra.mxu0 %v13346_v33  ;;  %14451 = vmatpush1.bf16.msra.mxu1 %v13348_v56  ;;  %v13408_v33 = vld [vmem:[#allocation2 + $0x1670] sm:$0xff]  ;;  %v13411_v56 = vld [vmem:[#allocation2 + $0x1688] sm:$0xff] }
 0xd59   : > { %13919 = vmatprep.subr.bf16.mxu0 %v13351_v11  ;;  %14452 = vmatprep.subr.bf16.mxu1 %v13353_v9  ;;  %v13413_v11 = vld [vmem:[#allocation2 + $0x1698] sm:$0xff]  ;;  %v13412_v9 = vld [vmem:[#allocation2 + $0x1690] sm:$0xff] }
 0xd5c   : > { %13920 = vmatpush1.bf16.msra.mxu0 %v13350_v52  ;;  %14453 = vmatpush1.bf16.msra.mxu1 %v13352_v18  ;;  %v13415_v52 = vld [vmem:[#allocation2 + $0x16a8] sm:$0xff]  ;;  %v13417_v18 = vld [vmem:[#allocation2 + $0x16b8] sm:$0xff] }
 0xd5d   : > { %13921 = vmatprep.subr.bf16.mxu0 %v13355_v35  ;;  %14454 = vmatprep.subr.bf16.mxu1 %v13357_v13  ;;  %v13414_v35 = vld [vmem:[#allocation2 + $0x16a0] sm:$0xff]  ;;  %v13416_v13 = vld [vmem:[#allocation2 + $0x16b0] sm:$0xff] }
 0xd60   : > { %13922 = vmatpush1.bf16.msra.mxu0 %v13354_v59  ;;  %14455 = vmatpush1.bf16.msra.mxu1 %v13356_v26  ;;  %v13419_v59 = vld [vmem:[#allocation2 + $0x16c8] sm:$0xff]  ;;  %v13421_v26 = vld [vmem:[#allocation2 + $0x16d8] sm:$0xff] }
 0xd61   : > { %13923 = vmatprep.subr.bf16.mxu0 %v13359_v0  ;;  %14456 = vmatprep.subr.bf16.mxu1 %v13361_v42  ;;  %v13418_v0 = vld [vmem:[#allocation2 + $0x16c0] sm:$0xff]  ;;  %v13420_v42 = vld [vmem:[#allocation2 + $0x16d0] sm:$0xff] }
 0xd64   : > { %13924 = vmatpush1.bf16.msra.mxu0 %v13358_v14  ;;  %14457 = vmatpush1.bf16.msra.mxu1 %v13360_v49  ;;  %v13423_v14 = vld [vmem:[#allocation2 + $0x16e8] sm:$0xff]  ;;  %v13425_v49 = vld [vmem:[#allocation2 + $0x16f8] sm:$0xff] }
 0xd65   : > { %13925 = vmatprep.subr.bf16.mxu0 %v13363_v57  ;;  %14458 = vmatprep.subr.bf16.mxu1 %v13365_v46  ;;  %v13422_v57 = vld [vmem:[#allocation2 + $0x16e0] sm:$0xff]  ;;  %v13424_v46 = vld [vmem:[#allocation2 + $0x16f0] sm:$0xff] }
 0xd68   : > { %13926 = vmatpush1.bf16.msra.mxu0 %v13362_v39  ;;  %14459 = vmatpush1.bf16.msra.mxu1 %v13364_v36  ;;  %v13427_v39 = vld [vmem:[#allocation2 + $0x1708] sm:$0xff]  ;;  %v13429_v36 = vld [vmem:[#allocation2 + $0x1718] sm:$0xff] }
 0xd69   : > { %13927 = vmatprep.subr.bf16.mxu0 %v13367_v10  ;;  %14460 = vmatprep.subr.bf16.mxu1 %v13369_v30  ;;  %v13426_v10 = vld [vmem:[#allocation2 + $0x1700] sm:$0xff]  ;;  %v13428_v30 = vld [vmem:[#allocation2 + $0x1710] sm:$0xff] }
 0xd6c   : > { %13928 = vmatpush1.bf16.msra.mxu0 %v13366_v22  ;;  %14461 = vmatpush1.bf16.msra.mxu1 %v13368_v27  ;;  %v13431_v22 = vld [vmem:[#allocation2 + $0x1728] sm:$0xff]  ;;  %v13433_v27 = vld [vmem:[#allocation2 + $0x1738] sm:$0xff] }
 0xd6d   : > { %13929 = vmatprep.subr.bf16.mxu0 %v13371_v3  ;;  %14462 = vmatprep.subr.bf16.mxu1 %v13373_v15  ;;  %v13430_v3 = vld [vmem:[#allocation2 + $0x1720] sm:$0xff]  ;;  %v13432_v15 = vld [vmem:[#allocation2 + $0x1730] sm:$0xff] }
 0xd70   : > { %13930 = vmatpush1.bf16.msra.mxu0 %v13370_v32  ;;  %14463 = vmatpush1.bf16.msra.mxu1 %v13372_v47  ;;  %v13435_v32 = vld [vmem:[#allocation2 + $0x1748] sm:$0xff]  ;;  %v13437_v47 = vld [vmem:[#allocation2 + $0x1758] sm:$0xff] }
 0xd71   : > { %13931 = vmatprep.subr.bf16.mxu0 %v13375_v21  ;;  %14464 = vmatprep.subr.bf16.mxu1 %v13377_v61  ;;  %v13434_v21 = vld [vmem:[#allocation2 + $0x1740] sm:$0xff]  ;;  %v13436_v61 = vld [vmem:[#allocation2 + $0x1750] sm:$0xff] }
 0xd74   : > { %13932 = vmatpush1.bf16.msra.mxu0 %v13374_v45  ;;  %14465 = vmatpush1.bf16.msra.mxu1 %v13376_v16  ;;  %v13439_v45 = vld [vmem:[#allocation2 + $0x1768] sm:$0xff]  ;;  %v13441_v16 = vld [vmem:[#allocation2 + $0x1778] sm:$0xff] }
 0xd75   : > { %13933 = vmatprep.subr.bf16.mxu0 %v13379_v41  ;;  %14466 = vmatprep.subr.bf16.mxu1 %v13381_v2  ;;  %v13438_v41 = vld [vmem:[#allocation2 + $0x1760] sm:$0xff]  ;;  %v13440_v2 = vld [vmem:[#allocation2 + $0x1770] sm:$0xff] }
 0xd78   : > { %13934 = vmatpush1.bf16.msra.mxu0 %v13378_v62  ;;  %14467 = vmatpush1.bf16.msra.mxu1 %v13380_v34  ;;  %v13443_v62 = vld [vmem:[#allocation2 + $0x1788] sm:$0xff]  ;;  %v13445_v34 = vld [vmem:[#allocation2 + $0x1798] sm:$0xff] }
 0xd79   : > { %13935 = vmatprep.subr.bf16.mxu0 %v13383_v40  ;;  %14468 = vmatprep.subr.bf16.mxu1 %v13385_v63  ;;  %v13442_v40 = vld [vmem:[#allocation2 + $0x1780] sm:$0xff]  ;;  %v13444_v63 = vld [vmem:[#allocation2 + $0x1790] sm:$0xff] }
 0xd7c   : > { %13936 = vmatpush1.bf16.msra.mxu0 %v13382_v31  ;;  %14469 = vmatpush1.bf16.msra.mxu1 %v13384_v7  ;;  %v13447_v31 = vld [vmem:[#allocation2 + $0x17a8] sm:$0xff]  ;;  %v13449_v7 = vld [vmem:[#allocation2 + $0x17b8] sm:$0xff] }
 0xd7d   : > { %13937 = vmatprep.subr.bf16.mxu0 %v13387_v50  ;;  %14470 = vmatprep.subr.bf16.mxu1 %v13389_v4  ;;  %v13446_v50 = vld [vmem:[#allocation2 + $0x17a0] sm:$0xff]  ;;  %v13448_v4 = vld [vmem:[#allocation2 + $0x17b0] sm:$0xff] }
 0xd80   : > { %13938 = vmatpush1.bf16.msra.mxu0 %v13386_v19  ;;  %14471 = vmatpush1.bf16.msra.mxu1 %v13388_v28  ;;  %v13451_v19 = vld [vmem:[#allocation2 + $0x17c8] sm:$0xff]  ;;  %v13453_v28 = vld [vmem:[#allocation2 + $0x17d8] sm:$0xff] }
 0xd81   : > { %13939 = vmatprep.subr.bf16.mxu0 %v13391_v38  ;;  %14472 = vmatprep.subr.bf16.mxu1 %v13393_v5  ;;  %v13450_v38 = vld [vmem:[#allocation2 + $0x17c0] sm:$0xff]  ;;  %v13452_v5 = vld [vmem:[#allocation2 + $0x17d0] sm:$0xff] }
 0xd84   : > { %13940 = vmatpush1.bf16.msra.mxu0 %v13390_v58  ;;  %14473 = vmatpush1.bf16.msra.mxu1 %v13392_v44  ;;  %v13455_v58 = vld [vmem:[#allocation2 + $0x17e8] sm:$0xff]  ;;  %v13457_v44 = vld [vmem:[#allocation2 + $0x17f8] sm:$0xff] }
 0xd85   : > { %13950 = vmatprep.subr.bf16.mxu0 %v13395_v1  ;;  %14483 = vmatprep.subr.bf16.mxu1 %v13397_v53  ;;  %v13454_v1 = vld [vmem:[#allocation2 + $0x17e0] sm:$0xff]  ;;  %v13456_v53 = vld [vmem:[#allocation2 + $0x17f0] sm:$0xff] }
 0xd87   : > { %13942 = vmatmul.mubr.bf16.vlgmr.msra.gmra.mrb[184].mxu0 %v21614_v54  ;;  %14475 = vmatmul.mubr.bf16.vlgmr.msra.gmra.mrb[56].mxu1 %v21614_v54  ;;  %v13409_v54 = vld [vmem:[#allocation2 + $0x1678] sm:$0xff] }
 0xd88   : > { %13951 = vmatpush1.bf16.msra.mxu0 %v13394_v8  ;;  %14484 = vmatpush1.bf16.msra.mxu1 %v13396_v37  ;;  %v13459_v8 = vld [vmem:[#allocation2 + $0x1808] sm:$0xff]  ;;  %v13461_v37 = vld [vmem:[#allocation2 + $0x1818] sm:$0xff] }
 0xd89   : > { %13952 = vmatprep.subr.bf16.mxu0 %v13399_v17  ;;  %14485 = vmatprep.subr.bf16.mxu1 %v13401_v48  ;;  %v13458_v17 = vld [vmem:[#allocation2 + $0x1800] sm:$0xff]  ;;  %v13460_v48 = vld [vmem:[#allocation2 + $0x1810] sm:$0xff] }
 0xd8a   : > { %13982 = vmatprep.mubr.bf16.mxu0 %v21626_v12  ;;  %14515 = vmatprep.mubr.bf16.mxu1 %v21626_v12  ;;  %v13410_v12 = vld [vmem:[#allocation2 + $0x1680] sm:$0xff] }
 0xd8c   : > { %13953 = vmatpush1.bf16.msra.mxu0 %v13398_v20  ;;  %14486 = vmatpush1.bf16.msra.mxu1 %v13400_v25  ;;  %v13463_v20 = vld [vmem:[#allocation2 + $0x1828] sm:$0xff]  ;;  %v13465_v25 = vld [vmem:[#allocation2 + $0x1838] sm:$0xff] }
 0xd8d   : > { %13954 = vmatprep.subr.bf16.mxu0 %v13403_v60  ;;  %14487 = vmatprep.subr.bf16.mxu1 %v13405_v29  ;;  %v13462_v60 = vld [vmem:[#allocation2 + $0x1820] sm:$0xff]  ;;  %v13464_v29 = vld [vmem:[#allocation2 + $0x1830] sm:$0xff] }
 0xd90   : > { %13955 = vmatpush1.bf16.msra.mxu0 %v13402_v55  ;;  %14488 = vmatpush1.bf16.msra.mxu1 %v13404_v24  ;;  %v13467_v55 = vld [vmem:[#allocation2 + $0x1848] sm:$0xff]  ;;  %v13469_v24 = vld [vmem:[#allocation2 + $0x1858] sm:$0xff] }
 0xd91   : > { %13956 = vmatprep.subr.bf16.mxu0 %v13407_v43  ;;  %14489 = vmatprep.subr.bf16.mxu1 %v13409_v54  ;;  %v17869_v43 = vmov 0   ;;  %v13466_v54 = vld [vmem:[#allocation2 + $0x1840] sm:$0xff] }
 0xd94   : > { %13957 = vmatpush1.bf16.msra.mxu0 %v13406_v51  ;;  %14490 = vmatpush1.bf16.msra.mxu1 %v13408_v33  ;;  %v13468_v51 = vld [vmem:[#allocation2 + $0x1850] sm:$0xff]  ;;  %v13471_v33 = vld [vmem:[#allocation2 + $0x1868] sm:$0xff] }
 0xd95   : > { %13958 = vmatprep.subr.bf16.mxu0 %v13411_v56  ;;  %14491 = vmatprep.subr.bf16.mxu1 %v13413_v11  ;;  %v13473_v56 = vld [vmem:[#allocation2 + $0x1878] sm:$0xff]  ;;  %v13472_v11 = vld [vmem:[#allocation2 + $0x1870] sm:$0xff] }
 0xd98   : > { %13959 = vmatpush1.bf16.msra.mxu0 %v13410_v12  ;;  %14492 = vmatpush1.bf16.msra.mxu1 %v13412_v9  ;;  %v17738_v12 = vld [vmem:[%s21839_s9 + $0x40] sm:$0xff]  }
 0xd99   : > { %13960 = vmatprep.subr.bf16.mxu0 %v13415_v52  ;;  %14493 = vmatprep.subr.bf16.mxu1 %v13417_v18  ;;  %v17739_v9 = vld [vmem:[%s21839_s9 + $0xc0] sm:$0xff]  }
 0xd9a   : > { %v17740_v52 = vld [vmem:[%s21839_s9] sm:$0xff]  }
 0xd9b   : > { %v17741_v18 = vld [vmem:[%s21839_s9 + $0x80] sm:$0xff]  }
 0xd9c   : > { %13961 = vmatpush1.bf16.msra.mxu0 %v13414_v35  ;;  %14494 = vmatpush1.bf16.msra.mxu1 %v13416_v13  ;;  %v17742_v35 = vld [vmem:[%s21839_s9 + $0x48] sm:$0xff]  }
 0xd9d   : > { %13962 = vmatprep.subr.bf16.mxu0 %v13419_v59  ;;  %14495 = vmatprep.subr.bf16.mxu1 %v13421_v26  ;;  %v17743_v13 = vld [vmem:[%s21839_s9 + $0xc8] sm:$0xff]  }
 0xd9e   : > { %v17744_v59 = vld [vmem:[%s21839_s9 + $0x8] sm:$0xff]  }
 0xd9f   : > { %v17745_v26 = vld [vmem:[%s21839_s9 + $0x88] sm:$0xff]  }
 0xda0   : > { %13963 = vmatpush1.bf16.msra.mxu0 %v13418_v0  ;;  %14496 = vmatpush1.bf16.msra.mxu1 %v13420_v42  ;;  %v17746_v0 = vld [vmem:[%s21839_s9 + $0x50] sm:$0xff]  }
 0xda1   : > { %13964 = vmatprep.subr.bf16.mxu0 %v13423_v14  ;;  %14497 = vmatprep.subr.bf16.mxu1 %v13425_v49  ;;  %v17748_v42 = vld [vmem:[%s21839_s9 + $0x10] sm:$0xff]   ;;  %v17750_v49 = vld [vmem:[%s21839_s9 + $0x58] sm:$0xff]  }
 0xda2   : > { %v17749_v14 = vld [vmem:[%s21839_s9 + $0x90] sm:$0xff]  }
 0xda4   : > { %13965 = vmatpush1.bf16.msra.mxu0 %v13422_v57  ;;  %14498 = vmatpush1.bf16.msra.mxu1 %v13424_v46  ;;  %v17751_v57 = vld [vmem:[%s21839_s9 + $0xd8] sm:$0xff]  }
 0xda5   : > { %13966 = vmatprep.subr.bf16.mxu0 %v13427_v39  ;;  %14499 = vmatprep.subr.bf16.mxu1 %v13429_v36  ;;  %v17752_v46 = vld [vmem:[%s21839_s9 + $0x18] sm:$0xff]   ;;  %v17754_v36 = vld [vmem:[%s21839_s9 + $0x60] sm:$0xff]  }
 0xda6   : > { %v17753_v39 = vld [vmem:[%s21839_s9 + $0x98] sm:$0xff]  }
 0xda8   : > { %13967 = vmatpush1.bf16.msra.mxu0 %v13426_v10  ;;  %14500 = vmatpush1.bf16.msra.mxu1 %v13428_v30  ;;  %v17755_v10 = vld [vmem:[%s21839_s9 + $0xe0] sm:$0xff]  }
 0xda9   : > { %13968 = vmatprep.subr.bf16.mxu0 %v13431_v22  ;;  %14501 = vmatprep.subr.bf16.mxu1 %v13433_v27  ;;  %v17756_v30 = vld [vmem:[%s21839_s9 + $0x20] sm:$0xff]   ;;  %v17758_v27 = vld [vmem:[%s21839_s9 + $0x68] sm:$0xff]  }
 0xdaa   : > { %v17757_v22 = vld [vmem:[%s21839_s9 + $0xa0] sm:$0xff]  }
 0xdac   : > { %13969 = vmatpush1.bf16.msra.mxu0 %v13430_v3  ;;  %14502 = vmatpush1.bf16.msra.mxu1 %v13432_v15  ;;  %v17759_v3 = vld [vmem:[%s21839_s9 + $0xe8] sm:$0xff]  }
 0xdad   : > { %13970 = vmatprep.subr.bf16.mxu0 %v13435_v32  ;;  %14503 = vmatprep.subr.bf16.mxu1 %v13437_v47  ;;  %v17760_v15 = vld [vmem:[%s21839_s9 + $0x28] sm:$0xff]   ;;  %v17762_v47 = vld [vmem:[%s21839_s9 + $0x70] sm:$0xff]  }
 0xdae   : > { %v17761_v32 = vld [vmem:[%s21839_s9 + $0xa8] sm:$0xff]  }
 0xdb0   : > { %13971 = vmatpush1.bf16.msra.mxu0 %v13434_v21  ;;  %14504 = vmatpush1.bf16.msra.mxu1 %v13436_v61  ;;  %v17763_v21 = vld [vmem:[%s21839_s9 + $0xf0] sm:$0xff]  }
 0xdb1   : > { %13972 = vmatprep.subr.bf16.mxu0 %v13439_v45  ;;  %14505 = vmatprep.subr.bf16.mxu1 %v13441_v16  ;;  %v17764_v61 = vld [vmem:[%s21839_s9 + $0x30] sm:$0xff]   ;;  %v17766_v16 = vld [vmem:[%s21839_s9 + $0x78] sm:$0xff]  }
 0xdb2   : > { %v17765_v45 = vld [vmem:[%s21839_s9 + $0xb0] sm:$0xff]  }
 0xdb4   : > { %13973 = vmatpush1.bf16.msra.mxu0 %v13438_v41  ;;  %14506 = vmatpush1.bf16.msra.mxu1 %v13440_v2  ;;  %v17767_v41 = vld [vmem:[%s21839_s9 + $0xf8] sm:$0xff]  }
 0xdb5   : > { %13974 = vmatprep.subr.bf16.mxu0 %v13443_v62  ;;  %14507 = vmatprep.subr.bf16.mxu1 %v13445_v34  ;;  %v17768_v2 = vld [vmem:[%s21839_s9 + $0x38] sm:$0xff]   ;;  %v13476_v34 = vlaneseq }
 0xdb6   : > { %v17769_v62 = vld [vmem:[%s21839_s9 + $0xb8] sm:$0xff]  }
 0xdb8   : > { %13975 = vmatpush1.bf16.msra.mxu0 %v13442_v40  ;;  %14508 = vmatpush1.bf16.msra.mxu1 %v13444_v63  ;;  %v13477_v40 = vshrl.u32 %v13476_v34, 7 }
 0xdb9   : > { %13976 = vmatprep.subr.bf16.mxu0 %v13447_v31  ;;  %14509 = vmatprep.subr.bf16.mxu1 %v13449_v7  ;;  %v13474_v7 = vld [vmem:[%s21838_s8] sm:$0xf] }
 0xdba   : > { %v13478_v63 = vsub.s32 0, %v13477_v40  ;;  %v13486_v31 = vsub.s32 2, %v13477_v40 }
 0xdbc   : > { %13977 = vmatpush1.bf16.msra.mxu0 %v13446_v50  ;;  %14510 = vmatpush1.bf16.msra.mxu1 %v13448_v4  ;;  %v13482_v50 = vsub.s32 1, %v13477_v40  ;;  %v13490_v4 = vsub.s32 3, %v13477_v40 }
 0xdbd   : > { %13978 = vmatprep.subr.bf16.mxu0 %v13451_v19  ;;  %14511 = vmatprep.subr.bf16.mxu1 %v13453_v28  ;;  %v13479_v19 = vrot.slane %v13474_v7, %v13478_v63  ;;  %v13487_v28 = vrot.slane %v13474_v7, %v13486_v31 }
 0xdc0   : > { %13979 = vmatpush1.bf16.msra.mxu0 %v13450_v38  ;;  %14512 = vmatpush1.bf16.msra.mxu1 %v13452_v5  ;;  %v13483_v38 = vrot.slane %v13474_v7, %v13482_v50  ;;  %v13491_v5 = vrot.slane %v13474_v7, %v13490_v4 }
 0xdc1   : > { %13980 = vmatprep.subr.bf16.mxu0 %v13455_v58  ;;  %14513 = vmatprep.subr.bf16.mxu1 %v13457_v44 }
 0xdc4   : > { %13981 = vmatpush1.bf16.msra.mxu0 %v13454_v1  ;;  %14514 = vmatpush1.bf16.msra.mxu1 %v13456_v53 }
 0xdc5   : > { %13991 = vmatprep.subr.bf16.mxu0 %v13459_v8  ;;  %14524 = vmatprep.subr.bf16.mxu1 %v13461_v37 }
 0xdc7   : > { %13983 = vmatmul.mubr.bf16.vlgmr.msra.gmra.mrb[184].mxu0 %v21622_v23  ;;  %14516 = vmatmul.mubr.bf16.vlgmr.msra.gmra.mrb[56].mxu1 %v21622_v23  ;;  %v13470_v23 = vld [vmem:[#allocation2 + $0x1860] sm:$0xff] }
 0xdc8   : > { %13992 = vmatpush1.bf16.msra.mxu0 %v13458_v17  ;;  %14525 = vmatpush1.bf16.msra.mxu1 %v13460_v48 }
 0xdc9   : > { %13993 = vmatprep.subr.bf16.mxu0 %v13463_v20  ;;  %14526 = vmatprep.subr.bf16.mxu1 %v13465_v25 }
 0xdca   : > { %14023 = vmatprep.mubr.bf16.mxu0 %v17869_v43  ;;  %14556 = vmatprep.mubr.bf16.mxu1 %v17869_v43 }
 0xdcc   : > { %13994 = vmatpush1.bf16.msra.mxu0 %v13462_v60  ;;  %14527 = vmatpush1.bf16.msra.mxu1 %v13464_v29 }
 0xdcd   : > { %13995 = vmatprep.subr.bf16.mxu0 %v13467_v55  ;;  %14528 = vmatprep.subr.bf16.mxu1 %v13469_v24 }
 0xdd0   : > { %13996 = vmatpush1.bf16.msra.mxu0 %v13466_v54  ;;  %14529 = vmatpush1.bf16.msra.mxu1 %v13468_v51 }
 0xdd1   : > { %13997 = vmatprep.subr.bf16.mxu0 %v13471_v33  ;;  %14530 = vmatprep.subr.bf16.mxu1 %v13473_v56 }
 0xdd4   : > { %13998 = vmatpush1.bf16.msra.mxu0 %v13470_v23  ;;  %14531 = vmatpush1.bf16.msra.mxu1 %v13472_v11 }
 0xdd5   : > { %16721 = vmatprep.subr.bf16.mxu0 %v17738_v12  ;;  %16743 = vmatprep.subr.bf16.mxu1 %v17739_v9  ;;  %v14637_v9 = vld [vmem:[%s21840_s10] sm:$0x1] }
 0xdd7   : > { %15635 = vmatmul.mubr.msk.bf16.vlgmr.msra.gmra.mrb[184].mxu0 %vm12008_vm1, %v21512_v6  ;;  %15636 = vmatmul.mubr.msk.bf16.vlgmr.msra.gmra.mrb[56].mxu1 %vm12008_vm1, %v21512_v6  ;;  %v17747_v6 = vld [vmem:[%s21839_s9 + $0xd0] sm:$0xff]  }
 0xdd8   : > { %16722 = vmatpush3.bf16.msra.mxu0 %v17740_v52  ;;  %16744 = vmatpush3.bf16.msra.mxu1 %v17741_v18 }
 0xdd9   : > { %16723 = vmatprep.subr.bf16.mxu0 %v17742_v35  ;;  %16745 = vmatprep.subr.bf16.mxu1 %v17743_v13 }
 0xddc   : > { %16724 = vmatpush3.bf16.msra.mxu0 %v17744_v59  ;;  %16746 = vmatpush3.bf16.msra.mxu1 %v17745_v26 }
 0xddd   : > { %16725 = vmatprep.subr.bf16.mxu0 %v17746_v0  ;;  %16747 = vmatprep.subr.bf16.mxu1 %v17747_v6 }
 0xde0   : > { %16726 = vmatpush3.bf16.msra.mxu0 %v17748_v42  ;;  %16748 = vmatpush3.bf16.msra.mxu1 %v17749_v14 }
 0xde1   : > { %16727 = vmatprep.subr.bf16.mxu0 %v17750_v49  ;;  %16749 = vmatprep.subr.bf16.mxu1 %v17751_v57 }
 0xde4   : > { %16728 = vmatpush3.bf16.msra.mxu0 %v17752_v46  ;;  %16750 = vmatpush3.bf16.msra.mxu1 %v17753_v39 }
 0xde5   : > { %16729 = vmatprep.subr.bf16.mxu0 %v17754_v36  ;;  %16751 = vmatprep.subr.bf16.mxu1 %v17755_v10 }
 0xde8   : > { %16730 = vmatpush3.bf16.msra.mxu0 %v17756_v30  ;;  %16752 = vmatpush3.bf16.msra.mxu1 %v17757_v22 }
 0xde9   : > { %16731 = vmatprep.subr.bf16.mxu0 %v17758_v27  ;;  %16753 = vmatprep.subr.bf16.mxu1 %v17759_v3 }
 0xdec   : > { %16732 = vmatpush3.bf16.msra.mxu0 %v17760_v15  ;;  %16754 = vmatpush3.bf16.msra.mxu1 %v17761_v32 }
 0xded   : > { %16733 = vmatprep.subr.bf16.mxu0 %v17762_v47  ;;  %16755 = vmatprep.subr.bf16.mxu1 %v17763_v21 }
 0xdf0   : > { %16734 = vmatpush3.bf16.msra.mxu0 %v17764_v61  ;;  %16756 = vmatpush3.bf16.msra.mxu1 %v17765_v45 }
 0xdf1   : > { %16735 = vmatprep.subr.bf16.mxu0 %v17766_v16  ;;  %16757 = vmatprep.subr.bf16.mxu1 %v17767_v41 }
 0xdf4   : > { %16736 = vmatpush3.bf16.msra.mxu0 %v17768_v2  ;;  %16758 = vmatpush3.bf16.msra.mxu1 %v17769_v62 }
 0xeaa   : > { %v14025_v58 = vpop.f32.mrb[184].mxu0  ;;  %v14558_v44 = vpop.f32.mrb[56].mxu1 }
 0xeab   : > { %v17037_v1 = vadd.f32 %v14025_v58, %v13479_v19  ;;  %v17039_v53 = vadd.f32 %v14558_v44, %v13487_v28  ;;  %v14027_v8 = vpop.f32.mrb[185].mxu0  ;;  %v14560_v37 = vpop.f32.mrb[57].mxu1 }
 0xeac   : > { %v17038_v17 = vadd.f32 %v14027_v8, %v13483_v38  ;;  %v17040_v48 = vadd.f32 %v14560_v37, %v13491_v5  ;;  %v14029_v20 = vpop.f32.mrb[186].mxu0  ;;  %v14562_v25 = vpop.f32.mrb[58].mxu1 }
 0xead   : > { %v14565_v60 = vmax.f32 %v17037_v1, 0.0  ;;  %v14567_v29 = vmax.f32 %v17039_v53, 0.0  ;;  %v14030_v55 = vpop.f32.mrb[187].mxu0  ;;  %v14563_v24 = vpop.f32.mrb[59].mxu1 }
 0xeae   : > { %v14566_v43 = vmax.f32 %v17038_v17, 0.0  ;;  %v14568_v54 = vmax.f32 %v17040_v48, 0.0 }
 0xeaf   : > { %v14569_v56 = vpack.c.bf16 %v14565_v60, %v14565_v60  ;;  %v14571_v23 = vpack.c.bf16 %v14567_v29, %v14567_v29 }
 0xeb0   : > { %v14570_v51 = vpack.c.bf16 %v14566_v43, %v14566_v43  ;;  %v14572_v33 = vpack.c.bf16 %v14568_v54, %v14568_v54 }
 0xeb2   : > { %14862 = vmatprep.mubr.bf16.mxu0 %v14570_v51  ;;  %14902 = vmatprep.mubr.bf16.mxu1 %v14572_v33 }
 0xeb3   : > { %14863 = vmatmul.mubr.bf16.vlgmr.msra.gmra.mrb[188].mxu0 %v14569_v56  ;;  %14903 = vmatmul.mubr.bf16.vlgmr.msra.gmra.mrb[60].mxu1 %v14571_v23 }
 0xf86   : > { %v16737_v11 = vpop.f32.mrb[188].mxu0  ;;  %v16759_v12 = vpop.f32.mrb[60].mxu1 }
 0xf87   : > { %v16738_v52 = vpop.f32.mrb[189].mxu0  ;;  %v16760_v18 = vpop.f32.mrb[61].mxu1 }
 0xf88   : > { %v16739_v35 = vadd.f32 %v16738_v52, %v16737_v11  ;;  %v16761_v13 = vadd.f32 %v16760_v18, %v16759_v12  ;;  %v16740_v59 = vpop.f32.mrb[190].mxu0  ;;  %v16762_v26 = vpop.f32.mrb[62].mxu1 }
 0xf89   : > { %v16741_v0 = vpop.f32.mrb[191].mxu0  ;;  %v16763_v6 = vpop.f32.mrb[63].mxu1 }
 0xf8a   : > { %v14865_v42 = vadd.f32 %v16739_v35, %v14637_v9 }
 0xf8c   : > { %v14905_v14 = vadd.f32 %v16761_v13, %v14865_v42 }
 0xf8e   : > { %14910 = vst [vmem:[%s17988_s22] sm:$0x1] %v14905_v14 }
 0xf8f   : > { %17783 = shalt.err (!%p17780_p7)
}
 0xf90   : > { %s17784_s30 = scalar_lea.hbm %s21785_s15, 16  ;;  %s17788_s25 = scalar_lea.hbm %s21841_s11, 32 }
 0xf91   : > { %p17785_p8 = scmp.ne.s32.totalorder %s21785_s15, %s17784_s30  ;;  %p17789_p11 = scmp.lt.u32.totalorder %s21785_s15, %s21841_s11 }
 0xf92   : > { %p17790_p12 = scmp.lt.u32.totalorder %s17788_s25, %s17784_s30  ;;  %p17792_p0 = scmp.lt.u32.totalorder %s17784_s30, %s21785_s15 }
 0xf93   : > { %p17786_p9 = pnand %p17785_p8, %p17966_p5 }
 0xf94   : > { %p17791_p13 = por %p17790_p12, %p17789_p11 }
 0xf95   : > { %p17787_p10 = pneg %p17786_p9 }
 0xf96   : > { %p17793_p1 = por %p17792_p0, %p17791_p13 }
 0xf98   : > { %p17794_p2 = pnand %p17793_p1, %p17787_p10 }
 0xf9a   : > { %17797 = shalt.err (!%p17794_p2)
}
 0xf9b   : > { %17258 = dma.vmem_to_hbm [thread:$0]  (%p17966_p5), %s21787_s14, 16, %s21785_s15, %s14912_s19  }
 0xf9c PF: > { %p17264_p3 = scmp.ge.s32.totalorder %s17850_s20, 2  ;;  %s14936_s21 = sand.u32 1, %s17838_s17  }
 0xf9d   : > { %s14937_s23 = scalar_lea.sflag [#allocation5], %s14936_s21 }
 0xf9e   : > { %p17261_p4 = pnand %p17264_p3, %p17970_p6 }
 0xfa0   : > { %17833 = dma.done.wait (!%p17261_p4), %s14937_s23, 16  }
 0xfa1   : > { %17835 = vsyncadd (!%p17261_p4), %s14937_s23, 4294967280  ;;  %s21860_s20 = sld [smem:[#allocation10_spill]]  ;;  %s21861_s29 = sld [smem:[#allocation9_spill]] }
 0xfa2   : > { %s21862_s19 = sld [smem:[#allocation11_spill]]  ;;  %s21863_s17 = smov %s17842_s18 }
 0xfa7   : > { %p21_p7 = scmp.ge.s32.totalorder %s21860_s20, 4   ;;  %s21864_s18 = smov %s21861_s29 }
 0xfa9   :  { %23 = sbr.rel (!%p21_p7) target bundleno = 3 (0x3), region = 212 }
 0xfb0   :  { %14941 = vsyncpa [#allocation5], 1 }
 0xfb1   :  { %14943 = vsyncpa [#allocation5 + $0x1], 1 }
 0xfb2   :  { %14944 = vsyncmov [#allocation3] }
 0xfb5   :  { %s14945_s27 = vpop.sfrf %14944 }
 0xfb6   :  { %p15672_p5 = scmp.ne.s32.totalorder %s14945_s27, 0 }
 0xfb8   :  { %14949 = shalt.err (%p15672_p5)  }

</bundles_post_ra>
